<compile_context>
chip_gen: v7x
topology: tpu7x:2x2x1
jax: 0.10.0
libtpu: 0.0.40
codegen_flags: <defaults>
</compile_context>

<pallas_src>
import functools

import jax
import jax.numpy as jnp
from jax.experimental import pallas as pl
from jax.experimental.pallas import tpu as pltpu

F32 = jnp.float32
BF16 = jnp.bfloat16
VMEM = pl.BlockSpec(memory_space=pltpu.MemorySpace.VMEM)

# ----------------------------- dimensions -----------------------------

X_DIM = 78            # raw node feature dim (cat(aug, x) -> 156 = num_feature_xd)
LATENT = 16           # vae.latent_size
ZX_PAD = 128          # padded [z, x] width (94 -> 128)
F1, F1P = 156, 256    # num_feature_xd and its lane-padded width
F2, F2P = 312, 384
F3, F3P = 624, 640
CONCAT = F3 + F2 + F1           # 1092
OUTPUT_DIM = 128
EMBED_DIM = 128
FILTER_NUM, FILTERP = 32, 128
VOCAB_XT = 26         # num_feature_xt + 1
VOCAB_PAD = 128
KSIZE = 3             # protein conv kernel width
HEAD_OUT_PAD = 128    # n_output=1 padded to a full lane tile
NEG_INF = float(jnp.finfo(jnp.float32).min)

# ----------------------------- fused kernel -----------------------------


def _fused_kernel(adj_ref, zx_ref, xsh_ref, tgt_ref,
                  vae_w, vae_b,
                  c1w, c1b, c2w, c2b, c3w, c3b,
                  g1wa, g1wb, g1wc, g1b, g2w, g2b,
                  emb_w, pconv_w, pconv_b, plin_w, plin_b,
                  f1w, f1b, f2w, f2b, ow, ob,
                  out_ref, *, batch, nodes_per_graph, seq_len):
    n = adj_ref.shape[0]

    # ---------------- adjacency powers + gcn_norm (all in VMEM) ----------------
    adj = adj_ref[...]
    row = jax.lax.broadcasted_iota(jnp.int32, (n, n), 0)
    col = jax.lax.broadcasted_iota(jnp.int32, (n, n), 1)
    eye = (row == col).astype(F32)

    def norm(a):
        # PyG gcn_norm with add_remaining_self_loops; A (and its powers) symmetric.
        a_hat = jnp.maximum(a, eye)
        dr = jax.lax.rsqrt(jnp.sum(a_hat, axis=1, keepdims=True))
        dc = jax.lax.rsqrt(jnp.sum(a_hat, axis=0, keepdims=True))
        return (dr * a_hat * dc).astype(BF16)

    adj_b = adj.astype(BF16)                               # exact (0/1)
    adj2 = (jnp.dot(adj_b, adj_b, preferred_element_type=F32) > 0.0).astype(F32)
    adj3 = (jnp.dot(adj2.astype(BF16), adj_b,
                    preferred_element_type=F32) > 0.0).astype(F32)
    a1, a2, a3 = norm(adj), norm(adj2), norm(adj3)

    # ---------------- graph branch ----------------
    # VAE aug: x_list = cat(tanh(dec([z, x])), x) in lane-padded layout; xsh
    # carries x in cols [78:156), zeros elsewhere.
    x_aug = jnp.tanh(jnp.dot(zx_ref[...].astype(BF16), vae_w[...],
                             preferred_element_type=F32) + vae_b[...])
    x_list = (x_aug + xsh_ref[...]).astype(BF16)           # (N, 256)

    def gcn(a, h, w, b):
        hw = jnp.dot(h, w[...], preferred_element_type=F32).astype(BF16)
        return jnp.maximum(jnp.dot(a, hw, preferred_element_type=F32) + b[...], 0.0)

    # Shared X @ W1 product, reused for the k1 / k2 / k3 paths.
    xw0 = jnp.dot(x_list, c1w[...], preferred_element_type=F32).astype(BF16)

    def first(a):
        return jnp.maximum(jnp.dot(a, xw0, preferred_element_type=F32) + c1b[...], 0.0)

    h1 = first(a1).astype(BF16)
    h2 = gcn(a1, h1, c2w, c2b).astype(BF16)
    h3 = gcn(a1, h2, c3w, c3b)                             # (N, 640) f32
    h4 = first(a2).astype(BF16)
    h5 = gcn(a2, h4, c2w, c2b)                             # (N, 384) f32
    h6 = first(a3)                                         # (N, 256) f32

    # Global max pool: nodes contiguous & equal-sized per graph -> reshape+max.
    # TODO(synk): ragged graphs need a masked pool over batch_vec instead.
    def gpool(h):
        return jnp.max(h.reshape(batch, nodes_per_graph, h.shape[1]), axis=1)

    p3, p5, p6 = gpool(h3), gpool(h5), gpool(h6)           # (B, 640/384/256)

    # fc_g1 as three row-sliced matmuls (avoids materializing the 1280 concat).
    xg = (jnp.dot(p3.astype(BF16), g1wa[...], preferred_element_type=F32)
          + jnp.dot(p5.astype(BF16), g1wb[...], preferred_element_type=F32)
          + jnp.dot(p6.astype(BF16), g1wc[...], preferred_element_type=F32)
          + g1b[...])
    xg = jnp.maximum(xg, 0.0)
    xg = jnp.dot(xg.astype(BF16), g2w[...], preferred_element_type=F32) + g2b[...]

    def attn(z):                                           # tanh -> softmax(dim=1) -> beta*z
        w = jnp.tanh(z)
        w = w - jnp.max(w, axis=1, keepdims=True)
        e = jnp.exp(w)
        return z * (e * pl.reciprocal(jnp.sum(e, axis=1, keepdims=True), approx=True))

    xg = attn(xg)                                          # (B, 128)

    # ---------------- protein branch ----------------
    total = batch * seq_len
    # Embedding lookup as one-hot matmul against the (vocab-padded) table.
    tgt = tgt_ref[...]                                     # (B*L, 1) int32
    vocab_iota = jax.lax.broadcasted_iota(jnp.int32, (total, VOCAB_PAD), 1)
    onehot = (vocab_iota == tgt).astype(BF16)
    e = jnp.dot(onehot, emb_w[...], preferred_element_type=F32)   # (B*L, 128)

    # conv1d(k=3) as one K=384 matmul of shifted activations (XLU roll);
    # wrap-around rows are masked out of the pool below.
    e3 = jnp.concatenate(
        [e,
         pltpu.roll(e, shift=total - 1, axis=0),
         pltpu.roll(e, shift=total - 2, axis=0)], axis=1).astype(BF16)
    y = jnp.maximum(jnp.dot(e3, pconv_w[...], preferred_element_type=F32)
                    + pconv_b[...], 0.0)                   # (B*L, FILTERP)

    y3 = y.reshape(batch, seq_len, FILTERP)
    pos = jax.lax.broadcasted_iota(jnp.int32, (batch, seq_len, FILTERP), 1)
    y3 = jnp.where(pos < (seq_len - (KSIZE - 1)), y3, jnp.float32(NEG_INF))
    pooled = jnp.max(y3, axis=1)                           # (B, FILTERP)

    xt = jnp.dot(pooled.astype(BF16), plin_w[...],
                 preferred_element_type=F32) + plin_b[...]
    xt = attn(xt)                                          # (B, 128)

    # ---------------- head ----------------
    xc = jnp.concatenate([xg, xt], axis=1).astype(BF16)    # (B, 256)
    h = jnp.maximum(jnp.dot(xc, f1w[...], preferred_element_type=F32) + f1b[...], 0.0)
    h = jnp.maximum(jnp.dot(h.astype(BF16), f2w[...],
                            preferred_element_type=F32) + f2b[...], 0.0)
    out_ref[...] = (jnp.dot(h, ow[...], preferred_element_type=F32)
                    + ob[...]).astype(out_ref.dtype)


# ----------------------------- parameters -----------------------------


def init_params(key):
    ks = iter(jax.random.split(key, 24))

    def mat(shape, fan_in):
        return jax.random.normal(next(ks), shape, F32) / jnp.sqrt(jnp.float32(fan_in))

    def pad2(w, rows, cols):
        return jnp.zeros((rows, cols), w.dtype).at[: w.shape[0], : w.shape[1]].set(w)

    p = {}
    # TODO(synk): vae.inference architecture is not given; deterministic
    # one-layer decoder aug = tanh([z, x] @ W + b) of width 78 substituted.
    p["vae_w"] = pad2(mat((LATENT + X_DIM, X_DIM), LATENT + X_DIM), ZX_PAD, F1P).astype(BF16)
    p["vae_b"] = jnp.zeros((1, F1P), F32)

    p["conv1_w"] = pad2(mat((F1, F1), F1), F1P, F1P).astype(BF16)
    p["conv1_b"] = jnp.zeros((1, F1P), F32)
    p["conv2_w"] = pad2(mat((F1, F2), F1), F1P, F2P).astype(BF16)
    p["conv2_b"] = jnp.zeros((1, F2P), F32)
    p["conv3_w"] = pad2(mat((F2, F3), F2), F2P, F3P).astype(BF16)
    p["conv3_b"] = jnp.zeros((1, F3P), F32)

    # fc_g1 split into the h3 / h5 / h6 row blocks of the original (1092,1024)
    # weight, each zero-padded to the lane-padded activation widths.
    g1 = mat((CONCAT, 1024), CONCAT)
    p["fc_g1_wa"] = pad2(g1[0:F3, :], F3P, 1024).astype(BF16)
    p["fc_g1_wb"] = pad2(g1[F3:F3 + F2, :], F2P, 1024).astype(BF16)
    p["fc_g1_wc"] = pad2(g1[F3 + F2:, :], F1P, 1024).astype(BF16)
    p["fc_g1_b"] = jnp.zeros((1, 1024), F32)
    p["fc_g2_w"] = mat((1024, OUTPUT_DIM), 1024).astype(BF16)
    p["fc_g2_b"] = jnp.zeros((1, OUTPUT_DIM), F32)

    emb = mat((VOCAB_XT, EMBED_DIM), EMBED_DIM).at[0].set(0.0)   # padding_idx=0
    p["embed_xt"] = pad2(emb, VOCAB_PAD, EMBED_DIM).astype(BF16)

    # TODO(synk): TargetRepresentation is not provided; substitute a single
    # conv1d(E->32,k=3)+ReLU+global-max-pool+Linear(32->128) protein encoder.
    p["pconv_w"] = pad2(mat((EMBED_DIM * KSIZE, FILTER_NUM), EMBED_DIM * KSIZE),
                        EMBED_DIM * KSIZE, FILTERP).astype(BF16)
    p["pconv_b"] = jnp.zeros((1, FILTERP), F32)
    p["plin_w"] = pad2(mat((FILTER_NUM, 128), FILTER_NUM), FILTERP, 128).astype(BF16)
    p["plin_b"] = jnp.zeros((1, 128), F32)

    p["fc1_w"] = mat((256, 1024), 256).astype(BF16)
    p["fc1_b"] = jnp.zeros((1, 1024), F32)
    p["fc2_w"] = mat((1024, 512), 1024).astype(BF16)
    p["fc2_b"] = jnp.zeros((1, 512), F32)
    p["out_w"] = pad2(mat((512, 1), 512), 512, HEAD_OUT_PAD)
    p["out_b"] = jnp.zeros((1, HEAD_OUT_PAD), F32)
    return p


# ----------------------------- forward -----------------------------


def gcn_net_forward(params, x, edge_index, batch_vec, target, n_graphs, noise_key):
    n_nodes = x.shape[0]
    seq_len = target.shape[1]
    assert n_nodes % n_graphs == 0, "driver assumes equal-sized contiguous graphs"
    nodes_per_graph = n_nodes // n_graphs
    del batch_vec  # TODO(synk): ragged batch_vec needs a masked pool variant.

    # VAE noise + lane-padded inputs for the fused kernel.
    z = jax.random.normal(noise_key, (n_nodes, LATENT), dtype=F32)
    zx = jnp.zeros((n_nodes, ZX_PAD), F32)
    zx = zx.at[:, :LATENT].set(z).at[:, LATENT:LATENT + X_DIM].set(x)
    xshift = jnp.zeros((n_nodes, F1P), F32).at[:, X_DIM:2 * X_DIM].set(x)

    # Dense adjacency (to_dense_adj); powers & normalization happen in-kernel.
    adj = jnp.zeros((n_nodes, n_nodes), F32).at[edge_index[0], edge_index[1]].set(1.0)

    tgt_flat = target.reshape(n_graphs * seq_len, 1).astype(jnp.int32)

    # TODO(synk): on v7x the graph and protein branches could run on the two
    # TensorCores in parallel (pl.core_map); kept single-core for portability.
    # TODO(synk): beyond ~1-2k nodes the dense N^2 adjacencies need a node-tile
    # grid and an explicit vmem_limit_bytes; fine at this demo size.
    out_pad = pl.pallas_call(
        functools.partial(_fused_kernel, batch=n_graphs,
                          nodes_per_graph=nodes_per_graph, seq_len=seq_len),
        out_shape=jax.ShapeDtypeStruct((n_graphs, HEAD_OUT_PAD), F32),
        in_specs=[VMEM] * 29,
        out_specs=VMEM,
    )(adj, zx, xshift, tgt_flat,
      params["vae_w"], params["vae_b"],
      params["conv1_w"], params["conv1_b"],
      params["conv2_w"], params["conv2_b"],
      params["conv3_w"], params["conv3_b"],
      params["fc_g1_wa"], params["fc_g1_wb"], params["fc_g1_wc"], params["fc_g1_b"],
      params["fc_g2_w"], params["fc_g2_b"],
      params["embed_xt"],
      params["pconv_w"], params["pconv_b"],
      params["plin_w"], params["plin_b"],
      params["fc1_w"], params["fc1_b"],
      params["fc2_w"], params["fc2_b"],
      params["out_w"], params["out_b"])

    return out_pad[:, :1]                                  # (B, 1)


# ----------------------------- driver -----------------------------


def build_example(key, n_graphs=2, nodes_per_graph=16, seq_len=64):
    kx, kt = jax.random.split(key)
    n_nodes = n_graphs * nodes_per_graph
    x = jax.random.normal(kx, (n_nodes, X_DIM), dtype=F32)

    srcs, dsts = [], []
    for g in range(n_graphs):
        off = g * nodes_per_graph
        for i in range(nodes_per_graph):
            j = (i + 1) % nodes_per_graph
            srcs += [off + i, off + j]
            dsts += [off + j, off + i]
    edge_index = jnp.array([srcs, dsts], dtype=jnp.int32)

    batch_vec = jnp.repeat(jnp.arange(n_graphs, dtype=jnp.int32), nodes_per_graph)
    target = jax.random.randint(kt, (n_graphs, seq_len), 1, VOCAB_XT, dtype=jnp.int32)
    return x, edge_index, batch_vec, target


if __name__ == "__main__":
    root = jax.random.PRNGKey(0)
    k_params, k_data, k_noise = jax.random.split(root, 3)

    params = init_params(k_params)
    x, edge_index, batch_vec, target = build_example(k_data)

    out = gcn_net_forward(params, x, edge_index, batch_vec, target,
                          n_graphs=2, noise_key=k_noise)
    out = jax.block_until_ready(out)

    assert out.shape == (2, 1), out.shape
    assert bool(jnp.all(jnp.isfinite(out)))
    print("KERNEL_OK")
</pallas_src>

<mosaic_0001>
module attributes {stable_mosaic.version = 11 : i64} {
  func.func @_fused_kernel(%arg0: memref<32x32xf32, #tpu.memory_space<vmem>>, %arg1: memref<32x128xf32, #tpu.memory_space<vmem>>, %arg2: memref<32x256xf32, #tpu.memory_space<vmem>>, %arg3: memref<128x1xi32, #tpu.memory_space<vmem>>, %arg4: memref<128x256xbf16, #tpu.memory_space<vmem>>, %arg5: memref<1x256xf32, #tpu.memory_space<vmem>>, %arg6: memref<256x256xbf16, #tpu.memory_space<vmem>>, %arg7: memref<1x256xf32, #tpu.memory_space<vmem>>, %arg8: memref<256x384xbf16, #tpu.memory_space<vmem>>, %arg9: memref<1x384xf32, #tpu.memory_space<vmem>>, %arg10: memref<384x640xbf16, #tpu.memory_space<vmem>>, %arg11: memref<1x640xf32, #tpu.memory_space<vmem>>, %arg12: memref<640x1024xbf16, #tpu.memory_space<vmem>>, %arg13: memref<384x1024xbf16, #tpu.memory_space<vmem>>, %arg14: memref<256x1024xbf16, #tpu.memory_space<vmem>>, %arg15: memref<1x1024xf32, #tpu.memory_space<vmem>>, %arg16: memref<1024x128xbf16, #tpu.memory_space<vmem>>, %arg17: memref<1x128xf32, #tpu.memory_space<vmem>>, %arg18: memref<128x128xbf16, #tpu.memory_space<vmem>>, %arg19: memref<384x128xbf16, #tpu.memory_space<vmem>>, %arg20: memref<1x128xf32, #tpu.memory_space<vmem>>, %arg21: memref<128x128xbf16, #tpu.memory_space<vmem>>, %arg22: memref<1x128xf32, #tpu.memory_space<vmem>>, %arg23: memref<256x1024xbf16, #tpu.memory_space<vmem>>, %arg24: memref<1x1024xf32, #tpu.memory_space<vmem>>, %arg25: memref<1024x512xbf16, #tpu.memory_space<vmem>>, %arg26: memref<1x512xf32, #tpu.memory_space<vmem>>, %arg27: memref<512x128xf32, #tpu.memory_space<vmem>>, %arg28: memref<1x128xf32, #tpu.memory_space<vmem>>, %arg29: memref<2x128xf32, #tpu.memory_space<vmem>>) attributes {dimension_semantics = [], scalar_prefetch = 0 : i64, scratch_operands = 0 : i64, tpu.core_type = #tpu.core_type<tc>} {
    %c0 = arith.constant 0 : index
    %c0_0 = arith.constant 0 : index
    %0 = vector.load %arg0[%c0, %c0_0] : memref<32x32xf32, #tpu.memory_space<vmem>>, vector<32x32xf32>
    %1 = tpu.iota {dimensions = array<i32: 0>} : vector<32x32xi32>
    %2 = tpu.iota {dimensions = array<i32: 1>} : vector<32x32xi32>
    %3 = arith.cmpi eq, %1, %2 : vector<32x32xi32>
    %4 = arith.extui %3 : vector<32x32xi1> to vector<32x32xi32>
    %5 = arith.sitofp %4 : vector<32x32xi32> to vector<32x32xf32>
    %6 = arith.truncf %0 : vector<32x32xf32> to vector<32x32xbf16>
    %cst = arith.constant dense<0.000000e+00> : vector<32x32xf32>
    %7 = tpu.matmul %6, %6, %cst {dimension_numbers = #tpu.dot_dimension_numbers<[1], [0], [0], [1], [0, 0, 1, 1], [], []>} : vector<32x32xbf16>, vector<32x32xbf16>, vector<32x32xf32> -> vector<32x32xf32>
    %cst_1 = arith.constant 0.000000e+00 : f32
    %8 = vector.broadcast %cst_1 : f32 to vector<32x32xf32>
    %9 = arith.cmpf ogt, %7, %8 : vector<32x32xf32>
    %10 = arith.extui %9 : vector<32x32xi1> to vector<32x32xi32>
    %11 = arith.sitofp %10 : vector<32x32xi32> to vector<32x32xf32>
    %12 = arith.truncf %11 : vector<32x32xf32> to vector<32x32xbf16>
    %cst_2 = arith.constant dense<0.000000e+00> : vector<32x32xf32>
    %13 = tpu.matmul %12, %6, %cst_2 {dimension_numbers = #tpu.dot_dimension_numbers<[1], [0], [0], [1], [0, 0, 1, 1], [], []>} : vector<32x32xbf16>, vector<32x32xbf16>, vector<32x32xf32> -> vector<32x32xf32>
    %cst_3 = arith.constant 0.000000e+00 : f32
    %14 = vector.broadcast %cst_3 : f32 to vector<32x32xf32>
    %15 = arith.cmpf ogt, %13, %14 : vector<32x32xf32>
    %16 = arith.extui %15 : vector<32x32xi1> to vector<32x32xi32>
    %17 = arith.sitofp %16 : vector<32x32xi32> to vector<32x32xf32>
    %18 = arith.maximumf %0, %5 : vector<32x32xf32>
    %cst_4 = arith.constant dense<0.000000e+00> : vector<32xf32>
    %19 = vector.multi_reduction <add>, %18, %cst_4 [1] : vector<32x32xf32> to vector<32xf32>
    %20 = vector.shape_cast %19 : vector<32xf32> to vector<32x1xf32>
    %21 = math.rsqrt %20 : vector<32x1xf32>
    %cst_5 = arith.constant dense<0.000000e+00> : vector<32xf32>
    %22 = vector.multi_reduction <add>, %18, %cst_5 [0] : vector<32x32xf32> to vector<32xf32>
    %23 = vector.shape_cast %22 : vector<32xf32> to vector<1x32xf32>
    %24 = math.rsqrt %23 : vector<1x32xf32>
    %25 = vector.broadcast %21 : vector<32x1xf32> to vector<32x32xf32>
    %26 = arith.mulf %25, %18 : vector<32x32xf32>
    %27 = vector.broadcast %24 : vector<1x32xf32> to vector<32x32xf32>
    %28 = arith.mulf %26, %27 : vector<32x32xf32>
    %29 = arith.truncf %28 : vector<32x32xf32> to vector<32x32xbf16>
    %30 = arith.maximumf %11, %5 : vector<32x32xf32>
    %cst_6 = arith.constant dense<0.000000e+00> : vector<32xf32>
    %31 = vector.multi_reduction <add>, %30, %cst_6 [1] : vector<32x32xf32> to vector<32xf32>
    %32 = vector.shape_cast %31 : vector<32xf32> to vector<32x1xf32>
    %33 = math.rsqrt %32 : vector<32x1xf32>
    %cst_7 = arith.constant dense<0.000000e+00> : vector<32xf32>
    %34 = vector.multi_reduction <add>, %30, %cst_7 [0] : vector<32x32xf32> to vector<32xf32>
    %35 = vector.shape_cast %34 : vector<32xf32> to vector<1x32xf32>
    %36 = math.rsqrt %35 : vector<1x32xf32>
    %37 = vector.broadcast %33 : vector<32x1xf32> to vector<32x32xf32>
    %38 = arith.mulf %37, %30 : vector<32x32xf32>
    %39 = vector.broadcast %36 : vector<1x32xf32> to vector<32x32xf32>
    %40 = arith.mulf %38, %39 : vector<32x32xf32>
    %41 = arith.truncf %40 : vector<32x32xf32> to vector<32x32xbf16>
    %42 = arith.maximumf %17, %5 : vector<32x32xf32>
    %cst_8 = arith.constant dense<0.000000e+00> : vector<32xf32>
    %43 = vector.multi_reduction <add>, %42, %cst_8 [1] : vector<32x32xf32> to vector<32xf32>
    %44 = vector.shape_cast %43 : vector<32xf32> to vector<32x1xf32>
    %45 = math.rsqrt %44 : vector<32x1xf32>
    %cst_9 = arith.constant dense<0.000000e+00> : vector<32xf32>
    %46 = vector.multi_reduction <add>, %42, %cst_9 [0] : vector<32x32xf32> to vector<32xf32>
    %47 = vector.shape_cast %46 : vector<32xf32> to vector<1x32xf32>
    %48 = math.rsqrt %47 : vector<1x32xf32>
    %49 = vector.broadcast %45 : vector<32x1xf32> to vector<32x32xf32>
    %50 = arith.mulf %49, %42 : vector<32x32xf32>
    %51 = vector.broadcast %48 : vector<1x32xf32> to vector<32x32xf32>
    %52 = arith.mulf %50, %51 : vector<32x32xf32>
    %53 = arith.truncf %52 : vector<32x32xf32> to vector<32x32xbf16>
    %c0_10 = arith.constant 0 : index
    %c0_11 = arith.constant 0 : index
    %54 = vector.load %arg1[%c0_10, %c0_11] : memref<32x128xf32, #tpu.memory_space<vmem>>, vector<32x128xf32>
    %55 = arith.truncf %54 : vector<32x128xf32> to vector<32x128xbf16>
    %c0_12 = arith.constant 0 : index
    %c0_13 = arith.constant 0 : index
    %56 = vector.load %arg4[%c0_12, %c0_13] : memref<128x256xbf16, #tpu.memory_space<vmem>>, vector<128x256xbf16>
    %cst_14 = arith.constant dense<0.000000e+00> : vector<32x256xf32>
    %57 = tpu.matmul %55, %56, %cst_14 {dimension_numbers = #tpu.dot_dimension_numbers<[1], [0], [0], [1], [0, 0, 1, 1], [], []>} : vector<32x128xbf16>, vector<128x256xbf16>, vector<32x256xf32> -> vector<32x256xf32>
    %c0_15 = arith.constant 0 : index
    %c0_16 = arith.constant 0 : index
    %58 = vector.load %arg5[%c0_15, %c0_16] : memref<1x256xf32, #tpu.memory_space<vmem>>, vector<1x256xf32>
    %59 = vector.broadcast %58 : vector<1x256xf32> to vector<32x256xf32>
    %60 = arith.addf %57, %59 : vector<32x256xf32>
    %61 = math.tanh %60 : vector<32x256xf32>
    %c0_17 = arith.constant 0 : index
    %c0_18 = arith.constant 0 : index
    %62 = vector.load %arg2[%c0_17, %c0_18] : memref<32x256xf32, #tpu.memory_space<vmem>>, vector<32x256xf32>
    %63 = arith.addf %61, %62 : vector<32x256xf32>
    %64 = arith.truncf %63 : vector<32x256xf32> to vector<32x256xbf16>
    %c0_19 = arith.constant 0 : index
    %c0_20 = arith.constant 0 : index
    %65 = vector.load %arg6[%c0_19, %c0_20] : memref<256x256xbf16, #tpu.memory_space<vmem>>, vector<256x256xbf16>
    %cst_21 = arith.constant dense<0.000000e+00> : vector<32x256xf32>
    %66 = tpu.matmul %64, %65, %cst_21 {dimension_numbers = #tpu.dot_dimension_numbers<[1], [0], [0], [1], [0, 0, 1, 1], [], []>} : vector<32x256xbf16>, vector<256x256xbf16>, vector<32x256xf32> -> vector<32x256xf32>
    %67 = arith.truncf %66 : vector<32x256xf32> to vector<32x256xbf16>
    %cst_22 = arith.constant dense<0.000000e+00> : vector<32x256xf32>
    %68 = tpu.matmul %29, %67, %cst_22 {dimension_numbers = #tpu.dot_dimension_numbers<[1], [0], [0], [1], [0, 0, 1, 1], [], []>} : vector<32x32xbf16>, vector<32x256xbf16>, vector<32x256xf32> -> vector<32x256xf32>
    %c0_23 = arith.constant 0 : index
    %c0_24 = arith.constant 0 : index
    %69 = vector.load %arg7[%c0_23, %c0_24] : memref<1x256xf32, #tpu.memory_space<vmem>>, vector<1x256xf32>
    %70 = vector.broadcast %69 : vector<1x256xf32> to vector<32x256xf32>
    %71 = arith.addf %68, %70 : vector<32x256xf32>
    %cst_25 = arith.constant 0.000000e+00 : f32
    %72 = vector.broadcast %cst_25 : f32 to vector<32x256xf32>
    %73 = arith.maximumf %71, %72 : vector<32x256xf32>
    %74 = arith.truncf %73 : vector<32x256xf32> to vector<32x256xbf16>
    %c0_26 = arith.constant 0 : index
    %c0_27 = arith.constant 0 : index
    %75 = vector.load %arg8[%c0_26, %c0_27] : memref<256x384xbf16, #tpu.memory_space<vmem>>, vector<256x384xbf16>
    %cst_28 = arith.constant dense<0.000000e+00> : vector<32x384xf32>
    %76 = tpu.matmul %74, %75, %cst_28 {dimension_numbers = #tpu.dot_dimension_numbers<[1], [0], [0], [1], [0, 0, 1, 1], [], []>} : vector<32x256xbf16>, vector<256x384xbf16>, vector<32x384xf32> -> vector<32x384xf32>
    %77 = arith.truncf %76 : vector<32x384xf32> to vector<32x384xbf16>
    %cst_29 = arith.constant dense<0.000000e+00> : vector<32x384xf32>
    %78 = tpu.matmul %29, %77, %cst_29 {dimension_numbers = #tpu.dot_dimension_numbers<[1], [0], [0], [1], [0, 0, 1, 1], [], []>} : vector<32x32xbf16>, vector<32x384xbf16>, vector<32x384xf32> -> vector<32x384xf32>
    %c0_30 = arith.constant 0 : index
    %c0_31 = arith.constant 0 : index
    %79 = vector.load %arg9[%c0_30, %c0_31] : memref<1x384xf32, #tpu.memory_space<vmem>>, vector<1x384xf32>
    %80 = vector.broadcast %79 : vector<1x384xf32> to vector<32x384xf32>
    %81 = arith.addf %78, %80 : vector<32x384xf32>
    %cst_32 = arith.constant 0.000000e+00 : f32
    %82 = vector.broadcast %cst_32 : f32 to vector<32x384xf32>
    %83 = arith.maximumf %81, %82 : vector<32x384xf32>
    %84 = arith.truncf %83 : vector<32x384xf32> to vector<32x384xbf16>
    %c0_33 = arith.constant 0 : index
    %c0_34 = arith.constant 0 : index
    %85 = vector.load %arg10[%c0_33, %c0_34] : memref<384x640xbf16, #tpu.memory_space<vmem>>, vector<384x640xbf16>
    %cst_35 = arith.constant dense<0.000000e+00> : vector<32x640xf32>
    %86 = tpu.matmul %84, %85, %cst_35 {dimension_numbers = #tpu.dot_dimension_numbers<[1], [0], [0], [1], [0, 0, 1, 1], [], []>} : vector<32x384xbf16>, vector<384x640xbf16>, vector<32x640xf32> -> vector<32x640xf32>
    %87 = arith.truncf %86 : vector<32x640xf32> to vector<32x640xbf16>
    %cst_36 = arith.constant dense<0.000000e+00> : vector<32x640xf32>
    %88 = tpu.matmul %29, %87, %cst_36 {dimension_numbers = #tpu.dot_dimension_numbers<[1], [0], [0], [1], [0, 0, 1, 1], [], []>} : vector<32x32xbf16>, vector<32x640xbf16>, vector<32x640xf32> -> vector<32x640xf32>
    %c0_37 = arith.constant 0 : index
    %c0_38 = arith.constant 0 : index
    %89 = vector.load %arg11[%c0_37, %c0_38] : memref<1x640xf32, #tpu.memory_space<vmem>>, vector<1x640xf32>
    %90 = vector.broadcast %89 : vector<1x640xf32> to vector<32x640xf32>
    %91 = arith.addf %88, %90 : vector<32x640xf32>
    %cst_39 = arith.constant 0.000000e+00 : f32
    %92 = vector.broadcast %cst_39 : f32 to vector<32x640xf32>
    %93 = arith.maximumf %91, %92 : vector<32x640xf32>
    %cst_40 = arith.constant dense<0.000000e+00> : vector<32x256xf32>
    %94 = tpu.matmul %41, %67, %cst_40 {dimension_numbers = #tpu.dot_dimension_numbers<[1], [0], [0], [1], [0, 0, 1, 1], [], []>} : vector<32x32xbf16>, vector<32x256xbf16>, vector<32x256xf32> -> vector<32x256xf32>
    %c0_41 = arith.constant 0 : index
    %c0_42 = arith.constant 0 : index
    %95 = vector.load %arg7[%c0_41, %c0_42] : memref<1x256xf32, #tpu.memory_space<vmem>>, vector<1x256xf32>
    %96 = vector.broadcast %95 : vector<1x256xf32> to vector<32x256xf32>
    %97 = arith.addf %94, %96 : vector<32x256xf32>
    %cst_43 = arith.constant 0.000000e+00 : f32
    %98 = vector.broadcast %cst_43 : f32 to vector<32x256xf32>
    %99 = arith.maximumf %97, %98 : vector<32x256xf32>
    %100 = arith.truncf %99 : vector<32x256xf32> to vector<32x256xbf16>
    %c0_44 = arith.constant 0 : index
    %c0_45 = arith.constant 0 : index
    %101 = vector.load %arg8[%c0_44, %c0_45] : memref<256x384xbf16, #tpu.memory_space<vmem>>, vector<256x384xbf16>
    %cst_46 = arith.constant dense<0.000000e+00> : vector<32x384xf32>
    %102 = tpu.matmul %100, %101, %cst_46 {dimension_numbers = #tpu.dot_dimension_numbers<[1], [0], [0], [1], [0, 0, 1, 1], [], []>} : vector<32x256xbf16>, vector<256x384xbf16>, vector<32x384xf32> -> vector<32x384xf32>
    %103 = arith.truncf %102 : vector<32x384xf32> to vector<32x384xbf16>
    %cst_47 = arith.constant dense<0.000000e+00> : vector<32x384xf32>
    %104 = tpu.matmul %41, %103, %cst_47 {dimension_numbers = #tpu.dot_dimension_numbers<[1], [0], [0], [1], [0, 0, 1, 1], [], []>} : vector<32x32xbf16>, vector<32x384xbf16>, vector<32x384xf32> -> vector<32x384xf32>
    %c0_48 = arith.constant 0 : index
    %c0_49 = arith.constant 0 : index
    %105 = vector.load %arg9[%c0_48, %c0_49] : memref<1x384xf32, #tpu.memory_space<vmem>>, vector<1x384xf32>
    %106 = vector.broadcast %105 : vector<1x384xf32> to vector<32x384xf32>
    %107 = arith.addf %104, %106 : vector<32x384xf32>
    %cst_50 = arith.constant 0.000000e+00 : f32
    %108 = vector.broadcast %cst_50 : f32 to vector<32x384xf32>
    %109 = arith.maximumf %107, %108 : vector<32x384xf32>
    %cst_51 = arith.constant dense<0.000000e+00> : vector<32x256xf32>
    %110 = tpu.matmul %53, %67, %cst_51 {dimension_numbers = #tpu.dot_dimension_numbers<[1], [0], [0], [1], [0, 0, 1, 1], [], []>} : vector<32x32xbf16>, vector<32x256xbf16>, vector<32x256xf32> -> vector<32x256xf32>
    %c0_52 = arith.constant 0 : index
    %c0_53 = arith.constant 0 : index
    %111 = vector.load %arg7[%c0_52, %c0_53] : memref<1x256xf32, #tpu.memory_space<vmem>>, vector<1x256xf32>
    %112 = vector.broadcast %111 : vector<1x256xf32> to vector<32x256xf32>
    %113 = arith.addf %110, %112 : vector<32x256xf32>
    %cst_54 = arith.constant 0.000000e+00 : f32
    %114 = vector.broadcast %cst_54 : f32 to vector<32x256xf32>
    %115 = arith.maximumf %113, %114 : vector<32x256xf32>
    %116 = vector.shape_cast %93 : vector<32x640xf32> to vector<2x16x640xf32>
    %cst_55 = arith.constant dense<0xFF800000> : vector<2x640xf32>
    %117 = vector.multi_reduction <maximumf>, %116, %cst_55 [1] : vector<2x16x640xf32> to vector<2x640xf32>
    %118 = vector.shape_cast %109 : vector<32x384xf32> to vector<2x16x384xf32>
    %cst_56 = arith.constant dense<0xFF800000> : vector<2x384xf32>
    %119 = vector.multi_reduction <maximumf>, %118, %cst_56 [1] : vector<2x16x384xf32> to vector<2x384xf32>
    %120 = vector.shape_cast %115 : vector<32x256xf32> to vector<2x16x256xf32>
    %cst_57 = arith.constant dense<0xFF800000> : vector<2x256xf32>
    %121 = vector.multi_reduction <maximumf>, %120, %cst_57 [1] : vector<2x16x256xf32> to vector<2x256xf32>
    %122 = arith.truncf %117 : vector<2x640xf32> to vector<2x640xbf16>
    %c0_58 = arith.constant 0 : index
    %c0_59 = arith.constant 0 : index
    %123 = vector.load %arg12[%c0_58, %c0_59] : memref<640x1024xbf16, #tpu.memory_space<vmem>>, vector<640x1024xbf16>
    %cst_60 = arith.constant dense<0.000000e+00> : vector<2x1024xf32>
    %124 = tpu.matmul %122, %123, %cst_60 {dimension_numbers = #tpu.dot_dimension_numbers<[1], [0], [0], [1], [0, 0, 1, 1], [], []>} : vector<2x640xbf16>, vector<640x1024xbf16>, vector<2x1024xf32> -> vector<2x1024xf32>
    %125 = arith.truncf %119 : vector<2x384xf32> to vector<2x384xbf16>
    %c0_61 = arith.constant 0 : index
    %c0_62 = arith.constant 0 : index
    %126 = vector.load %arg13[%c0_61, %c0_62] : memref<384x1024xbf16, #tpu.memory_space<vmem>>, vector<384x1024xbf16>
    %cst_63 = arith.constant dense<0.000000e+00> : vector<2x1024xf32>
    %127 = tpu.matmul %125, %126, %cst_63 {dimension_numbers = #tpu.dot_dimension_numbers<[1], [0], [0], [1], [0, 0, 1, 1], [], []>} : vector<2x384xbf16>, vector<384x1024xbf16>, vector<2x1024xf32> -> vector<2x1024xf32>
    %128 = arith.addf %124, %127 : vector<2x1024xf32>
    %129 = arith.truncf %121 : vector<2x256xf32> to vector<2x256xbf16>
    %c0_64 = arith.constant 0 : index
    %c0_65 = arith.constant 0 : index
    %130 = vector.load %arg14[%c0_64, %c0_65] : memref<256x1024xbf16, #tpu.memory_space<vmem>>, vector<256x1024xbf16>
    %cst_66 = arith.constant dense<0.000000e+00> : vector<2x1024xf32>
    %131 = tpu.matmul %129, %130, %cst_66 {dimension_numbers = #tpu.dot_dimension_numbers<[1], [0], [0], [1], [0, 0, 1, 1], [], []>} : vector<2x256xbf16>, vector<256x1024xbf16>, vector<2x1024xf32> -> vector<2x1024xf32>
    %132 = arith.addf %128, %131 : vector<2x1024xf32>
    %c0_67 = arith.constant 0 : index
    %c0_68 = arith.constant 0 : index
    %133 = vector.load %arg15[%c0_67, %c0_68] : memref<1x1024xf32, #tpu.memory_space<vmem>>, vector<1x1024xf32>
    %134 = vector.broadcast %133 : vector<1x1024xf32> to vector<2x1024xf32>
    %135 = arith.addf %132, %134 : vector<2x1024xf32>
    %cst_69 = arith.constant 0.000000e+00 : f32
    %136 = vector.broadcast %cst_69 : f32 to vector<2x1024xf32>
    %137 = arith.maximumf %135, %136 : vector<2x1024xf32>
    %138 = arith.truncf %137 : vector<2x1024xf32> to vector<2x1024xbf16>
    %c0_70 = arith.constant 0 : index
    %c0_71 = arith.constant 0 : index
    %139 = vector.load %arg16[%c0_70, %c0_71] : memref<1024x128xbf16, #tpu.memory_space<vmem>>, vector<1024x128xbf16>
    %cst_72 = arith.constant dense<0.000000e+00> : vector<2x128xf32>
    %140 = tpu.matmul %138, %139, %cst_72 {dimension_numbers = #tpu.dot_dimension_numbers<[1], [0], [0], [1], [0, 0, 1, 1], [], []>} : vector<2x1024xbf16>, vector<1024x128xbf16>, vector<2x128xf32> -> vector<2x128xf32>
    %c0_73 = arith.constant 0 : index
    %c0_74 = arith.constant 0 : index
    %141 = vector.load %arg17[%c0_73, %c0_74] : memref<1x128xf32, #tpu.memory_space<vmem>>, vector<1x128xf32>
    %142 = vector.broadcast %141 : vector<1x128xf32> to vector<2x128xf32>
    %143 = arith.addf %140, %142 : vector<2x128xf32>
    %144 = math.tanh %143 : vector<2x128xf32>
    %cst_75 = arith.constant dense<0xFF800000> : vector<2xf32>
    %145 = vector.multi_reduction <maximumf>, %144, %cst_75 [1] : vector<2x128xf32> to vector<2xf32>
    %146 = vector.shape_cast %145 : vector<2xf32> to vector<2x1xf32>
    %147 = vector.broadcast %146 : vector<2x1xf32> to vector<2x128xf32>
    %148 = arith.subf %144, %147 : vector<2x128xf32>
    %149 = math.exp %148 : vector<2x128xf32>
    %cst_76 = arith.constant dense<0.000000e+00> : vector<2xf32>
    %150 = vector.multi_reduction <add>, %149, %cst_76 [1] : vector<2x128xf32> to vector<2xf32>
    %151 = vector.shape_cast %150 : vector<2xf32> to vector<2x1xf32>
    %152 = tpu.reciprocal %151 {approx = true} : vector<2x1xf32> -> vector<2x1xf32>
    %153 = vector.broadcast %152 : vector<2x1xf32> to vector<2x128xf32>
    %154 = arith.mulf %149, %153 : vector<2x128xf32>
    %155 = arith.mulf %143, %154 : vector<2x128xf32>
    %c0_77 = arith.constant 0 : index
    %c0_78 = arith.constant 0 : index
    %156 = vector.load %arg3[%c0_77, %c0_78] : memref<128x1xi32, #tpu.memory_space<vmem>>, vector<128x1xi32>
    %157 = tpu.iota {dimensions = array<i32: 1>} : vector<128x128xi32>
    %158 = vector.broadcast %156 : vector<128x1xi32> to vector<128x128xi32>
    %159 = arith.cmpi eq, %157, %158 : vector<128x128xi32>
    %160 = arith.extui %159 : vector<128x128xi1> to vector<128x128xi32>
    %161 = arith.sitofp %160 : vector<128x128xi32> to vector<128x128xf32>
    %162 = arith.truncf %161 : vector<128x128xf32> to vector<128x128xbf16>
    %c0_79 = arith.constant 0 : index
    %c0_80 = arith.constant 0 : index
    %163 = vector.load %arg18[%c0_79, %c0_80] : memref<128x128xbf16, #tpu.memory_space<vmem>>, vector<128x128xbf16>
    %cst_81 = arith.constant dense<0.000000e+00> : vector<128x128xf32>
    %164 = tpu.matmul %162, %163, %cst_81 {dimension_numbers = #tpu.dot_dimension_numbers<[1], [0], [0], [1], [0, 0, 1, 1], [], []>} : vector<128x128xbf16>, vector<128x128xbf16>, vector<128x128xf32> -> vector<128x128xf32>
    %c127_i32 = arith.constant 127 : i32
    %165 = tpu.dynamic_rotate %164 by %c127_i32 dim 0 : vector<128x128xf32>, i32 -> vector<128x128xf32>
    %c126_i32 = arith.constant 126 : i32
    %166 = tpu.dynamic_rotate %164 by %c126_i32 dim 0 : vector<128x128xf32>, i32 -> vector<128x128xf32>
    %167 = tpu.concatenate %164, %165, %166 in 1 : vector<128x128xf32>, vector<128x128xf32>, vector<128x128xf32> -> vector<128x384xf32>
    %168 = arith.truncf %167 : vector<128x384xf32> to vector<128x384xbf16>
    %c0_82 = arith.constant 0 : index
    %c0_83 = arith.constant 0 : index
    %169 = vector.load %arg19[%c0_82, %c0_83] : memref<384x128xbf16, #tpu.memory_space<vmem>>, vector<384x128xbf16>
    %cst_84 = arith.constant dense<0.000000e+00> : vector<128x128xf32>
    %170 = tpu.matmul %168, %169, %cst_84 {dimension_numbers = #tpu.dot_dimension_numbers<[1], [0], [0], [1], [0, 0, 1, 1], [], []>} : vector<128x384xbf16>, vector<384x128xbf16>, vector<128x128xf32> -> vector<128x128xf32>
    %c0_85 = arith.constant 0 : index
    %c0_86 = arith.constant 0 : index
    %171 = vector.load %arg20[%c0_85, %c0_86] : memref<1x128xf32, #tpu.memory_space<vmem>>, vector<1x128xf32>
    %172 = vector.broadcast %171 : vector<1x128xf32> to vector<128x128xf32>
    %173 = arith.addf %170, %172 : vector<128x128xf32>
    %cst_87 = arith.constant 0.000000e+00 : f32
    %174 = vector.broadcast %cst_87 : f32 to vector<128x128xf32>
    %175 = arith.maximumf %173, %174 : vector<128x128xf32>
    %176 = vector.shape_cast %175 : vector<128x128xf32> to vector<2x64x128xf32>
    %177 = tpu.iota {dimensions = array<i32: 1>} : vector<2x64x128xi32>
    %c62_i32 = arith.constant 62 : i32
    %178 = vector.broadcast %c62_i32 : i32 to vector<2x64x128xi32>
    %179 = arith.cmpi slt, %177, %178 : vector<2x64x128xi32>
    %cst_88 = arith.constant -3.40282347E+38 : f32
    %180 = vector.broadcast %cst_88 : f32 to vector<2x64x128xf32>
    %181 = arith.select %179, %176, %180 : vector<2x64x128xi1>, vector<2x64x128xf32>
    %cst_89 = arith.constant dense<0xFF800000> : vector<2x128xf32>
    %182 = vector.multi_reduction <maximumf>, %181, %cst_89 [1] : vector<2x64x128xf32> to vector<2x128xf32>
    %183 = arith.truncf %182 : vector<2x128xf32> to vector<2x128xbf16>
    %c0_90 = arith.constant 0 : index
    %c0_91 = arith.constant 0 : index
    %184 = vector.load %arg21[%c0_90, %c0_91] : memref<128x128xbf16, #tpu.memory_space<vmem>>, vector<128x128xbf16>
    %cst_92 = arith.constant dense<0.000000e+00> : vector<2x128xf32>
    %185 = tpu.matmul %183, %184, %cst_92 {dimension_numbers = #tpu.dot_dimension_numbers<[1], [0], [0], [1], [0, 0, 1, 1], [], []>} : vector<2x128xbf16>, vector<128x128xbf16>, vector<2x128xf32> -> vector<2x128xf32>
    %c0_93 = arith.constant 0 : index
    %c0_94 = arith.constant 0 : index
    %186 = vector.load %arg22[%c0_93, %c0_94] : memref<1x128xf32, #tpu.memory_space<vmem>>, vector<1x128xf32>
    %187 = vector.broadcast %186 : vector<1x128xf32> to vector<2x128xf32>
    %188 = arith.addf %185, %187 : vector<2x128xf32>
    %189 = math.tanh %188 : vector<2x128xf32>
    %cst_95 = arith.constant dense<0xFF800000> : vector<2xf32>
    %190 = vector.multi_reduction <maximumf>, %189, %cst_95 [1] : vector<2x128xf32> to vector<2xf32>
    %191 = vector.shape_cast %190 : vector<2xf32> to vector<2x1xf32>
    %192 = vector.broadcast %191 : vector<2x1xf32> to vector<2x128xf32>
    %193 = arith.subf %189, %192 : vector<2x128xf32>
    %194 = math.exp %193 : vector<2x128xf32>
    %cst_96 = arith.constant dense<0.000000e+00> : vector<2xf32>
    %195 = vector.multi_reduction <add>, %194, %cst_96 [1] : vector<2x128xf32> to vector<2xf32>
    %196 = vector.shape_cast %195 : vector<2xf32> to vector<2x1xf32>
    %197 = tpu.reciprocal %196 {approx = true} : vector<2x1xf32> -> vector<2x1xf32>
    %198 = vector.broadcast %197 : vector<2x1xf32> to vector<2x128xf32>
    %199 = arith.mulf %194, %198 : vector<2x128xf32>
    %200 = arith.mulf %188, %199 : vector<2x128xf32>
    %201 = tpu.concatenate %155, %200 in 1 : vector<2x128xf32>, vector<2x128xf32> -> vector<2x256xf32>
    %202 = arith.truncf %201 : vector<2x256xf32> to vector<2x256xbf16>
    %c0_97 = arith.constant 0 : index
    %c0_98 = arith.constant 0 : index
    %203 = vector.load %arg23[%c0_97, %c0_98] : memref<256x1024xbf16, #tpu.memory_space<vmem>>, vector<256x1024xbf16>
    %cst_99 = arith.constant dense<0.000000e+00> : vector<2x1024xf32>
    %204 = tpu.matmul %202, %203, %cst_99 {dimension_numbers = #tpu.dot_dimension_numbers<[1], [0], [0], [1], [0, 0, 1, 1], [], []>} : vector<2x256xbf16>, vector<256x1024xbf16>, vector<2x1024xf32> -> vector<2x1024xf32>
    %c0_100 = arith.constant 0 : index
    %c0_101 = arith.constant 0 : index
    %205 = vector.load %arg24[%c0_100, %c0_101] : memref<1x1024xf32, #tpu.memory_space<vmem>>, vector<1x1024xf32>
    %206 = vector.broadcast %205 : vector<1x1024xf32> to vector<2x1024xf32>
    %207 = arith.addf %204, %206 : vector<2x1024xf32>
    %cst_102 = arith.constant 0.000000e+00 : f32
    %208 = vector.broadcast %cst_102 : f32 to vector<2x1024xf32>
    %209 = arith.maximumf %207, %208 : vector<2x1024xf32>
    %210 = arith.truncf %209 : vector<2x1024xf32> to vector<2x1024xbf16>
    %c0_103 = arith.constant 0 : index
    %c0_104 = arith.constant 0 : index
    %211 = vector.load %arg25[%c0_103, %c0_104] : memref<1024x512xbf16, #tpu.memory_space<vmem>>, vector<1024x512xbf16>
    %cst_105 = arith.constant dense<0.000000e+00> : vector<2x512xf32>
    %212 = tpu.matmul %210, %211, %cst_105 {dimension_numbers = #tpu.dot_dimension_numbers<[1], [0], [0], [1], [0, 0, 1, 1], [], []>} : vector<2x1024xbf16>, vector<1024x512xbf16>, vector<2x512xf32> -> vector<2x512xf32>
    %c0_106 = arith.constant 0 : index
    %c0_107 = arith.constant 0 : index
    %213 = vector.load %arg26[%c0_106, %c0_107] : memref<1x512xf32, #tpu.memory_space<vmem>>, vector<1x512xf32>
    %214 = vector.broadcast %213 : vector<1x512xf32> to vector<2x512xf32>
    %215 = arith.addf %212, %214 : vector<2x512xf32>
    %cst_108 = arith.constant 0.000000e+00 : f32
    %216 = vector.broadcast %cst_108 : f32 to vector<2x512xf32>
    %217 = arith.maximumf %215, %216 : vector<2x512xf32>
    %c0_109 = arith.constant 0 : index
    %c0_110 = arith.constant 0 : index
    %218 = vector.load %arg27[%c0_109, %c0_110] : memref<512x128xf32, #tpu.memory_space<vmem>>, vector<512x128xf32>
    %cst_111 = arith.constant dense<0.000000e+00> : vector<2x128xf32>
    %219 = tpu.matmul %217, %218, %cst_111 {dimension_numbers = #tpu.dot_dimension_numbers<[1], [0], [0], [1], [0, 0, 1, 1], [], []>} : vector<2x512xf32>, vector<512x128xf32>, vector<2x128xf32> -> vector<2x128xf32>
    %c0_112 = arith.constant 0 : index
    %c0_113 = arith.constant 0 : index
    %220 = vector.load %arg28[%c0_112, %c0_113] : memref<1x128xf32, #tpu.memory_space<vmem>>, vector<1x128xf32>
    %221 = vector.broadcast %220 : vector<1x128xf32> to vector<2x128xf32>
    %222 = arith.addf %219, %221 : vector<2x128xf32>
    %c0_114 = arith.constant 0 : index
    %c0_115 = arith.constant 0 : index
    %223 = vector.load %arg29[%c0_114, %c0_115] : memref<2x128xf32, #tpu.memory_space<vmem>>, vector<2x128xf32>
    tpu.vector_store %arg29[%c0_114, %c0_115], %222 {strides = array<i32>} : memref<2x128xf32, #tpu.memory_space<vmem>>, vector<2x128xf32>,
    return
  }
}

</mosaic_0001>

<bundles_post_ra>
// kernel: tpu_custom_call.1
= control target key start
LH: loop header
LB: loop body
LE: loop exit
PB: predicated region body
PF: predicated region fallthrough
CT: control target
= control target key end

     0   :  { %s17135_s6 = smov 1   ;;  %s17136_s10 = smov 2   ;;  %s18428_s0 = inlined_call_operand.smem [shape: u32[30], index: -1, kind: input, shape index: {}] }
   0x1   :  { %s17217_s5 = sld [smem:[%s18428_s0]]   ;;  %s17137_s14 = smov 3  }
   0x2   :  { %s17222_s9 = sld [smem:[%s18428_s0 + %s17135_s6]]   ;;  %s17138_s18 = smov 4  }
   0x3   :  { %s17227_s13 = sld [smem:[%s18428_s0 + %s17136_s10]]   ;;  %s17139_s22 = smov 5  }
   0x4   :  { %s17232_s17 = sld [smem:[%s18428_s0 + %s17137_s14]]   ;;  %s17140_s26 = smov 6  }
   0x5   :  { %s17237_s21 = sld [smem:[%s18428_s0 + %s17138_s18]]   ;;  %s17141_s30 = smov 7  }
   0x6   :  { %s17242_s25 = sld [smem:[%s18428_s0 + %s17139_s22]]   ;;  %s17142_s4 = smov 8  }
   0x7   :  { %s17247_s29 = sld [smem:[%s18428_s0 + %s17140_s26]]   ;;  %s17143_s10 = smov 9  }
   0x8   :  { %s17252_s3 = sld [smem:[%s18428_s0 + %s17141_s30]]   ;;  %s17144_s15 = smov 10  }
   0x9   :  { %s17257_s8 = sld [smem:[%s18428_s0 + %s17142_s4]]   ;;  %s17145_s20 = smov 11  }
   0xa   :  { %18441 = sst [smem:[#allocation63_spill]] %s17232_s17  ;;  %s17146_s26 = smov 12  }
   0xb   :  { %s17262_s14 = sld [smem:[%s18428_s0 + %s17143_s10]]   ;;  %s17147_s1 = smov 13  }
   0xc   :  { %18442 = sst [smem:[#allocation64_spill]] %s17242_s25  ;;  %s17148_s7 = smov 14  }
   0xd   :  { %s17267_s19 = sld [smem:[%s18428_s0 + %s17144_s15]]   ;;  %s17149_s15 = smov 15  }
   0xe   :  { %18443 = sst [smem:[#allocation65_spill]] %s17252_s3  ;;  %s17150_s22 = smov 16  }
   0xf   :  { %s17272_s24 = sld [smem:[%s18428_s0 + %s17145_s20]]   ;;  %s17151_s28 = smov 17  }
  0x10   :  { %s17277_s30 = sld [smem:[%s18428_s0 + %s17146_s26]]  }
  0x11   :  { %18444 = sst [smem:[#allocation66_spill]] %s17262_s14 }
  0x12   :  { %s17282_s6 = sld [smem:[%s18428_s0 + %s17147_s1]]  }
  0x13   :  { %s17287_s12 = sld [smem:[%s18428_s0 + %s17148_s7]]   ;;  %s17152_s7 = smov 18  }
  0x14   :  { %s17292_s20 = sld [smem:[%s18428_s0 + %s17149_s15]]   ;;  %s17153_s15 = smov 19  }
  0x15   :  { %18445 = sst [smem:[#allocation67_spill]] %s17272_s24 }
  0x16   :  { %s17297_s27 = sld [smem:[%s18428_s0 + %s17150_s22]]   ;;  %s17154_s22 = smov 20  }
  0x17   :  { %s17302_s4 = sld [smem:[%s18428_s0 + %s17151_s28]]   ;;  %s17155_s28 = smov 21  }
  0x18   :  { %18446 = sst [smem:[#allocation68_spill]] %s17282_s6 }
  0x19   :  { %s17307_s17 = sld [smem:[%s18428_s0 + %s17152_s7]]   ;;  %s17156_s7 = smov 22  }
  0x1a   :  { %18447 = sst [smem:[#allocation69_spill]] %s17292_s20 }
  0x1b   :  { %s17312_s20 = sld [smem:[%s18428_s0 + %s17153_s15]]   ;;  %s17157_s15 = smov 23  }
  0x1c   :  { %s17317_s6 = sld [smem:[%s18428_s0 + %s17154_s22]]   ;;  %s17158_s22 = smov 24  }
  0x1d   :  { %18448 = sst [smem:[#allocation70_spill]] %s17302_s4 }
  0x1e   :  { %s17322_s4 = sld [smem:[%s18428_s0 + %s17155_s28]]   ;;  %s17159_s28 = smov 25  }
  0x1f   :  { %s17327_s24 = sld [smem:[%s18428_s0 + %s17156_s7]]   ;;  %s17160_s7 = smov 26  }
  0x20   :  { %s17337_s14 = sld [smem:[%s18428_s0 + %s17158_s22]]   ;;  %s17162_s22 = smov 28  }
  0x21   :  { %18449 = sst [smem:[#allocation71_spill]] %s17312_s20 }
  0x22   :  { %s17332_s20 = sld [smem:[%s18428_s0 + %s17157_s15]]   ;;  %s17161_s15 = smov 27  }
  0x23   :  { %s17347_s3 = sld [smem:[%s18428_s0 + %s17160_s7]]  }
  0x24   :  { %18450 = sst [smem:[#allocation72_spill]] %s17322_s4 }
  0x25   :  { %s17342_s4 = sld [smem:[%s18428_s0 + %s17159_s28]]   ;;  %s17163_s28 = smov 29  }
  0x26   :  { %s17357_s25 = sld [smem:[%s18428_s0 + %s17162_s22]]  }
  0x28   :  { %18451 = sst [smem:[#allocation73_spill]] %s17332_s20 }
  0x29   :  { %s17352_s20 = sld [smem:[%s18428_s0 + %s17161_s15]]  }
  0x2b   :  { %18452 = sst [smem:[#allocation74_spill]] %s17342_s4 }
  0x2c   :  { %s17362_s4 = sld [smem:[%s18428_s0 + %s17163_s28]]  }
  0x2d   :  { %64 = vsyncpa [#allocation3], 0 }
  0x2e   :  { %65 = vsyncpa [#allocation6], 0 }
  0x2f   :  { %66 = vsyncpa [#allocation9], 0 }
  0x30   :  { %67 = vsyncpa [#allocation12], 0 }
  0x31   :  { %68 = vsyncpa [#allocation15], 0 }
  0x32   :  { %69 = vsyncpa [#allocation18], 0 }
  0x33   :  { %70 = vsyncpa [#allocation21], 0 }
  0x34   :  { %71 = vsyncpa [#allocation24], 0 }
  0x35   :  { %72 = vsyncpa [#allocation27], 0 }
  0x36   :  { %73 = vsyncpa [#allocation30], 0 }
  0x37   :  { %74 = vsyncpa [#allocation33], 0 }
  0x38   :  { %75 = vsyncpa [#allocation36], 0 }
  0x39   :  { %76 = vsyncpa [#allocation39], 0 }
  0x3a   :  { %77 = vsyncpa [#allocation42], 0 }
  0x3b   :  { %78 = vsyncpa [#allocation45], 0 }
  0x3c   :  { %79 = vsyncpa [#allocation4], 0  ;;  %s17164_s0 = smov [#allocation5]   ;;  %s17165_s10 = smov [#allocation8]  }
  0x3d   :  { %s97_s7 = sshll.u32 %s17164_s0, 4  ;;  %s123_s11 = sshll.u32 %s17165_s10, 4  ;;  %s98_s7 = int_to_ptr.vmem [resolvable:$true] %s97_s7  ;;  %s17364_s11 = int_to_ptr.vmem [resolvable:$true] %s123_s11 }
  0x3e   :  { %s16465_s15 = scalar_lea.hbm %s17222_s9, 512 }
  0x3f   :  { %p16466_p0 = scmp.ne.s32.totalorder %s17222_s9, %s16465_s15  ;;  %p16469_p1 = scmp.lt.u32.totalorder %s16465_s15, %s17222_s9 }
  0x41   :  { %p16471_p2 = pnand %p16469_p1, %p16466_p0 }
  0x43   :  { %16474 = shalt.err (!%p16471_p2)
}
  0x44   :  { %s16475_s16 = scalar_lea.vmem %s98_s7, 512  ;;  %p16480_p4 = scmp.lt.s32.totalorder %s98_s7, %s98_s7 }
  0x45   :  { %p16476_p3 = scmp.ne.s32.totalorder %s98_s7, %s16475_s16  ;;  %p16481_p5 = scmp.lt.s32.totalorder %s16475_s16, %s16475_s16 }
  0x47   :  { %p16482_p6 = por %p16481_p5, %p16480_p4 }
  0x49   :  { %p16483_p7 = pnand %p16482_p6, %p16476_p3 }
  0x4b   :  { %16486 = shalt.err (!%p16483_p7)
}
  0x4c   :  { %s17166_s18 = smov 128   ;;  %s17167_s22 = smov 8  }
  0x4d   :  { %103 = dma.hbm_to_vmem [thread:$0]  %s17222_s9, 512, %s98_s7, [#allocation6], %s17166_s18, %s17166_s18, %s17167_s22  }
  0x4e   :  { %s16487_s23 = scalar_lea.hbm %s17237_s21, 2048 }
  0x4f   :  { %p16488_p8 = scmp.ne.s32.totalorder %s17237_s21, %s16487_s23  ;;  %p16491_p9 = scmp.lt.u32.totalorder %s16487_s23, %s17237_s21 }
  0x51   :  { %p16493_p10 = pnand %p16491_p9, %p16488_p8 }
  0x53   :  { %16496 = shalt.err (!%p16493_p10)
}
  0x54   :  { %s16497_s26 = scalar_lea.vmem %s17364_s11, 2048  ;;  %p16502_p12 = scmp.lt.s32.totalorder %s17364_s11, %s17364_s11 }
  0x55   :  { %p16498_p11 = scmp.ne.s32.totalorder %s17364_s11, %s16497_s26  ;;  %p16503_p13 = scmp.lt.s32.totalorder %s16497_s26, %s16497_s26 }
  0x57   :  { %p16504_p0 = por %p16503_p13, %p16502_p12 }
  0x59   :  { %p16505_p1 = pnand %p16504_p0, %p16498_p11 }
  0x5b   :  { %16508 = shalt.err (!%p16505_p1)
}
  0x5c   :  { %129 = dma.hbm_to_vmem [thread:$0]  %s17237_s21, 2048, %s17364_s11, [#allocation9], %s17166_s18, %s17166_s18, %s17167_s22  }
  0x5d   :  { %s17168_s9 = smov [#allocation11]   ;;  %s17169_s1 = smov [#allocation14]  }
  0x5e   :  { %s145_s28 = sshll.u32 %s17168_s9, 4  ;;  %s167_s2 = sshll.u32 %s17169_s1, 4  ;;  %s146_s28 = int_to_ptr.vmem [resolvable:$true] %s145_s28  ;;  %s17385_s2 = int_to_ptr.vmem [resolvable:$true] %s167_s2 }
  0x5f   :  { %s16509_s0 = scalar_lea.hbm %s17247_s29, 4096 }
  0x60   :  { %p16510_p2 = scmp.ne.s32.totalorder %s17247_s29, %s16509_s0  ;;  %p16513_p3 = scmp.lt.u32.totalorder %s16509_s0, %s17247_s29 }
  0x62   :  { %p16515_p4 = pnand %p16513_p3, %p16510_p2 }
  0x64   :  { %16518 = shalt.err (!%p16515_p4)
}
  0x65   :  { %s16519_s7 = scalar_lea.vmem %s146_s28, 4096  ;;  %p16524_p6 = scmp.lt.s32.totalorder %s146_s28, %s146_s28 }
  0x66   :  { %p16520_p5 = scmp.ne.s32.totalorder %s146_s28, %s16519_s7  ;;  %p16525_p7 = scmp.lt.s32.totalorder %s16519_s7, %s16519_s7 }
  0x68   :  { %p16526_p8 = por %p16525_p7, %p16524_p6 }
  0x6a   :  { %p16527_p9 = pnand %p16526_p8, %p16520_p5 }
  0x6c   :  { %16530 = shalt.err (!%p16527_p9)
}
  0x6d   :  { %151 = dma.hbm_to_vmem [thread:$0]  %s17247_s29, 4096, %s146_s28, [#allocation12], %s17166_s18, %s17166_s18, %s17167_s22  }
  0x6e   :  { %s16531_s21 = scalar_lea.hbm %s17257_s8, 6144 }
  0x6f   :  { %p16532_p10 = scmp.ne.s32.totalorder %s17257_s8, %s16531_s21  ;;  %p16535_p11 = scmp.lt.u32.totalorder %s16531_s21, %s17257_s8 }
  0x71   :  { %p16537_p12 = pnand %p16535_p11, %p16532_p10 }
  0x73   :  { %16540 = shalt.err (!%p16537_p12)
}
  0x74   :  { %s16541_s10 = scalar_lea.vmem %s17385_s2, 6144  ;;  %p16546_p0 = scmp.lt.s32.totalorder %s17385_s2, %s17385_s2 }
  0x75   :  { %p16542_p13 = scmp.ne.s32.totalorder %s17385_s2, %s16541_s10  ;;  %p16547_p1 = scmp.lt.s32.totalorder %s16541_s10, %s16541_s10 }
  0x77   :  { %p16548_p2 = por %p16547_p1, %p16546_p0 }
  0x79   :  { %p16549_p3 = pnand %p16548_p2, %p16542_p13 }
  0x7b   :  { %16552 = shalt.err (!%p16549_p3)
}
  0x7c   :  { %s17170_s11 = smov 192   ;;  %s17171_s29 = smov 12  }
  0x7d   :  { %173 = dma.hbm_to_vmem [thread:$0]  %s17257_s8, 6144, %s17385_s2, [#allocation15], %s17170_s11, %s17170_s11, %s17171_s29  }
  0x7e   :  { %s17172_s15 = smov [#allocation17]   ;;  %s16553_s23 = scalar_lea.hbm %s17267_s19, 15360 }
  0x7f   :  { %s189_s16 = sshll.u32 %s17172_s15, 4  ;;  %p16554_p4 = scmp.ne.s32.totalorder %s17267_s19, %s16553_s23  ;;  %s190_s16 = int_to_ptr.vmem [resolvable:$true] %s189_s16 }
  0x80   :  { %p16557_p5 = scmp.lt.u32.totalorder %s16553_s23, %s17267_s19 }
  0x82   :  { %p16559_p6 = pnand %p16557_p5, %p16554_p4 }
  0x84   :  { %16562 = shalt.err (!%p16559_p6)
}
  0x85   :  { %s16563_s26 = scalar_lea.vmem %s190_s16, 15360  ;;  %p16568_p8 = scmp.lt.s32.totalorder %s190_s16, %s190_s16 }
  0x86   :  { %p16564_p7 = scmp.ne.s32.totalorder %s190_s16, %s16563_s26  ;;  %p16569_p9 = scmp.lt.s32.totalorder %s16563_s26, %s16563_s26 }
  0x88   :  { %p16570_p10 = por %p16569_p9, %p16568_p8 }
  0x8a   :  { %p16571_p11 = pnand %p16570_p10, %p16564_p7 }
  0x8c   :  { %16574 = shalt.err (!%p16571_p11)
}
  0x8d   :  { %s17173_s9 = smov 320   ;;  %s17174_s8 = smov 20  }
  0x8e   :  { %195 = dma.hbm_to_vmem [thread:$0]  %s17267_s19, 15360, %s190_s16, [#allocation18], %s17173_s9, %s17173_s9, %s17174_s8  }
  0x8f   :  { %s17175_s28 = smov [#allocation20]   ;;  %s16575_s2 = scalar_lea.hbm %s17277_s30, 40960 }
  0x90   :  { %s211_s1 = sshll.u32 %s17175_s28, 4  ;;  %p16576_p12 = scmp.ne.s32.totalorder %s17277_s30, %s16575_s2  ;;  %s212_s1 = int_to_ptr.vmem [resolvable:$true] %s211_s1 }
  0x91   :  { %p16579_p13 = scmp.lt.u32.totalorder %s16575_s2, %s17277_s30 }
  0x93   :  { %p16581_p0 = pnand %p16579_p13, %p16576_p12 }
  0x95   :  { %16584 = shalt.err (!%p16581_p0)
}
  0x96   :  { %s16585_s0 = scalar_lea.vmem %s212_s1, 40960  ;;  %p16590_p2 = scmp.lt.s32.totalorder %s212_s1, %s212_s1 }
  0x97   :  { %p16586_p1 = scmp.ne.s32.totalorder %s212_s1, %s16585_s0  ;;  %p16591_p3 = scmp.lt.s32.totalorder %s16585_s0, %s16585_s0 }
  0x99   :  { %p16592_p4 = por %p16591_p3, %p16590_p2 }
  0x9b   :  { %p16593_p5 = pnand %p16592_p4, %p16586_p1 }
  0x9d   :  { %16596 = shalt.err (!%p16593_p5)
}
  0x9e   :  { %s17176_s7 = smov 512   ;;  %s17177_s19 = smov 32  }
  0x9f   :  { %217 = dma.hbm_to_vmem [thread:$0]  %s17277_s30, 40960, %s212_s1, [#allocation21], %s17176_s7, %s17176_s7, %s17177_s19  }
  0xa0   :  { %s17178_s21 = smov [#allocation23]   ;;  %s17179_s11 = smov [#allocation26]  }
  0xa1   :  { %s235_s10 = sshll.u32 %s17178_s21, 4  ;;  %s257_s29 = sshll.u32 %s17179_s11, 4  ;;  %s236_s10 = int_to_ptr.vmem [resolvable:$true] %s235_s10  ;;  %s17414_s29 = int_to_ptr.vmem [resolvable:$true] %s257_s29 }
  0xa2   :  { %s16597_s15 = scalar_lea.hbm %s17287_s12, 16384 }
  0xa3   :  { %p16598_p6 = scmp.ne.s32.totalorder %s17287_s12, %s16597_s15  ;;  %p16601_p7 = scmp.lt.u32.totalorder %s16597_s15, %s17287_s12 }
  0xa5   :  { %p16603_p8 = pnand %p16601_p7, %p16598_p6 }
  0xa7   :  { %16606 = shalt.err (!%p16603_p8)
}
  0xa8   :  { %s16607_s16 = scalar_lea.vmem %s236_s10, 16384  ;;  %p16612_p10 = scmp.lt.s32.totalorder %s236_s10, %s236_s10 }
  0xa9   :  { %p16608_p9 = scmp.ne.s32.totalorder %s236_s10, %s16607_s16  ;;  %p16613_p11 = scmp.lt.s32.totalorder %s16607_s16, %s16607_s16 }
  0xab   :  { %p16614_p12 = por %p16613_p11, %p16612_p10 }
  0xad   :  { %p16615_p13 = pnand %p16614_p12, %p16608_p9 }
  0xaf   :  { %16618 = shalt.err (!%p16615_p13)
}
  0xb0   :  { %241 = dma.hbm_to_vmem [thread:$0]  %s17287_s12, 16384, %s236_s10, [#allocation24], %s17176_s7, %s17176_s7, %s17177_s19  }
  0xb1   :  { %s16619_s30 = scalar_lea.hbm %s17297_s27, 8192 }
  0xb2   :  { %p16620_p0 = scmp.ne.s32.totalorder %s17297_s27, %s16619_s30  ;;  %p16623_p1 = scmp.lt.u32.totalorder %s16619_s30, %s17297_s27 }
  0xb4   :  { %p16625_p2 = pnand %p16623_p1, %p16620_p0 }
  0xb6   :  { %16628 = shalt.err (!%p16625_p2)
}
  0xb7   :  { %s16629_s23 = scalar_lea.vmem %s17414_s29, 8192  ;;  %p16634_p4 = scmp.lt.s32.totalorder %s17414_s29, %s17414_s29 }
  0xb8   :  { %p16630_p3 = scmp.ne.s32.totalorder %s17414_s29, %s16629_s23  ;;  %p16635_p5 = scmp.lt.s32.totalorder %s16629_s23, %s16629_s23 }
  0xba   :  { %p16636_p6 = por %p16635_p5, %p16634_p4 }
  0xbc   :  { %p16637_p7 = pnand %p16636_p6, %p16630_p3 }
  0xbe   :  { %16640 = shalt.err (!%p16637_p7)
}
  0xbf   :  { %s17180_s26 = smov 64   ;;  %s17181_s12 = smov 4  }
  0xc0   :  { %263 = dma.hbm_to_vmem [thread:$0]  %s17297_s27, 8192, %s17414_s29, [#allocation27], %s17180_s26, %s17180_s26, %s17181_s12  }
  0xc1   :  { %s17182_s9 = smov [#allocation29]   ;;  %s17183_s28 = smov [#allocation32]  }
  0xc2   :  { %s279_s8 = sshll.u32 %s17182_s9, 4  ;;  %s304_s1 = sshll.u32 %s17183_s28, 4  ;;  %s280_s8 = int_to_ptr.vmem [resolvable:$true] %s279_s8  ;;  %s305_s1 = int_to_ptr.vmem [resolvable:$true] %s304_s1 }
  0xc3   :  { %s16641_s2 = scalar_lea.hbm %s17307_s17, 1024 }
  0xc4   :  { %p16642_p8 = scmp.ne.s32.totalorder %s17307_s17, %s16641_s2  ;;  %p16645_p9 = scmp.lt.u32.totalorder %s16641_s2, %s17307_s17 }
  0xc6   :  { %p16647_p10 = pnand %p16645_p9, %p16642_p8 }
  0xc8   :  { %16650 = shalt.err (!%p16647_p10)
}
  0xc9   :  { %s16651_s0 = scalar_lea.vmem %s280_s8, 1024  ;;  %p16656_p12 = scmp.lt.s32.totalorder %s280_s8, %s280_s8 }
  0xca   :  { %p16652_p11 = scmp.ne.s32.totalorder %s280_s8, %s16651_s0  ;;  %p16657_p13 = scmp.lt.s32.totalorder %s16651_s0, %s16651_s0 }
  0xcc   :  { %p16658_p0 = por %p16657_p13, %p16656_p12 }
  0xce   :  { %p16659_p1 = pnand %p16658_p0, %p16652_p11 }
  0xd0   :  { %16662 = shalt.err (!%p16659_p1)
}
  0xd1   :  { %285 = dma.hbm_to_vmem [thread:$0]  %s17307_s17, 1024, %s280_s8, [#allocation30], %s17180_s26, %s17180_s26, %s17181_s12  }
  0xd2   :  { %s16663_s27 = scalar_lea.hbm %s17317_s6, 16 }
  0xd3   :  { %p16664_p2 = scmp.ne.s32.totalorder %s17317_s6, %s16663_s27  ;;  %p16667_p3 = scmp.lt.u32.totalorder %s16663_s27, %s17317_s6 }
  0xd5   :  { %p16669_p4 = pnand %p16667_p3, %p16664_p2 }
  0xd7   :  { %16672 = shalt.err (!%p16669_p4)
}
  0xd8   :  { %s16673_s21 = scalar_lea.vmem %s305_s1, 16  ;;  %s16677_s10 = scalar_lea.vmem %s305_s1, 32 }
  0xd9   :  { %p16674_p5 = scmp.ne.s32.totalorder %s305_s1, %s16673_s21  ;;  %p16678_p6 = scmp.lt.s32.totalorder %s305_s1, %s305_s1 }
  0xda   :  { %p16679_p7 = scmp.lt.s32.totalorder %s16677_s10, %s16673_s21 }
  0xdc   :  { %p16680_p8 = por %p16679_p7, %p16678_p6 }
  0xde   :  { %p16681_p9 = pnand %p16680_p8, %p16674_p5 }
  0xe0   :  { %16684 = shalt.err (!%p16681_p9)
}
  0xe1   :  { %307 = dma.hbm_to_vmem [thread:$0]  %s17317_s6, 16, %s305_s1, [#allocation33]  }
  0xe2   :  { %s17184_s11 = smov [#allocation35]   ;;  %s17185_s29 = smov [#allocation38]  }
  0xe3   :  { %s326_s17 = sshll.u32 %s17184_s11, 4  ;;  %s348_s15 = sshll.u32 %s17185_s29, 4  ;;  %s327_s17 = int_to_ptr.vmem [resolvable:$true] %s326_s17  ;;  %s349_s15 = int_to_ptr.vmem [resolvable:$true] %s348_s15 }
  0xe4   :  { %s16685_s16 = scalar_lea.hbm %s17327_s24, 16 }
  0xe5   :  { %p16686_p10 = scmp.ne.s32.totalorder %s17327_s24, %s16685_s16  ;;  %p16689_p11 = scmp.lt.u32.totalorder %s16685_s16, %s17327_s24 }
  0xe7   :  { %p16691_p12 = pnand %p16689_p11, %p16686_p10 }
  0xe9   :  { %16694 = shalt.err (!%p16691_p12)
}
  0xea   :  { %s16695_s30 = scalar_lea.vmem %s327_s17, 16  ;;  %s16699_s23 = scalar_lea.vmem %s327_s17, 32 }
  0xeb   :  { %p16696_p13 = scmp.ne.s32.totalorder %s327_s17, %s16695_s30  ;;  %p16700_p0 = scmp.lt.s32.totalorder %s327_s17, %s327_s17 }
  0xec   :  { %p16701_p1 = scmp.lt.s32.totalorder %s16699_s23, %s16695_s30 }
  0xee   :  { %p16702_p2 = por %p16701_p1, %p16700_p0 }
  0xf0   :  { %p16703_p3 = pnand %p16702_p2, %p16696_p13 }
  0xf2   :  { %16706 = shalt.err (!%p16703_p3)
}
  0xf3   :  { %329 = dma.hbm_to_vmem [thread:$0]  %s17327_s24, 16, %s327_s17, [#allocation36]  }
  0xf4   :  { %s16707_s6 = scalar_lea.hbm %s17337_s14, 128 }
  0xf5   :  { %p16708_p4 = scmp.ne.s32.totalorder %s17337_s14, %s16707_s6  ;;  %p16711_p5 = scmp.lt.u32.totalorder %s16707_s6, %s17337_s14 }
  0xf7   :  { %p16713_p6 = pnand %p16711_p5, %p16708_p4 }
  0xf9   :  { %16716 = shalt.err (!%p16713_p6)
}
  0xfa   :  { %s16717_s9 = scalar_lea.vmem %s349_s15, 128  ;;  %p16722_p8 = scmp.lt.s32.totalorder %s349_s15, %s349_s15 }
  0xfb   :  { %p16718_p7 = scmp.ne.s32.totalorder %s349_s15, %s16717_s9  ;;  %p16723_p9 = scmp.lt.s32.totalorder %s16717_s9, %s16717_s9 }
  0xfd   :  { %p16724_p10 = por %p16723_p9, %p16722_p8 }
  0xff   :  { %p16725_p11 = pnand %p16724_p10, %p16718_p7 }
 0x101   :  { %16728 = shalt.err (!%p16725_p11)
}
 0x102   :  { %351 = dma.hbm_to_vmem [thread:$0]  %s17337_s14, 128, %s349_s15, [#allocation39]  }
 0x103   :  { %s17186_s8 = smov [#allocation41]   ;;  %s17187_s24 = smov [#allocation2]  }
 0x104   :  { %s370_s28 = sshll.u32 %s17186_s8, 4  ;;  %s85_s1 = sshll.u32 %s17187_s24, 4  ;;  %s371_s28 = int_to_ptr.vmem [resolvable:$true] %s370_s28  ;;  %s17454_s1 = int_to_ptr.vmem [resolvable:$true] %s85_s1 }
 0x105   :  { %s16729_s2 = scalar_lea.hbm %s17347_s3, 64 }
 0x106   :  { %p16730_p12 = scmp.ne.s32.totalorder %s17347_s3, %s16729_s2  ;;  %p16733_p13 = scmp.lt.u32.totalorder %s16729_s2, %s17347_s3 }
 0x108   :  { %p16735_p0 = pnand %p16733_p13, %p16730_p12 }
 0x10a   :  { %16738 = shalt.err (!%p16735_p0)
}
 0x10b   :  { %s16739_s0 = scalar_lea.vmem %s371_s28, 64  ;;  %p16744_p2 = scmp.lt.s32.totalorder %s371_s28, %s371_s28 }
 0x10c   :  { %p16740_p1 = scmp.ne.s32.totalorder %s371_s28, %s16739_s0  ;;  %p16745_p3 = scmp.lt.s32.totalorder %s16739_s0, %s16739_s0 }
 0x10e   :  { %p16746_p4 = por %p16745_p3, %p16744_p2 }
 0x110   :  { %p16747_p5 = pnand %p16746_p4, %p16740_p1 }
 0x112   :  { %16750 = shalt.err (!%p16747_p5)
}
 0x113   :  { %373 = dma.hbm_to_vmem [thread:$0]  %s17347_s3, 64, %s371_s28, [#allocation42]  }
 0x114   :  { %s16751_s14 = scalar_lea.hbm %s17217_s5, 512 }
 0x115   :  { %p16752_p6 = scmp.ne.s32.totalorder %s17217_s5, %s16751_s14  ;;  %p16755_p7 = scmp.lt.u32.totalorder %s16751_s14, %s17217_s5 }
 0x117   :  { %p16757_p8 = pnand %p16755_p7, %p16752_p6 }
 0x119   :  { %16760 = shalt.err (!%p16757_p8)
}
 0x11a   :  { %s16761_s27 = scalar_lea.vmem %s17454_s1, 512  ;;  %p16766_p10 = scmp.lt.s32.totalorder %s17454_s1, %s17454_s1 }
 0x11b   :  { %p16762_p9 = scmp.ne.s32.totalorder %s17454_s1, %s16761_s27  ;;  %p16767_p11 = scmp.lt.s32.totalorder %s16761_s27, %s16761_s27 }
 0x11d   :  { %p16768_p12 = por %p16767_p11, %p16766_p10 }
 0x11f   :  { %p16769_p13 = pnand %p16768_p12, %p16762_p9 }
 0x121   :  { %16772 = shalt.err (!%p16769_p13)
}
 0x122   :  { %91 = dma.hbm_to_vmem [thread:$0]  %s17217_s5, 512, %s17454_s1, [#allocation3], %s17166_s18, %s17166_s18, %s17167_s22  }
 0x123   :  { %s17188_s3 = smov [#allocation7]   ;;  %s16773_s10 = scalar_lea.hbm %s17227_s13, 1024 }
 0x124   :  { %s109_s21 = sshll.u32 %s17188_s3, 4  ;;  %p16774_p0 = scmp.ne.s32.totalorder %s17227_s13, %s16773_s10  ;;  %s110_s21 = int_to_ptr.vmem [resolvable:$true] %s109_s21 }
 0x125   :  { %p16777_p1 = scmp.lt.u32.totalorder %s16773_s10, %s17227_s13 }
 0x127   :  { %p16779_p2 = pnand %p16777_p1, %p16774_p0 }
 0x129   :  { %16782 = shalt.err (!%p16779_p2)
}
 0x12a   :  { %s16783_s11 = scalar_lea.vmem %s110_s21, 1024  ;;  %p16788_p4 = scmp.lt.s32.totalorder %s110_s21, %s110_s21 }
 0x12b   :  { %p16784_p3 = scmp.ne.s32.totalorder %s110_s21, %s16783_s11  ;;  %p16789_p5 = scmp.lt.s32.totalorder %s16783_s11, %s16783_s11 }
 0x12d   :  { %p16790_p6 = por %p16789_p5, %p16788_p4 }
 0x12f   :  { %p16791_p7 = pnand %p16790_p6, %p16784_p3 }
 0x131   :  { %16794 = shalt.err (!%p16791_p7)
}
 0x132   :  { %s17189_s17 = smov 256   ;;  %s18453_s29 = sld [smem:[#allocation64_spill]] }
 0x133   :  { %s17190_s5 = smov 16   ;;  %s17191_s15 = smov [#allocation10]  }
 0x134   :  { %115 = dma.hbm_to_vmem [thread:$0]  %s17227_s13, 1024, %s110_s21, [#allocation6], %s17189_s17, %s17189_s17, %s17190_s5  }
 0x135   :  { %s136_s16 = sshll.u32 %s17191_s15, 4  ;;  %s17192_s30 = smov [#allocation13]   ;;  %s137_s16 = int_to_ptr.vmem [resolvable:$true] %s136_s16 }
 0x136   :  { %s158_s23 = sshll.u32 %s17192_s30, 4  ;;  %s159_s23 = int_to_ptr.vmem [resolvable:$true] %s158_s23 }
 0x138   :  { %s16795_s6 = scalar_lea.hbm %s18453_s29, 32 }
 0x139   :  { %p16796_p8 = scmp.ne.s32.totalorder %s18453_s29, %s16795_s6  ;;  %p16799_p9 = scmp.lt.u32.totalorder %s16795_s6, %s18453_s29 }
 0x13b   :  { %p16801_p10 = pnand %p16799_p9, %p16796_p8 }
 0x13d   :  { %16804 = shalt.err (!%p16801_p10)
}
 0x13e   :  { %s16805_s9 = scalar_lea.vmem %s137_s16, 32  ;;  %p16810_p12 = scmp.lt.s32.totalorder %s137_s16, %s137_s16 }
 0x13f   :  { %p16806_p11 = scmp.ne.s32.totalorder %s137_s16, %s16805_s9  ;;  %p16811_p13 = scmp.lt.s32.totalorder %s16805_s9, %s16805_s9 }
 0x141   :  { %p16812_p0 = por %p16811_p13, %p16810_p12 }
 0x143   :  { %p16813_p1 = pnand %p16812_p0, %p16806_p11 }
 0x145   :  { %16816 = shalt.err (!%p16813_p1)
}
 0x146   :  { %s18454_s8 = sld [smem:[#allocation65_spill]] }
 0x147   :  { %139 = dma.hbm_to_vmem [thread:$0]  %s18453_s29, 32, %s137_s16, [#allocation9]  }
 0x14c   :  { %s16817_s13 = scalar_lea.hbm %s18454_s8, 32 }
 0x14d   :  { %p16818_p2 = scmp.ne.s32.totalorder %s18454_s8, %s16817_s13  ;;  %p16821_p3 = scmp.lt.u32.totalorder %s16817_s13, %s18454_s8 }
 0x14f   :  { %p16823_p4 = pnand %p16821_p3, %p16818_p2 }
 0x151   :  { %16826 = shalt.err (!%p16823_p4)
}
 0x152   :  { %s16827_s28 = scalar_lea.vmem %s159_s23, 32  ;;  %p16832_p6 = scmp.lt.s32.totalorder %s159_s23, %s159_s23 }
 0x153   :  { %p16828_p5 = scmp.ne.s32.totalorder %s159_s23, %s16827_s28  ;;  %p16833_p7 = scmp.lt.s32.totalorder %s16827_s28, %s16827_s28 }
 0x155   :  { %p16834_p8 = por %p16833_p7, %p16832_p6 }
 0x157   :  { %p16835_p9 = pnand %p16834_p8, %p16828_p5 }
 0x159   :  { %16838 = shalt.err (!%p16835_p9)
}
 0x15a   :  { %s18455_s24 = sld [smem:[#allocation66_spill]]  ;;  %s17193_s1 = smov [#allocation16]  }
 0x15b   :  { %161 = dma.hbm_to_vmem [thread:$0]  %s18454_s8, 32, %s159_s23, [#allocation12]  }
 0x15c   :  { %s180_s2 = sshll.u32 %s17193_s1, 4  ;;  %s17194_s0 = smov [#allocation19]   ;;  %s181_s2 = int_to_ptr.vmem [resolvable:$true] %s180_s2 }
 0x15d   :  { %s202_s14 = sshll.u32 %s17194_s0, 4  ;;  %s203_s14 = int_to_ptr.vmem [resolvable:$true] %s202_s14 }
 0x160   :  { %s16839_s27 = scalar_lea.hbm %s18455_s24, 48 }
 0x161   :  { %p16840_p10 = scmp.ne.s32.totalorder %s18455_s24, %s16839_s27  ;;  %p16843_p11 = scmp.lt.u32.totalorder %s16839_s27, %s18455_s24 }
 0x163   :  { %p16845_p12 = pnand %p16843_p11, %p16840_p10 }
 0x165   :  { %16848 = shalt.err (!%p16845_p12)
}
 0x166   :  { %s16849_s3 = scalar_lea.vmem %s181_s2, 48  ;;  %s16853_s21 = scalar_lea.vmem %s181_s2, 64 }
 0x167   :  { %p16850_p13 = scmp.ne.s32.totalorder %s181_s2, %s16849_s3  ;;  %p16854_p0 = scmp.lt.s32.totalorder %s181_s2, %s181_s2 }
 0x168   :  { %p16855_p1 = scmp.lt.s32.totalorder %s16853_s21, %s16849_s3 }
 0x16a   :  { %p16856_p2 = por %p16855_p1, %p16854_p0 }
 0x16c   :  { %p16857_p3 = pnand %p16856_p2, %p16850_p13 }
 0x16e   :  { %16860 = shalt.err (!%p16857_p3)
}
 0x16f   :  { %s18456_s10 = sld [smem:[#allocation67_spill]] }
 0x170   :  { %183 = dma.hbm_to_vmem [thread:$0]  %s18455_s24, 48, %s181_s2, [#allocation15]  }
 0x175   :  { %s16861_s11 = scalar_lea.hbm %s18456_s10, 80 }
 0x176   :  { %p16862_p4 = scmp.ne.s32.totalorder %s18456_s10, %s16861_s11  ;;  %p16865_p5 = scmp.lt.u32.totalorder %s16861_s11, %s18456_s10 }
 0x178   :  { %p16867_p6 = pnand %p16865_p5, %p16862_p4 }
 0x17a   :  { %16870 = shalt.err (!%p16867_p6)
}
 0x17b   :  { %s16871_s29 = scalar_lea.vmem %s203_s14, 80  ;;  %s16875_s15 = scalar_lea.vmem %s203_s14, 96 }
 0x17c   :  { %p16872_p7 = scmp.ne.s32.totalorder %s203_s14, %s16871_s29  ;;  %p16876_p8 = scmp.lt.s32.totalorder %s203_s14, %s203_s14 }
 0x17d   :  { %p16877_p9 = scmp.lt.s32.totalorder %s16875_s15, %s16871_s29 }
 0x17f   :  { %p16878_p10 = por %p16877_p9, %p16876_p8 }
 0x181   :  { %p16879_p11 = pnand %p16878_p10, %p16872_p7 }
 0x183   :  { %16882 = shalt.err (!%p16879_p11)
}
 0x184   :  { %s18457_s16 = sld [smem:[#allocation68_spill]]  ;;  %s17195_s30 = smov [#allocation22]  }
 0x185   :  { %205 = dma.hbm_to_vmem [thread:$0]  %s18456_s10, 80, %s203_s14, [#allocation18]  }
 0x186   :  { %s223_s23 = sshll.u32 %s17195_s30, 4  ;;  %s17196_s6 = smov [#allocation25]   ;;  %s224_s23 = int_to_ptr.vmem [resolvable:$true] %s223_s23 }
 0x187   :  { %s248_s9 = sshll.u32 %s17196_s6, 4  ;;  %s249_s9 = int_to_ptr.vmem [resolvable:$true] %s248_s9 }
 0x18a   :  { %s16883_s8 = scalar_lea.hbm %s18457_s16, 24576 }
 0x18b   :  { %p16884_p12 = scmp.ne.s32.totalorder %s18457_s16, %s16883_s8  ;;  %p16887_p13 = scmp.lt.u32.totalorder %s16883_s8, %s18457_s16 }
 0x18d   :  { %p16889_p0 = pnand %p16887_p13, %p16884_p12 }
 0x18f   :  { %16892 = shalt.err (!%p16889_p0)
}
 0x190   :  { %s16893_s13 = scalar_lea.vmem %s224_s23, 24576  ;;  %p16898_p2 = scmp.lt.s32.totalorder %s224_s23, %s224_s23 }
 0x191   :  { %p16894_p1 = scmp.ne.s32.totalorder %s224_s23, %s16893_s13  ;;  %p16899_p3 = scmp.lt.s32.totalorder %s16893_s13, %s16893_s13 }
 0x193   :  { %p16900_p4 = por %p16899_p3, %p16898_p2 }
 0x195   :  { %p16901_p5 = pnand %p16900_p4, %p16894_p1 }
 0x197   :  { %16904 = shalt.err (!%p16901_p5)
}
 0x198   :  { %s18458_s28 = sld [smem:[#allocation69_spill]] }
 0x199   :  { %229 = dma.hbm_to_vmem [thread:$0]  %s18457_s16, 24576, %s224_s23, [#allocation21], %s17176_s7, %s17176_s7, %s17177_s19  }
 0x19e   :  { %s16905_s24 = scalar_lea.hbm %s18458_s28, 128 }
 0x19f   :  { %p16906_p6 = scmp.ne.s32.totalorder %s18458_s28, %s16905_s24  ;;  %p16909_p7 = scmp.lt.u32.totalorder %s16905_s24, %s18458_s28 }
 0x1a1   :  { %p16911_p8 = pnand %p16909_p7, %p16906_p6 }
 0x1a3   :  { %16914 = shalt.err (!%p16911_p8)
}
 0x1a4   :  { %s16915_s1 = scalar_lea.vmem %s249_s9, 128  ;;  %p16920_p10 = scmp.lt.s32.totalorder %s249_s9, %s249_s9 }
 0x1a5   :  { %p16916_p9 = scmp.ne.s32.totalorder %s249_s9, %s16915_s1  ;;  %p16921_p11 = scmp.lt.s32.totalorder %s16915_s1, %s16915_s1 }
 0x1a7   :  { %p16922_p12 = por %p16921_p11, %p16920_p10 }
 0x1a9   :  { %p16923_p13 = pnand %p16922_p12, %p16916_p9 }
 0x1ab   :  { %16926 = shalt.err (!%p16923_p13)
}
 0x1ac   :  { %s18459_s2 = sld [smem:[#allocation70_spill]]  ;;  %s17197_s0 = smov [#allocation28]  }
 0x1ad   :  { %251 = dma.hbm_to_vmem [thread:$0]  %s18458_s28, 128, %s249_s9, [#allocation24]  }
 0x1ae   :  { %s270_s14 = sshll.u32 %s17197_s0, 4  ;;  %s17198_s27 = smov [#allocation31]   ;;  %s271_s14 = int_to_ptr.vmem [resolvable:$true] %s270_s14 }
 0x1af   :  { %s291_s3 = sshll.u32 %s17198_s27, 4  ;;  %s292_s3 = int_to_ptr.vmem [resolvable:$true] %s291_s3 }
 0x1b2   :  { %s16927_s21 = scalar_lea.hbm %s18459_s2, 16 }
 0x1b3   :  { %p16928_p0 = scmp.ne.s32.totalorder %s18459_s2, %s16927_s21  ;;  %p16931_p1 = scmp.lt.u32.totalorder %s16927_s21, %s18459_s2 }
 0x1b5   :  { %p16933_p2 = pnand %p16931_p1, %p16928_p0 }
 0x1b7   :  { %16936 = shalt.err (!%p16933_p2)
}
 0x1b8   :  { %s16937_s10 = scalar_lea.vmem %s271_s14, 16  ;;  %s16941_s11 = scalar_lea.vmem %s271_s14, 32 }
 0x1b9   :  { %p16938_p3 = scmp.ne.s32.totalorder %s271_s14, %s16937_s10  ;;  %p16942_p4 = scmp.lt.s32.totalorder %s271_s14, %s271_s14 }
 0x1ba   :  { %p16943_p5 = scmp.lt.s32.totalorder %s16941_s11, %s16937_s10 }
 0x1bc   :  { %p16944_p6 = por %p16943_p5, %p16942_p4 }
 0x1be   :  { %p16945_p7 = pnand %p16944_p6, %p16938_p3 }
 0x1c0   :  { %16948 = shalt.err (!%p16945_p7)
}
 0x1c1   :  { %s18460_s29 = sld [smem:[#allocation71_spill]] }
 0x1c2   :  { %273 = dma.hbm_to_vmem [thread:$0]  %s18459_s2, 16, %s271_s14, [#allocation27]  }
 0x1c7   :  { %s16949_s15 = scalar_lea.hbm %s18460_s29, 3072 }
 0x1c8   :  { %p16950_p8 = scmp.ne.s32.totalorder %s18460_s29, %s16949_s15  ;;  %p16953_p9 = scmp.lt.u32.totalorder %s16949_s15, %s18460_s29 }
 0x1ca   :  { %p16955_p10 = pnand %p16953_p9, %p16950_p8 }
 0x1cc   :  { %16958 = shalt.err (!%p16955_p10)
}
 0x1cd   :  { %s16959_s16 = scalar_lea.vmem %s292_s3, 3072  ;;  %p16964_p12 = scmp.lt.s32.totalorder %s292_s3, %s292_s3 }
 0x1ce   :  { %p16960_p11 = scmp.ne.s32.totalorder %s292_s3, %s16959_s16  ;;  %p16965_p13 = scmp.lt.s32.totalorder %s16959_s16, %s16959_s16 }
 0x1d0   :  { %p16966_p0 = por %p16965_p13, %p16964_p12 }
 0x1d2   :  { %p16967_p1 = pnand %p16966_p0, %p16960_p11 }
 0x1d4   :  { %16970 = shalt.err (!%p16967_p1)
}
 0x1d5   :  { %s18461_s30 = sld [smem:[#allocation72_spill]]  ;;  %s17199_s23 = smov [#allocation34]  }
 0x1d6   :  { %297 = dma.hbm_to_vmem [thread:$0]  %s18460_s29, 3072, %s292_s3, [#allocation30], %s17180_s26, %s17180_s26, %s17181_s12  }
 0x1d7   :  { %s313_s6 = sshll.u32 %s17199_s23, 4  ;;  %s17200_s9 = smov [#allocation37]   ;;  %s314_s6 = int_to_ptr.vmem [resolvable:$true] %s313_s6 }
 0x1d8   :  { %s335_s8 = sshll.u32 %s17200_s9, 4  ;;  %s336_s8 = int_to_ptr.vmem [resolvable:$true] %s335_s8 }
 0x1db   :  { %s16971_s13 = scalar_lea.hbm %s18461_s30, 1024 }
 0x1dc   :  { %p16972_p2 = scmp.ne.s32.totalorder %s18461_s30, %s16971_s13  ;;  %p16975_p3 = scmp.lt.u32.totalorder %s16971_s13, %s18461_s30 }
 0x1de   :  { %p16977_p4 = pnand %p16975_p3, %p16972_p2 }
 0x1e0   :  { %16980 = shalt.err (!%p16977_p4)
}
 0x1e1   :  { %s16981_s28 = scalar_lea.vmem %s314_s6, 1024  ;;  %p16986_p6 = scmp.lt.s32.totalorder %s314_s6, %s314_s6 }
 0x1e2   :  { %p16982_p5 = scmp.ne.s32.totalorder %s314_s6, %s16981_s28  ;;  %p16987_p7 = scmp.lt.s32.totalorder %s16981_s28, %s16981_s28 }
 0x1e4   :  { %p16988_p8 = por %p16987_p7, %p16986_p6 }
 0x1e6   :  { %p16989_p9 = pnand %p16988_p8, %p16982_p5 }
 0x1e8   :  { %16992 = shalt.err (!%p16989_p9)
}
 0x1e9   :  { %s18462_s24 = sld [smem:[#allocation73_spill]] }
 0x1ea   :  { %319 = dma.hbm_to_vmem [thread:$0]  %s18461_s30, 1024, %s314_s6, [#allocation33], %s17180_s26, %s17180_s26, %s17181_s12  }
 0x1ef   :  { %s16993_s1 = scalar_lea.hbm %s18462_s24, 16384 }
 0x1f0   :  { %p16994_p10 = scmp.ne.s32.totalorder %s18462_s24, %s16993_s1  ;;  %p16997_p11 = scmp.lt.u32.totalorder %s16993_s1, %s18462_s24 }
 0x1f2   :  { %p16999_p12 = pnand %p16997_p11, %p16994_p10 }
 0x1f4   :  { %17002 = shalt.err (!%p16999_p12)
}
 0x1f5   :  { %s17003_s2 = scalar_lea.vmem %s336_s8, 16384  ;;  %p17008_p0 = scmp.lt.s32.totalorder %s336_s8, %s336_s8 }
 0x1f6   :  { %p17004_p13 = scmp.ne.s32.totalorder %s336_s8, %s17003_s2  ;;  %p17009_p1 = scmp.lt.s32.totalorder %s17003_s2, %s17003_s2 }
 0x1f8   :  { %p17010_p2 = por %p17009_p1, %p17008_p0 }
 0x1fa   :  { %p17011_p3 = pnand %p17010_p2, %p17004_p13 }
 0x1fc   :  { %17014 = shalt.err (!%p17011_p3)
}
 0x1fd   :  { %s18463_s0 = sld [smem:[#allocation74_spill]]  ;;  %s17201_s26 = smov [#allocation40]  }
 0x1fe   :  { %341 = dma.hbm_to_vmem [thread:$0]  %s18462_s24, 16384, %s336_s8, [#allocation36], %s17176_s7, %s17176_s7, %s17177_s19  }
 0x1ff   :  { %s357_s12 = sshll.u32 %s17201_s26, 4  ;;  %s17202_s14 = smov [#allocation43]   ;;  %s358_s12 = int_to_ptr.vmem [resolvable:$true] %s357_s12 }
 0x200   :  { %s379_s27 = sshll.u32 %s17202_s14, 4  ;;  %s380_s27 = int_to_ptr.vmem [resolvable:$true] %s379_s27 }
 0x203   :  { %s17015_s3 = scalar_lea.hbm %s18463_s0, 32768 }
 0x204   :  { %p17016_p4 = scmp.ne.s32.totalorder %s18463_s0, %s17015_s3  ;;  %p17019_p5 = scmp.lt.u32.totalorder %s17015_s3, %s18463_s0 }
 0x206   :  { %p17021_p6 = pnand %p17019_p5, %p17016_p4 }
 0x208   :  { %17024 = shalt.err (!%p17021_p6)
}
 0x209   :  { %s17025_s21 = scalar_lea.vmem %s358_s12, 32768  ;;  %p17030_p8 = scmp.lt.s32.totalorder %s358_s12, %s358_s12 }
 0x20a   :  { %p17026_p7 = scmp.ne.s32.totalorder %s358_s12, %s17025_s21  ;;  %p17031_p9 = scmp.lt.s32.totalorder %s17025_s21, %s17025_s21 }
 0x20c   :  { %p17032_p10 = por %p17031_p9, %p17030_p8 }
 0x20e   :  { %p17033_p11 = pnand %p17032_p10, %p17026_p7 }
 0x210   :  { %17036 = shalt.err (!%p17033_p11)
}
 0x211   :  { %363 = dma.hbm_to_vmem [thread:$0]  %s18463_s0, 32768, %s358_s12, [#allocation39], %s17189_s17, %s17189_s17, %s17190_s5  }
 0x212   :  { %s17037_s7 = scalar_lea.hbm %s17352_s20, 8192 }
 0x213   :  { %p17038_p12 = scmp.ne.s32.totalorder %s17352_s20, %s17037_s7  ;;  %p17041_p13 = scmp.lt.u32.totalorder %s17037_s7, %s17352_s20 }
 0x215   :  { %p17043_p0 = pnand %p17041_p13, %p17038_p12 }
 0x217   :  { %17046 = shalt.err (!%p17043_p0)
}
 0x218   :  { %s17047_s19 = scalar_lea.vmem %s380_s27, 8192  ;;  %p17052_p2 = scmp.lt.s32.totalorder %s380_s27, %s380_s27 }
 0x219   :  { %p17048_p1 = scmp.ne.s32.totalorder %s380_s27, %s17047_s19  ;;  %p17053_p3 = scmp.lt.s32.totalorder %s17047_s19, %s17047_s19 }
 0x21b   :  { %p17054_p4 = por %p17053_p3, %p17052_p2 }
 0x21d   :  { %p17055_p5 = pnand %p17054_p4, %p17048_p1 }
 0x21f   :  { %17058 = shalt.err (!%p17055_p5)
}
 0x220   :  { %385 = dma.hbm_to_vmem [thread:$0]  %s17352_s20, 8192, %s380_s27, [#allocation42], %s17166_s18, %s17166_s18, %s17167_s22  }
 0x221   :  { %s17203_s17 = smov [#allocation44]   ;;  %s17059_s10 = scalar_lea.hbm %s17357_s25, 16 }
 0x222   :  { %s392_s5 = sshll.u32 %s17203_s17, 4  ;;  %p17060_p6 = scmp.ne.s32.totalorder %s17357_s25, %s17059_s10  ;;  %s393_s5 = int_to_ptr.vmem [resolvable:$true] %s392_s5 }
 0x223   :  { %p17063_p7 = scmp.lt.u32.totalorder %s17059_s10, %s17357_s25 }
 0x225   :  { %p17065_p8 = pnand %p17063_p7, %p17060_p6 }
 0x227   :  { %17068 = shalt.err (!%p17065_p8)
}
 0x228   :  { %s17069_s11 = scalar_lea.vmem %s393_s5, 16  ;;  %s17073_s29 = scalar_lea.vmem %s393_s5, 32 }
 0x229   :  { %p17070_p9 = scmp.ne.s32.totalorder %s393_s5, %s17069_s11  ;;  %p17074_p10 = scmp.lt.s32.totalorder %s393_s5, %s393_s5 }
 0x22a   :  { %p17075_p11 = scmp.lt.s32.totalorder %s17073_s29, %s17069_s11 }
 0x22c   :  { %p17076_p12 = por %p17075_p11, %p17074_p10 }
 0x22e   :  { %p17077_p13 = pnand %p17076_p12, %p17070_p9 }
 0x230   :  { %17080 = shalt.err (!%p17077_p13)
}
 0x231   :  { %395 = dma.hbm_to_vmem [thread:$0]  %s17357_s25, 16, %s393_s5, [#allocation45]  }
 0x232   :  { %17103 = dma.done.wait [#allocation3], 512  }
 0x233   :  { %17104 = vsyncadd [#allocation3], 4294966784 }
 0x234   :  { %17105 = dma.done.wait [#allocation6], 1536  }
 0x235   :  { %17106 = vsyncadd [#allocation6], 4294965760 }
 0x236   :  { %17107 = dma.done.wait [#allocation9], 2080  }
 0x237   :  { %17108 = vsyncadd [#allocation9], 4294965216 }
 0x238   :  { %17109 = dma.done.wait [#allocation12], 4128  }
 0x239   :  { %17110 = vsyncadd [#allocation12], 4294963168 }
 0x23a   :  { %17111 = dma.done.wait [#allocation15], 6192  }
 0x23b   :  { %17112 = vsyncadd [#allocation15], 4294961104 }
 0x23c   :  { %17113 = dma.done.wait [#allocation18], 15440  }
 0x23d   :  { %17114 = vsyncadd [#allocation18], 4294951856 }
 0x23e   :  { %17115 = dma.done.wait [#allocation21], 65536  }
 0x23f   :  { %17116 = vsyncadd [#allocation21], 4294901760 }
 0x240   :  { %17117 = dma.done.wait [#allocation24], 16512  }
 0x241   :  { %17118 = vsyncadd [#allocation24], 4294950784 }
 0x242   :  { %17119 = dma.done.wait [#allocation27], 8208  }
 0x243   :  { %17120 = vsyncadd [#allocation27], 4294959088 }
 0x244   :  { %17121 = dma.done.wait [#allocation30], 4096  }
 0x245   :  { %17122 = vsyncadd [#allocation30], 4294963200 }
 0x246   :  { %17123 = dma.done.wait [#allocation33], 1040  }
 0x247   :  { %17124 = vsyncadd [#allocation33], 4294966256 }
 0x248   :  { %17125 = dma.done.wait [#allocation36], 16400  }
 0x249   :  { %17126 = vsyncadd [#allocation36], 4294950896 }
 0x24a   :  { %17127 = dma.done.wait [#allocation39], 32896  }
 0x24b   :  { %17128 = vsyncadd [#allocation39], 4294934400 }
 0x24c   :  { %17129 = dma.done.wait [#allocation42], 8256  }
 0x24d   :  { %17130 = vsyncadd [#allocation42], 4294959040 }
 0x24e   :  { %17131 = dma.done.wait [#allocation45], 16  }
 0x24f   :  { %17132 = vsyncadd [#allocation45], 4294967280  ;;  %v485_v0 = vlaneseq  ;;  %v17204_v1 = vmov 0   ;;  %v17205_v4 = vmov 0.0   ;;  %v481_v6 = vld [vmem:[#allocation2] sm:$0xff]  ;;  %v17561_v7 = vld [vmem:[#allocation2 + $0x8] sm:$0xff] }
 0x250   :  { %909 = vmatprep.mubr.bf16.mxu0 %v17204_v1  ;;  %15566 = vset.pattern.permute.xlu1 %v17204_v1  ;;  %v17563_v8 = vld [vmem:[#allocation2 + $0x10] sm:$0xff]  ;;  %vm506_vm1 = vcmask 261120   ;;  %v504_v9 = vpack.c.bf16 %v17561_v7, %v481_v6  ;;  %v17566_v10 = vld [vmem:[#allocation2 + $0x18] sm:$0xff]  ;;  %v15567_v13 = vld [vmem:[#allocation8 + $0x4] ss:$8 sps:$4 sm:$0xff]   ;;  %vm4185_vm13 = vcmask 1041409  }
 0x251   :  { %v17551_v2 = vshrl.u32 %v485_v0, 7  ;;  %v17553_v3 = vand.u32 127, %v485_v0  ;;  %15565 = vset.pattern.permute.xlu0 %v17204_v1  ;;  %v505_v12 = vpack.c.bf16 %v17566_v10, %v17563_v8  ;;  %v15569_v14 = vld [vmem:[#allocation8] ss:$8 sps:$4 sm:$0xff]   ;;  %v15570_v15 = vld [vmem:[#allocation8 + $0x14] ss:$8 sps:$4 sm:$0xff]   ;;  %877 = vmatprep.subr.bf16.mxu0 %v15567_v13 }
 0x252   :  { %15239 = vmatprep.subr.bf16.mxu1 %v504_v9  ;;  %15243 = vmatprep.mubr.msk.bf16.mxu1 %vm506_vm1, %v504_v9  ;;  %v15572_v17 = vld [vmem:[#allocation8 + $0x10] ss:$8 sps:$4 sm:$0xff]   ;;  %v15573_v18 = vld [vmem:[#allocation8 + $0x24] ss:$8 sps:$4 sm:$0xff]   ;;  %v15575_v19 = vld [vmem:[#allocation8 + $0x20] ss:$8 sps:$4 sm:$0xff]  }
 0x253   :  { %vm492_vm0 = vcmp.eq.s32.totalorder %v17551_v2, %v17553_v3  ;;  %15240 = vmatpush3.bf16.msra.mxu1 %v504_v9  ;;  %878 = vmatpush1.bf16.msra.mxu0 %v15569_v14  ;;  %v15576_v20 = vld [vmem:[#allocation8 + $0x34] ss:$8 sps:$4 sm:$0xff]   ;;  %v15578_v21 = vld [vmem:[#allocation8 + $0x30] ss:$8 sps:$4 sm:$0xff]   ;;  %v15579_v22 = vld [vmem:[#allocation8 + $0x44] ss:$8 sps:$4 sm:$0xff]  }
 0x254   :  { %v17559_v5 = vsel %vm492_vm0, 1.0, %v17205_v4  ;;  %15241 = vmatprep.subr.bf16.mxu1 %v505_v12  ;;  %879 = vmatprep.subr.bf16.mxu0 %v15570_v15  ;;  %v15581_v23 = vld [vmem:[#allocation8 + $0x40] ss:$8 sps:$4 sm:$0xff]   ;;  %v15582_v24 = vld [vmem:[#allocation8 + $0x54] ss:$8 sps:$4 sm:$0xff]   ;;  %v488_v36 = vadd.s32 16, %v17551_v2 }
 0x255   :  { %v17569_v11 = vmax.f32 %v481_v6, %v17559_v5  ;;  %v15584_v25 = vld [vmem:[#allocation8 + $0x50] ss:$8 sps:$4 sm:$0xff]   ;;  %v15585_v26 = vld [vmem:[#allocation8 + $0x64] ss:$8 sps:$4 sm:$0xff]   ;;  %v15587_v27 = vld [vmem:[#allocation8 + $0x60] ss:$8 sps:$4 sm:$0xff]  }
 0x256   :  { %v15588_v28 = vld [vmem:[#allocation8 + $0x74] ss:$8 sps:$4 sm:$0xff]   ;;  %v15590_v29 = vld [vmem:[#allocation8 + $0x70] ss:$8 sps:$4 sm:$0xff]   ;;  %v763_v30 = vld [vmem:[#allocation5] sm:$0xff]  ;;  %vm494_vm2 = vcmp.eq.s32.totalorder %v488_v36, %v17553_v3  ;;  %v487_v37 = vadd.s32 8, %v17551_v2 }
 0x257   :  { %v17576_v16 = vsel %vm506_vm1, %v17569_v11, 0.0  ;;  %15242 = vmatpush3.bf16.msra.mxu1 %v505_v12  ;;  %880 = vmatpush1.bf16.msra.mxu0 %v15572_v17  ;;  %v764_v31 = vld [vmem:[#allocation5 + $0x8] sm:$0xff]  ;;  %v765_v33 = vld [vmem:[#allocation5 + $0x10] sm:$0xff]  ;;  %v766_v34 = vld [vmem:[#allocation5 + $0x18] sm:$0xff]  ;;  %v17586_v38 = vsel %vm494_vm2, 1.0, %v17205_v4  ;;  %v489_v40 = vadd.s32 24, %v17551_v2 }
 0x258   :  { %648 = vadd.xlane.f32.xlu0 %v17576_v16  ;;  %15247 = vmatprep.subr.bf16.mxu1 %v504_v9  ;;  %v767_v32 = vpack.c.bf16 %v764_v31, %v763_v30  ;;  %v768_v35 = vpack.c.bf16 %v766_v34, %v765_v33  ;;  %v17590_v39 = vmax.f32 %v17563_v8, %v17586_v38  ;;  %v15593_v49 = vld [vmem:[#allocation11 + $0x4] ss:$8 sps:$4 sm:$0xff]   ;;  %v15591_v60 = vld [vmem:[#allocation11] ss:$8 sps:$4 sm:$0xff]   ;;  %v15596_v63 = vld [vmem:[#allocation11 + $0x14] ss:$8 sps:$4 sm:$0xff]  }
 0x259   :  { %881 = vmatprep.subr.bf16.mxu0 %v15573_v18  ;;  %vm493_vm3 = vcmp.eq.s32.totalorder %v487_v37, %v17553_v3  ;;  %vm495_vm4 = vcmp.eq.s32.totalorder %v489_v40, %v17553_v3  ;;  %v15599_v14 = vld [vmem:[#allocation11 + $0x24] ss:$8 sps:$4 sm:$0xff]   ;;  %v15597_v18 = vld [vmem:[#allocation11 + $0x20] ss:$8 sps:$4 sm:$0xff]   ;;  %v15606_v30 = vld [vmem:[#allocation11 + $0x50] ss:$8 sps:$4 sm:$0xff]  }
 0x25a   :  { %15244 = vmatmul.mubr.msk.bf16.vlgmr.msra.gmra.mrb[0].mxu1 %vm506_vm1, %v505_v12  ;;  %v17595_v41 = vsel %vm493_vm3, 1.0, %v17205_v4  ;;  %v653_v42 = vsel %vm506_vm1, %v17590_v39, 0.0  ;;  %v17605_v44 = vsel %vm495_vm4, 1.0, %v17205_v4  ;;  %v15611_v31 = vld [vmem:[#allocation11 + $0x64] ss:$8 sps:$4 sm:$0xff]   ;;  %s18464_s25 = sld [smem:[#allocation63_spill]] }
 0x25b   :  { %15248 = vmatpush3.bf16.msra.mxu1 %v504_v9  ;;  %882 = vmatpush1.bf16.msra.mxu0 %v15575_v19  ;;  %v17601_v43 = vmax.f32 %v17561_v7, %v17595_v41  ;;  %v17611_v46 = vmax.f32 %v17566_v10, %v17605_v44  ;;  %v15594_v10 = vld [vmem:[#allocation11 + $0x10] ss:$8 sps:$4 sm:$0xff]   ;;  %v15609_v37 = vld [vmem:[#allocation11 + $0x60] ss:$8 sps:$4 sm:$0xff]   ;;  %s17208_s20 = smov [#allocation46]  }
 0x25c   :  { %15249 = vmatprep.subr.bf16.mxu1 %v505_v12  ;;  %883 = vmatprep.subr.bf16.mxu0 %v15576_v20  ;;  %v15602_v20 = vld [vmem:[#allocation11 + $0x34] ss:$8 sps:$4 sm:$0xff]   ;;  %s13394_s18 = sshll.u32 %s17208_s20, 4  ;;  %s13395_s18 = int_to_ptr.vmem [resolvable:$true] %s13394_s18 }
 0x25d   :  { %654 = vadd.xlane.f32.xlu1 %v653_v42  ;;  %v650_v45 = vsel %vm506_vm1, %v17601_v43, 0.0  ;;  %v656_v47 = vsel %vm506_vm1, %v17611_v46, 0.0  ;;  %s17081_s22 = scalar_lea.vmem %s13395_s18, 32  ;;  %p17086_p1 = scmp.lt.s32.totalorder %s13395_s18, %s13395_s18 }
 0x25e   :  { %651 = vadd.xlane.f32.xlu0 %v650_v45  ;;  %v663_v48 = vadd.f32 %v650_v45, %v17576_v16  ;;  %v15614_v45 = vld [vmem:[#allocation11 + $0x74] ss:$8 sps:$4 sm:$0xff]   ;;  %p17082_p0 = scmp.ne.s32.totalorder %s13395_s18, %s17081_s22  ;;  %p17087_p2 = scmp.lt.s32.totalorder %s17081_s22, %s17081_s22 }
 0x25f   :  { %15250 = vmatpush3.bf16.msra.mxu1 %v505_v12  ;;  %884 = vmatpush1.bf16.msra.mxu0 %v15578_v21  ;;  %v15600_v21 = vld [vmem:[#allocation11 + $0x30] ss:$8 sps:$4 sm:$0xff]  }
 0x260   :  { %885 = vmatprep.subr.bf16.mxu0 %v15579_v22  ;;  %v664_v50 = vadd.f32 %v663_v48, %v653_v42  ;;  %1150 = vmatprep.subr.bf16.mxu1 %v15593_v49  ;;  %v15605_v22 = vld [vmem:[#allocation11 + $0x44] ss:$8 sps:$4 sm:$0xff]   ;;  %v15612_v48 = vld [vmem:[#allocation11 + $0x70] ss:$8 sps:$4 sm:$0xff]   ;;  %p17088_p3 = por %p17087_p2, %p17086_p1 }
 0x261   :  { %657 = vadd.xlane.f32.xlu1 %v656_v47  ;;  %v15617_v49 = vld [vmem:[#allocation11 + $0x84] ss:$8 sps:$4 sm:$0xff]  }
 0x262   :  { %v17616_v51 = vadd.f32 %v664_v50, %v656_v47  ;;  %p17089_p4 = pnand %p17088_p3, %p17082_p0 }
 0x263   :  { %886 = vmatpush1.bf16.msra.mxu0 %v15581_v23  ;;  %v785_v23 = vld [vmem:[#allocation10] sm:$0x3] }
 0x264   :  { %887 = vmatprep.subr.bf16.mxu0 %v15582_v24  ;;  %v17647_v24 = vsub.s32 0, %v17551_v2 }
 0x267   :  { %888 = vmatpush1.bf16.msra.mxu0 %v15584_v25  ;;  %v17650_v25 = vsub.s32 1, %v17551_v2 }
 0x268   :  { %889 = vmatprep.subr.bf16.mxu0 %v15585_v26  ;;  %v15603_v26 = vld [vmem:[#allocation11 + $0x40] ss:$8 sps:$4 sm:$0xff]  }
 0x26b   :  { %890 = vmatpush1.bf16.msra.mxu0 %v15587_v27  ;;  %v15608_v27 = vld [vmem:[#allocation11 + $0x54] ss:$8 sps:$4 sm:$0xff]  }
 0x26c   :  { %891 = vmatprep.subr.bf16.mxu0 %v15588_v28  ;;  %v790_v28 = vrot.slane %v785_v23, %v17647_v24 }
 0x26f   :  { %892 = vmatpush1.bf16.msra.mxu0 %v15590_v29  ;;  %v794_v29 = vrot.slane %v785_v23, %v17650_v25 }
 0x272   :  { %910 = vmatmul.mubr.bf16.vlgmr.msra.gmra.mrb[0].mxu0 %v767_v32 }
 0x273   :  { %919 = vmatprep.mubr.bf16.mxu0 %v17204_v1 }
 0x27a   :  { %920 = vmatmul.mubr.bf16.gmra.mrb[4].mxu0 %v768_v35 }
 0x27b   :  { %1257 = vmatprep.mubr.bf16.mxu0 %v17204_v1 }
 0x32d   :  { %v15245_v52 = vpop.f32.mrb[0].mxu1 }
 0x32e   :  { %vm564_vm5 = vcmp.gt.f32.partialorder %v15245_v52, 0.0  ;;  %v547_v53 = vpop.f32.mrb[1].mxu1 }
 0x32f   :  { %v13454_v54 = vsel %vm564_vm5, 1.0, %v17205_v4  ;;  %vm562_vm6 = vcmp.gt.f32.partialorder %v547_v53, 0.0  ;;  %v15246_v55 = vpop.f32.mrb[2].mxu1 }
 0x330   :  { %v13452_v56 = vsel %vm562_vm6, 1.0, %v17205_v4  ;;  %vm565_vm7 = vcmp.gt.f32.partialorder %v15246_v55, 0.0  ;;  %v550_v57 = vpop.f32.mrb[3].mxu1  ;;  %v17631_v8 = vmax.f32 %v13454_v54, %v17586_v38 }
 0x331   :  { %v13455_v58 = vsel %vm565_vm7, 1.0, %v17205_v4  ;;  %vm563_vm8 = vcmp.gt.f32.partialorder %v550_v57, 0.0  ;;  %v17622_v59 = vmax.f32 %v13452_v56, %v17559_v5  ;;  %v939_v57 = vld [vmem:[#allocation7 + $0x8] sm:$0xff] }
 0x332   :  { %v575_v61 = vpack.c.bf16 %v13455_v58, %v13454_v54  ;;  %v13453_v62 = vsel %vm563_vm8, 1.0, %v17205_v4  ;;  %v17637_v12 = vmax.f32 %v13455_v58, %v17605_v44  ;;  %v693_v15 = vsel %vm506_vm1, %v17631_v8, 0.0  ;;  %v938_v54 = vld [vmem:[#allocation7] sm:$0xff] }
 0x333   :  { %v574_v0 = vpack.c.bf16 %v13453_v62, %v13452_v56  ;;  %v687_v6 = vsel %vm506_vm1, %v17622_v59, 0.0  ;;  %v17628_v7 = vmax.f32 %v13453_v62, %v17595_v41  ;;  %v15615_v58 = vld [vmem:[#allocation11 + $0x80] ss:$8 sps:$4 sm:$0xff]   ;;  %v940_v62 = vld [vmem:[#allocation7 + $0x10] sm:$0xff] }
 0x334   :  { %688 = vadd.xlane.f32.xlu0 %v687_v6  ;;  %v696_v17 = vsel %vm506_vm1, %v17637_v12, 0.0 }
 0x335   :  { %15251 = vmatprep.mubr.msk.bf16.mxu1 %vm506_vm1, %v574_v0  ;;  %v690_v9 = vsel %vm506_vm1, %v17628_v7, 0.0 }
 0x336   :  { %691 = vadd.xlane.f32.xlu1 %v690_v9  ;;  %v703_v13 = vadd.f32 %v690_v9, %v687_v6  ;;  %15252 = vmatmul.mubr.msk.bf16.vlgmr.msra.gmra.mrb[4].mxu1 %vm506_vm1, %v575_v61  ;;  %v941_v6 = vld [vmem:[#allocation7 + $0x18] sm:$0xff] }
 0x337   :  { %1151 = vmatpush1.bf16.msra.mxu1 %v15591_v60 }
 0x338   :  { %694 = vadd.xlane.f32.xlu0 %v693_v15  ;;  %v704_v16 = vadd.f32 %v703_v13, %v693_v15  ;;  %1152 = vmatprep.subr.bf16.mxu1 %v15596_v63  ;;  %v15620_v63 = vld [vmem:[#allocation11 + $0x94] ss:$8 sps:$4 sm:$0xff]  }
 0x33a   :  { %697 = vadd.xlane.f32.xlu1 %v696_v17  ;;  %v17644_v19 = vadd.f32 %v704_v16, %v696_v17 }
 0x33b   :  { %1153 = vmatpush1.bf16.msra.mxu1 %v15594_v10 }
 0x33c   :  { %1154 = vmatprep.subr.bf16.mxu1 %v15599_v14 }
 0x33f   :  { %1155 = vmatpush1.bf16.msra.mxu1 %v15597_v18  ;;  %v15618_v18 = vld [vmem:[#allocation11 + $0x90] ss:$8 sps:$4 sm:$0xff]  }
 0x340   :  { %1156 = vmatprep.subr.bf16.mxu1 %v15602_v20 }
 0x343   :  { %1157 = vmatpush1.bf16.msra.mxu1 %v15600_v21  ;;  %v15623_v21 = vld [vmem:[#allocation11 + $0xa4] ss:$8 sps:$4 sm:$0xff]  }
 0x344   :  { %1158 = vmatprep.subr.bf16.mxu1 %v15605_v22 }
 0x345   :  { %v911_v32 = vpop.f32.mrb[0].mxu0 }
 0x346   :  { %v912_v33 = vadd.f32 %v911_v32, %v790_v28  ;;  %v913_v34 = vpop.f32.mrb[1].mxu0  ;;  %v15626_v32 = vld [vmem:[#allocation11 + $0xb4] ss:$8 sps:$4 sm:$0xff]  }
 0x347   :  { %1159 = vmatpush1.bf16.msra.mxu1 %v15603_v26  ;;  %v914_v35 = vadd.f32 %v913_v34, %v794_v29  ;;  %v915_v36 = vpop.f32.mrb[2].mxu0  ;;  %v942_v26 = vld [vmem:[#allocation7 + $0x20] sm:$0xff] }
 0x348   :  { %1160 = vmatprep.subr.bf16.mxu1 %v15608_v27  ;;  %16359 = vtanh.f32 %v912_v33  ;;  %v916_v40 = vadd.f32 %v915_v36, %v790_v28  ;;  %v917_v42 = vpop.f32.mrb[3].mxu0  ;;  %v943_v27 = vld [vmem:[#allocation7 + $0x28] sm:$0xff]  ;;  %v945_v33 = vld [vmem:[#allocation7 + $0x38] sm:$0xff] }
 0x349   :  { %16361 = vtanh.f32 %v914_v35  ;;  %v918_v47 = vadd.f32 %v917_v42, %v794_v29  ;;  %v15624_v42 = vld [vmem:[#allocation11 + $0xb0] ss:$8 sps:$4 sm:$0xff]  }
 0x34a   :  { %16363 = vtanh.f32 %v916_v40 }
 0x34b   :  { %1161 = vmatpush1.bf16.msra.mxu1 %v15606_v30  ;;  %16365 = vtanh.f32 %v918_v47  ;;  %v944_v30 = vld [vmem:[#allocation7 + $0x30] sm:$0xff] }
 0x34c   :  { %1162 = vmatprep.subr.bf16.mxu1 %v15611_v31  ;;  %v15629_v47 = vld [vmem:[#allocation11 + $0xc4] ss:$8 sps:$4 sm:$0xff]  }
 0x34d   :  { %v921_v50 = vpop.f32.mrb[4].mxu0 }
 0x34e   :  { %v922_v52 = vadd.f32 %v921_v50, %v790_v28  ;;  %v923_v53 = vpop.f32.mrb[5].mxu0  ;;  %v15627_v50 = vld [vmem:[#allocation11 + $0xc0] ss:$8 sps:$4 sm:$0xff]  }
 0x34f   :  { %1163 = vmatpush1.bf16.msra.mxu1 %v15609_v37  ;;  %v924_v55 = vadd.f32 %v923_v53, %v794_v29  ;;  %v925_v56 = vpop.f32.mrb[6].mxu0  ;;  %v15630_v53 = vld [vmem:[#allocation11 + $0xd0] ss:$8 sps:$4 sm:$0xff]  }
 0x350   :  { %1164 = vmatprep.subr.bf16.mxu1 %v15614_v45  ;;  %16367 = vtanh.f32 %v922_v52  ;;  %v926_v60 = vadd.f32 %v925_v56, %v790_v28  ;;  %v927_v61 = vpop.f32.mrb[7].mxu0  ;;  %v15632_v52 = vld [vmem:[#allocation11 + $0xd4] ss:$8 sps:$4 sm:$0xff]  }
 0x351   :  { %16369 = vtanh.f32 %v924_v55  ;;  %v928_v0 = vadd.f32 %v927_v61, %v794_v29  ;;  %v15621_v29 = vld [vmem:[#allocation11 + $0xa0] ss:$8 sps:$4 sm:$0xff]   ;;  %v15638_v56 = vld [vmem:[#allocation11 + $0xf4] ss:$8 sps:$4 sm:$0xff]  }
 0x352   :  { %v16360_v9 = vpop.eup %16359  ;;  %16371 = vtanh.f32 %v926_v60  ;;  %v15633_v55 = vld [vmem:[#allocation11 + $0xe0] ss:$8 sps:$4 sm:$0xff]  }
 0x353   :  { %1165 = vmatpush1.bf16.msra.mxu1 %v15612_v48  ;;  %v16362_v10 = vpop.eup %16361  ;;  %16373 = vtanh.f32 %v928_v0  ;;  %v946_v13 = vadd.f32 %v16360_v9, %v938_v54  ;;  %v15635_v54 = vld [vmem:[#allocation11 + $0xe4] ss:$8 sps:$4 sm:$0xff]  }
 0x354   :  { %1166 = vmatprep.subr.bf16.mxu1 %v15617_v49  ;;  %v16364_v14 = vpop.eup %16363  ;;  %v947_v15 = vadd.f32 %v16362_v10, %v939_v57  ;;  %v15636_v57 = vld [vmem:[#allocation11 + $0xf0] ss:$8 sps:$4 sm:$0xff]  }
 0x355   :  { %v16366_v16 = vpop.eup %16365  ;;  %v948_v17 = vadd.f32 %v16364_v14, %v940_v62 }
 0x356   :  { %v949_v20 = vadd.f32 %v16366_v16, %v941_v6 }
 0x357   :  { %1167 = vmatpush1.bf16.msra.mxu1 %v15615_v58  ;;  %v954_v22 = vpack.c.bf16 %v948_v17, %v946_v13 }
 0x358   :  { %1168 = vmatprep.subr.bf16.mxu1 %v15620_v63  ;;  %v955_v23 = vpack.c.bf16 %v949_v20, %v947_v15 }
 0x35a   :  { %v16368_v28 = vpop.eup %16367  ;;  %1182 = vmatprep.mubr.bf16.mxu1 %v955_v23  ;;  %v15667_v23 = vld [vmem:[#allocation14 + $0x8] ss:$12 sps:$4 sm:$0xff]  }
 0x35b   :  { %1169 = vmatpush1.bf16.msra.mxu1 %v15618_v18  ;;  %v16370_v31 = vpop.eup %16369  ;;  %v950_v34 = vadd.f32 %v16368_v28, %v942_v26  ;;  %v15671_v26 = vld [vmem:[#allocation14 + $0xe0] ss:$12 sps:$4 sm:$0xff]   ;;  %v15676_v28 = vld [vmem:[#allocation14 + $0xf8] ss:$12 sps:$4 sm:$0xff]  }
 0x35c   :  { %1170 = vmatprep.subr.bf16.mxu1 %v15623_v21  ;;  %v16372_v35 = vpop.eup %16371  ;;  %v951_v36 = vadd.f32 %v16370_v31, %v943_v27  ;;  %v666_v21 = vrot.slane %v17616_v51, 4  ;;  %v15672_v27 = vld [vmem:[#allocation14 + $0x20] ss:$12 sps:$4 sm:$0xff]   ;;  %v15681_v31 = vld [vmem:[#allocation14 + $0x110] ss:$12 sps:$4 sm:$0xff]  }
 0x35d   :  { %v16374_v37 = vpop.eup %16373  ;;  %v952_v40 = vadd.f32 %v16372_v35, %v944_v30  ;;  %v15677_v30 = vld [vmem:[#allocation14 + $0x38] ss:$12 sps:$4 sm:$0xff]   ;;  %v15686_v35 = vld [vmem:[#allocation14 + $0x128] ss:$12 sps:$4 sm:$0xff]  }
 0x35e   :  { %v953_v45 = vadd.f32 %v16374_v37, %v945_v33  ;;  %v649_v33 = vpop.xlane.xlu0 %648 }
 0x35f   :  { %1171 = vmatpush1.bf16.msra.mxu1 %v15621_v29  ;;  %v956_v48 = vpack.c.bf16 %v952_v40, %v950_v34  ;;  %v15682_v34 = vld [vmem:[#allocation14 + $0x50] ss:$12 sps:$4 sm:$0xff]   ;;  %16375 = vrsqrt.f32 %v649_v33  ;;  %v15691_v40 = vld [vmem:[#allocation14 + $0x140] ss:$12 sps:$4 sm:$0xff]   ;;  %v15654_v33 = vld [vmem:[#allocation14 + $0x78] ss:$12 sps:$4 sm:$0xff]  }
 0x360   :  { %1172 = vmatprep.subr.bf16.mxu1 %v15626_v32  ;;  %v957_v49 = vpack.c.bf16 %v953_v45, %v951_v36  ;;  %v655_v45 = vpop.xlane.xlu1 %654 }
 0x362   :  { %v652_v37 = vpop.xlane.xlu0 %651 }
 0x363   :  { %1173 = vmatpush1.bf16.msra.mxu1 %v15624_v42  ;;  %16377 = vrsqrt.f32 %v652_v37  ;;  %v15665_v37 = vld [vmem:[#allocation14 + $0xc4] ss:$12 sps:$4 sm:$0xff]  }
 0x364   :  { %1174 = vmatprep.subr.bf16.mxu1 %v15629_v47 }
 0x367   :  { %1175 = vmatpush1.bf16.msra.mxu1 %v15627_v50 }
 0x368   :  { %1176 = vmatprep.subr.bf16.mxu1 %v15632_v52 }
 0x36b   :  { %1177 = vmatpush1.bf16.msra.mxu1 %v15630_v53 }
 0x36c   :  { %1178 = vmatprep.subr.bf16.mxu1 %v15635_v54  ;;  %v16376_v54 = vpop.eup %16375 }
 0x36f   :  { %1179 = vmatpush1.bf16.msra.mxu1 %v15633_v55 }
 0x370   :  { %1180 = vmatprep.subr.bf16.mxu1 %v15638_v56  ;;  %v16378_v56 = vpop.eup %16377 }
 0x373   :  { %1181 = vmatpush1.bf16.msra.mxu1 %v15636_v57  ;;  %v673_v57 = vmul.f32 %v16376_v54, %v17569_v11  ;;  %v15639_v11 = vld [vmem:[#allocation14] ss:$12 sps:$4 sm:$0xff]  }
 0x374   :  { %v15683_v54 = vld [vmem:[#allocation14 + $0x120] ss:$12 sps:$4 sm:$0xff]  }
 0x376   :  { %1183 = vmatmul.mubr.bf16.vlgmr.msra.gmra.mrb[8].mxu1 %v954_v22  ;;  %v15666_v22 = vld [vmem:[#allocation14 + $0xc8] ss:$12 sps:$4 sm:$0xff]  }
 0x377   :  { %1192 = vmatprep.mubr.bf16.mxu1 %v957_v49  ;;  %14870 = vmatprep.subr.bf16.mxu1 %v15666_v22  ;;  %v658_v49 = vpop.xlane.xlu1 %657  ;;  %v15644_v22 = vld [vmem:[#allocation14 + $0x1c] ss:$12 sps:$4 sm:$0xff]  }
 0x378   :  { %14871 = vmatpush3.bf16.msra.mxu1 %v15667_v23  ;;  %v15642_v23 = vld [vmem:[#allocation14 + $0x18] ss:$12 sps:$4 sm:$0xff]  }
 0x379   :  { %14872 = vmatprep.subr.bf16.mxu1 %v15671_v26 }
 0x37c   :  { %14873 = vmatpush3.bf16.msra.mxu1 %v15672_v27  ;;  %v15647_v27 = vld [vmem:[#allocation14 + $0x34] ss:$12 sps:$4 sm:$0xff]  }
 0x37d   :  { %14874 = vmatprep.subr.bf16.mxu1 %v15676_v28  ;;  %v15645_v28 = vld [vmem:[#allocation14 + $0x30] ss:$12 sps:$4 sm:$0xff]  }
 0x37e   :  { %1193 = vmatmul.mubr.bf16.gmra.mrb[12].mxu1 %v956_v48 }
 0x380   :  { %14875 = vmatpush3.bf16.msra.mxu1 %v15677_v30  ;;  %v15653_v30 = vld [vmem:[#allocation14 + $0x64] ss:$12 sps:$4 sm:$0xff]  }
 0x381   :  { %14876 = vmatprep.subr.bf16.mxu1 %v15681_v31  ;;  %v15651_v31 = vld [vmem:[#allocation14 + $0x60] ss:$12 sps:$4 sm:$0xff]  }
 0x384   :  { %14877 = vmatpush3.bf16.msra.mxu1 %v15682_v34  ;;  %v15659_v34 = vld [vmem:[#allocation14 + $0x94] ss:$12 sps:$4 sm:$0xff]  }
 0x385   :  { %14878 = vmatprep.subr.bf16.mxu1 %v15686_v35  ;;  %v15657_v35 = vld [vmem:[#allocation14 + $0x90] ss:$12 sps:$4 sm:$0xff]  }
 0x409   :  { %v15253_v58 = vpop.f32.mrb[4].mxu1 }
 0x40a   :  { %vm633_vm9 = vcmp.gt.f32.partialorder %v15253_v58, 0.0  ;;  %v616_v60 = vpop.f32.mrb[5].mxu1  ;;  %v674_v58 = vmul.f32 %v16378_v56, %v17601_v43  ;;  %v15690_v56 = vld [vmem:[#allocation14 + $0x13c] ss:$12 sps:$4 sm:$0xff]  }
 0x40b   :  { %vm631_vm10 = vcmp.gt.f32.partialorder %v616_v60, 0.0  ;;  %v15254_v61 = vpop.f32.mrb[6].mxu1  ;;  %v13460_v62 = vsel %vm633_vm9, 1.0, %v17205_v4 }
 0x40c   :  { %v13458_v63 = vsel %vm631_vm10, 1.0, %v17205_v4  ;;  %vm634_vm11 = vcmp.gt.f32.partialorder %v15254_v61, 0.0  ;;  %v619_v0 = vpop.f32.mrb[7].mxu1  ;;  %v17667_v15 = vmax.f32 %v13460_v62, %v17586_v38 }
 0x40d   :  { %vm632_vm12 = vcmp.gt.f32.partialorder %v619_v0, 0.0  ;;  %v17657_v6 = vmax.f32 %v13458_v63, %v17559_v5  ;;  %v13461_v9 = vsel %vm634_vm11, 1.0, %v17205_v4 }
 0x40e   :  { %v13459_v10 = vsel %vm632_vm12, 1.0, %v17205_v4  ;;  %v17672_v5 = vmax.f32 %v13461_v9, %v17605_v44  ;;  %v733_v18 = vsel %vm506_vm1, %v17667_v15, 0.0  ;;  %v667_v44 = vadd.f32 %v666_v21, %v17616_v51  ;;  %v15687_v51 = vld [vmem:[#allocation14 + $0x68] ss:$12 sps:$4 sm:$0xff]  }
 0x40f   :  { %v727_v13 = vsel %vm506_vm1, %v17657_v6, 0.0  ;;  %v17664_v14 = vmax.f32 %v13459_v10, %v17595_v41  ;;  %14879 = vmatpush3.bf16.msra.mxu1 %v15687_v51  ;;  %v15660_v51 = vld [vmem:[#allocation14 + $0xa8] ss:$12 sps:$4 sm:$0xff]  }
 0x410   :  { %728 = vadd.xlane.f32.xlu0 %v727_v13  ;;  %v736_v41 = vsel %vm506_vm1, %v17672_v5, 0.0  ;;  %v668_v29 = vrot.slane %v667_v44, 2  ;;  %14880 = vmatprep.subr.bf16.mxu1 %v15691_v40  ;;  %v15663_v40 = vld [vmem:[#allocation14 + $0xc0] ss:$12 sps:$4 sm:$0xff]  }
 0x411   :  { %v730_v16 = vsel %vm506_vm1, %v17664_v14, 0.0 }
 0x412   :  { %731 = vadd.xlane.f32.xlu1 %v730_v16  ;;  %v743_v17 = vadd.f32 %v730_v16, %v727_v13  ;;  %v669_v32 = vadd.f32 %v668_v29, %v667_v44  ;;  %v15650_v29 = vld [vmem:[#allocation14 + $0x4c] ss:$12 sps:$4 sm:$0xff]  }
 0x414   :  { %734 = vadd.xlane.f32.xlu0 %v733_v18  ;;  %v744_v20 = vadd.f32 %v743_v17, %v733_v18  ;;  %v670_v36 = vrot.slane %v669_v32, 1  ;;  %v15641_v18 = vld [vmem:[#allocation14 + $0x4] ss:$12 sps:$4 sm:$0xff]  }
 0x416   :  { %737 = vadd.xlane.f32.xlu1 %v736_v41  ;;  %v17678_v38 = vadd.f32 %v744_v20, %v736_v41  ;;  %v671_v42 = vadd.f32 %v670_v36, %v669_v32  ;;  %v15656_v32 = vld [vmem:[#allocation14 + $0x7c] ss:$12 sps:$4 sm:$0xff]   ;;  %v15662_v36 = vld [vmem:[#allocation14 + $0xac] ss:$12 sps:$4 sm:$0xff]  }
 0x418   :  { %16379 = vrsqrt.f32 %v671_v42  ;;  %v15670_v42 = vld [vmem:[#allocation14 + $0xdc] ss:$12 sps:$4 sm:$0xff]  }
 0x419   :  { %16381 = vrsqrt.f32 %v655_v45  ;;  %v15668_v45 = vld [vmem:[#allocation14 + $0xd8] ss:$12 sps:$4 sm:$0xff]  }
 0x41a   :  { %16383 = vrsqrt.f32 %v658_v49  ;;  %v15680_v49 = vld [vmem:[#allocation14 + $0x10c] ss:$12 sps:$4 sm:$0xff]  }
 0x422   :  { %v16380_v61 = vpop.eup %16379 }
 0x423   :  { %v16382_v10 = vpop.eup %16381  ;;  %v677_v13 = vmul.f32 %v16380_v61, %v673_v57  ;;  %v678_v16 = vmul.f32 %v16380_v61, %v674_v58  ;;  %v15688_v57 = vld [vmem:[#allocation14 + $0x138] ss:$12 sps:$4 sm:$0xff]   ;;  %v15692_v58 = vld [vmem:[#allocation14 + $0x80] ss:$12 sps:$4 sm:$0xff]  }
 0x424   :  { %v16384_v20 = vpop.eup %16383  ;;  %v675_v43 = vmul.f32 %v16382_v10, %v17590_v39  ;;  %14881 = vmatpush3.bf16.msra.mxu1 %v15692_v58  ;;  %v15701_v10 = vld [vmem:[#allocation14 + $0x170] ss:$12 sps:$4 sm:$0xff]  }
 0x425   :  { %v17697_v41 = vpack.c.bf16 %v678_v16, %v677_v13  ;;  %v676_v21 = vmul.f32 %v16384_v20, %v17611_v46  ;;  %v15648_v46 = vld [vmem:[#allocation14 + $0x48] ss:$12 sps:$4 sm:$0xff]   ;;  %v15702_v16 = vld [vmem:[#allocation14 + $0xb0] ss:$12 sps:$4 sm:$0xff]  }
 0x426   :  { %v679_v44 = vmul.f32 %v16380_v61, %v675_v43  ;;  %v15698_v13 = vld [vmem:[#allocation14 + $0x168] ss:$12 sps:$4 sm:$0xff]  }
 0x427   :  { %v680_v26 = vmul.f32 %v16380_v61, %v676_v21  ;;  %v15696_v61 = vld [vmem:[#allocation14 + $0x158] ss:$12 sps:$4 sm:$0xff]  }
 0x428   :  { %14882 = vmatprep.subr.bf16.mxu1 %v15696_v61 }
 0x429   :  { %v17703_v39 = vpack.c.bf16 %v680_v26, %v679_v44 }
 0x449   :  { %v1184_v47 = vpop.f32.mrb[8].mxu1 }
 0x44a   :  { %v1186_v48 = vpop.f32.mrb[9].mxu1 }
 0x44b   :  { %v1188_v50 = vpop.f32.mrb[10].mxu1 }
 0x44c   :  { %v17682_v52 = vpack.c.bf16 %v1188_v50, %v1184_v47  ;;  %v1190_v53 = vpop.f32.mrb[11].mxu1  ;;  %v15675_v47 = vld [vmem:[#allocation14 + $0xf4] ss:$12 sps:$4 sm:$0xff]  }
 0x44d   :  { %v17684_v55 = vpack.c.bf16 %v1190_v53, %v1186_v48  ;;  %v15673_v48 = vld [vmem:[#allocation14 + $0xf0] ss:$12 sps:$4 sm:$0xff]   ;;  %v15678_v50 = vld [vmem:[#allocation14 + $0x108] ss:$12 sps:$4 sm:$0xff]  }
 0x44e   :  { %v15685_v53 = vld [vmem:[#allocation14 + $0x124] ss:$12 sps:$4 sm:$0xff]  }
 0x44f   :  { %1225 = vmatprep.subr.bf16.mxu0 %v17684_v55 }
 0x450   :  { %1226 = vmatpush1.bf16.msra.mxu0 %v17682_v52 }
 0x451   :  { %v1194_v60 = vpop.f32.mrb[12].mxu1 }
 0x452   :  { %v1196_v62 = vpop.f32.mrb[13].mxu1 }
 0x453   :  { %v1198_v63 = vpop.f32.mrb[14].mxu1 }
 0x454   :  { %v17690_v0 = vpack.c.bf16 %v1198_v63, %v1194_v60  ;;  %v1200_v9 = vpop.f32.mrb[15].mxu1  ;;  %v15695_v60 = vld [vmem:[#allocation14 + $0x154] ss:$12 sps:$4 sm:$0xff]   ;;  %v15697_v63 = vld [vmem:[#allocation14 + $0x98] ss:$12 sps:$4 sm:$0xff]  }
 0x455   :  { %v17692_v17 = vpack.c.bf16 %v1200_v9, %v1196_v62  ;;  %v15693_v62 = vld [vmem:[#allocation14 + $0x150] ss:$12 sps:$4 sm:$0xff]   ;;  %14883 = vmatpush3.bf16.msra.mxu1 %v15697_v63  ;;  %v15700_v9 = vld [vmem:[#allocation14 + $0x16c] ss:$12 sps:$4 sm:$0xff]  }
 0x456   :  { %14884 = vmatprep.subr.bf16.mxu1 %v15701_v10 }
 0x457   :  { %1227 = vmatprep.subr.bf16.mxu0 %v17692_v17 }
 0x458   :  { %1228 = vmatpush1.bf16.msra.mxu0 %v17690_v0 }
 0x459   :  { %1610 = vmatprep.subr.bf16.mxu0 %v15641_v18  ;;  %14885 = vmatpush3.bf16.msra.mxu1 %v15702_v16  ;;  %v1207_v18 = vld [vmem:[#allocation13] sm:$0x3] }
 0x45a   :  { %v17708_v20 = vrot.slane %v1207_v18, %v17647_v24 }
 0x45b   :  { %13510 = vmatmul.mubr.msk.bf16.vlgmr.msra.gmra.mrb[8].mxu0 %vm506_vm1, %v17697_v41 }
 0x45c   :  { %1267 = vmatprep.mubr.bf16.mxu0 %v17204_v1  ;;  %1611 = vmatpush1.bf16.msra.mxu0 %v15639_v11  ;;  %v17711_v11 = vrot.slane %v1207_v18, %v17650_v25 }
 0x45d   :  { %1612 = vmatprep.subr.bf16.mxu0 %v15644_v22 }
 0x460   :  { %1613 = vmatpush1.bf16.msra.mxu0 %v15642_v23 }
 0x461   :  { %1614 = vmatprep.subr.bf16.mxu0 %v15647_v27 }
 0x463   :  { %13511 = vmatmul.mubr.msk.bf16.gmra.mrb[12].mxu0 %vm506_vm1, %v17703_v39 }
 0x464   :  { %1615 = vmatpush1.bf16.msra.mxu0 %v15645_v28 }
 0x465   :  { %1616 = vmatprep.subr.bf16.mxu0 %v15650_v29 }
 0x468   :  { %1617 = vmatpush1.bf16.msra.mxu0 %v15648_v46 }
 0x469   :  { %1618 = vmatprep.subr.bf16.mxu0 %v15653_v30 }
 0x46c   :  { %1619 = vmatpush1.bf16.msra.mxu0 %v15651_v31 }
 0x46d   :  { %1620 = vmatprep.subr.bf16.mxu0 %v15656_v32 }
 0x470   :  { %1621 = vmatpush1.bf16.msra.mxu0 %v15654_v33 }
 0x471   :  { %1622 = vmatprep.subr.bf16.mxu0 %v15659_v34 }
 0x474   :  { %1623 = vmatpush1.bf16.msra.mxu0 %v15657_v35 }
 0x475   :  { %1624 = vmatprep.subr.bf16.mxu0 %v15662_v36 }
 0x478   :  { %1625 = vmatpush1.bf16.msra.mxu0 %v15660_v51 }
 0x479   :  { %1626 = vmatprep.subr.bf16.mxu0 %v15665_v37 }
 0x47c   :  { %1627 = vmatpush1.bf16.msra.mxu0 %v15663_v40 }
 0x47d   :  { %1628 = vmatprep.subr.bf16.mxu0 %v15670_v42 }
 0x480   :  { %1629 = vmatpush1.bf16.msra.mxu0 %v15668_v45 }
 0x481   :  { %1630 = vmatprep.subr.bf16.mxu0 %v15675_v47 }
 0x484   :  { %1631 = vmatpush1.bf16.msra.mxu0 %v15673_v48 }
 0x485   :  { %1632 = vmatprep.subr.bf16.mxu0 %v15680_v49 }
 0x488   :  { %1633 = vmatpush1.bf16.msra.mxu0 %v15678_v50 }
 0x489   :  { %1634 = vmatprep.subr.bf16.mxu0 %v15685_v53 }
 0x48c   :  { %1635 = vmatpush1.bf16.msra.mxu0 %v15683_v54 }
 0x48d   :  { %1636 = vmatprep.subr.bf16.mxu0 %v15690_v56 }
 0x490   :  { %1637 = vmatpush1.bf16.msra.mxu0 %v15688_v57 }
 0x491   :  { %1638 = vmatprep.subr.bf16.mxu0 %v15695_v60 }
 0x494   :  { %1639 = vmatpush1.bf16.msra.mxu0 %v15693_v62 }
 0x495   :  { %1640 = vmatprep.subr.bf16.mxu0 %v15700_v9 }
 0x498   :  { %1641 = vmatpush1.bf16.msra.mxu0 %v15698_v13 }
 0x52e   :  { %v1259_v43 = vpop.f32.mrb[8].mxu0 }
 0x52f   :  { %v1260_v21 = vadd.f32 %v1259_v43, %v17708_v20  ;;  %v1261_v22 = vpop.f32.mrb[9].mxu0 }
 0x530   :  { %v1262_v23 = vadd.f32 %v1261_v22, %v17711_v11  ;;  %v1263_v44 = vpop.f32.mrb[10].mxu0 }
 0x531   :  { %v1264_v26 = vadd.f32 %v1263_v44, %v17708_v20  ;;  %v1265_v27 = vpop.f32.mrb[11].mxu0  ;;  %v1278_v29 = vmax.f32 %v1260_v21, 0.0 }
 0x532   :  { %v1266_v28 = vadd.f32 %v1265_v27, %v17711_v11  ;;  %v1279_v30 = vmax.f32 %v1262_v23, 0.0 }
 0x533   :  { %v1280_v46 = vmax.f32 %v1264_v26, 0.0 }
 0x534   :  { %v1281_v31 = vmax.f32 %v1266_v28, 0.0 }
 0x535   :  { %v1286_v32 = vpack.c.bf16 %v1280_v46, %v1278_v29 }
 0x536   :  { %v1287_v33 = vpack.c.bf16 %v1281_v31, %v1279_v30  ;;  %v1269_v34 = vpop.f32.mrb[12].mxu0 }
 0x537   :  { %v1270_v35 = vadd.f32 %v1269_v34, %v17708_v20  ;;  %v1271_v36 = vpop.f32.mrb[13].mxu0 }
 0x538   :  { %v1272_v51 = vadd.f32 %v1271_v36, %v17711_v11  ;;  %v1273_v37 = vpop.f32.mrb[14].mxu0  ;;  %1642 = vmatprep.mubr.bf16.mxu0 %v1287_v33  ;;  %1695 = vmatprep.mubr.bf16.mxu1 %v1287_v33  ;;  %v15705_v33 = vld [vmem:[#allocation17 + $0x4] ss:$20 sps:$4 sm:$0xff]   ;;  %v15703_v36 = vld [vmem:[#allocation17] ss:$20 sps:$4 sm:$0xff]  }
 0x539   :  { %v1274_v40 = vadd.f32 %v1273_v37, %v17708_v20  ;;  %v1275_v42 = vpop.f32.mrb[15].mxu0  ;;  %1643 = vmatmul.mubr.bf16.vlgmr.msra.gmra.mrb[16].mxu0 %v1286_v32  ;;  %1696 = vmatmul.mubr.bf16.vlgmr.msra.gmra.mrb[16].mxu1 %v1286_v32  ;;  %v1282_v47 = vmax.f32 %v1270_v35, 0.0  ;;  %v15708_v35 = vld [vmem:[#allocation17 + $0xc] ss:$20 sps:$4 sm:$0xff]   ;;  %v15706_v37 = vld [vmem:[#allocation17 + $0x8] ss:$20 sps:$4 sm:$0xff]  }
 0x53a   :  { %v1276_v45 = vadd.f32 %v1275_v42, %v17711_v11  ;;  %v1283_v49 = vmax.f32 %v1272_v51, 0.0  ;;  %v15711_v51 = vld [vmem:[#allocation17 + $0x2c] ss:$20 sps:$4 sm:$0xff]   ;;  %v15709_v42 = vld [vmem:[#allocation17 + $0x28] ss:$20 sps:$4 sm:$0xff]  }
 0x53b   :  { %v1284_v48 = vmax.f32 %v1274_v40, 0.0  ;;  %v15714_v40 = vld [vmem:[#allocation17 + $0x34] ss:$20 sps:$4 sm:$0xff]  }
 0x53c   :  { %v1285_v50 = vmax.f32 %v1276_v45, 0.0  ;;  %v15717_v45 = vld [vmem:[#allocation17 + $0x54] ss:$20 sps:$4 sm:$0xff]  }
 0x53d   :  { %v1288_v53 = vpack.c.bf16 %v1284_v48, %v1282_v47  ;;  %v15712_v47 = vld [vmem:[#allocation17 + $0x30] ss:$20 sps:$4 sm:$0xff]  }
 0x53e   :  { %v1289_v54 = vpack.c.bf16 %v1285_v50, %v1283_v49  ;;  %v15720_v48 = vld [vmem:[#allocation17 + $0x5c] ss:$20 sps:$4 sm:$0xff]  }
 0x53f   :  { %v15715_v49 = vld [vmem:[#allocation17 + $0x50] ss:$20 sps:$4 sm:$0xff]  }
 0x540   :  { %1652 = vmatprep.mubr.bf16.mxu0 %v1289_v54  ;;  %1703 = vmatprep.mubr.bf16.mxu1 %v1289_v54  ;;  %v15723_v50 = vld [vmem:[#allocation17 + $0x7c] ss:$20 sps:$4 sm:$0xff]   ;;  %v15726_v54 = vld [vmem:[#allocation17 + $0x84] ss:$20 sps:$4 sm:$0xff]  }
 0x541   :  { %1653 = vmatmul.mubr.bf16.gmra.mrb[20].mxu0 %v1288_v53  ;;  %1704 = vmatmul.mubr.bf16.gmra.mrb[20].mxu1 %v1288_v53  ;;  %v15718_v53 = vld [vmem:[#allocation17 + $0x58] ss:$20 sps:$4 sm:$0xff]  }
 0x542   :  { %15259 = vmatprep.mubr.msk.bf16.mxu0 %vm506_vm1, %v17697_v41  ;;  %1767 = vmatprep.mubr.bf16.mxu1 %v17204_v1 }
 0x60c   :  { %v1644_v56 = vpop.f32.mrb[16].mxu0  ;;  %v14886_v57 = vpop.f32.mrb[16].mxu1 }
 0x60d   :  { %v1646_v58 = vpop.f32.mrb[17].mxu0  ;;  %v14887_v60 = vpop.f32.mrb[17].mxu1 }
 0x60e   :  { %v14888_v61 = vadd.f32 %v14887_v60, %v14886_v57  ;;  %v1648_v62 = vpop.f32.mrb[18].mxu0  ;;  %v14889_v63 = vpop.f32.mrb[18].mxu1  ;;  %v15729_v57 = vld [vmem:[#allocation17 + $0xa4] ss:$20 sps:$4 sm:$0xff]   ;;  %v15732_v60 = vld [vmem:[#allocation17 + $0xac] ss:$20 sps:$4 sm:$0xff]  }
 0x60f   :  { %v1712_v9 = vpack.c.bf16 %v1648_v62, %v1644_v56  ;;  %v1650_v10 = vpop.f32.mrb[19].mxu0  ;;  %v14890_v13 = vpop.f32.mrb[19].mxu1  ;;  %v15721_v56 = vld [vmem:[#allocation17 + $0x78] ss:$20 sps:$4 sm:$0xff]  }
 0x610   :  { %v1713_v16 = vpack.c.bf16 %v1650_v10, %v1646_v58  ;;  %v14891_v18 = vadd.f32 %v14890_v13, %v14889_v63  ;;  %v15724_v58 = vld [vmem:[#allocation17 + $0x80] ss:$20 sps:$4 sm:$0xff]   ;;  %v15730_v63 = vld [vmem:[#allocation17 + $0xa8] ss:$20 sps:$4 sm:$0xff]  }
 0x611   :  { %v15735_v62 = vld [vmem:[#allocation17 + $0xcc] ss:$20 sps:$4 sm:$0xff]   ;;  %v15733_v10 = vld [vmem:[#allocation17 + $0xc8] ss:$20 sps:$4 sm:$0xff]  }
 0x612   :  { %v1714_v43 = vpack.c.bf16 %v14891_v18, %v14888_v61  ;;  %1735 = vmatprep.subr.bf16.mxu1 %v1713_v16  ;;  %v15727_v61 = vld [vmem:[#allocation17 + $0xa0] ss:$20 sps:$4 sm:$0xff]   ;;  %v15736_v16 = vld [vmem:[#allocation17 + $0xd0] ss:$20 sps:$4 sm:$0xff]  }
 0x613   :  { %1736 = vmatpush1.bf16.msra.mxu1 %v1712_v9  ;;  %v15738_v9 = vld [vmem:[#allocation17 + $0xd4] ss:$20 sps:$4 sm:$0xff]   ;;  %v15744_v18 = vld [vmem:[#allocation17 + $0xfc] ss:$20 sps:$4 sm:$0xff]  }
 0x614   :  { %v1654_v21 = vpop.f32.mrb[20].mxu0  ;;  %v14892_v22 = vpop.f32.mrb[20].mxu1  ;;  %15255 = vmatprep.subr.bf16.mxu0 %v1714_v43  ;;  %v15741_v13 = vld [vmem:[#allocation17 + $0xf4] ss:$20 sps:$4 sm:$0xff]  }
 0x615   :  { %v1656_v23 = vpop.f32.mrb[21].mxu0  ;;  %v14893_v44 = vpop.f32.mrb[21].mxu1  ;;  %15256 = vmatpush3.bf16.msra.mxu0 %v1714_v43  ;;  %v15739_v43 = vld [vmem:[#allocation17 + $0xf0] ss:$20 sps:$4 sm:$0xff]  }
 0x616   :  { %v14894_v26 = vadd.f32 %v14893_v44, %v14892_v22  ;;  %v1658_v27 = vpop.f32.mrb[22].mxu0  ;;  %v14895_v28 = vpop.f32.mrb[22].mxu1  ;;  %v15742_v22 = vld [vmem:[#allocation17 + $0xf8] ss:$20 sps:$4 sm:$0xff]  }
 0x617   :  { %v1715_v29 = vpack.c.bf16 %v1658_v27, %v1654_v21  ;;  %v1660_v46 = vpop.f32.mrb[23].mxu0  ;;  %v14896_v30 = vpop.f32.mrb[23].mxu1  ;;  %v15747_v21 = vld [vmem:[#allocation17 + $0x11c] ss:$20 sps:$4 sm:$0xff]   ;;  %v15745_v44 = vld [vmem:[#allocation17 + $0x118] ss:$20 sps:$4 sm:$0xff]  }
 0x618   :  { %v1716_v31 = vpack.c.bf16 %v1660_v46, %v1656_v23  ;;  %v14897_v32 = vadd.f32 %v14896_v30, %v14895_v28  ;;  %v15750_v23 = vld [vmem:[#allocation17 + $0x124] ss:$20 sps:$4 sm:$0xff]   ;;  %v15748_v27 = vld [vmem:[#allocation17 + $0x120] ss:$20 sps:$4 sm:$0xff]   ;;  %v15754_v30 = vld [vmem:[#allocation17 + $0x148] ss:$20 sps:$4 sm:$0xff]  }
 0x619   :  { %v15756_v28 = vld [vmem:[#allocation17 + $0x14c] ss:$20 sps:$4 sm:$0xff]  }
 0x61a   :  { %v1717_v34 = vpack.c.bf16 %v14897_v32, %v14894_v26  ;;  %1737 = vmatprep.subr.bf16.mxu1 %v1716_v31  ;;  %v15753_v26 = vld [vmem:[#allocation17 + $0x144] ss:$20 sps:$4 sm:$0xff]   ;;  %v15759_v46 = vld [vmem:[#allocation17 + $0x16c] ss:$20 sps:$4 sm:$0xff]   ;;  %v15762_v31 = vld [vmem:[#allocation17 + $0x174] ss:$20 sps:$4 sm:$0xff]  }
 0x61b   :  { %1738 = vmatpush1.bf16.msra.mxu1 %v1715_v29  ;;  %v15751_v29 = vld [vmem:[#allocation17 + $0x140] ss:$20 sps:$4 sm:$0xff]   ;;  %v15757_v32 = vld [vmem:[#allocation17 + $0x168] ss:$20 sps:$4 sm:$0xff]  }
 0x61c   :  { %15257 = vmatprep.subr.bf16.mxu0 %v1717_v34  ;;  %2623 = vmatprep.subr.bf16.mxu1 %v15705_v33  ;;  %v15765_v33 = vld [vmem:[#allocation17 + $0x194] ss:$20 sps:$4 sm:$0xff]  }
 0x61d   :  { %15258 = vmatpush3.bf16.msra.mxu0 %v1717_v34  ;;  %v15760_v34 = vld [vmem:[#allocation17 + $0x170] ss:$20 sps:$4 sm:$0xff]  }
 0x61e   :  { %13560 = vmatmul.mubr.msk.bf16.vlgmr.msra.gmra.mrb[24].mxu1 %vm506_vm1, %v17697_v41  ;;  %2729 = vmatprep.subr.bf16.mxu0 %v15708_v35  ;;  %v15768_v35 = vld [vmem:[#allocation17 + $0x19c] ss:$20 sps:$4 sm:$0xff]  }
 0x61f   :  { %1777 = vmatprep.mubr.bf16.mxu1 %v17204_v1  ;;  %2624 = vmatpush1.bf16.msra.mxu1 %v15703_v36  ;;  %v15763_v36 = vld [vmem:[#allocation17 + $0x190] ss:$20 sps:$4 sm:$0xff]  }
 0x620   :  { %15260 = vmatmul.mubr.msk.bf16.vlgmr.msra.gmra.mrb[24].mxu0 %vm506_vm1, %v17703_v39  ;;  %2625 = vmatprep.subr.bf16.mxu1 %v15711_v51  ;;  %v15771_v51 = vld [vmem:[#allocation17 + $0x1bc] ss:$20 sps:$4 sm:$0xff]  }
 0x621   :  { %2730 = vmatpush1.bf16.msra.mxu0 %v15706_v37  ;;  %v15766_v37 = vld [vmem:[#allocation17 + $0x198] ss:$20 sps:$4 sm:$0xff]  }
 0x622   :  { %2731 = vmatprep.subr.bf16.mxu0 %v15714_v40  ;;  %v15774_v40 = vld [vmem:[#allocation17 + $0x1c4] ss:$20 sps:$4 sm:$0xff]  }
 0x623   :  { %2626 = vmatpush1.bf16.msra.mxu1 %v15709_v42  ;;  %v15769_v42 = vld [vmem:[#allocation17 + $0x1b8] ss:$20 sps:$4 sm:$0xff]  }
 0x624   :  { %2627 = vmatprep.subr.bf16.mxu1 %v15717_v45  ;;  %v15777_v45 = vld [vmem:[#allocation17 + $0x1e4] ss:$20 sps:$4 sm:$0xff]  }
 0x625   :  { %2732 = vmatpush1.bf16.msra.mxu0 %v15712_v47  ;;  %v15772_v47 = vld [vmem:[#allocation17 + $0x1c0] ss:$20 sps:$4 sm:$0xff]  }
 0x626   :  { %13561 = vmatmul.mubr.msk.bf16.gmra.mrb[28].mxu1 %vm506_vm1, %v17703_v39  ;;  %2733 = vmatprep.subr.bf16.mxu0 %v15720_v48  ;;  %v15780_v48 = vld [vmem:[#allocation17 + $0x1ec] ss:$20 sps:$4 sm:$0xff]  }
 0x627   :  { %2628 = vmatpush1.bf16.msra.mxu1 %v15715_v49  ;;  %v15775_v49 = vld [vmem:[#allocation17 + $0x1e0] ss:$20 sps:$4 sm:$0xff]  }
 0x628   :  { %2629 = vmatprep.subr.bf16.mxu1 %v15723_v50  ;;  %v15783_v50 = vld [vmem:[#allocation17 + $0x20c] ss:$20 sps:$4 sm:$0xff]  }
 0x629   :  { %2734 = vmatpush1.bf16.msra.mxu0 %v15718_v53  ;;  %v15778_v53 = vld [vmem:[#allocation17 + $0x1e8] ss:$20 sps:$4 sm:$0xff]  }
 0x62a   :  { %2735 = vmatprep.subr.bf16.mxu0 %v15726_v54  ;;  %v15786_v54 = vld [vmem:[#allocation17 + $0x214] ss:$20 sps:$4 sm:$0xff]  }
 0x62b   :  { %2630 = vmatpush1.bf16.msra.mxu1 %v15721_v56  ;;  %v15781_v56 = vld [vmem:[#allocation17 + $0x208] ss:$20 sps:$4 sm:$0xff]  }
 0x62c   :  { %2631 = vmatprep.subr.bf16.mxu1 %v15729_v57  ;;  %v15784_v57 = vld [vmem:[#allocation17 + $0x210] ss:$20 sps:$4 sm:$0xff]  }
 0x62d   :  { %2736 = vmatpush1.bf16.msra.mxu0 %v15724_v58  ;;  %v15789_v58 = vld [vmem:[#allocation17 + $0x234] ss:$20 sps:$4 sm:$0xff]  }
 0x62e   :  { %2737 = vmatprep.subr.bf16.mxu0 %v15732_v60  ;;  %v15792_v60 = vld [vmem:[#allocation17 + $0x23c] ss:$20 sps:$4 sm:$0xff]  }
 0x62f   :  { %2632 = vmatpush1.bf16.msra.mxu1 %v15727_v61  ;;  %v15787_v61 = vld [vmem:[#allocation17 + $0x230] ss:$20 sps:$4 sm:$0xff]  }
 0x630   :  { %2633 = vmatprep.subr.bf16.mxu1 %v15735_v62  ;;  %v15790_v62 = vld [vmem:[#allocation17 + $0x238] ss:$20 sps:$4 sm:$0xff]  }
 0x631   :  { %2738 = vmatpush1.bf16.msra.mxu0 %v15730_v63  ;;  %v15795_v63 = vld [vmem:[#allocation17 + $0x25c] ss:$20 sps:$4 sm:$0xff]  }
 0x632   :  { %2739 = vmatprep.subr.bf16.mxu0 %v15738_v9  ;;  %v15798_v9 = vld [vmem:[#allocation17 + $0x264] ss:$20 sps:$4 sm:$0xff]  }
 0x633   :  { %2634 = vmatpush1.bf16.msra.mxu1 %v15733_v10  ;;  %v15793_v10 = vld [vmem:[#allocation17 + $0x258] ss:$20 sps:$4 sm:$0xff]  }
 0x634   :  { %2635 = vmatprep.subr.bf16.mxu1 %v15741_v13  ;;  %v15796_v13 = vld [vmem:[#allocation17 + $0x260] ss:$20 sps:$4 sm:$0xff]  }
 0x635   :  { %2740 = vmatpush1.bf16.msra.mxu0 %v15736_v16  ;;  %v15801_v16 = vld [vmem:[#allocation17 + $0x284] ss:$20 sps:$4 sm:$0xff]  }
 0x636   :  { %2741 = vmatprep.subr.bf16.mxu0 %v15744_v18  ;;  %v15804_v18 = vld [vmem:[#allocation17 + $0x28c] ss:$20 sps:$4 sm:$0xff]  }
 0x637   :  { %2636 = vmatpush1.bf16.msra.mxu1 %v15739_v43  ;;  %v1718_v43 = vld [vmem:[#allocation16] sm:$0x7] }
 0x638   :  { %2637 = vmatprep.subr.bf16.mxu1 %v15747_v21  ;;  %v17732_v21 = vsub.s32 2, %v17551_v2 }
 0x639   :  { %2742 = vmatpush1.bf16.msra.mxu0 %v15742_v22  ;;  %v17735_v22 = vrot.slane %v1718_v43, %v17647_v24 }
 0x63a   :  { %2743 = vmatprep.subr.bf16.mxu0 %v15750_v23  ;;  %v17738_v23 = vrot.slane %v1718_v43, %v17650_v25 }
 0x63b   :  { %2638 = vmatpush1.bf16.msra.mxu1 %v15745_v44  ;;  %v17741_v44 = vrot.slane %v1718_v43, %v17732_v21 }
 0x63c   :  { %2639 = vmatprep.subr.bf16.mxu1 %v15753_v26 }
 0x63d   :  { %2744 = vmatpush1.bf16.msra.mxu0 %v15748_v27 }
 0x63e   :  { %2745 = vmatprep.subr.bf16.mxu0 %v15756_v28 }
 0x63f   :  { %2640 = vmatpush1.bf16.msra.mxu1 %v15751_v29 }
 0x640   :  { %2641 = vmatprep.subr.bf16.mxu1 %v15759_v46 }
 0x641   :  { %2746 = vmatpush1.bf16.msra.mxu0 %v15754_v30 }
 0x642   :  { %2747 = vmatprep.subr.bf16.mxu0 %v15762_v31 }
 0x643   :  { %2642 = vmatpush1.bf16.msra.mxu1 %v15757_v32 }
 0x644   :  { %2643 = vmatprep.subr.bf16.mxu1 %v15765_v33 }
 0x645   :  { %2748 = vmatpush1.bf16.msra.mxu0 %v15760_v34 }
 0x646   :  { %2749 = vmatprep.subr.bf16.mxu0 %v15768_v35 }
 0x647   :  { %2644 = vmatpush1.bf16.msra.mxu1 %v15763_v36 }
 0x648   :  { %2645 = vmatprep.subr.bf16.mxu1 %v15771_v51 }
 0x649   :  { %2750 = vmatpush1.bf16.msra.mxu0 %v15766_v37 }
 0x64a   :  { %2751 = vmatprep.subr.bf16.mxu0 %v15774_v40 }
 0x64b   :  { %2646 = vmatpush1.bf16.msra.mxu1 %v15769_v42 }
 0x64c   :  { %2647 = vmatprep.subr.bf16.mxu1 %v15777_v45 }
 0x64d   :  { %2752 = vmatpush1.bf16.msra.mxu0 %v15772_v47 }
 0x64e   :  { %2753 = vmatprep.subr.bf16.mxu0 %v15780_v48 }
 0x64f   :  { %2648 = vmatpush1.bf16.msra.mxu1 %v15775_v49 }
 0x650   :  { %2649 = vmatprep.subr.bf16.mxu1 %v15783_v50 }
 0x651   :  { %2754 = vmatpush1.bf16.msra.mxu0 %v15778_v53 }
 0x652   :  { %2755 = vmatprep.subr.bf16.mxu0 %v15786_v54 }
 0x653   :  { %2650 = vmatpush1.bf16.msra.mxu1 %v15781_v56  ;;  %v15799_v56 = vld [vmem:[#allocation17 + $0x280] ss:$20 sps:$4 sm:$0xff]  }
 0x654   :  { %2651 = vmatprep.subr.bf16.mxu1 %v15789_v58 }
 0x655   :  { %2756 = vmatpush1.bf16.msra.mxu0 %v15784_v57 }
 0x656   :  { %2757 = vmatprep.subr.bf16.mxu0 %v15792_v60 }
 0x657   :  { %2652 = vmatpush1.bf16.msra.mxu1 %v15787_v61 }
 0x658   :  { %2653 = vmatprep.subr.bf16.mxu1 %v15795_v63 }
 0x659   :  { %2758 = vmatpush1.bf16.msra.mxu0 %v15790_v62  ;;  %v15802_v62 = vld [vmem:[#allocation17 + $0x288] ss:$20 sps:$4 sm:$0xff]  }
 0x65a   :  { %2759 = vmatprep.subr.bf16.mxu0 %v15798_v9 }
 0x65b   :  { %2654 = vmatpush1.bf16.msra.mxu1 %v15793_v10 }
 0x65c   :  { %2676 = vmatprep.subr.bf16.mxu1 %v15801_v16  ;;  %v15810_v16 = vld [vmem:[#allocation17 + $0x2b4] ss:$20 sps:$4 sm:$0xff]  }
 0x65d   :  { %2760 = vmatpush1.bf16.msra.mxu0 %v15796_v13  ;;  %v15807_v13 = vld [vmem:[#allocation17 + $0x2ac] ss:$20 sps:$4 sm:$0xff]  }
 0x65e   :  { %2782 = vmatprep.subr.bf16.mxu0 %v15804_v18 }
 0x6f1   :  { %v1769_v26 = vpop.f32.mrb[24].mxu1 }
 0x6f2   :  { %v1770_v27 = vadd.f32 %v1769_v26, %v17735_v22  ;;  %v1771_v28 = vpop.f32.mrb[25].mxu1 }
 0x6f3   :  { %v1772_v29 = vadd.f32 %v1771_v28, %v17738_v23  ;;  %v1773_v46 = vpop.f32.mrb[26].mxu1  ;;  %v15261_v30 = vpop.f32.mrb[24].mxu0 }
 0x6f4   :  { %v1774_v31 = vadd.f32 %v1773_v46, %v17735_v22  ;;  %v1831_v32 = vadd.f32 %v15261_v30, %v17741_v44  ;;  %v1775_v33 = vpop.f32.mrb[27].mxu1  ;;  %v1822_v34 = vpop.f32.mrb[25].mxu0  ;;  %v1837_v37 = vmax.f32 %v1770_v27, 0.0  ;;  %v15805_v46 = vld [vmem:[#allocation17 + $0x2a8] ss:$20 sps:$4 sm:$0xff]  }
 0x6f5   :  { %v1776_v35 = vadd.f32 %v1775_v33, %v17738_v23  ;;  %v1823_v36 = vadd.f32 %v1822_v34, %v17741_v44  ;;  %v15262_v51 = vpop.f32.mrb[26].mxu0  ;;  %v1838_v47 = vmax.f32 %v1772_v29, 0.0  ;;  %v15808_v30 = vld [vmem:[#allocation17 + $0x2b0] ss:$20 sps:$4 sm:$0xff]   ;;  %v15813_v33 = vld [vmem:[#allocation17 + $0x2d4] ss:$20 sps:$4 sm:$0xff]  }
 0x6f6   :  { %v1840_v40 = vmax.f32 %v1774_v31, 0.0  ;;  %v1834_v42 = vadd.f32 %v15262_v51, %v17741_v44  ;;  %v1825_v45 = vpop.f32.mrb[27].mxu0  ;;  %v1845_v53 = vmax.f32 %v1831_v32, 0.0  ;;  %v15816_v34 = vld [vmem:[#allocation17 + $0x2dc] ss:$20 sps:$4 sm:$0xff]  }
 0x6f7   :  { %v1841_v48 = vmax.f32 %v1776_v35, 0.0  ;;  %v1826_v49 = vadd.f32 %v1825_v45, %v17741_v44  ;;  %v1839_v58 = vmax.f32 %v1823_v36, 0.0  ;;  %v15819_v45 = vld [vmem:[#allocation17 + $0x2fc] ss:$20 sps:$4 sm:$0xff]  }
 0x6f8   :  { %v17751_v50 = vpack.c.bf16 %v1840_v40, %v1837_v37  ;;  %v1848_v54 = vmax.f32 %v1834_v42, 0.0  ;;  %v15811_v40 = vld [vmem:[#allocation17 + $0x2d0] ss:$20 sps:$4 sm:$0xff]   ;;  %v15814_v42 = vld [vmem:[#allocation17 + $0x2d8] ss:$20 sps:$4 sm:$0xff]  }
 0x6f9   :  { %v17753_v57 = vpack.c.bf16 %v1841_v48, %v1838_v47  ;;  %v1842_v60 = vmax.f32 %v1826_v49, 0.0  ;;  %v1779_v61 = vpop.f32.mrb[28].mxu1  ;;  %v15822_v47 = vld [vmem:[#allocation17 + $0x304] ss:$20 sps:$4 sm:$0xff]   ;;  %v15820_v49 = vld [vmem:[#allocation17 + $0x300] ss:$20 sps:$4 sm:$0xff]  }
 0x6fa   :  { %v17755_v63 = vpack.c.bf16 %v1848_v54, %v1845_v53  ;;  %v1780_v9 = vadd.f32 %v1779_v61, %v17735_v22  ;;  %v1781_v10 = vpop.f32.mrb[29].mxu1  ;;  %v15817_v48 = vld [vmem:[#allocation17 + $0x2f8] ss:$20 sps:$4 sm:$0xff]   ;;  %v15834_v61 = vld [vmem:[#allocation17 + $0x354] ss:$20 sps:$4 sm:$0xff]  }
 0x6fb   :  { %v17758_v18 = vpack.c.bf16 %v1842_v60, %v1839_v58  ;;  %v1782_v43 = vadd.f32 %v1781_v10, %v17738_v23  ;;  %v1783_v26 = vpop.f32.mrb[30].mxu1  ;;  %2655 = vmatprep.mubr.bf16.mxu1 %v17753_v57  ;;  %2761 = vmatprep.mubr.bf16.mxu0 %v17753_v57  ;;  %v15825_v53 = vld [vmem:[#allocation17 + $0x324] ss:$20 sps:$4 sm:$0xff]   ;;  %v15828_v54 = vld [vmem:[#allocation17 + $0x32c] ss:$20 sps:$4 sm:$0xff]  }
 0x6fc   :  { %v1784_v27 = vadd.f32 %v1783_v26, %v17735_v22  ;;  %v1785_v28 = vpop.f32.mrb[31].mxu1  ;;  %2656 = vmatmul.mubr.bf16.vlgmr.msra.gmra.mrb[32].mxu1 %v17751_v50  ;;  %2762 = vmatmul.mubr.bf16.vlgmr.msra.gmra.mrb[28].mxu0 %v17751_v50  ;;  %v1843_v31 = vmax.f32 %v1780_v9, 0.0  ;;  %v15826_v58 = vld [vmem:[#allocation17 + $0x328] ss:$20 sps:$4 sm:$0xff]   ;;  %v15831_v60 = vld [vmem:[#allocation17 + $0x34c] ss:$20 sps:$4 sm:$0xff]  }
 0x6fd   :  { %v1786_v29 = vadd.f32 %v1785_v28, %v17738_v23  ;;  %2677 = vmatpush1.bf16.msra.mxu1 %v15799_v56  ;;  %2783 = vmatpush1.bf16.msra.mxu0 %v15802_v62  ;;  %v1844_v35 = vmax.f32 %v1782_v43, 0.0  ;;  %v15823_v56 = vld [vmem:[#allocation17 + $0x320] ss:$20 sps:$4 sm:$0xff]   ;;  %v15829_v62 = vld [vmem:[#allocation17 + $0x348] ss:$20 sps:$4 sm:$0xff]  }
 0x6fe   :  { %v1846_v32 = vmax.f32 %v1784_v27, 0.0  ;;  %2678 = vmatprep.subr.bf16.mxu1 %v15807_v13  ;;  %2784 = vmatprep.subr.bf16.mxu0 %v15810_v16  ;;  %v15832_v9 = vld [vmem:[#allocation17 + $0x350] ss:$20 sps:$4 sm:$0xff]   ;;  %v15837_v10 = vld [vmem:[#allocation17 + $0x374] ss:$20 sps:$4 sm:$0xff]  }
 0x6ff   :  { %v1847_v36 = vmax.f32 %v1786_v29, 0.0  ;;  %v15840_v13 = vld [vmem:[#allocation17 + $0x37c] ss:$20 sps:$4 sm:$0xff]   ;;  %v15838_v43 = vld [vmem:[#allocation17 + $0x378] ss:$20 sps:$4 sm:$0xff]  }
 0x700   :  { %v17767_v51 = vpack.c.bf16 %v1846_v32, %v1843_v31  ;;  %v15835_v16 = vld [vmem:[#allocation17 + $0x370] ss:$20 sps:$4 sm:$0xff]   ;;  %v15841_v28 = vld [vmem:[#allocation17 + $0x398] ss:$20 sps:$4 sm:$0xff]   ;;  %v15844_v29 = vld [vmem:[#allocation17 + $0x3a0] ss:$20 sps:$4 sm:$0xff]  }
 0x701   :  { %v17769_v37 = vpack.c.bf16 %v1847_v36, %v1844_v35  ;;  %2679 = vmatpush1.bf16.msra.mxu1 %v15805_v46  ;;  %2785 = vmatpush1.bf16.msra.mxu0 %v15808_v30  ;;  %v15843_v26 = vld [vmem:[#allocation17 + $0x39c] ss:$20 sps:$4 sm:$0xff]   ;;  %v15846_v27 = vld [vmem:[#allocation17 + $0x3a4] ss:$20 sps:$4 sm:$0xff]   ;;  %v15853_v35 = vld [vmem:[#allocation17 + $0x1a0] ss:$20 sps:$4 sm:$0xff]  }
 0x702   :  { %2680 = vmatprep.subr.bf16.mxu1 %v15813_v33  ;;  %2786 = vmatprep.subr.bf16.mxu0 %v15816_v34  ;;  %v15847_v46 = vld [vmem:[#allocation17 + $0x150] ss:$20 sps:$4 sm:$0xff]   ;;  %v15850_v32 = vld [vmem:[#allocation17 + $0x178] ss:$20 sps:$4 sm:$0xff]   ;;  %v15854_v36 = vld [vmem:[#allocation17 + $0x2e0] ss:$20 sps:$4 sm:$0xff]  }
 0x703   :  { %2665 = vmatprep.mubr.bf16.mxu1 %v17769_v37  ;;  %2771 = vmatprep.mubr.bf16.mxu0 %v17769_v37  ;;  %v15848_v30 = vld [vmem:[#allocation17 + $0x290] ss:$20 sps:$4 sm:$0xff]   ;;  %v15851_v33 = vld [vmem:[#allocation17 + $0x2b8] ss:$20 sps:$4 sm:$0xff]  }
 0x704   :  { %2666 = vmatmul.mubr.bf16.gmra.mrb[36].mxu1 %v17767_v51  ;;  %2772 = vmatmul.mubr.bf16.gmra.mrb[32].mxu0 %v17767_v51  ;;  %v15849_v31 = vld [vmem:[#allocation17 + $0x10] ss:$20 sps:$4 sm:$0xff]   ;;  %v15852_v34 = vld [vmem:[#allocation17 + $0x38] ss:$20 sps:$4 sm:$0xff]  }
 0x705   :  { %2681 = vmatpush1.bf16.msra.mxu1 %v15811_v40  ;;  %2787 = vmatpush1.bf16.msra.mxu0 %v15814_v42  ;;  %v15855_v40 = vld [vmem:[#allocation17 + $0x60] ss:$20 sps:$4 sm:$0xff]   ;;  %v15856_v42 = vld [vmem:[#allocation17 + $0x1c8] ss:$20 sps:$4 sm:$0xff]  }
 0x706   :  { %2682 = vmatprep.subr.bf16.mxu1 %v15819_v45  ;;  %2788 = vmatprep.subr.bf16.mxu0 %v15822_v47  ;;  %v15857_v45 = vld [vmem:[#allocation17 + $0x308] ss:$20 sps:$4 sm:$0xff]  }
 0x707   :  { %2708 = vmatprep.mubr.bf16.mxu1 %v17204_v1  ;;  %2814 = vmatprep.mubr.bf16.mxu0 %v17204_v1  ;;  %v15858_v47 = vld [vmem:[#allocation17 + $0x88] ss:$20 sps:$4 sm:$0xff]  }
 0x709   :  { %2683 = vmatpush1.bf16.msra.mxu1 %v15817_v48  ;;  %2789 = vmatpush1.bf16.msra.mxu0 %v15820_v49  ;;  %v15859_v48 = vld [vmem:[#allocation17 + $0x1f0] ss:$20 sps:$4 sm:$0xff]  }
 0x70a   :  { %2684 = vmatprep.subr.bf16.mxu1 %v15825_v53  ;;  %2790 = vmatprep.subr.bf16.mxu0 %v15828_v54  ;;  %v15860_v49 = vld [vmem:[#allocation17 + $0x330] ss:$20 sps:$4 sm:$0xff]   ;;  %v15862_v54 = vld [vmem:[#allocation17 + $0x218] ss:$20 sps:$4 sm:$0xff]  }
 0x70b   :  { %v15861_v53 = vld [vmem:[#allocation17 + $0xb0] ss:$20 sps:$4 sm:$0xff]  }
 0x70d   :  { %2685 = vmatpush1.bf16.msra.mxu1 %v15823_v56  ;;  %2791 = vmatpush1.bf16.msra.mxu0 %v15826_v58  ;;  %v15863_v56 = vld [vmem:[#allocation17 + $0x358] ss:$20 sps:$4 sm:$0xff]  }
 0x70e   :  { %2686 = vmatprep.subr.bf16.mxu1 %v15831_v60  ;;  %2792 = vmatprep.subr.bf16.mxu0 %v15834_v61  ;;  %v15864_v58 = vld [vmem:[#allocation17 + $0xd8] ss:$20 sps:$4 sm:$0xff]   ;;  %v15866_v60 = vld [vmem:[#allocation17 + $0x380] ss:$20 sps:$4 sm:$0xff]   ;;  %v15868_v61 = vld [vmem:[#allocation17 + $0x268] ss:$20 sps:$4 sm:$0xff]  }
 0x711   :  { %2687 = vmatpush1.bf16.msra.mxu1 %v15829_v62  ;;  %2793 = vmatpush1.bf16.msra.mxu0 %v15832_v9  ;;  %v15869_v62 = vld [vmem:[#allocation17 + $0x3a8] ss:$20 sps:$4 sm:$0xff]  }
 0x712   :  { %2688 = vmatprep.subr.bf16.mxu1 %v15837_v10  ;;  %2794 = vmatprep.subr.bf16.mxu0 %v15840_v13  ;;  %v15870_v9 = vld [vmem:[#allocation17 + $0x128] ss:$20 sps:$4 sm:$0xff]   ;;  %v706_v10 = vrot.slane %v17644_v19, 4 }
 0x714   :  { %v707_v13 = vadd.f32 %v706_v10, %v17644_v19  ;;  %v16417_v10 = vld [vmem:[#allocation14 + $0xc8] ss:$12 sps:$4 sm:$0xff]  }
 0x715   :  { %2689 = vmatpush1.bf16.msra.mxu1 %v15835_v16  ;;  %2795 = vmatpush1.bf16.msra.mxu0 %v15838_v43 }
 0x716   :  { %2690 = vmatprep.subr.bf16.mxu1 %v15843_v26  ;;  %2796 = vmatprep.subr.bf16.mxu0 %v15846_v27  ;;  %v708_v26 = vrot.slane %v707_v13, 2 }
 0x719   :  { %2691 = vmatpush1.bf16.msra.mxu1 %v15841_v28  ;;  %2797 = vmatpush1.bf16.msra.mxu0 %v15844_v29 }
 0x71a   :  { %14902 = vmatprep.subr.bf16.mxu1 %v15847_v46  ;;  %15263 = vmatprep.subr.bf16.mxu0 %v15848_v30 }
 0x71c   :  { %2709 = vmatmul.mubr.bf16.vlgmr.msra.gmra.mrb[32].mxu1 %v17758_v18  ;;  %2815 = vmatmul.mubr.bf16.vlgmr.msra.gmra.mrb[28].mxu0 %v17758_v18 }
 0x71d   :  { %14903 = vmatpush3.bf16.msra.mxu1 %v15849_v31  ;;  %15264 = vmatpush3.bf16.msra.mxu0 %v15848_v30 }
 0x71e   :  { %14904 = vmatprep.subr.bf16.mxu1 %v15850_v32  ;;  %15265 = vmatprep.subr.bf16.mxu0 %v15851_v33 }
 0x71f   :  { %2718 = vmatprep.mubr.bf16.mxu1 %v17204_v1  ;;  %2824 = vmatprep.mubr.bf16.mxu0 %v17204_v1 }
 0x721   :  { %14905 = vmatpush3.bf16.msra.mxu1 %v15852_v34  ;;  %15266 = vmatpush3.bf16.msra.mxu0 %v15851_v33  ;;  %v689_v33 = vpop.xlane.xlu0 %688  ;;  %v692_v34 = vpop.xlane.xlu1 %691 }
 0x722   :  { %14906 = vmatprep.subr.bf16.mxu1 %v15853_v35  ;;  %15267 = vmatprep.subr.bf16.mxu0 %v15854_v36  ;;  %16385 = vrsqrt.f32 %v692_v34 }
 0x723   :  { %16387 = vrsqrt.f32 %v689_v33 }
 0x724   :  { %2719 = vmatmul.mubr.bf16.gmra.mrb[36].mxu1 %v17755_v63  ;;  %2825 = vmatmul.mubr.bf16.gmra.mrb[32].mxu0 %v17755_v63 }
 0x725   :  { %14907 = vmatpush3.bf16.msra.mxu1 %v15855_v40  ;;  %2867 = vmatprep.mubr.bf16.mxu1 %v17753_v57  ;;  %v15865_v57 = vld [vmem:[#allocation17 + $0x240] ss:$20 sps:$4 sm:$0xff]  }
 0x726   :  { %15268 = vmatpush3.bf16.msra.mxu0 %v15854_v36  ;;  %15279 = vmatprep.mubr.bf16.mxu0 %v17758_v18  ;;  %v15867_v18 = vld [vmem:[#allocation17 + $0x100] ss:$20 sps:$4 sm:$0xff]  }
 0x727   :  { %14908 = vmatprep.subr.bf16.mxu1 %v15856_v42  ;;  %15269 = vmatprep.subr.bf16.mxu0 %v15857_v45 }
 0x729   :  { %14909 = vmatpush3.bf16.msra.mxu1 %v15858_v47 }
 0x72a   :  { %15270 = vmatpush3.bf16.msra.mxu0 %v15857_v45  ;;  %14910 = vmatprep.subr.bf16.mxu1 %v15859_v48 }
 0x72b   :  { %15271 = vmatprep.subr.bf16.mxu0 %v15860_v49 }
 0x72d   :  { %14911 = vmatpush3.bf16.msra.mxu1 %v15861_v53 }
 0x72e   :  { %15272 = vmatpush3.bf16.msra.mxu0 %v15860_v49  ;;  %14912 = vmatprep.subr.bf16.mxu1 %v15862_v54 }
 0x72f   :  { %15273 = vmatprep.subr.bf16.mxu0 %v15863_v56 }
 0x731   :  { %14913 = vmatpush3.bf16.msra.mxu1 %v15864_v58 }
 0x732   :  { %15274 = vmatpush3.bf16.msra.mxu0 %v15863_v56  ;;  %14914 = vmatprep.subr.bf16.mxu1 %v15865_v57 }
 0x733   :  { %15275 = vmatprep.subr.bf16.mxu0 %v15866_v60 }
 0x735   :  { %14915 = vmatpush3.bf16.msra.mxu1 %v15867_v18  ;;  %v695_v18 = vpop.xlane.xlu0 %694 }
 0x736   :  { %15276 = vmatpush3.bf16.msra.mxu0 %v15866_v60  ;;  %14916 = vmatprep.subr.bf16.mxu1 %v15868_v61  ;;  %v698_v60 = vpop.xlane.xlu1 %697  ;;  %v16386_v61 = vpop.eup %16385 }
 0x737   :  { %15277 = vmatprep.subr.bf16.mxu0 %v15869_v62 }
 0x739   :  { %14917 = vmatpush3.bf16.msra.mxu1 %v15870_v9  ;;  %v714_v9 = vmul.f32 %v16386_v61, %v17628_v7 }
 0x73a   :  { %15278 = vmatpush3.bf16.msra.mxu0 %v15869_v62  ;;  %v16388_v62 = vpop.eup %16387 }
 0x73c   :  { %2868 = vmatmul.mubr.bf16.vlgmr.msra.gmra.mrb[40].mxu1 %v17751_v50 }
 0x73d   :  { %15280 = vmatmul.mubr.bf16.vlgmr.msra.gmra.mrb[36].mxu0 %v17755_v63  ;;  %2875 = vmatprep.mubr.bf16.mxu1 %v17769_v37 }
 0x73e   :  { %3055 = vmatprep.mubr.bf16.mxu0 %v17204_v1 }
 0x744   :  { %2876 = vmatmul.mubr.bf16.gmra.mrb[44].mxu1 %v17767_v51  ;;  %v709_v51 = vadd.f32 %v708_v26, %v707_v13  ;;  %v713_v13 = vmul.f32 %v16388_v62, %v17622_v59  ;;  %v16424_v62 = vld [vmem:[#allocation14 + $0x50] ss:$12 sps:$4 sm:$0xff]  }
 0x745   :  { %3002 = vmatprep.mubr.bf16.mxu1 %v17204_v1 }
 0x746   :  { %v710_v36 = vrot.slane %v709_v51, 1 }
 0x748   :  { %v711_v57 = vadd.f32 %v710_v36, %v709_v51  ;;  %v16418_v51 = vld [vmem:[#allocation14 + $0x8] ss:$12 sps:$4 sm:$0xff]  }
 0x74a   :  { %16389 = vrsqrt.f32 %v711_v57 }
 0x74b   :  { %16391 = vrsqrt.f32 %v698_v60 }
 0x74c   :  { %16393 = vrsqrt.f32 %v695_v18  ;;  %v16423_v18 = vld [vmem:[#allocation14 + $0x110] ss:$12 sps:$4 sm:$0xff]  }
 0x7ef   :  { %v2710_v16 = vpop.f32.mrb[32].mxu1  ;;  %v2816_v43 = vpop.f32.mrb[28].mxu0 }
 0x7f0   :  { %v2712_v27 = vpop.f32.mrb[33].mxu1  ;;  %v2818_v28 = vpop.f32.mrb[29].mxu0 }
 0x7f1   :  { %v2714_v50 = vpop.f32.mrb[34].mxu1  ;;  %v2820_v29 = vpop.f32.mrb[30].mxu0 }
 0x7f2   :  { %v2933_v63 = vpack.c.bf16 %v2714_v50, %v2710_v16  ;;  %v2935_v46 = vpack.c.bf16 %v2820_v29, %v2816_v43  ;;  %v2716_v37 = vpop.f32.mrb[35].mxu1  ;;  %v2822_v30 = vpop.f32.mrb[31].mxu0 }
 0x7f3   :  { %v2934_v31 = vpack.c.bf16 %v2716_v37, %v2712_v27  ;;  %v2936_v32 = vpack.c.bf16 %v2822_v30, %v2818_v28  ;;  %v16390_v16 = vpop.eup %16389 }
 0x7f4   :  { %v718_v43 = vmul.f32 %v16390_v16, %v714_v9  ;;  %v16392_v26 = vpop.eup %16391  ;;  %v717_v27 = vmul.f32 %v16390_v16, %v713_v13  ;;  %v16426_v13 = vld [vmem:[#allocation14 + $0x68] ss:$12 sps:$4 sm:$0xff]  }
 0x7f5   :  { %2970 = vmatprep.subr.bf16.mxu1 %v2934_v31  ;;  %3023 = vmatprep.subr.bf16.mxu0 %v2936_v32  ;;  %v16394_v7 = vpop.eup %16393  ;;  %v716_v59 = vmul.f32 %v16392_v26, %v17637_v12  ;;  %v16429_v26 = vld [vmem:[#allocation14] ss:$12 sps:$4 sm:$0xff]  }
 0x7f6   :  { %2971 = vmatpush1.bf16.msra.mxu1 %v2933_v63  ;;  %3024 = vmatpush1.bf16.msra.mxu0 %v2935_v46  ;;  %v17812_v28 = vpack.c.bf16 %v718_v43, %v717_v27  ;;  %v16428_v43 = vld [vmem:[#allocation14 + $0x140] ss:$12 sps:$4 sm:$0xff]  }
 0x7f7   :  { %v2720_v19 = vpop.f32.mrb[36].mxu1  ;;  %v2826_v35 = vpop.f32.mrb[32].mxu0  ;;  %v720_v12 = vmul.f32 %v16390_v16, %v716_v59  ;;  %v16430_v27 = vld [vmem:[#allocation14 + $0x80] ss:$12 sps:$4 sm:$0xff]   ;;  %v16433_v59 = vld [vmem:[#allocation14 + $0x18] ss:$12 sps:$4 sm:$0xff]  }
 0x7f8   :  { %v2722_v40 = vpop.f32.mrb[37].mxu1  ;;  %v2828_v42 = vpop.f32.mrb[33].mxu0 }
 0x7f9   :  { %v2724_v45 = vpop.f32.mrb[38].mxu1  ;;  %v2830_v47 = vpop.f32.mrb[34].mxu0 }
 0x7fa   :  { %v2938_v48 = vpack.c.bf16 %v2724_v45, %v2720_v19  ;;  %v2940_v49 = vpack.c.bf16 %v2830_v47, %v2826_v35  ;;  %v2726_v53 = vpop.f32.mrb[39].mxu1  ;;  %v2832_v54 = vpop.f32.mrb[35].mxu0  ;;  %v16419_v35 = vld [vmem:[#allocation14 + $0xe0] ss:$12 sps:$4 sm:$0xff]  }
 0x7fb   :  { %v2939_v56 = vpack.c.bf16 %v2726_v53, %v2722_v40  ;;  %v2941_v58 = vpack.c.bf16 %v2832_v54, %v2828_v42  ;;  %v16420_v42 = vld [vmem:[#allocation14 + $0x20] ss:$12 sps:$4 sm:$0xff]  }
 0x7fd   :  { %2972 = vmatprep.subr.bf16.mxu1 %v2939_v56  ;;  %3025 = vmatprep.subr.bf16.mxu0 %v2941_v58  ;;  %v16422_v58 = vld [vmem:[#allocation14 + $0x38] ss:$12 sps:$4 sm:$0xff]  }
 0x7fe   :  { %2973 = vmatpush1.bf16.msra.mxu1 %v2938_v48  ;;  %3026 = vmatpush1.bf16.msra.mxu0 %v2940_v49 }
 0x7ff   :  { %3151 = vmatprep.subr.bf16.mxu0 %v17684_v55 }
 0x801   :  { %13684 = vmatmul.mubr.msk.bf16.vlgmr.msra.gmra.mrb[48].mxu1 %vm506_vm1, %v17697_v41  ;;  %13686 = vmatmul.mubr.msk.bf16.vlgmr.msra.gmra.mrb[40].mxu0 %vm506_vm1, %v17697_v41 }
 0x802   :  { %3152 = vmatpush1.bf16.msra.mxu0 %v17682_v52  ;;  %3012 = vmatprep.mubr.bf16.mxu1 %v17204_v1 }
 0x803   :  { %3153 = vmatprep.subr.bf16.mxu0 %v17692_v17  ;;  %3065 = vmatprep.mubr.bf16.mxu0 %v17204_v1 }
 0x806   :  { %3154 = vmatpush1.bf16.msra.mxu0 %v17690_v0 }
 0x807   :  { %14944 = vmatprep.subr.bf16.mxu0 %v16417_v10  ;;  %v16425_v10 = vld [vmem:[#allocation14 + $0x128] ss:$12 sps:$4 sm:$0xff]  }
 0x809   :  { %13685 = vmatmul.mubr.msk.bf16.gmra.mrb[52].mxu1 %vm506_vm1, %v17703_v39  ;;  %13687 = vmatmul.mubr.msk.bf16.gmra.mrb[44].mxu0 %vm506_vm1, %v17703_v39 }
 0x80a   :  { %15287 = vmatprep.mubr.msk.bf16.mxu1 %vm506_vm1, %v17697_v41  ;;  %3183 = vmatprep.mubr.bf16.mxu0 %v17204_v1  ;;  %v715_v41 = vmul.f32 %v16394_v7, %v17631_v8  ;;  %v16421_v8 = vld [vmem:[#allocation14 + $0xf8] ss:$12 sps:$4 sm:$0xff]   ;;  %v16431_v7 = vld [vmem:[#allocation14 + $0x1c] ss:$12 sps:$4 sm:$0xff]  }
 0x80c   :  { %v719_v40 = vmul.f32 %v16390_v16, %v715_v41  ;;  %v16427_v16 = vld [vmem:[#allocation14 + $0x4] ss:$12 sps:$4 sm:$0xff]   ;;  %v16440_v41 = vld [vmem:[#allocation14 + $0x48] ss:$12 sps:$4 sm:$0xff]  }
 0x80e   :  { %v17819_v48 = vpack.c.bf16 %v720_v12, %v719_v40  ;;  %v16447_v12 = vld [vmem:[#allocation14 + $0xac] ss:$12 sps:$4 sm:$0xff]  }
 0x80f   :  { %v14918_v50 = vpop.f32.mrb[40].mxu1  ;;  %v16450_v40 = vld [vmem:[#allocation14 + $0xc0] ss:$12 sps:$4 sm:$0xff]  }
 0x810   :  { %v15281_v29 = vpop.f32.mrb[36].mxu0  ;;  %v14919_v63 = vpop.f32.mrb[41].mxu1 }
 0x811   :  { %v14920_v46 = vadd.f32 %v14919_v63, %v14918_v50  ;;  %v2918_v37 = vpop.f32.mrb[37].mxu0  ;;  %v14921_v30 = vpop.f32.mrb[42].mxu1  ;;  %13690 = vmatmul.mubr.msk.bf16.vlgmr.msra.gmra.mrb[48].mxu0 %vm506_vm1, %v17812_v28  ;;  %v16432_v50 = vld [vmem:[#allocation14 + $0x158] ss:$12 sps:$4 sm:$0xff]   ;;  %v16435_v63 = vld [vmem:[#allocation14 + $0x34] ss:$12 sps:$4 sm:$0xff]  }
 0x812   :  { %v15282_v31 = vpop.f32.mrb[38].mxu0  ;;  %v14922_v32 = vpop.f32.mrb[43].mxu1  ;;  %3193 = vmatprep.mubr.bf16.mxu0 %v17204_v1  ;;  %14945 = vmatpush3.bf16.msra.mxu0 %v16418_v51  ;;  %v16443_v51 = vld [vmem:[#allocation14 + $0x7c] ss:$12 sps:$4 sm:$0xff]  }
 0x813   :  { %v2919_v33 = vadd.f32 %v14920_v46, %v2918_v37  ;;  %v14923_v34 = vadd.f32 %v14922_v32, %v14921_v30  ;;  %v2921_v19 = vpop.f32.mrb[39].mxu0  ;;  %14946 = vmatprep.subr.bf16.mxu0 %v16419_v35  ;;  %v16436_v46 = vld [vmem:[#allocation14 + $0x170] ss:$12 sps:$4 sm:$0xff]   ;;  %v16442_v32 = vld [vmem:[#allocation14 + $0x60] ss:$12 sps:$4 sm:$0xff]  }
 0x814   :  { %v16437_v37 = vld [vmem:[#allocation14 + $0x30] ss:$12 sps:$4 sm:$0xff]   ;;  %v16448_v35 = vld [vmem:[#allocation14 + $0xa8] ss:$12 sps:$4 sm:$0xff]  }
 0x815   :  { %v2922_v36 = vadd.f32 %v14923_v34, %v2921_v19  ;;  %v16438_v30 = vld [vmem:[#allocation14 + $0xb0] ss:$12 sps:$4 sm:$0xff]   ;;  %v16445_v34 = vld [vmem:[#allocation14 + $0x94] ss:$12 sps:$4 sm:$0xff]  }
 0x816   :  { %14947 = vmatpush3.bf16.msra.mxu0 %v16420_v42  ;;  %v16446_v19 = vld [vmem:[#allocation14 + $0x90] ss:$12 sps:$4 sm:$0xff]  }
 0x817   :  { %v2937_v45 = vpack.c.bf16 %v2922_v36, %v2919_v33  ;;  %v14924_v47 = vpop.f32.mrb[44].mxu1  ;;  %14948 = vmatprep.subr.bf16.mxu0 %v16421_v8  ;;  %v16444_v33 = vld [vmem:[#allocation14 + $0x78] ss:$12 sps:$4 sm:$0xff]   ;;  %v16451_v42 = vld [vmem:[#allocation14 + $0xdc] ss:$12 sps:$4 sm:$0xff]  }
 0x818   :  { %v14925_v49 = vpop.f32.mrb[45].mxu1  ;;  %v16449_v36 = vld [vmem:[#allocation14 + $0xc4] ss:$12 sps:$4 sm:$0xff]  }
 0x819   :  { %v14926_v53 = vadd.f32 %v14925_v49, %v14924_v47  ;;  %v14927_v54 = vpop.f32.mrb[46].mxu1  ;;  %15283 = vmatprep.subr.bf16.mxu1 %v2937_v45  ;;  %13691 = vmatmul.mubr.msk.bf16.gmra.mrb[52].mxu0 %vm506_vm1, %v17819_v48  ;;  %v16453_v47 = vld [vmem:[#allocation14 + $0xf4] ss:$12 sps:$4 sm:$0xff]   ;;  %v16454_v8 = vld [vmem:[#allocation14 + $0xf0] ss:$12 sps:$4 sm:$0xff]  }
 0x81a   :  { %v14928_v56 = vpop.f32.mrb[47].mxu1  ;;  %15284 = vmatpush3.bf16.msra.mxu1 %v2937_v45  ;;  %14949 = vmatpush3.bf16.msra.mxu0 %v16422_v58  ;;  %v16452_v45 = vld [vmem:[#allocation14 + $0xd8] ss:$12 sps:$4 sm:$0xff]   ;;  %v16459_v58 = vld [vmem:[#allocation14 + $0x13c] ss:$12 sps:$4 sm:$0xff]  }
 0x81b   :  { %v2927_v57 = vadd.f32 %v15281_v29, %v14926_v53  ;;  %v14929_v60 = vadd.f32 %v14928_v56, %v14927_v54  ;;  %14950 = vmatprep.subr.bf16.mxu0 %v16423_v18  ;;  %v16434_v29 = vld [vmem:[#allocation14 + $0x98] ss:$12 sps:$4 sm:$0xff]   ;;  %v16456_v53 = vld [vmem:[#allocation14 + $0x108] ss:$12 sps:$4 sm:$0xff]   ;;  %v16458_v56 = vld [vmem:[#allocation14 + $0x120] ss:$12 sps:$4 sm:$0xff]  }
 0x81c   :  { %v16455_v49 = vld [vmem:[#allocation14 + $0x10c] ss:$12 sps:$4 sm:$0xff]   ;;  %v16457_v54 = vld [vmem:[#allocation14 + $0x124] ss:$12 sps:$4 sm:$0xff]  }
 0x81d   :  { %v2930_v61 = vadd.f32 %v15282_v31, %v14929_v60  ;;  %v16441_v31 = vld [vmem:[#allocation14 + $0x64] ss:$12 sps:$4 sm:$0xff]   ;;  %v16461_v60 = vld [vmem:[#allocation14 + $0x154] ss:$12 sps:$4 sm:$0xff]  }
 0x81e   :  { %14951 = vmatpush3.bf16.msra.mxu0 %v16424_v62  ;;  %v16462_v18 = vld [vmem:[#allocation14 + $0x150] ss:$12 sps:$4 sm:$0xff]   ;;  %v16464_v62 = vld [vmem:[#allocation14 + $0x168] ss:$12 sps:$4 sm:$0xff]  }
 0x81f   :  { %v2942_v9 = vpack.c.bf16 %v2930_v61, %v2927_v57  ;;  %14952 = vmatprep.subr.bf16.mxu0 %v16425_v10  ;;  %v16460_v57 = vld [vmem:[#allocation14 + $0x138] ss:$12 sps:$4 sm:$0xff]   ;;  %v17828_v10 = vsub.s32 3, %v17551_v2 }
 0x820   :  { %v16463_v61 = vld [vmem:[#allocation14 + $0x16c] ss:$12 sps:$4 sm:$0xff]  }
 0x821   :  { %15285 = vmatprep.subr.bf16.mxu1 %v2942_v9 }
 0x822   :  { %15286 = vmatpush3.bf16.msra.mxu1 %v2942_v9  ;;  %14953 = vmatpush3.bf16.msra.mxu0 %v16426_v13  ;;  %v17825_v9 = vld [vmem:[#allocation19] sm:$0x1f] }
 0x823   :  { %3216 = vmatprep.subr.bf16.mxu1 %v16427_v16  ;;  %14954 = vmatprep.subr.bf16.mxu0 %v16428_v43  ;;  %v2948_v13 = vrot.slane %v17825_v9, %v17647_v24  ;;  %v2956_v16 = vrot.slane %v17825_v9, %v17732_v21  ;;  %v2952_v43 = vrot.slane %v17825_v9, %v17650_v25 }
 0x825   :  { %15288 = vmatmul.mubr.msk.bf16.vlgmr.msra.gmra.mrb[56].mxu1 %vm506_vm1, %v17703_v39  ;;  %v16439_v39 = vld [vmem:[#allocation14 + $0x4c] ss:$12 sps:$4 sm:$0xff]  }
 0x826   :  { %3217 = vmatpush1.bf16.msra.mxu1 %v16429_v26  ;;  %14955 = vmatpush3.bf16.msra.mxu0 %v16430_v27  ;;  %v2960_v26 = vrot.slane %v17825_v9, %v17828_v10 }
 0x827   :  { %3218 = vmatprep.subr.bf16.mxu1 %v16431_v7  ;;  %14956 = vmatprep.subr.bf16.mxu0 %v16432_v50 }
 0x82a   :  { %3219 = vmatpush1.bf16.msra.mxu1 %v16433_v59  ;;  %14957 = vmatpush3.bf16.msra.mxu0 %v16434_v29 }
 0x82b   :  { %3220 = vmatprep.subr.bf16.mxu1 %v16435_v63  ;;  %14958 = vmatprep.subr.bf16.mxu0 %v16436_v46 }
 0x82e   :  { %3221 = vmatpush1.bf16.msra.mxu1 %v16437_v37  ;;  %14959 = vmatpush3.bf16.msra.mxu0 %v16438_v30 }
 0x82f   :  { %3222 = vmatprep.subr.bf16.mxu1 %v16439_v39 }
 0x832   :  { %3223 = vmatpush1.bf16.msra.mxu1 %v16440_v41 }
 0x833   :  { %3224 = vmatprep.subr.bf16.mxu1 %v16441_v31 }
 0x836   :  { %3225 = vmatpush1.bf16.msra.mxu1 %v16442_v32 }
 0x837   :  { %3226 = vmatprep.subr.bf16.mxu1 %v16443_v51 }
 0x83a   :  { %3227 = vmatpush1.bf16.msra.mxu1 %v16444_v33 }
 0x83b   :  { %3228 = vmatprep.subr.bf16.mxu1 %v16445_v34 }
 0x83e   :  { %3229 = vmatpush1.bf16.msra.mxu1 %v16446_v19 }
 0x83f   :  { %3230 = vmatprep.subr.bf16.mxu1 %v16447_v12 }
 0x842   :  { %3231 = vmatpush1.bf16.msra.mxu1 %v16448_v35 }
 0x843   :  { %3232 = vmatprep.subr.bf16.mxu1 %v16449_v36 }
 0x846   :  { %3233 = vmatpush1.bf16.msra.mxu1 %v16450_v40 }
 0x847   :  { %3234 = vmatprep.subr.bf16.mxu1 %v16451_v42 }
 0x84a   :  { %3235 = vmatpush1.bf16.msra.mxu1 %v16452_v45 }
 0x84b   :  { %3236 = vmatprep.subr.bf16.mxu1 %v16453_v47 }
 0x84e   :  { %3237 = vmatpush1.bf16.msra.mxu1 %v16454_v8 }
 0x84f   :  { %3238 = vmatprep.subr.bf16.mxu1 %v16455_v49 }
 0x852   :  { %3239 = vmatpush1.bf16.msra.mxu1 %v16456_v53 }
 0x853   :  { %3240 = vmatprep.subr.bf16.mxu1 %v16457_v54 }
 0x856   :  { %3241 = vmatpush1.bf16.msra.mxu1 %v16458_v56 }
 0x857   :  { %3242 = vmatprep.subr.bf16.mxu1 %v16459_v58 }
 0x85a   :  { %3243 = vmatpush1.bf16.msra.mxu1 %v16460_v57  ;;  %v17839_v57 = vsub.s32 4, %v17551_v2 }
 0x85b   :  { %3244 = vmatprep.subr.bf16.mxu1 %v16461_v60 }
 0x85e   :  { %3245 = vmatpush1.bf16.msra.mxu1 %v16462_v18 }
 0x85f   :  { %3246 = vmatprep.subr.bf16.mxu1 %v16463_v61 }
 0x862   :  { %3247 = vmatpush1.bf16.msra.mxu1 %v16464_v62 }
 0x8d4   :  { %v3004_v27 = vpop.f32.mrb[48].mxu1  ;;  %v3057_v7 = vpop.f32.mrb[40].mxu0 }
 0x8d5   :  { %v3005_v50 = vadd.f32 %v3004_v27, %v2948_v13  ;;  %v3058_v59 = vadd.f32 %v3057_v7, %v2956_v16  ;;  %v3006_v29 = vpop.f32.mrb[49].mxu1  ;;  %v3059_v63 = vpop.f32.mrb[41].mxu0 }
 0x8d6   :  { %v3007_v46 = vadd.f32 %v3006_v29, %v2952_v43  ;;  %v3060_v37 = vadd.f32 %v3059_v63, %v2960_v26  ;;  %v3008_v30 = vpop.f32.mrb[50].mxu1  ;;  %v3061_v39 = vpop.f32.mrb[42].mxu0 }
 0x8d7   :  { %v3009_v41 = vadd.f32 %v3008_v30, %v2948_v13  ;;  %v3062_v31 = vadd.f32 %v3061_v39, %v2956_v16  ;;  %v3010_v32 = vpop.f32.mrb[51].mxu1  ;;  %v3063_v51 = vpop.f32.mrb[43].mxu0  ;;  %v3125_v19 = vmax.f32 %v3005_v50, 0.0  ;;  %v3127_v12 = vmax.f32 %v3058_v59, 0.0 }
 0x8d8   :  { %v3011_v33 = vadd.f32 %v3010_v32, %v2952_v43  ;;  %v3064_v34 = vadd.f32 %v3063_v51, %v2960_v26  ;;  %v3126_v40 = vmax.f32 %v3007_v46, 0.0  ;;  %v3128_v42 = vmax.f32 %v3060_v37, 0.0 }
 0x8d9   :  { %v3130_v35 = vmax.f32 %v3009_v41, 0.0  ;;  %v3132_v36 = vmax.f32 %v3062_v31, 0.0 }
 0x8da   :  { %v3131_v45 = vmax.f32 %v3011_v33, 0.0  ;;  %v3133_v47 = vmax.f32 %v3064_v34, 0.0 }
 0x8db   :  { %v3505_v8 = vmax.f32 %v3125_v19, %v3130_v35  ;;  %v3519_v49 = vmax.f32 %v3127_v12, %v3132_v36 }
 0x8dc   :  { %v3512_v53 = vmax.f32 %v3126_v40, %v3131_v45  ;;  %v3526_v54 = vmax.f32 %v3128_v42, %v3133_v47  ;;  %v3014_v56 = vpop.f32.mrb[52].mxu1  ;;  %v3067_v58 = vpop.f32.mrb[44].mxu0 }
 0x8dd   :  { %v3506_v60 = vrot.slane %v3505_v8, 4  ;;  %v3520_v18 = vrot.slane %v3519_v49, 4  ;;  %v3015_v61 = vadd.f32 %v3014_v56, %v2948_v13  ;;  %v3068_v62 = vadd.f32 %v3067_v58, %v2956_v16  ;;  %v3016_v27 = vpop.f32.mrb[53].mxu1  ;;  %v3069_v7 = vpop.f32.mrb[45].mxu0 }
 0x8de   :  { %v3513_v50 = vrot.slane %v3512_v53, 4  ;;  %v3527_v59 = vrot.slane %v3526_v54, 4  ;;  %v3017_v29 = vadd.f32 %v3016_v27, %v2952_v43  ;;  %v3070_v63 = vadd.f32 %v3069_v7, %v2960_v26  ;;  %v3018_v46 = vpop.f32.mrb[54].mxu1  ;;  %v3071_v37 = vpop.f32.mrb[46].mxu0 }
 0x8df   :  { %v3507_v30 = vmax.f32 %v3505_v8, %v3506_v60  ;;  %v3521_v39 = vmax.f32 %v3519_v49, %v3520_v18  ;;  %v3135_v41 = vmax.f32 %v3015_v61, 0.0  ;;  %v3137_v31 = vmax.f32 %v3068_v62, 0.0  ;;  %v3020_v32 = vpop.f32.mrb[55].mxu1  ;;  %v3073_v51 = vpop.f32.mrb[47].mxu0 }
 0x8e0   :  { %v3514_v33 = vmax.f32 %v3512_v53, %v3513_v50  ;;  %v3528_v34 = vmax.f32 %v3526_v54, %v3527_v59  ;;  %v3136_v19 = vmax.f32 %v3017_v29, 0.0  ;;  %v3138_v12 = vmax.f32 %v3070_v63, 0.0 }
 0x8e1   :  { %v3508_v35 = vrot.slane %v3507_v30, 2  ;;  %v3522_v36 = vrot.slane %v3521_v39, 2  ;;  %v3019_v40 = vadd.f32 %v3018_v46, %v2948_v13  ;;  %v3072_v42 = vadd.f32 %v3071_v37, %v2956_v16 }
 0x8e2   :  { %v3515_v45 = vrot.slane %v3514_v33, 2  ;;  %v3529_v47 = vrot.slane %v3528_v34, 2  ;;  %v3021_v56 = vadd.f32 %v3020_v32, %v2952_v43  ;;  %v3074_v58 = vadd.f32 %v3073_v51, %v2960_v26 }
 0x8e3   :  { %v3509_v27 = vmax.f32 %v3507_v30, %v3508_v35  ;;  %v3523_v7 = vmax.f32 %v3521_v39, %v3522_v36  ;;  %v3140_v8 = vmax.f32 %v3019_v40, 0.0  ;;  %v3142_v49 = vmax.f32 %v3072_v42, 0.0 }
 0x8e4   :  { %v3516_v60 = vmax.f32 %v3514_v33, %v3515_v45  ;;  %v3530_v18 = vmax.f32 %v3528_v34, %v3529_v47  ;;  %v3141_v61 = vmax.f32 %v3021_v56, 0.0  ;;  %v3143_v62 = vmax.f32 %v3074_v58, 0.0  ;;  %v3185_v53 = vpop.f32.mrb[48].mxu0 }
 0x8e5   :  { %v3510_v54 = vrot.slane %v3509_v27, 1  ;;  %v3524_v50 = vrot.slane %v3523_v7, 1  ;;  %v3540_v59 = vmax.f32 %v3135_v41, %v3140_v8  ;;  %v3554_v29 = vmax.f32 %v3137_v31, %v3142_v49  ;;  %v3187_v63 = vpop.f32.mrb[49].mxu0 }
 0x8e6   :  { %v3517_v13 = vrot.slane %v3516_v60, 1  ;;  %v3531_v16 = vrot.slane %v3530_v18, 1  ;;  %v3547_v46 = vmax.f32 %v3136_v19, %v3141_v61  ;;  %v3561_v37 = vmax.f32 %v3138_v12, %v3143_v62  ;;  %v3189_v43 = vpop.f32.mrb[50].mxu0 }
 0x8e7   :  { %v3511_v26 = vmax.f32 %v3509_v27, %v3510_v54  ;;  %v3525_v30 = vmax.f32 %v3523_v7, %v3524_v50  ;;  %v3541_v39 = vrot.slane %v3540_v59, 4  ;;  %v3555_v32 = vrot.slane %v3554_v29, 4  ;;  %v3191_v51 = vpop.f32.mrb[51].mxu0 }
 0x8e8   :  { %v3518_v33 = vmax.f32 %v3516_v60, %v3517_v13  ;;  %v3532_v34 = vmax.f32 %v3530_v18, %v3531_v16  ;;  %v3548_v35 = vrot.slane %v3547_v46, 4  ;;  %v3562_v36 = vrot.slane %v3561_v37, 4 }
 0x8e9   :  { %v3542_v40 = vmax.f32 %v3540_v59, %v3541_v39  ;;  %v3556_v42 = vmax.f32 %v3554_v29, %v3555_v32  ;;  %v17843_v31 = vrot.slane %v17825_v9, %v17839_v57  ;;  %v3645_v19 = vpack.c.bf16 %v3511_v26, %v3511_v26 }
 0x8ea   :  { %v3549_v45 = vmax.f32 %v3547_v46, %v3548_v35  ;;  %v3563_v41 = vmax.f32 %v3561_v37, %v3562_v36  ;;  %v3647_v12 = vpack.c.bf16 %v3525_v30, %v3525_v30  ;;  %v3646_v58 = vpack.c.bf16 %v3518_v33, %v3518_v33 }
 0x8eb   :  { %v3543_v47 = vrot.slane %v3542_v40, 2  ;;  %v3557_v56 = vrot.slane %v3556_v42, 2  ;;  %v3648_v27 = vpack.c.bf16 %v3532_v34, %v3532_v34  ;;  %v3186_v61 = vadd.f32 %v3185_v53, %v17708_v20 }
 0x8ec   :  { %v3550_v7 = vrot.slane %v3549_v45, 2  ;;  %v3564_v8 = vrot.slane %v3563_v41, 2  ;;  %v3195_v49 = vpop.f32.mrb[52].mxu0  ;;  %v3188_v62 = vadd.f32 %v3187_v63, %v17711_v11  ;;  %v3190_v59 = vadd.f32 %v3189_v43, %v17708_v20 }
 0x8ed   :  { %v3544_v60 = vmax.f32 %v3542_v40, %v3543_v47  ;;  %v3558_v18 = vmax.f32 %v3556_v42, %v3557_v56  ;;  %v3197_v54 = vpop.f32.mrb[53].mxu0  ;;  %v3192_v29 = vadd.f32 %v3191_v51, %v17711_v11  ;;  %v3204_v37 = vmax.f32 %v3186_v61, 0.0 }
 0x8ee   :  { %v3551_v50 = vmax.f32 %v3549_v45, %v3550_v7  ;;  %v3565_v9 = vmax.f32 %v3563_v41, %v3564_v8  ;;  %v3199_v13 = vpop.f32.mrb[54].mxu0  ;;  %v3205_v26 = vmax.f32 %v3188_v62, 0.0  ;;  %v3206_v33 = vmax.f32 %v3190_v59, 0.0 }
 0x8ef   :  { %v3545_v16 = vrot.slane %v3544_v60, 1  ;;  %v3559_v46 = vrot.slane %v3558_v18, 1  ;;  %v3201_v30 = vpop.f32.mrb[55].mxu0  ;;  %v3207_v34 = vmax.f32 %v3192_v29, 0.0  ;;  %v5493_v53 = vunpack.c.l.b16 %v3645_v19 }
 0x8f0   :  { %v3552_v39 = vrot.slane %v3551_v50, 1  ;;  %v3566_v32 = vrot.slane %v3565_v9, 1  ;;  %v3196_v36 = vadd.f32 %v3195_v49, %v17708_v20  ;;  %v3212_v43 = vpack.c.bf16 %v3206_v33, %v3204_v37 }
 0x8f1   :  { %v3546_v35 = vmax.f32 %v3544_v60, %v3545_v16  ;;  %v3560_v63 = vmax.f32 %v3558_v18, %v3559_v46  ;;  %v3213_v45 = vpack.c.bf16 %v3207_v34, %v3205_v26  ;;  %v5495_v51 = vunpack.c.l.b16 %v3647_v12 }
 0x8f2   :  { %v3553_v40 = vmax.f32 %v3551_v50, %v3552_v39  ;;  %v3567_v42 = vmax.f32 %v3565_v9, %v3566_v32  ;;  %v3198_v56 = vadd.f32 %v3197_v54, %v17711_v11  ;;  %v5494_v7 = vunpack.c.l.b16 %v3646_v58 }
 0x8f3   :  { %v3650_v41 = vpack.c.bf16 %v3546_v35, %v3546_v35  ;;  %v3652_v47 = vpack.c.bf16 %v3560_v63, %v3560_v63  ;;  %v3200_v62 = vadd.f32 %v3199_v13, %v17708_v20  ;;  %3248 = vmatprep.mubr.bf16.mxu1 %v3213_v45  ;;  %3301 = vmatprep.mubr.bf16.mxu0 %v3213_v45  ;;  %v5496_v19 = vunpack.c.l.b16 %v3648_v27 }
 0x8f4   :  { %v3651_v8 = vpack.c.bf16 %v3553_v40, %v3553_v40  ;;  %v3653_v61 = vpack.c.bf16 %v3567_v42, %v3567_v42  ;;  %v3202_v49 = vadd.f32 %v3201_v30, %v17711_v11  ;;  %3249 = vmatmul.mubr.bf16.vlgmr.msra.gmra.mrb[60].mxu1 %v3212_v43  ;;  %3302 = vmatmul.mubr.bf16.vlgmr.msra.gmra.mrb[56].mxu0 %v3212_v43  ;;  %v3208_v9 = vmax.f32 %v3196_v36, 0.0 }
 0x8f5   :  { %v5498_v60 = vunpack.c.l.b16 %v3650_v41  ;;  %v5500_v18 = vunpack.c.l.b16 %v3652_v47  ;;  %v3210_v59 = vmax.f32 %v3200_v62, 0.0  ;;  %v3209_v29 = vmax.f32 %v3198_v56, 0.0 }
 0x8f6   :  { %v5499_v50 = vunpack.c.l.b16 %v3651_v8  ;;  %v5501_v12 = vunpack.c.l.b16 %v3653_v61  ;;  %v3211_v54 = vmax.f32 %v3202_v49, 0.0 }
 0x8f7   :  { %v17854_v58 = vsel %vm4185_vm13, %v5498_v60, %v5493_v53  ;;  %v17857_v13 = vsel %vm4185_vm13, %v5500_v18, %v5495_v51  ;;  %v3214_v16 = vpack.c.bf16 %v3210_v59, %v3208_v9 }
 0x8f8   :  { %v15289_v27 = vpop.f32.mrb[56].mxu1  ;;  %v17860_v46 = vsel %vm4185_vm13, %v5499_v50, %v5494_v7  ;;  %v17863_v37 = vsel %vm4185_vm13, %v5501_v12, %v5496_v19  ;;  %v3215_v26 = vpack.c.bf16 %v3211_v54, %v3209_v29  ;;  %v3981_v29 = vld [vmem:[#allocation22] sm:$0xff] }
 0x8f9   :  { %v3119_v30 = vadd.f32 %v15289_v27, %v17843_v31  ;;  %v3110_v39 = vpop.f32.mrb[57].mxu1  ;;  %v3985_v54 = vld [vmem:[#allocation22 + $0x20] sm:$0xff] }
 0x8fa   :  { %v3111_v32 = vadd.f32 %v3110_v39, %v17843_v31  ;;  %v15290_v33 = vpop.f32.mrb[58].mxu1  ;;  %3258 = vmatprep.mubr.bf16.mxu1 %v3215_v26  ;;  %3309 = vmatprep.mubr.bf16.mxu0 %v3215_v26  ;;  %v13698_v27 = vcombine.low %v3981_v29, %v3985_v54  ;;  %v13699_v26 = vcombine.high %v3981_v29, %v3985_v54 }
 0x8fb   :  { %v3122_v34 = vadd.f32 %v15290_v33, %v17843_v31  ;;  %v3113_v53 = vpop.f32.mrb[59].mxu1  ;;  %v3139_v63 = vmax.f32 %v3119_v30, 0.0  ;;  %v3993_v30 = vld [vmem:[#allocation22 + $0x60] sm:$0xff] }
 0x8fc   :  { %v3114_v35 = vadd.f32 %v3113_v53, %v17843_v31  ;;  %3259 = vmatmul.mubr.bf16.gmra.mrb[64].mxu1 %v3214_v16  ;;  %3310 = vmatmul.mubr.bf16.gmra.mrb[60].mxu0 %v3214_v16  ;;  %v3129_v40 = vmax.f32 %v3111_v32, 0.0  ;;  %v3989_v16 = vld [vmem:[#allocation22 + $0x40] sm:$0xff] }
 0x8fd   :  { %v3144_v36 = vmax.f32 %v3122_v34, 0.0  ;;  %3356 = vmatprep.mubr.bf16.mxu0 %v17204_v1  ;;  %v13707_v39 = vcombine.high %v3989_v16, %v3993_v30  ;;  %v3997_v32 = vld [vmem:[#allocation22 + $0x80] sm:$0xff]  ;;  %5155 = vmatprep.subr.bf16.mxu1 %v13699_v26  ;;  %v13706_v34 = vcombine.low %v3989_v16, %v3993_v30 }
 0x8fe   :  { %v3134_v42 = vmax.f32 %v3114_v35, 0.0  ;;  %v4001_v33 = vld [vmem:[#allocation22 + $0xa0] sm:$0xff]  ;;  %5156 = vmatpush1.bf16.msra.mxu1 %v13698_v27 }
 0x8ff   :  { %v3568_v43 = vmax.f32 %v3139_v63, %v3144_v36  ;;  %5157 = vmatprep.subr.bf16.mxu1 %v13707_v39  ;;  %v13715_v53 = vcombine.high %v3997_v32, %v4001_v33  ;;  %v4005_v35 = vld [vmem:[#allocation22 + $0xc0] sm:$0xff]  ;;  %v13714_v36 = vcombine.low %v3997_v32, %v4001_v33 }
 0x900   :  { %v3533_v45 = vmax.f32 %v3129_v40, %v3134_v42  ;;  %v4009_v63 = vld [vmem:[#allocation22 + $0xe0] sm:$0xff] }
 0x901   :  { %v3569_v51 = vrot.slane %v3568_v43, 4  ;;  %v13723_v40 = vcombine.high %v4005_v35, %v4009_v63  ;;  %v4013_v42 = vld [vmem:[#allocation22 + $0x100] sm:$0xff] }
 0x902   :  { %v3534_v41 = vrot.slane %v3533_v45, 4  ;;  %5158 = vmatpush1.bf16.msra.mxu1 %v13706_v34 }
 0x903   :  { %v3570_v47 = vmax.f32 %v3568_v43, %v3569_v51  ;;  %5159 = vmatprep.subr.bf16.mxu1 %v13715_v53  ;;  %v4017_v43 = vld [vmem:[#allocation22 + $0x120] sm:$0xff] }
 0x904   :  { %v3535_v56 = vmax.f32 %v3533_v45, %v3534_v41  ;;  %v13722_v45 = vcombine.low %v4005_v35, %v4009_v63  ;;  %v13731_v51 = vcombine.high %v4013_v42, %v4017_v43  ;;  %v4021_v41 = vld [vmem:[#allocation22 + $0x140] sm:$0xff] }
 0x905   :  { %v3571_v7 = vrot.slane %v3570_v47, 2 }
 0x906   :  { %v3536_v8 = vrot.slane %v3535_v56, 2  ;;  %5160 = vmatpush1.bf16.msra.mxu1 %v13714_v36 }
 0x907   :  { %v3572_v61 = vmax.f32 %v3570_v47, %v3571_v7  ;;  %5161 = vmatprep.subr.bf16.mxu1 %v13723_v40  ;;  %v4025_v47 = vld [vmem:[#allocation22 + $0x160] sm:$0xff] }
 0x908   :  { %v3537_v62 = vmax.f32 %v3535_v56, %v3536_v8  ;;  %v13730_v56 = vcombine.low %v4013_v42, %v4017_v43  ;;  %v13739_v7 = vcombine.high %v4021_v41, %v4025_v47  ;;  %v4029_v8 = vld [vmem:[#allocation22 + $0x180] sm:$0xff] }
 0x909   :  { %v3573_v19 = vrot.slane %v3572_v61, 1 }
 0x90a   :  { %v3538_v31 = vrot.slane %v3537_v62, 1  ;;  %5162 = vmatpush1.bf16.msra.mxu1 %v13722_v45 }
 0x90b   :  { %v3574_v60 = vmax.f32 %v3572_v61, %v3573_v19  ;;  %5163 = vmatprep.subr.bf16.mxu1 %v13731_v51  ;;  %v4033_v61 = vld [vmem:[#allocation22 + $0x1a0] sm:$0xff] }
 0x90c   :  { %v3539_v18 = vmax.f32 %v3537_v62, %v3538_v31  ;;  %v13738_v62 = vcombine.low %v4021_v41, %v4025_v47  ;;  %v13747_v19 = vcombine.high %v4029_v8, %v4033_v61  ;;  %v13746_v31 = vcombine.low %v4029_v8, %v4033_v61 }
 0x90d   :  { %v3654_v49 = vpack.c.bf16 %v3574_v60, %v3574_v60 }
 0x90e   :  { %v3649_v50 = vpack.c.bf16 %v3539_v18, %v3539_v18  ;;  %5164 = vmatpush1.bf16.msra.mxu1 %v13730_v56 }
 0x90f   :  { %v5502_v12 = vunpack.c.l.b16 %v3654_v49  ;;  %5165 = vmatprep.subr.bf16.mxu1 %v13739_v7  ;;  %v746_v49 = vrot.slane %v17678_v38, 4 }
 0x910   :  { %v5497_v9 = vunpack.c.l.b16 %v3649_v50 }
 0x911   :  { %v747_v32 = vadd.f32 %v746_v49, %v17678_v38  ;;  %v732_v38 = vpop.xlane.xlu1 %731 }
 0x912   :  { %v17871_v59 = vsel %vm4185_vm13, %v5502_v12, %v5497_v9  ;;  %5166 = vmatpush1.bf16.msra.mxu1 %v13738_v62  ;;  %v729_v62 = vpop.xlane.xlu0 %728  ;;  %16395 = vrsqrt.f32 %v732_v38  ;;  %v4073_v38 = vld [vmem:[#allocation22 + $0x2e0] sm:$0xff] }
 0x913   :  { %5167 = vmatprep.subr.bf16.mxu1 %v13747_v19  ;;  %v748_v35 = vrot.slane %v747_v32, 2  ;;  %16397 = vrsqrt.f32 %v729_v62 }
 0x915   :  { %v749_v7 = vadd.f32 %v748_v35, %v747_v32 }
 0x916   :  { %5168 = vmatpush1.bf16.msra.mxu1 %v13746_v31  ;;  %v738_v31 = vpop.xlane.xlu1 %737 }
 0x917   :  { %v750_v61 = vrot.slane %v749_v7, 1 }
 0x919   :  { %v751_v19 = vadd.f32 %v750_v61, %v749_v7 }
 0x91b   :  { %16399 = vrsqrt.f32 %v751_v19 }
 0x91c   :  { %16401 = vrsqrt.f32 %v738_v31  ;;  %v4125_v31 = vld [vmem:[#allocation22 + $0x480] sm:$0xff] }
 0x9c7   :  { %v3250_v60 = vpop.f32.mrb[60].mxu1  ;;  %v14960_v18 = vpop.f32.mrb[56].mxu0 }
 0x9c8   :  { %v3252_v50 = vpop.f32.mrb[61].mxu1  ;;  %v14961_v12 = vpop.f32.mrb[57].mxu0 }
 0x9c9   :  { %v14962_v9 = vadd.f32 %v14961_v12, %v14960_v18  ;;  %v3254_v29 = vpop.f32.mrb[62].mxu1  ;;  %v14963_v54 = vpop.f32.mrb[58].mxu0 }
 0x9ca   :  { %v3318_v16 = vpack.c.bf16 %v3254_v29, %v3250_v60  ;;  %v3256_v27 = vpop.f32.mrb[63].mxu1  ;;  %v14964_v26 = vpop.f32.mrb[59].mxu0 }
 0x9cb   :  { %v3319_v30 = vpack.c.bf16 %v3256_v27, %v3252_v50  ;;  %v14965_v39 = vadd.f32 %v14964_v26, %v14963_v54  ;;  %v735_v60 = vpop.xlane.xlu0 %734  ;;  %v16396_v18 = vpop.eup %16395  ;;  %v4041_v26 = vld [vmem:[#allocation22 + $0x1e0] sm:$0xff] }
 0x9cc   :  { %16403 = vrsqrt.f32 %v735_v60  ;;  %v16398_v49 = vpop.eup %16397  ;;  %v754_v50 = vmul.f32 %v16396_v18, %v17664_v14  ;;  %v4129_v60 = vld [vmem:[#allocation22 + $0x4a0] sm:$0xff] }
 0x9cd   :  { %v3320_v33 = vpack.c.bf16 %v14965_v39, %v14962_v9  ;;  %3324 = vmatprep.subr.bf16.mxu0 %v3319_v30  ;;  %v753_v12 = vmul.f32 %v16398_v49, %v17657_v6  ;;  %v4049_v39 = vld [vmem:[#allocation22 + $0x220] sm:$0xff]  ;;  %v13843_v18 = vcombine.high %v4125_v31, %v4129_v60 }
 0x9ce   :  { %3325 = vmatpush1.bf16.msra.mxu0 %v3318_v16  ;;  %v4077_v49 = vld [vmem:[#allocation22 + $0x300] sm:$0xff] }
 0x9cf   :  { %v3260_v34 = vpop.f32.mrb[64].mxu1  ;;  %v14966_v53 = vpop.f32.mrb[60].mxu0 }
 0x9d0   :  { %v3262_v63 = vpop.f32.mrb[65].mxu1  ;;  %v14967_v36 = vpop.f32.mrb[61].mxu0 }
 0x9d1   :  { %v14968_v40 = vadd.f32 %v14967_v36, %v14966_v53  ;;  %v3264_v42 = vpop.f32.mrb[66].mxu1  ;;  %v14969_v43 = vpop.f32.mrb[62].mxu0  ;;  %v4113_v36 = vld [vmem:[#allocation22 + $0x420] sm:$0xff] }
 0x9d2   :  { %v3321_v45 = vpack.c.bf16 %v3264_v42, %v3260_v34  ;;  %v3266_v51 = vpop.f32.mrb[67].mxu1  ;;  %v14970_v41 = vpop.f32.mrb[63].mxu0  ;;  %v4057_v34 = vld [vmem:[#allocation22 + $0x260] sm:$0xff] }
 0x9d3   :  { %v3322_v47 = vpack.c.bf16 %v3266_v51, %v3262_v63  ;;  %v14971_v56 = vadd.f32 %v14970_v41, %v14969_v43  ;;  %v4109_v63 = vld [vmem:[#allocation22 + $0x400] sm:$0xff] }
 0x9d4   :  { %v4061_v42 = vld [vmem:[#allocation22 + $0x280] sm:$0xff] }
 0x9d5   :  { %v3323_v8 = vpack.c.bf16 %v14971_v56, %v14968_v40  ;;  %3326 = vmatprep.subr.bf16.mxu0 %v3322_v47  ;;  %v13827_v40 = vcombine.high %v4109_v63, %v4113_v36  ;;  %v4065_v43 = vld [vmem:[#allocation22 + $0x2a0] sm:$0xff] }
 0x9d6   :  { %3327 = vmatpush1.bf16.msra.mxu0 %v3321_v45  ;;  %v13826_v45 = vcombine.low %v4109_v63, %v4113_v36  ;;  %v13779_v51 = vcombine.high %v4061_v42, %v4065_v43  ;;  %v13778_v41 = vcombine.low %v4061_v42, %v4065_v43  ;;  %v4117_v47 = vld [vmem:[#allocation22 + $0x440] sm:$0xff] }
 0x9d7   :  { %15291 = vmatprep.subr.bf16.mxu0 %v3320_v33  ;;  %v4121_v56 = vld [vmem:[#allocation22 + $0x460] sm:$0xff] }
 0x9d8   :  { %v13835_v7 = vcombine.high %v4117_v47, %v4121_v56  ;;  %v13834_v61 = vcombine.low %v4117_v47, %v4121_v56  ;;  %v4157_v42 = vld [vmem:[#allocation22 + $0x580] sm:$0xff] }
 0x9d9   :  { %13692 = vmatmul.mubr.msk.bf16.vlgmr.msra.gmra.mrb[64].mxu0 %vm506_vm1, %v17812_v28  ;;  %v4161_v43 = vld [vmem:[#allocation22 + $0x5a0] sm:$0xff] }
 0x9da   :  { %15292 = vmatpush3.bf16.msra.mxu0 %v3320_v33  ;;  %3366 = vmatprep.mubr.bf16.mxu0 %v17204_v1  ;;  %v13874_v47 = vcombine.low %v4157_v42, %v4161_v43 }
 0x9db   :  { %15293 = vmatprep.subr.bf16.mxu0 %v3323_v8 }
 0x9de   :  { %15294 = vmatpush3.bf16.msra.mxu0 %v3323_v8  ;;  %v4069_v8 = vld [vmem:[#allocation22 + $0x2c0] sm:$0xff] }
 0x9df   :  { %3444 = vmatprep.subr.bf16.mxu0 %v17684_v55  ;;  %v16400_v55 = vpop.eup %16399  ;;  %v13787_v62 = vcombine.high %v4069_v8, %v4073_v38  ;;  %v13786_v19 = vcombine.low %v4069_v8, %v4073_v38  ;;  %v4165_v8 = vld [vmem:[#allocation22 + $0x5c0] sm:$0xff] }
 0x9e0   :  { %v758_v9 = vmul.f32 %v16400_v55, %v754_v50  ;;  %v16402_v29 = vpop.eup %16401  ;;  %v4081_v50 = vld [vmem:[#allocation22 + $0x320] sm:$0xff] }
 0x9e1   :  { %13693 = vmatmul.mubr.msk.bf16.gmra.mrb[68].mxu0 %vm506_vm1, %v17819_v48  ;;  %v16404_v54 = vpop.eup %16403  ;;  %v756_v14 = vmul.f32 %v16402_v29, %v17672_v5  ;;  %v4045_v5 = vld [vmem:[#allocation22 + $0x200] sm:$0xff] }
 0x9e2   :  { %15295 = vmatprep.mubr.msk.bf16.mxu0 %vm506_vm1, %v17812_v28  ;;  %v757_v28 = vmul.f32 %v16400_v55, %v753_v12  ;;  %v755_v6 = vmul.f32 %v16404_v54, %v17667_v15  ;;  %v13763_v32 = vcombine.high %v4045_v5, %v4049_v39  ;;  %v13762_v33 = vcombine.low %v4045_v5, %v4049_v39  ;;  %v4053_v15 = vld [vmem:[#allocation22 + $0x240] sm:$0xff] }
 0x9e3   :  { %v13771_v53 = vcombine.high %v4053_v15, %v4057_v34  ;;  %v13770_v35 = vcombine.low %v4053_v15, %v4057_v34  ;;  %v13842_v12 = vcombine.low %v4125_v31, %v4129_v60  ;;  %v4133_v29 = vld [vmem:[#allocation22 + $0x4c0] sm:$0xff]  ;;  %v17907_v31 = vld [vmem:[#allocation22 + $0x28] sm:$0xff] }
 0x9e4   :  { %v761_v16 = vpack.c.bf16 %v758_v9, %v757_v28  ;;  %v13794_v9 = vcombine.low %v4077_v49, %v4081_v50  ;;  %v4137_v28 = vld [vmem:[#allocation22 + $0x4e0] sm:$0xff] }
 0x9e5   :  { %v13851_v54 = vcombine.high %v4133_v29, %v4137_v28  ;;  %v4153_v15 = vld [vmem:[#allocation22 + $0x560] sm:$0xff] }
 0x9e6   :  { %v4169_v38 = vld [vmem:[#allocation22 + $0x5e0] sm:$0xff] }
 0x9e9   :  { %15296 = vmatmul.mubr.msk.bf16.vlgmr.msra.gmra.mrb[72].mxu0 %vm506_vm1, %v17819_v48  ;;  %v759_v48 = vmul.f32 %v16400_v55, %v755_v6  ;;  %v13850_v6 = vcombine.low %v4133_v29, %v4137_v28 }
 0x9ea   :  { %3445 = vmatpush1.bf16.msra.mxu0 %v17682_v52  ;;  %3476 = vmatprep.mubr.bf16.mxu0 %v17204_v1  ;;  %v760_v52 = vmul.f32 %v16400_v55, %v756_v14  ;;  %v13795_v55 = vcombine.high %v4077_v49, %v4081_v50  ;;  %v4089_v14 = vld [vmem:[#allocation22 + $0x360] sm:$0xff] }
 0x9eb   :  { %3446 = vmatprep.subr.bf16.mxu0 %v17692_v17  ;;  %v4037_v17 = vld [vmem:[#allocation22 + $0x1c0] sm:$0xff] }
 0x9ec   :  { %v762_v27 = vpack.c.bf16 %v760_v52, %v759_v48  ;;  %v13755_v30 = vcombine.high %v4037_v17, %v4041_v26 }
 0x9ee   :  { %3447 = vmatpush1.bf16.msra.mxu0 %v17690_v0  ;;  %v13754_v0 = vcombine.low %v4037_v17, %v4041_v26  ;;  %5169 = vmatprep.subr.bf16.mxu1 %v13755_v30  ;;  %v4145_v17 = vld [vmem:[#allocation22 + $0x520] sm:$0xff] }
 0x9ef   :  { %5196 = vmatprep.subr.bf16.mxu0 %v13827_v40  ;;  %v4093_v30 = vld [vmem:[#allocation22 + $0x380] sm:$0xff] }
 0x9f0   :  { %5170 = vmatpush1.bf16.msra.mxu1 %v13754_v0  ;;  %v4097_v0 = vld [vmem:[#allocation22 + $0x3a0] sm:$0xff] }
 0x9f1   :  { %13696 = vmatmul.mubr.msk.bf16.vlgmr.msra.gmra.mrb[76].mxu0 %vm506_vm1, %v761_v16  ;;  %5171 = vmatprep.subr.bf16.mxu1 %v13763_v32  ;;  %v4085_v16 = vld [vmem:[#allocation22 + $0x340] sm:$0xff]  ;;  %v13811_v39 = vcombine.high %v4093_v30, %v4097_v0  ;;  %v13810_v32 = vcombine.low %v4093_v30, %v4097_v0 }
 0x9f2   :  { %3486 = vmatprep.mubr.bf16.mxu0 %v17204_v1  ;;  %5197 = vmatpush1.bf16.msra.mxu0 %v13826_v45  ;;  %v13803_v52 = vcombine.high %v4085_v16, %v4089_v14  ;;  %v13802_v48 = vcombine.low %v4085_v16, %v4089_v14  ;;  %v13875_v45 = vcombine.high %v4157_v42, %v4161_v43 }
 0x9f3   :  { %5198 = vmatprep.subr.bf16.mxu0 %v13835_v7 }
 0x9f4   :  { %5172 = vmatpush1.bf16.msra.mxu1 %v13762_v33  ;;  %v4149_v33 = vld [vmem:[#allocation22 + $0x540] sm:$0xff] }
 0x9f5   :  { %5173 = vmatprep.subr.bf16.mxu1 %v13771_v53  ;;  %v13867_v34 = vcombine.high %v4149_v33, %v4153_v15  ;;  %v4101_v53 = vld [vmem:[#allocation22 + $0x3c0] sm:$0xff]  ;;  %v13866_v63 = vcombine.low %v4149_v33, %v4153_v15 }
 0x9f6   :  { %5199 = vmatpush1.bf16.msra.mxu0 %v13834_v61  ;;  %v13883_v61 = vcombine.high %v4165_v8, %v4169_v38 }
 0x9f7   :  { %5200 = vmatprep.subr.bf16.mxu0 %v13843_v18 }
 0x9f8   :  { %5174 = vmatpush1.bf16.msra.mxu1 %v13770_v35  ;;  %v4105_v35 = vld [vmem:[#allocation22 + $0x3e0] sm:$0xff] }
 0x9f9   :  { %13697 = vmatmul.mubr.msk.bf16.gmra.mrb[80].mxu0 %vm506_vm1, %v762_v27  ;;  %5175 = vmatprep.subr.bf16.mxu1 %v13779_v51  ;;  %v4141_v27 = vld [vmem:[#allocation22 + $0x500] sm:$0xff]  ;;  %v13819_v36 = vcombine.high %v4101_v53, %v4105_v35  ;;  %v13818_v40 = vcombine.low %v4101_v53, %v4105_v35  ;;  %v17897_v51 = vld [vmem:[#allocation22 + $0x408] sm:$0xff] }
 0x9fa   :  { %5228 = vmatprep.mubr.bf16.mxu0 %v17204_v1  ;;  %5201 = vmatpush1.bf16.msra.mxu0 %v13842_v12  ;;  %v13859_v26 = vcombine.high %v4141_v27, %v4145_v17  ;;  %v13858_v5 = vcombine.low %v4141_v27, %v4145_v17 }
 0x9fb   :  { %5202 = vmatprep.subr.bf16.mxu0 %v13851_v54 }
 0x9fc   :  { %5176 = vmatpush1.bf16.msra.mxu1 %v13778_v41  ;;  %v17899_v41 = vld [vmem:[#allocation22 + $0x428] sm:$0xff] }
 0x9fd   :  { %5177 = vmatprep.subr.bf16.mxu1 %v13787_v62  ;;  %v13829_v56 = vcombine.high %v17897_v51, %v17899_v41  ;;  %v13828_v7 = vcombine.low %v17897_v51, %v17899_v41  ;;  %v13882_v62 = vcombine.low %v4165_v8, %v4169_v38  ;;  %v4134_v51 = vld [vmem:[#allocation22 + $0x4c8] sm:$0xff] }
 0x9fe   :  { %5203 = vmatpush1.bf16.msra.mxu0 %v13850_v6  ;;  %v4138_v41 = vld [vmem:[#allocation22 + $0x4e8] sm:$0xff] }
 0x9ff   :  { %5204 = vmatprep.subr.bf16.mxu0 %v13859_v26 }
 0xa00   :  { %5178 = vmatpush1.bf16.msra.mxu1 %v13786_v19  ;;  %v17905_v19 = vld [vmem:[#allocation22 + $0x8] sm:$0xff] }
 0xa01   :  { %5179 = vmatprep.subr.bf16.mxu1 %v13795_v55  ;;  %v13701_v60 = vcombine.high %v17905_v19, %v17907_v31  ;;  %v13700_v18 = vcombine.low %v17905_v19, %v17907_v31 }
 0xa02   :  { %5205 = vmatpush1.bf16.msra.mxu0 %v13858_v5 }
 0xa03   :  { %5206 = vmatprep.subr.bf16.mxu0 %v13867_v34 }
 0xa04   :  { %5180 = vmatpush1.bf16.msra.mxu1 %v13794_v9 }
 0xa05   :  { %5181 = vmatprep.subr.bf16.mxu1 %v13803_v52 }
 0xa06   :  { %5207 = vmatpush1.bf16.msra.mxu0 %v13866_v63 }
 0xa07   :  { %5208 = vmatprep.subr.bf16.mxu0 %v13875_v45 }
 0xa08   :  { %5182 = vmatpush1.bf16.msra.mxu1 %v13802_v48 }
 0xa09   :  { %5183 = vmatprep.subr.bf16.mxu1 %v13811_v39 }
 0xa0a   :  { %5209 = vmatpush1.bf16.msra.mxu0 %v13874_v47 }
 0xa0b   :  { %5210 = vmatprep.subr.bf16.mxu0 %v13883_v61 }
 0xa0c   :  { %5184 = vmatpush1.bf16.msra.mxu1 %v13810_v32 }
 0xa0d   :  { %5185 = vmatprep.subr.bf16.mxu1 %v13819_v36 }
 0xa0e   :  { %5211 = vmatpush1.bf16.msra.mxu0 %v13882_v62 }
 0xa0f   :  { %5237 = vmatprep.subr.bf16.mxu0 %v13701_v60 }
 0xa10   :  { %5186 = vmatpush1.bf16.msra.mxu1 %v13818_v40 }
 0xa11   :  { %5278 = vmatprep.subr.bf16.mxu1 %v13829_v56 }
 0xaac   :  { %v3358_v49 = vpop.f32.mrb[64].mxu0 }
 0xaad   :  { %v3359_v50 = vadd.f32 %v3358_v49, %v17735_v22  ;;  %v3360_v12 = vpop.f32.mrb[65].mxu0 }
 0xaae   :  { %v3361_v55 = vadd.f32 %v3360_v12, %v17738_v23  ;;  %v3362_v9 = vpop.f32.mrb[66].mxu0 }
 0xaaf   :  { %v3363_v29 = vadd.f32 %v3362_v9, %v17735_v22  ;;  %v3364_v28 = vpop.f32.mrb[67].mxu0  ;;  %v3426_v16 = vmax.f32 %v3359_v50, 0.0 }
 0xab0   :  { %v3365_v54 = vadd.f32 %v3364_v28, %v17738_v23  ;;  %v3427_v6 = vmax.f32 %v3361_v55, 0.0 }
 0xab1   :  { %v3429_v14 = vmax.f32 %v3363_v29, 0.0 }
 0xab2   :  { %v3430_v52 = vmax.f32 %v3365_v54, 0.0 }
 0xab3   :  { %v3575_v48 = vmax.f32 %v3426_v16, %v3429_v14 }
 0xab4   :  { %v3582_v27 = vmax.f32 %v3427_v6, %v3430_v52  ;;  %v3368_v17 = vpop.f32.mrb[68].mxu0 }
 0xab5   :  { %v3576_v26 = vrot.slane %v3575_v48, 4  ;;  %v3369_v30 = vadd.f32 %v3368_v17, %v17735_v22  ;;  %v3370_v0 = vpop.f32.mrb[69].mxu0 }
 0xab6   :  { %v3583_v5 = vrot.slane %v3582_v27, 4  ;;  %v3371_v39 = vadd.f32 %v3370_v0, %v17738_v23  ;;  %v3372_v32 = vpop.f32.mrb[70].mxu0 }
 0xab7   :  { %v3577_v33 = vmax.f32 %v3575_v48, %v3576_v26  ;;  %v3373_v15 = vadd.f32 %v3372_v32, %v17735_v22  ;;  %v3374_v34 = vpop.f32.mrb[71].mxu0  ;;  %v3432_v36 = vmax.f32 %v3369_v30, 0.0 }
 0xab8   :  { %v3584_v53 = vmax.f32 %v3582_v27, %v3583_v5  ;;  %v3375_v35 = vadd.f32 %v3374_v34, %v17738_v23  ;;  %v3433_v43 = vmax.f32 %v3371_v39, 0.0  ;;  %v17925_v5 = vld [vmem:[#allocation22 + $0x448] sm:$0xff] }
 0xab9   :  { %v3578_v63 = vrot.slane %v3577_v33, 2  ;;  %v3435_v40 = vmax.f32 %v3373_v15, 0.0  ;;  %v17927_v39 = vld [vmem:[#allocation22 + $0x468] sm:$0xff] }
 0xaba   :  { %v3585_v42 = vrot.slane %v3584_v53, 2  ;;  %v3436_v45 = vmax.f32 %v3375_v35, 0.0 }
 0xabb   :  { %v3579_v47 = vmax.f32 %v3577_v33, %v3578_v63  ;;  %v3596_v56 = vmax.f32 %v3432_v36, %v3435_v40 }
 0xabc   :  { %v3586_v8 = vmax.f32 %v3584_v53, %v3585_v42  ;;  %v3603_v38 = vmax.f32 %v3433_v43, %v3436_v45  ;;  %v15297_v61 = vpop.f32.mrb[72].mxu0  ;;  %v13837_v45 = vcombine.high %v17925_v5, %v17927_v39 }
 0xabd   :  { %v3597_v62 = vrot.slane %v3596_v56, 4  ;;  %v3420_v60 = vadd.f32 %v15297_v61, %v17741_v44  ;;  %v3411_v49 = vpop.f32.mrb[73].mxu0  ;;  %v3580_v23 = vrot.slane %v3579_v47, 1 }
 0xabe   :  { %v3604_v22 = vrot.slane %v3603_v38, 4  ;;  %v3412_v50 = vadd.f32 %v3411_v49, %v17741_v44  ;;  %v15298_v12 = vpop.f32.mrb[74].mxu0  ;;  %v3587_v28 = vrot.slane %v3586_v8, 1 }
 0xabf   :  { %v3598_v55 = vmax.f32 %v3596_v56, %v3597_v62  ;;  %v3423_v9 = vadd.f32 %v15298_v12, %v17741_v44  ;;  %v3414_v29 = vpop.f32.mrb[75].mxu0  ;;  %v3434_v6 = vmax.f32 %v3420_v60, 0.0  ;;  %v3581_v26 = vmax.f32 %v3579_v47, %v3580_v23 }
 0xac0   :  { %v3605_v54 = vmax.f32 %v3603_v38, %v3604_v22  ;;  %v3415_v16 = vadd.f32 %v3414_v29, %v17741_v44  ;;  %v3428_v27 = vmax.f32 %v3412_v50, 0.0  ;;  %v3588_v32 = vmax.f32 %v3586_v8, %v3587_v28 }
 0xac1   :  { %v3599_v14 = vrot.slane %v3598_v55, 2  ;;  %v3437_v52 = vmax.f32 %v3423_v9, 0.0  ;;  %v3975_v47 = vpack.c.bf16 %v3581_v26, %v3581_v26 }
 0xac2   :  { %v3606_v48 = vrot.slane %v3605_v54, 2  ;;  %v3431_v17 = vmax.f32 %v3415_v16, 0.0  ;;  %v3976_v62 = vpack.c.bf16 %v3588_v32, %v3588_v32 }
 0xac3   :  { %v3600_v30 = vmax.f32 %v3598_v55, %v3599_v14  ;;  %v3610_v0 = vmax.f32 %v3434_v6, %v3437_v52  ;;  %v4179_v16 = vunpack.c.l.b16 %v3975_v47 }
 0xac4   :  { %v3607_v33 = vmax.f32 %v3605_v54, %v3606_v48  ;;  %v3589_v15 = vmax.f32 %v3428_v27, %v3431_v17  ;;  %v3478_v34 = vpop.f32.mrb[76].mxu0  ;;  %v4180_v48 = vunpack.c.l.b16 %v3976_v62 }
 0xac5   :  { %v3601_v53 = vrot.slane %v3600_v30, 1  ;;  %v3611_v35 = vrot.slane %v3610_v0, 4  ;;  %v3479_v44 = vadd.f32 %v3478_v34, %v17708_v20  ;;  %v3480_v63 = vpop.f32.mrb[77].mxu0 }
 0xac6   :  { %v3608_v36 = vrot.slane %v3607_v33, 1  ;;  %v3590_v40 = vrot.slane %v3589_v15, 4  ;;  %v3481_v42 = vadd.f32 %v3480_v63, %v17711_v11  ;;  %v3482_v43 = vpop.f32.mrb[78].mxu0 }
 0xac7   :  { %v3602_v56 = vmax.f32 %v3600_v30, %v3601_v53  ;;  %v3612_v38 = vmax.f32 %v3610_v0, %v3611_v35  ;;  %v3483_v8 = vadd.f32 %v3482_v43, %v17708_v20  ;;  %v3484_v61 = vpop.f32.mrb[79].mxu0  ;;  %v3497_v23 = vmax.f32 %v3479_v44, 0.0 }
 0xac8   :  { %v3609_v60 = vmax.f32 %v3607_v33, %v3608_v36  ;;  %v3591_v49 = vmax.f32 %v3589_v15, %v3590_v40  ;;  %v3485_v22 = vadd.f32 %v3484_v61, %v17711_v11  ;;  %v3498_v28 = vmax.f32 %v3481_v42, 0.0 }
 0xac9   :  { %v3978_v50 = vpack.c.bf16 %v3602_v56, %v3602_v56  ;;  %v3613_v12 = vrot.slane %v3612_v38, 2  ;;  %v3499_v55 = vmax.f32 %v3483_v8, 0.0 }
 0xaca   :  { %v3979_v9 = vpack.c.bf16 %v3609_v60, %v3609_v60  ;;  %v3592_v29 = vrot.slane %v3591_v49, 2  ;;  %v3500_v54 = vmax.f32 %v3485_v22, 0.0 }
 0xacb   :  { %v4182_v14 = vunpack.c.l.b16 %v3978_v50  ;;  %v3614_v6 = vmax.f32 %v3612_v38, %v3613_v12  ;;  %v3617_v52 = vmax.f32 %v3497_v23, %v3499_v55 }
 0xacc   :  { %v4183_v27 = vunpack.c.l.b16 %v3979_v9  ;;  %v3593_v17 = vmax.f32 %v3591_v49, %v3592_v29  ;;  %v3624_v26 = vmax.f32 %v3498_v28, %v3500_v54  ;;  %v3488_v30 = vpop.f32.mrb[80].mxu0 }
 0xacd   :  { %v3615_v0 = vrot.slane %v3614_v6, 1  ;;  %v3618_v32 = vrot.slane %v3617_v52, 4  ;;  %v3489_v33 = vadd.f32 %v3488_v30, %v17708_v20  ;;  %v3490_v15 = vpop.f32.mrb[81].mxu0  ;;  %v4186_v34 = vsel %vm4185_vm13, %v4182_v14, %v4179_v16  ;;  %v4130_v16 = vld [vmem:[#allocation22 + $0x4a8] sm:$0xff] }
 0xace   :  { %v3594_v53 = vrot.slane %v3593_v17, 1  ;;  %v3625_v35 = vrot.slane %v3624_v26, 4  ;;  %v3491_v44 = vadd.f32 %v3490_v15, %v17711_v11  ;;  %v3492_v63 = vpop.f32.mrb[82].mxu0  ;;  %v4187_v36 = vsel %vm4185_vm13, %v4183_v27, %v4180_v48  ;;  %v3994_v48 = vld [vmem:[#allocation22 + $0x68] sm:$0xff] }
 0xacf   :  { %v3616_v40 = vmax.f32 %v3614_v6, %v3615_v0  ;;  %v3619_v42 = vmax.f32 %v3617_v52, %v3618_v32  ;;  %v3501_v43 = vmax.f32 %v3489_v33, 0.0  ;;  %v3493_v47 = vadd.f32 %v3492_v63, %v17708_v20  ;;  %v3494_v56 = vpop.f32.mrb[83].mxu0  ;;  %v4126_v20 = vld [vmem:[#allocation22 + $0x488] sm:$0xff] }
 0xad0   :  { %v3595_v38 = vmax.f32 %v3593_v17, %v3594_v53  ;;  %v3626_v8 = vmax.f32 %v3624_v26, %v3625_v35  ;;  %v3502_v61 = vmax.f32 %v3491_v44, 0.0  ;;  %v3495_v62 = vadd.f32 %v3494_v56, %v17711_v11  ;;  %v3990_v52 = vld [vmem:[#allocation22 + $0x48] sm:$0xff] }
 0xad1   :  { %v3980_v60 = vpack.c.bf16 %v3616_v40, %v3616_v40  ;;  %v3620_v49 = vrot.slane %v3619_v42, 2  ;;  %v3503_v22 = vmax.f32 %v3493_v47, 0.0  ;;  %v17941_v50 = vpack.c.b16 %v4187_v36, %v4187_v36  ;;  %v3998_v35 = vld [vmem:[#allocation22 + $0x88] sm:$0xff] }
 0xad2   :  { %v3977_v12 = vpack.c.bf16 %v3595_v38, %v3595_v38  ;;  %v3627_v23 = vrot.slane %v3626_v8, 2  ;;  %v3504_v55 = vmax.f32 %v3495_v62, 0.0  ;;  %v17943_v9 = vpack.c.b16 %v4186_v34, %v4186_v34  ;;  %v4002_v44 = vld [vmem:[#allocation22 + $0xa8] sm:$0xff] }
 0xad3   :  { %v4184_v29 = vunpack.c.l.b16 %v3980_v60  ;;  %v3621_v28 = vmax.f32 %v3619_v42, %v3620_v49  ;;  %v3631_v54 = vmax.f32 %v3501_v43, %v3503_v22  ;;  %5187 = vmatprep.mubr.bf16.mxu1 %v17941_v50  ;;  %v13836_v17 = vcombine.low %v17925_v5, %v17927_v39  ;;  %v4142_v47 = vld [vmem:[#allocation22 + $0x508] sm:$0xff] }
 0xad4   :  { %v4181_v14 = vunpack.c.l.b16 %v3977_v12  ;;  %v3628_v6 = vmax.f32 %v3626_v8, %v3627_v23  ;;  %v3638_v11 = vmax.f32 %v3502_v61, %v3504_v55  ;;  %5188 = vmatmul.mubr.bf16.vlgmr.msra.gmra.mrb[68].mxu1 %v17943_v9  ;;  %v13845_v0 = vcombine.high %v4126_v20, %v4130_v16  ;;  %v4146_v56 = vld [vmem:[#allocation22 + $0x528] sm:$0xff] }
 0xad5   :  { %v3632_v27 = vrot.slane %v3631_v54, 4  ;;  %5279 = vmatpush1.bf16.msra.mxu1 %v13828_v7  ;;  %5310 = vmatprep.mubr.bf16.mxu1 %v17204_v1  ;;  %v3622_v32 = vrot.slane %v3621_v28, 1  ;;  %v13709_v34 = vcombine.high %v3990_v52, %v3994_v48  ;;  %v13844_v5 = vcombine.low %v4126_v20, %v4130_v16  ;;  %v4006_v61 = vld [vmem:[#allocation22 + $0xc8] sm:$0xff] }
 0xad6   :  { %v3639_v26 = vrot.slane %v3638_v11, 4  ;;  %5280 = vmatprep.subr.bf16.mxu1 %v13837_v45  ;;  %v4188_v30 = vsel %vm4185_vm13, %v4184_v29, %v4181_v14  ;;  %v3629_v7 = vrot.slane %v3628_v6, 1  ;;  %v13708_v45 = vcombine.low %v3990_v52, %v3994_v48  ;;  %v4010_v62 = vld [vmem:[#allocation22 + $0xe8] sm:$0xff] }
 0xad7   :  { %v3633_v33 = vmax.f32 %v3631_v54, %v3632_v27  ;;  %v17957_v15 = vpack.c.b16 %v4188_v30, %v4188_v30  ;;  %v13853_v36 = vcombine.high %v4134_v51, %v4138_v41  ;;  %v3623_v40 = vmax.f32 %v3621_v28, %v3622_v32  ;;  %v4150_v55 = vld [vmem:[#allocation22 + $0x548] sm:$0xff] }
 0xad8   :  { %v3640_v53 = vmax.f32 %v3638_v11, %v3639_v26  ;;  %v13717_v43 = vcombine.high %v3998_v35, %v4002_v44  ;;  %v3630_v38 = vmax.f32 %v3628_v6, %v3629_v7  ;;  %v13852_v49 = vcombine.low %v4134_v51, %v4138_v41  ;;  %v4154_v29 = vld [vmem:[#allocation22 + $0x568] sm:$0xff] }
 0xad9   :  { %v3634_v63 = vrot.slane %v3633_v33, 2  ;;  %5281 = vmatpush1.bf16.msra.mxu1 %v13836_v17  ;;  %5229 = vmatmul.mubr.bf16.vlgmr.msra.gmra.mrb[84].mxu0 %v17957_v15  ;;  %v13716_v31 = vcombine.low %v3998_v35, %v4002_v44  ;;  %v7610_v22 = vpack.c.bf16 %v3623_v40, %v3623_v40  ;;  %v13725_v23 = vcombine.high %v4006_v61, %v4010_v62  ;;  %v4014_v20 = vld [vmem:[#allocation22 + $0x108] sm:$0xff] }
 0xada   :  { %v3641_v39 = vrot.slane %v3640_v53, 2  ;;  %5238 = vmatpush1.bf16.msra.mxu0 %v13700_v18  ;;  %5282 = vmatprep.subr.bf16.mxu1 %v13845_v0  ;;  %v13861_v18 = vcombine.high %v4142_v47, %v4146_v56  ;;  %v7611_v28 = vpack.c.bf16 %v3630_v38, %v3630_v38  ;;  %v4018_v16 = vld [vmem:[#allocation22 + $0x128] sm:$0xff]  ;;  %v13860_v6 = vcombine.low %v4142_v47, %v4146_v56  ;;  %v3983_v56 = vld [vmem:[#allocation22 + $0x10] sm:$0xff] }
 0xadb   :  { %v3635_v42 = vmax.f32 %v3633_v33, %v3634_v63  ;;  %5269 = vmatprep.mubr.bf16.mxu0 %v17941_v50  ;;  %5239 = vmatprep.subr.bf16.mxu0 %v13709_v34  ;;  %v13724_v52 = vcombine.low %v4006_v61, %v4010_v62  ;;  %v13869_v48 = vcombine.high %v4150_v55, %v4154_v29  ;;  %v7746_v27 = vunpack.c.l.b16 %v7610_v22  ;;  %v4158_v30 = vld [vmem:[#allocation22 + $0x588] sm:$0xff]  ;;  %v3987_v38 = vld [vmem:[#allocation22 + $0x30] sm:$0xff] }
 0xadc   :  { %v3642_v8 = vmax.f32 %v3640_v53, %v3641_v39  ;;  %v13733_v26 = vcombine.high %v4014_v20, %v4018_v16  ;;  %v4162_v0 = vld [vmem:[#allocation22 + $0x5a8] sm:$0xff]  ;;  %v7747_v32 = vunpack.c.l.b16 %v7611_v28  ;;  %v13868_v41 = vcombine.low %v4150_v55, %v4154_v29 }
 0xadd   :  { %v3636_v60 = vrot.slane %v3635_v42, 1  ;;  %5283 = vmatpush1.bf16.msra.mxu1 %v13844_v5  ;;  %v4022_v34 = vld [vmem:[#allocation22 + $0x148] sm:$0xff]  ;;  %v13732_v53 = vcombine.low %v4014_v20, %v4018_v16  ;;  %v13877_v35 = vcombine.high %v4158_v30, %v4162_v0  ;;  %v13876_v40 = vcombine.low %v4158_v30, %v4162_v0  ;;  %v4003_v20 = vld [vmem:[#allocation22 + $0xb0] sm:$0xff] }
 0xade   :  { %v3643_v19 = vrot.slane %v3642_v8, 1  ;;  %5240 = vmatpush1.bf16.msra.mxu0 %v13708_v45  ;;  %5284 = vmatprep.subr.bf16.mxu1 %v13853_v36  ;;  %v4026_v51 = vld [vmem:[#allocation22 + $0x168] sm:$0xff] }
 0xadf   :  { %v3637_v12 = vmax.f32 %v3635_v42, %v3636_v60  ;;  %5241 = vmatprep.subr.bf16.mxu0 %v13717_v43  ;;  %v13741_v63 = vcombine.high %v4022_v34, %v4026_v51  ;;  %v4166_v5 = vld [vmem:[#allocation22 + $0x5c8] sm:$0xff]  ;;  %v13740_v42 = vcombine.low %v4022_v34, %v4026_v51  ;;  %v4015_v51 = vld [vmem:[#allocation22 + $0x110] sm:$0xff] }
 0xae0   :  { %v3644_v54 = vmax.f32 %v3642_v8, %v3643_v19  ;;  %v4170_v39 = vld [vmem:[#allocation22 + $0x5e8] sm:$0xff] }
 0xae1   :  { %v7612_v14 = vpack.c.bf16 %v3637_v12, %v3637_v12  ;;  %5285 = vmatpush1.bf16.msra.mxu1 %v13852_v49  ;;  %v4030_v45 = vld [vmem:[#allocation22 + $0x188] sm:$0xff]  ;;  %v13885_v43 = vcombine.high %v4166_v5, %v4170_v39  ;;  %v13884_v62 = vcombine.low %v4166_v5, %v4170_v39  ;;  %v13703_v49 = vcombine.high %v3983_v56, %v3987_v38 }
 0xae2   :  { %v7613_v11 = vpack.c.bf16 %v3644_v54, %v3644_v54  ;;  %5242 = vmatpush1.bf16.msra.mxu0 %v13716_v31  ;;  %5286 = vmatprep.subr.bf16.mxu1 %v13861_v18  ;;  %v4034_v36 = vld [vmem:[#allocation22 + $0x1a8] sm:$0xff]  ;;  %v3991_v31 = vld [vmem:[#allocation22 + $0x50] sm:$0xff] }
 0xae3   :  { %v7748_v17 = vunpack.c.l.b16 %v7612_v14  ;;  %5243 = vmatprep.subr.bf16.mxu0 %v13725_v23  ;;  %v13749_v47 = vcombine.high %v4030_v45, %v4034_v36  ;;  %v4038_v8 = vld [vmem:[#allocation22 + $0x1c8] sm:$0xff]  ;;  %v13748_v60 = vcombine.low %v4030_v45, %v4034_v36  ;;  %v3995_v18 = vld [vmem:[#allocation22 + $0x70] sm:$0xff]  ;;  %v13702_v23 = vcombine.low %v3983_v56, %v3987_v38 }
 0xae4   :  { %v7749_v33 = vunpack.c.l.b16 %v7613_v11  ;;  %v4042_v61 = vld [vmem:[#allocation22 + $0x1e8] sm:$0xff]  ;;  %v13711_v29 = vcombine.high %v3991_v31, %v3995_v18  ;;  %v3999_v54 = vld [vmem:[#allocation22 + $0x90] sm:$0xff] }
 0xae5   :  { %5287 = vmatpush1.bf16.msra.mxu1 %v13860_v6  ;;  %v17965_v7 = vsel %vm4185_vm13, %v7748_v17, %v7746_v27  ;;  %v13757_v19 = vcombine.high %v4038_v8, %v4042_v61  ;;  %v4046_v22 = vld [vmem:[#allocation22 + $0x208] sm:$0xff]  ;;  %v13756_v55 = vcombine.low %v4038_v8, %v4042_v61  ;;  %v13710_v6 = vcombine.low %v3991_v31, %v3995_v18  ;;  %v4007_v27 = vld [vmem:[#allocation22 + $0xd0] sm:$0xff] }
 0xae6   :  { %5244 = vmatpush1.bf16.msra.mxu0 %v13724_v52  ;;  %5288 = vmatprep.subr.bf16.mxu1 %v13869_v48  ;;  %v17968_v44 = vsel %vm4185_vm13, %v7749_v33, %v7747_v32  ;;  %v4050_v12 = vld [vmem:[#allocation22 + $0x228] sm:$0xff]  ;;  %v13719_v52 = vcombine.high %v3999_v54, %v4003_v20  ;;  %v4011_v17 = vld [vmem:[#allocation22 + $0xf0] sm:$0xff]  ;;  %v13718_v0 = vcombine.low %v3999_v54, %v4003_v20 }
 0xae7   :  { %5245 = vmatprep.subr.bf16.mxu0 %v13733_v26  ;;  %v13765_v28 = vcombine.high %v4046_v22, %v4050_v12  ;;  %v4054_v16 = vld [vmem:[#allocation22 + $0x248] sm:$0xff]  ;;  %v13764_v11 = vcombine.low %v4046_v22, %v4050_v12  ;;  %v13727_v33 = vcombine.high %v4007_v27, %v4011_v17  ;;  %v4023_v36 = vld [vmem:[#allocation22 + $0x150] sm:$0xff] }
 0xae8   :  { %v4058_v14 = vld [vmem:[#allocation22 + $0x268] sm:$0xff]  ;;  %v4031_v61 = vld [vmem:[#allocation22 + $0x190] sm:$0xff] }
 0xae9   :  { %5289 = vmatpush1.bf16.msra.mxu1 %v13868_v41  ;;  %v13773_v48 = vcombine.high %v4054_v16, %v4058_v14  ;;  %v4062_v26 = vld [vmem:[#allocation22 + $0x288] sm:$0xff]  ;;  %v13772_v32 = vcombine.low %v4054_v16, %v4058_v14  ;;  %v4019_v41 = vld [vmem:[#allocation22 + $0x130] sm:$0xff] }
 0xaea   :  { %5246 = vmatpush1.bf16.msra.mxu0 %v13732_v53  ;;  %5290 = vmatprep.subr.bf16.mxu1 %v13877_v35  ;;  %v4066_v30 = vld [vmem:[#allocation22 + $0x2a8] sm:$0xff]  ;;  %v13735_v39 = vcombine.high %v4015_v51, %v4019_v41  ;;  %v4039_v12 = vld [vmem:[#allocation22 + $0x1d0] sm:$0xff] }
 0xaeb   :  { %5247 = vmatprep.subr.bf16.mxu0 %v13741_v63  ;;  %v13781_v34 = vcombine.high %v4062_v26, %v4066_v30  ;;  %v4070_v53 = vld [vmem:[#allocation22 + $0x2c8] sm:$0xff]  ;;  %v13726_v63 = vcombine.low %v4007_v27, %v4011_v17  ;;  %v13780_v5 = vcombine.low %v4062_v26, %v4066_v30  ;;  %v4047_v14 = vld [vmem:[#allocation22 + $0x210] sm:$0xff] }
 0xaec   :  { %v4074_v35 = vld [vmem:[#allocation22 + $0x2e8] sm:$0xff]  ;;  %v4055_v30 = vld [vmem:[#allocation22 + $0x250] sm:$0xff] }
 0xaed   :  { %5291 = vmatpush1.bf16.msra.mxu1 %v13876_v40  ;;  %v13789_v45 = vcombine.high %v4070_v53, %v4074_v35  ;;  %v4027_v40 = vld [vmem:[#allocation22 + $0x170] sm:$0xff]  ;;  %v13788_v56 = vcombine.low %v4070_v53, %v4074_v35 }
 0xaee   :  { %5248 = vmatpush1.bf16.msra.mxu0 %v13740_v42  ;;  %5292 = vmatprep.subr.bf16.mxu1 %v13885_v43  ;;  %v4078_v42 = vld [vmem:[#allocation22 + $0x308] sm:$0xff]  ;;  %v13743_v38 = vcombine.high %v4023_v36, %v4027_v40  ;;  %v4063_v35 = vld [vmem:[#allocation22 + $0x290] sm:$0xff] }
 0xaef   :  { %5249 = vmatprep.subr.bf16.mxu0 %v13749_v47  ;;  %v4082_v43 = vld [vmem:[#allocation22 + $0x328] sm:$0xff]  ;;  %v13734_v47 = vcombine.low %v4015_v51, %v4019_v41 }
 0xaf0   :  { %v13797_v8 = vcombine.high %v4078_v42, %v4082_v43  ;;  %v13796_v31 = vcombine.low %v4078_v42, %v4082_v43  ;;  %v4071_v43 = vld [vmem:[#allocation22 + $0x2d0] sm:$0xff] }
 0xaf1   :  { %5293 = vmatpush1.bf16.msra.mxu1 %v13884_v62  ;;  %v4035_v62 = vld [vmem:[#allocation22 + $0x1b0] sm:$0xff] }
 0xaf2   :  { %5250 = vmatpush1.bf16.msra.mxu0 %v13748_v60  ;;  %5319 = vmatprep.subr.bf16.mxu1 %v13703_v49  ;;  %v4086_v60 = vld [vmem:[#allocation22 + $0x348] sm:$0xff]  ;;  %v13751_v18 = vcombine.high %v4031_v61, %v4035_v62 }
 0xaf3   :  { %5251 = vmatprep.subr.bf16.mxu0 %v13757_v19  ;;  %v4090_v49 = vld [vmem:[#allocation22 + $0x368] sm:$0xff]  ;;  %v13742_v19 = vcombine.low %v4023_v36, %v4027_v40 }
 0xaf4   :  { %5311 = vmatmul.mubr.bf16.vlgmr.msra.gmra.mrb[72].mxu1 %v17957_v15  ;;  %v13805_v22 = vcombine.high %v4086_v60, %v4090_v49  ;;  %v13804_v54 = vcombine.low %v4086_v60, %v4090_v49  ;;  %v4079_v49 = vld [vmem:[#allocation22 + $0x310] sm:$0xff] }
 0xaf5   :  { %5320 = vmatpush1.bf16.msra.mxu1 %v13702_v23  ;;  %5351 = vmatprep.mubr.bf16.mxu1 %v17941_v50  ;;  %v4043_v23 = vld [vmem:[#allocation22 + $0x1f0] sm:$0xff] }
 0xaf6   :  { %5252 = vmatpush1.bf16.msra.mxu0 %v13756_v55  ;;  %5321 = vmatprep.subr.bf16.mxu1 %v13711_v29  ;;  %v4094_v55 = vld [vmem:[#allocation22 + $0x388] sm:$0xff]  ;;  %v13759_v20 = vcombine.high %v4039_v12, %v4043_v23 }
 0xaf7   :  { %5253 = vmatprep.subr.bf16.mxu0 %v13765_v28  ;;  %v4098_v29 = vld [vmem:[#allocation22 + $0x3a8] sm:$0xff]  ;;  %v13750_v28 = vcombine.low %v4031_v61, %v4035_v62 }
 0xaf8   :  { %v13813_v16 = vcombine.high %v4094_v55, %v4098_v29  ;;  %v13812_v27 = vcombine.low %v4094_v55, %v4098_v29  ;;  %v4087_v29 = vld [vmem:[#allocation22 + $0x350] sm:$0xff] }
 0xaf9   :  { %5322 = vmatpush1.bf16.msra.mxu1 %v13710_v6  ;;  %v4051_v6 = vld [vmem:[#allocation22 + $0x230] sm:$0xff] }
 0xafa   :  { %5254 = vmatpush1.bf16.msra.mxu0 %v13764_v11  ;;  %5323 = vmatprep.subr.bf16.mxu1 %v13719_v52  ;;  %v4102_v11 = vld [vmem:[#allocation22 + $0x3c8] sm:$0xff]  ;;  %v13767_v17 = vcombine.high %v4047_v14, %v4051_v6 }
 0xafb   :  { %5255 = vmatprep.subr.bf16.mxu0 %v13773_v48  ;;  %v4106_v52 = vld [vmem:[#allocation22 + $0x3e8] sm:$0xff]  ;;  %v13758_v48 = vcombine.low %v4039_v12, %v4043_v23 }
 0xafc   :  { %v13821_v26 = vcombine.high %v4102_v11, %v4106_v52  ;;  %v13820_v51 = vcombine.low %v4102_v11, %v4106_v52  ;;  %v4095_v52 = vld [vmem:[#allocation22 + $0x390] sm:$0xff] }
 0xafd   :  { %5324 = vmatpush1.bf16.msra.mxu1 %v13718_v0  ;;  %v4059_v0 = vld [vmem:[#allocation22 + $0x270] sm:$0xff] }
 0xafe   :  { %5256 = vmatpush1.bf16.msra.mxu0 %v13772_v32  ;;  %5325 = vmatprep.subr.bf16.mxu1 %v13727_v33  ;;  %v4111_v32 = vld [vmem:[#allocation22 + $0x410] sm:$0xff]  ;;  %v13775_v41 = vcombine.high %v4055_v30, %v4059_v0 }
 0xaff   :  { %5257 = vmatprep.subr.bf16.mxu0 %v13781_v34  ;;  %v4115_v33 = vld [vmem:[#allocation22 + $0x430] sm:$0xff]  ;;  %v13766_v34 = vcombine.low %v4047_v14, %v4051_v6 }
 0xb00   :  { %v13831_v53 = vcombine.high %v4111_v32, %v4115_v33  ;;  %v13830_v36 = vcombine.low %v4111_v32, %v4115_v33  ;;  %v4103_v33 = vld [vmem:[#allocation22 + $0x3d0] sm:$0xff] }
 0xb01   :  { %5326 = vmatpush1.bf16.msra.mxu1 %v13726_v63  ;;  %v4067_v63 = vld [vmem:[#allocation22 + $0x2b0] sm:$0xff] }
 0xb02   :  { %5258 = vmatpush1.bf16.msra.mxu0 %v13780_v5  ;;  %5327 = vmatprep.subr.bf16.mxu1 %v13735_v39  ;;  %v4119_v5 = vld [vmem:[#allocation22 + $0x450] sm:$0xff]  ;;  %v13783_v40 = vcombine.high %v4063_v35, %v4067_v63 }
 0xb03   :  { %5259 = vmatprep.subr.bf16.mxu0 %v13789_v45  ;;  %v4123_v39 = vld [vmem:[#allocation22 + $0x470] sm:$0xff]  ;;  %v13774_v45 = vcombine.low %v4055_v30, %v4059_v0 }
 0xb04   :  { %v13839_v42 = vcombine.high %v4119_v5, %v4123_v39  ;;  %v13838_v61 = vcombine.low %v4119_v5, %v4123_v39  ;;  %v4112_v39 = vld [vmem:[#allocation22 + $0x418] sm:$0xff] }
 0xb05   :  { %5328 = vmatpush1.bf16.msra.mxu1 %v13734_v47  ;;  %v4075_v47 = vld [vmem:[#allocation22 + $0x2f0] sm:$0xff] }
 0xb06   :  { %5260 = vmatpush1.bf16.msra.mxu0 %v13788_v56  ;;  %5329 = vmatprep.subr.bf16.mxu1 %v13743_v38  ;;  %v4127_v56 = vld [vmem:[#allocation22 + $0x490] sm:$0xff]  ;;  %v13791_v62 = vcombine.high %v4071_v43, %v4075_v47 }
 0xb07   :  { %5261 = vmatprep.subr.bf16.mxu0 %v13797_v8  ;;  %v4131_v38 = vld [vmem:[#allocation22 + $0x4b0] sm:$0xff]  ;;  %v13782_v8 = vcombine.low %v4063_v35, %v4067_v63 }
 0xb08   :  { %v13847_v60 = vcombine.high %v4127_v56, %v4131_v38  ;;  %v13846_v12 = vcombine.low %v4127_v56, %v4131_v38  ;;  %v4120_v38 = vld [vmem:[#allocation22 + $0x458] sm:$0xff] }
 0xb09   :  { %5330 = vmatpush1.bf16.msra.mxu1 %v13742_v19  ;;  %v4083_v19 = vld [vmem:[#allocation22 + $0x330] sm:$0xff] }
 0xb0a   :  { %5262 = vmatpush1.bf16.msra.mxu0 %v13796_v31  ;;  %5331 = vmatprep.subr.bf16.mxu1 %v13751_v18  ;;  %v4135_v31 = vld [vmem:[#allocation22 + $0x4d0] sm:$0xff]  ;;  %v13799_v23 = vcombine.high %v4079_v49, %v4083_v19 }
 0xb0b   :  { %5263 = vmatprep.subr.bf16.mxu0 %v13805_v22  ;;  %v4139_v18 = vld [vmem:[#allocation22 + $0x4f0] sm:$0xff]  ;;  %v13790_v22 = vcombine.low %v4071_v43, %v4075_v47 }
 0xb0c   :  { %v13855_v55 = vcombine.high %v4135_v31, %v4139_v18  ;;  %v13854_v14 = vcombine.low %v4135_v31, %v4139_v18  ;;  %v4128_v18 = vld [vmem:[#allocation22 + $0x498] sm:$0xff] }
 0xb0d   :  { %5332 = vmatpush1.bf16.msra.mxu1 %v13750_v28  ;;  %v4091_v28 = vld [vmem:[#allocation22 + $0x370] sm:$0xff] }
 0xb0e   :  { %5264 = vmatpush1.bf16.msra.mxu0 %v13804_v54  ;;  %5333 = vmatprep.subr.bf16.mxu1 %v13759_v20  ;;  %v4143_v54 = vld [vmem:[#allocation22 + $0x510] sm:$0xff]  ;;  %v13807_v6 = vcombine.high %v4087_v29, %v4091_v28 }
 0xb0f   :  { %5265 = vmatprep.subr.bf16.mxu0 %v13813_v16  ;;  %v4147_v20 = vld [vmem:[#allocation22 + $0x530] sm:$0xff]  ;;  %v13798_v16 = vcombine.low %v4079_v49, %v4083_v19 }
 0xb10   :  { %v13863_v11 = vcombine.high %v4143_v54, %v4147_v20  ;;  %v13862_v30 = vcombine.low %v4143_v54, %v4147_v20  ;;  %v4136_v20 = vld [vmem:[#allocation22 + $0x4d8] sm:$0xff] }
 0xb11   :  { %5334 = vmatpush1.bf16.msra.mxu1 %v13758_v48  ;;  %v4099_v48 = vld [vmem:[#allocation22 + $0x3b0] sm:$0xff] }
 0xb12   :  { %5266 = vmatpush1.bf16.msra.mxu0 %v13812_v27  ;;  %5335 = vmatprep.subr.bf16.mxu1 %v13767_v17  ;;  %v4151_v27 = vld [vmem:[#allocation22 + $0x550] sm:$0xff]  ;;  %v13815_v0 = vcombine.high %v4095_v52, %v4099_v48 }
 0xb13   :  { %5267 = vmatprep.subr.bf16.mxu0 %v13821_v26  ;;  %v4155_v17 = vld [vmem:[#allocation22 + $0x570] sm:$0xff]  ;;  %v13806_v26 = vcombine.low %v4087_v29, %v4091_v28 }
 0xb14   :  { %v13871_v32 = vcombine.high %v4151_v27, %v4155_v17  ;;  %v13870_v35 = vcombine.low %v4151_v27, %v4155_v17  ;;  %v4144_v17 = vld [vmem:[#allocation22 + $0x518] sm:$0xff] }
 0xb15   :  { %5336 = vmatpush1.bf16.msra.mxu1 %v13766_v34  ;;  %v4107_v34 = vld [vmem:[#allocation22 + $0x3f0] sm:$0xff] }
 0xb16   :  { %5268 = vmatpush1.bf16.msra.mxu0 %v13820_v51  ;;  %5337 = vmatprep.subr.bf16.mxu1 %v13775_v41  ;;  %v4159_v51 = vld [vmem:[#allocation22 + $0x590] sm:$0xff]  ;;  %v13823_v63 = vcombine.high %v4103_v33, %v4107_v34 }
 0xb17   :  { %5360 = vmatprep.subr.bf16.mxu0 %v13831_v53  ;;  %v4163_v41 = vld [vmem:[#allocation22 + $0x5b0] sm:$0xff]  ;;  %v13814_v53 = vcombine.low %v4095_v52, %v4099_v48 }
 0xb18   :  { %v13879_v5 = vcombine.high %v4159_v51, %v4163_v41  ;;  %v13878_v43 = vcombine.low %v4159_v51, %v4163_v41  ;;  %v4152_v41 = vld [vmem:[#allocation22 + $0x558] sm:$0xff] }
 0xb19   :  { %5338 = vmatpush1.bf16.msra.mxu1 %v13774_v45  ;;  %5270 = vmatmul.mubr.bf16.vlgmr.msra.gmra.mrb[88].mxu0 %v17943_v9  ;;  %v4116_v45 = vld [vmem:[#allocation22 + $0x438] sm:$0xff] }
 0xb1a   :  { %5339 = vmatprep.subr.bf16.mxu1 %v13783_v40  ;;  %5361 = vmatpush1.bf16.msra.mxu0 %v13830_v36  ;;  %v4167_v36 = vld [vmem:[#allocation22 + $0x5d0] sm:$0xff]  ;;  %v13833_v47 = vcombine.high %v4112_v39, %v4116_v45 }
 0xb1b   :  { %5362 = vmatprep.subr.bf16.mxu0 %v13839_v42  ;;  %5392 = vmatprep.mubr.bf16.mxu0 %v17204_v1  ;;  %v4171_v40 = vld [vmem:[#allocation22 + $0x5f0] sm:$0xff]  ;;  %v13822_v42 = vcombine.low %v4103_v33, %v4107_v34 }
 0xb1c   :  { %v13887_v56 = vcombine.high %v4167_v36, %v4171_v40  ;;  %v13886_v49 = vcombine.low %v4167_v36, %v4171_v40  ;;  %v4160_v36 = vld [vmem:[#allocation22 + $0x598] sm:$0xff] }
 0xb1d   :  { %5340 = vmatpush1.bf16.msra.mxu1 %v13782_v8  ;;  %v4124_v8 = vld [vmem:[#allocation22 + $0x478] sm:$0xff] }
 0xb1e   :  { %5341 = vmatprep.subr.bf16.mxu1 %v13791_v62  ;;  %5363 = vmatpush1.bf16.msra.mxu0 %v13838_v61  ;;  %v3984_v61 = vld [vmem:[#allocation22 + $0x18] sm:$0xff]  ;;  %v13841_v19 = vcombine.high %v4120_v38, %v4124_v8 }
 0xb1f   :  { %5364 = vmatprep.subr.bf16.mxu0 %v13847_v60  ;;  %v3988_v62 = vld [vmem:[#allocation22 + $0x38] sm:$0xff]  ;;  %v13832_v60 = vcombine.low %v4112_v39, %v4116_v45 }
 0xb20   :  { %v13705_v31 = vcombine.high %v3984_v61, %v3988_v62  ;;  %v13704_v29 = vcombine.low %v3984_v61, %v3988_v62  ;;  %v4164_v40 = vld [vmem:[#allocation22 + $0x5b8] sm:$0xff] }
 0xb21   :  { %5342 = vmatpush1.bf16.msra.mxu1 %v13790_v22  ;;  %v4132_v22 = vld [vmem:[#allocation22 + $0x4b8] sm:$0xff] }
 0xb22   :  { %5343 = vmatprep.subr.bf16.mxu1 %v13799_v23  ;;  %5365 = vmatpush1.bf16.msra.mxu0 %v13846_v12  ;;  %v3992_v12 = vld [vmem:[#allocation22 + $0x58] sm:$0xff]  ;;  %v13849_v28 = vcombine.high %v4128_v18, %v4132_v22 }
 0xb23   :  { %5366 = vmatprep.subr.bf16.mxu0 %v13855_v55  ;;  %v3996_v23 = vld [vmem:[#allocation22 + $0x78] sm:$0xff]  ;;  %v13840_v55 = vcombine.low %v4120_v38, %v4124_v8  ;;  %v13881_v38 = vcombine.high %v4160_v36, %v4164_v40 }
 0xb24   :  { %v13713_v54 = vcombine.high %v3992_v12, %v3996_v23  ;;  %v13712_v52 = vcombine.low %v3992_v12, %v3996_v23  ;;  %v4168_v61 = vld [vmem:[#allocation22 + $0x5d8] sm:$0xff]  ;;  %v3655_v12 = vld [vmem:[#allocation20] sm:$0xff] }
 0xb25   :  { %5344 = vmatpush1.bf16.msra.mxu1 %v13798_v16  ;;  %v4140_v16 = vld [vmem:[#allocation22 + $0x4f8] sm:$0xff]  ;;  %v3659_v23 = vld [vmem:[#allocation20 + $0x20] sm:$0xff] }
 0xb26   :  { %5345 = vmatprep.subr.bf16.mxu1 %v13807_v6  ;;  %5367 = vmatpush1.bf16.msra.mxu0 %v13854_v14  ;;  %v4000_v14 = vld [vmem:[#allocation22 + $0x98] sm:$0xff]  ;;  %v13857_v48 = vcombine.high %v4136_v20, %v4140_v16 }
 0xb27   :  { %5368 = vmatprep.subr.bf16.mxu0 %v13863_v11  ;;  %v4004_v6 = vld [vmem:[#allocation22 + $0xb8] sm:$0xff]  ;;  %v13848_v11 = vcombine.low %v4128_v18, %v4132_v22 }
 0xb28   :  { %v13721_v27 = vcombine.high %v4000_v14, %v4004_v6  ;;  %v13720_v33 = vcombine.low %v4000_v14, %v4004_v6  ;;  %v4172_v62 = vld [vmem:[#allocation22 + $0x5f8] sm:$0xff]  ;;  %v3663_v14 = vld [vmem:[#allocation20 + $0x40] sm:$0xff] }
 0xb29   :  { %5346 = vmatpush1.bf16.msra.mxu1 %v13806_v26  ;;  %v4148_v26 = vld [vmem:[#allocation22 + $0x538] sm:$0xff]  ;;  %v13889_v18 = vcombine.high %v4168_v61, %v4172_v62  ;;  %v3667_v6 = vld [vmem:[#allocation20 + $0x60] sm:$0xff] }
 0xb2a   :  { %5347 = vmatprep.subr.bf16.mxu1 %v13815_v0  ;;  %5369 = vmatpush1.bf16.msra.mxu0 %v13862_v30  ;;  %v4008_v30 = vld [vmem:[#allocation22 + $0xd8] sm:$0xff]  ;;  %v13865_v34 = vcombine.high %v4144_v17, %v4148_v26 }
 0xb2b   :  { %5370 = vmatprep.subr.bf16.mxu0 %v13871_v32  ;;  %v4012_v0 = vld [vmem:[#allocation22 + $0xf8] sm:$0xff]  ;;  %v13856_v32 = vcombine.low %v4136_v20, %v4140_v16  ;;  %v13891_v20 = vcombine.high %v3655_v12, %v3659_v23 }
 0xb2c   :  { %v13729_v51 = vcombine.high %v4008_v30, %v4012_v0 }
 0xb2d   :  { %5348 = vmatpush1.bf16.msra.mxu1 %v13814_v53  ;;  %v4156_v53 = vld [vmem:[#allocation22 + $0x578] sm:$0xff] }
 0xb2e   :  { %5349 = vmatprep.subr.bf16.mxu1 %v13823_v63  ;;  %5371 = vmatpush1.bf16.msra.mxu0 %v13870_v35  ;;  %v4020_v35 = vld [vmem:[#allocation22 + $0x138] sm:$0xff]  ;;  %v13864_v63 = vcombine.low %v4144_v17, %v4148_v26  ;;  %v13873_v39 = vcombine.high %v4152_v41, %v4156_v53  ;;  %v13899_v17 = vcombine.high %v3663_v14, %v3667_v6 }
 0xb2f   :  { %5372 = vmatprep.subr.bf16.mxu0 %v13879_v5  ;;  %v13728_v5 = vcombine.low %v4008_v30, %v4012_v0  ;;  %v17980_v26 = vpack.c.b16 %v17860_v46, %v17860_v46  ;;  %v3671_v0 = vld [vmem:[#allocation20 + $0x80] sm:$0xff] }
 0xb30   :  { %v3679_v46 = vld [vmem:[#allocation20 + $0xc0] sm:$0xff] }
 0xb31   :  { %5350 = vmatpush1.bf16.msra.mxu1 %v13822_v42  ;;  %v4024_v42 = vld [vmem:[#allocation22 + $0x158] sm:$0xff] }
 0xb32   :  { %5373 = vmatpush1.bf16.msra.mxu0 %v13878_v43  ;;  %5442 = vmatprep.subr.bf16.mxu1 %v13833_v47  ;;  %v4028_v43 = vld [vmem:[#allocation22 + $0x178] sm:$0xff]  ;;  %v13872_v47 = vcombine.low %v4152_v41, %v4156_v53 }
 0xb33   :  { %5374 = vmatprep.subr.bf16.mxu0 %v13887_v56  ;;  %v13745_v8 = vcombine.high %v4024_v42, %v4028_v43 }
 0xb34   :  { %5352 = vmatmul.mubr.bf16.vlgmr.msra.gmra.mrb[76].mxu1 %v17943_v9 }
 0xb35   :  { %5443 = vmatpush1.bf16.msra.mxu1 %v13832_v60  ;;  %5474 = vmatprep.mubr.bf16.mxu1 %v17204_v1  ;;  %v4032_v60 = vld [vmem:[#allocation22 + $0x198] sm:$0xff] }
 0xb36   :  { %5375 = vmatpush1.bf16.msra.mxu0 %v13886_v49  ;;  %5444 = vmatprep.subr.bf16.mxu1 %v13841_v19  ;;  %v4036_v49 = vld [vmem:[#allocation22 + $0x1b8] sm:$0xff]  ;;  %v13880_v19 = vcombine.low %v4160_v36, %v4164_v40  ;;  %v3687_v40 = vld [vmem:[#allocation20 + $0x100] sm:$0xff] }
 0xb37   :  { %5401 = vmatprep.subr.bf16.mxu0 %v13705_v31  ;;  %v13744_v31 = vcombine.low %v4024_v42, %v4028_v43  ;;  %v13753_v22 = vcombine.high %v4032_v60, %v4036_v49  ;;  %v3691_v42 = vld [vmem:[#allocation20 + $0x120] sm:$0xff]  ;;  %v4072_v43 = vld [vmem:[#allocation22 + $0x2d8] sm:$0xff] }
 0xb39   :  { %5445 = vmatpush1.bf16.msra.mxu1 %v13840_v55  ;;  %5393 = vmatmul.mubr.bf16.vlgmr.msra.gmra.mrb[92].mxu0 %v17957_v15  ;;  %v4040_v55 = vld [vmem:[#allocation22 + $0x1d8] sm:$0xff] }
 0xb3a   :  { %5402 = vmatpush1.bf16.msra.mxu0 %v13704_v29  ;;  %5433 = vmatprep.mubr.bf16.mxu0 %v17941_v50  ;;  %v4016_v50 = vld [vmem:[#allocation22 + $0x118] sm:$0xff] }
 0xb3b   :  { %5446 = vmatprep.subr.bf16.mxu1 %v13849_v28  ;;  %5403 = vmatprep.subr.bf16.mxu0 %v13713_v54  ;;  %v13737_v45 = vcombine.high %v4016_v50, %v4020_v35  ;;  %v13736_v56 = vcombine.low %v4016_v50, %v4020_v35  ;;  %v4044_v29 = vld [vmem:[#allocation22 + $0x1f8] sm:$0xff]  ;;  %v13888_v28 = vcombine.low %v4168_v61, %v4172_v62  ;;  %v3683_v35 = vld [vmem:[#allocation20 + $0xe0] sm:$0xff] }
 0xb3c   :  { %v13752_v54 = vcombine.low %v4032_v60, %v4036_v49  ;;  %v13761_v16 = vcombine.high %v4040_v55, %v4044_v29  ;;  %v3695_v62 = vld [vmem:[#allocation20 + $0x140] sm:$0xff]  ;;  %v4080_v49 = vld [vmem:[#allocation22 + $0x318] sm:$0xff] }
 0xb3d   :  { %5447 = vmatpush1.bf16.msra.mxu1 %v13848_v11  ;;  %v4048_v11 = vld [vmem:[#allocation22 + $0x218] sm:$0xff]  ;;  %v3699_v60 = vld [vmem:[#allocation20 + $0x160] sm:$0xff] }
 0xb3e   :  { %5404 = vmatpush1.bf16.msra.mxu0 %v13712_v52  ;;  %5448 = vmatprep.subr.bf16.mxu1 %v13857_v48  ;;  %v4052_v52 = vld [vmem:[#allocation22 + $0x238] sm:$0xff]  ;;  %v13890_v48 = vcombine.low %v3655_v12, %v3659_v23  ;;  %v3703_v23 = vld [vmem:[#allocation20 + $0x180] sm:$0xff] }
 0xb3f   :  { %5405 = vmatprep.subr.bf16.mxu0 %v13721_v27  ;;  %v13760_v27 = vcombine.low %v4040_v55, %v4044_v29  ;;  %v13769_v30 = vcombine.high %v4048_v11, %v4052_v52  ;;  %v13768_v41 = vcombine.low %v4048_v11, %v4052_v52  ;;  %v3707_v55 = vld [vmem:[#allocation20 + $0x1a0] sm:$0xff]  ;;  %v4088_v29 = vld [vmem:[#allocation22 + $0x358] sm:$0xff] }
 0xb40   :  { %v3715_v11 = vld [vmem:[#allocation20 + $0x1e0] sm:$0xff]  ;;  %v4096_v52 = vld [vmem:[#allocation22 + $0x398] sm:$0xff] }
 0xb41   :  { %5449 = vmatpush1.bf16.msra.mxu1 %v13856_v32  ;;  %v3675_v32 = vld [vmem:[#allocation20 + $0xa0] sm:$0xff] }
 0xb42   :  { %5406 = vmatpush1.bf16.msra.mxu0 %v13720_v33  ;;  %5450 = vmatprep.subr.bf16.mxu1 %v13865_v34  ;;  %v4056_v33 = vld [vmem:[#allocation22 + $0x258] sm:$0xff]  ;;  %v13907_v53 = vcombine.high %v3671_v0, %v3675_v32 }
 0xb43   :  { %5407 = vmatprep.subr.bf16.mxu0 %v13729_v51  ;;  %v4060_v34 = vld [vmem:[#allocation22 + $0x278] sm:$0xff]  ;;  %v13898_v51 = vcombine.low %v3663_v14, %v3667_v6  ;;  %v3711_v6 = vld [vmem:[#allocation20 + $0x1c0] sm:$0xff] }
 0xb44   :  { %v13777_v50 = vcombine.high %v4056_v33, %v4060_v34 }
 0xb45   :  { %5451 = vmatpush1.bf16.msra.mxu1 %v13864_v63  ;;  %v4064_v63 = vld [vmem:[#allocation22 + $0x298] sm:$0xff] }
 0xb46   :  { %5408 = vmatpush1.bf16.msra.mxu0 %v13728_v5  ;;  %5452 = vmatprep.subr.bf16.mxu1 %v13873_v39  ;;  %v4068_v5 = vld [vmem:[#allocation22 + $0x2b8] sm:$0xff]  ;;  %v13906_v39 = vcombine.low %v3671_v0, %v3675_v32  ;;  %v3719_v32 = vld [vmem:[#allocation20 + $0x200] sm:$0xff] }
 0xb47   :  { %5409 = vmatprep.subr.bf16.mxu0 %v13737_v45  ;;  %v13915_v45 = vcombine.high %v3679_v46, %v3683_v35  ;;  %v13785_v36 = vcombine.high %v4064_v63, %v4068_v5 }
 0xb49   :  { %5453 = vmatpush1.bf16.msra.mxu1 %v13872_v47  ;;  %v4076_v47 = vld [vmem:[#allocation22 + $0x2f8] sm:$0xff] }
 0xb4a   :  { %5410 = vmatpush1.bf16.msra.mxu0 %v13736_v56  ;;  %5454 = vmatprep.subr.bf16.mxu1 %v13881_v38  ;;  %v13914_v56 = vcombine.low %v3679_v46, %v3683_v35  ;;  %v13784_v38 = vcombine.low %v4064_v63, %v4068_v5  ;;  %v13793_v61 = vcombine.high %v4072_v43, %v4076_v47  ;;  %v3727_v35 = vld [vmem:[#allocation20 + $0x240] sm:$0xff] }
 0xb4b   :  { %5411 = vmatprep.subr.bf16.mxu0 %v13745_v8  ;;  %v13923_v8 = vcombine.high %v3687_v40, %v3691_v42  ;;  %v3731_v63 = vld [vmem:[#allocation20 + $0x260] sm:$0xff] }
 0xb4c   :  { %v3783_v5 = vld [vmem:[#allocation20 + $0x400] sm:$0xff] }
 0xb4d   :  { %5455 = vmatpush1.bf16.msra.mxu1 %v13880_v19  ;;  %v4084_v19 = vld [vmem:[#allocation22 + $0x338] sm:$0xff] }
 0xb4e   :  { %5412 = vmatpush1.bf16.msra.mxu0 %v13744_v31  ;;  %5456 = vmatprep.subr.bf16.mxu1 %v13889_v18  ;;  %v13922_v31 = vcombine.low %v3687_v40, %v3691_v42  ;;  %v13792_v18 = vcombine.low %v4072_v43, %v4076_v47  ;;  %v13801_v12 = vcombine.high %v4080_v49, %v4084_v19  ;;  %v3735_v42 = vld [vmem:[#allocation20 + $0x280] sm:$0xff] }
 0xb4f   :  { %5413 = vmatprep.subr.bf16.mxu0 %v13753_v22  ;;  %v13931_v22 = vcombine.high %v3695_v62, %v3699_v60  ;;  %v3739_v43 = vld [vmem:[#allocation20 + $0x2a0] sm:$0xff] }
 0xb50   :  { %v3791_v47 = vld [vmem:[#allocation20 + $0x440] sm:$0xff] }
 0xb51   :  { %5457 = vmatpush1.bf16.msra.mxu1 %v13888_v28  ;;  %v4092_v28 = vld [vmem:[#allocation22 + $0x378] sm:$0xff] }
 0xb52   :  { %5414 = vmatpush1.bf16.msra.mxu0 %v13752_v54  ;;  %7118 = vmatprep.subr.bf16.mxu1 %v13891_v20  ;;  %v13930_v54 = vcombine.low %v3695_v62, %v3699_v60  ;;  %v13800_v20 = vcombine.low %v4080_v49, %v4084_v19  ;;  %v13809_v14 = vcombine.high %v4088_v29, %v4092_v28  ;;  %v3743_v60 = vld [vmem:[#allocation20 + $0x2c0] sm:$0xff] }
 0xb53   :  { %5415 = vmatprep.subr.bf16.mxu0 %v13761_v16  ;;  %v13939_v16 = vcombine.high %v3703_v23, %v3707_v55  ;;  %v3747_v49 = vld [vmem:[#allocation20 + $0x2e0] sm:$0xff] }
 0xb54   :  { %5475 = vmatmul.mubr.bf16.vlgmr.msra.gmra.mrb[80].mxu1 %v17957_v15  ;;  %v13776_v15 = vcombine.low %v4056_v33, %v4060_v34  ;;  %v3723_v33 = vld [vmem:[#allocation20 + $0x220] sm:$0xff]  ;;  %v4104_v34 = vld [vmem:[#allocation22 + $0x3d8] sm:$0xff] }
 0xb55   :  { %7119 = vmatpush1.bf16.msra.mxu1 %v13890_v48  ;;  %7150 = vmatprep.mubr.bf16.mxu1 %v17980_v26  ;;  %v4100_v48 = vld [vmem:[#allocation22 + $0x3b8] sm:$0xff]  ;;  %v3799_v19 = vld [vmem:[#allocation20 + $0x480] sm:$0xff] }
 0xb56   :  { %5416 = vmatpush1.bf16.msra.mxu0 %v13760_v27  ;;  %7120 = vmatprep.subr.bf16.mxu1 %v13899_v17  ;;  %v13938_v27 = vcombine.low %v3703_v23, %v3707_v55  ;;  %v13808_v17 = vcombine.low %v4088_v29, %v4092_v28  ;;  %v13817_v0 = vcombine.high %v4096_v52, %v4100_v48  ;;  %v3751_v29 = vld [vmem:[#allocation20 + $0x300] sm:$0xff] }
 0xb57   :  { %5417 = vmatprep.subr.bf16.mxu0 %v13769_v30  ;;  %v13947_v30 = vcombine.high %v3711_v6, %v3715_v11  ;;  %v13979_v23 = vcombine.high %v3743_v60, %v3747_v49  ;;  %v3755_v28 = vld [vmem:[#allocation20 + $0x320] sm:$0xff] }
 0xb59   :  { %7121 = vmatpush1.bf16.msra.mxu1 %v13898_v51  ;;  %v4108_v51 = vld [vmem:[#allocation22 + $0x3f8] sm:$0xff] }
 0xb5a   :  { %5418 = vmatpush1.bf16.msra.mxu0 %v13768_v41  ;;  %7122 = vmatprep.subr.bf16.mxu1 %v13907_v53  ;;  %v13946_v41 = vcombine.low %v3711_v6, %v3715_v11  ;;  %v13816_v53 = vcombine.low %v4096_v52, %v4100_v48  ;;  %v13825_v46 = vcombine.high %v4104_v34, %v4108_v51  ;;  %v3759_v6 = vld [vmem:[#allocation20 + $0x340] sm:$0xff] }
 0xb5b   :  { %5419 = vmatprep.subr.bf16.mxu0 %v13777_v50  ;;  %v13955_v50 = vcombine.high %v3719_v32, %v3723_v33  ;;  %v3763_v11 = vld [vmem:[#allocation20 + $0x360] sm:$0xff] }
 0xb5c   :  { %v3815_v52 = vld [vmem:[#allocation20 + $0x500] sm:$0xff] }
 0xb5d   :  { %7123 = vmatpush1.bf16.msra.mxu1 %v13906_v39  ;;  %v3787_v39 = vld [vmem:[#allocation20 + $0x420] sm:$0xff] }
 0xb5e   :  { %5420 = vmatpush1.bf16.msra.mxu0 %v13776_v15  ;;  %7124 = vmatprep.subr.bf16.mxu1 %v13915_v45  ;;  %v13954_v15 = vcombine.low %v3719_v32, %v3723_v33  ;;  %v13824_v45 = vcombine.low %v4104_v34, %v4108_v51  ;;  %v14019_v40 = vcombine.high %v3783_v5, %v3787_v39  ;;  %v3819_v48 = vld [vmem:[#allocation20 + $0x520] sm:$0xff] }
 0xb5f   :  { %5421 = vmatprep.subr.bf16.mxu0 %v13785_v36  ;;  %v13963_v36 = vcombine.high %v3727_v35, %v3731_v63  ;;  %v3767_v32 = vld [vmem:[#allocation20 + $0x380] sm:$0xff] }
 0xb60   :  { %v3771_v33 = vld [vmem:[#allocation20 + $0x3a0] sm:$0xff] }
 0xb61   :  { %7125 = vmatpush1.bf16.msra.mxu1 %v13914_v56  ;;  %v3795_v56 = vld [vmem:[#allocation20 + $0x460] sm:$0xff] }
 0xb62   :  { %5422 = vmatpush1.bf16.msra.mxu0 %v13784_v38  ;;  %7126 = vmatprep.subr.bf16.mxu1 %v13923_v8  ;;  %v13962_v38 = vcombine.low %v3727_v35, %v3731_v63  ;;  %v14018_v8 = vcombine.low %v3783_v5, %v3787_v39  ;;  %v14027_v62 = vcombine.high %v3791_v47, %v3795_v56  ;;  %v3823_v34 = vld [vmem:[#allocation20 + $0x540] sm:$0xff] }
 0xb63   :  { %5423 = vmatprep.subr.bf16.mxu0 %v13793_v61  ;;  %v13971_v61 = vcombine.high %v3735_v42, %v3739_v43  ;;  %v3827_v51 = vld [vmem:[#allocation20 + $0x560] sm:$0xff] }
 0xb64   :  { %v3775_v35 = vld [vmem:[#allocation20 + $0x3c0] sm:$0xff] }
 0xb65   :  { %7127 = vmatpush1.bf16.msra.mxu1 %v13922_v31  ;;  %v3803_v31 = vld [vmem:[#allocation20 + $0x4a0] sm:$0xff] }
 0xb66   :  { %5424 = vmatpush1.bf16.msra.mxu0 %v13792_v18  ;;  %7128 = vmatprep.subr.bf16.mxu1 %v13931_v22  ;;  %v13970_v18 = vcombine.low %v3735_v42, %v3739_v43  ;;  %v17987_v22 = vpack.c.b16 %v17863_v37, %v17863_v37  ;;  %v14035_v55 = vcombine.high %v3799_v19, %v3803_v31  ;;  %v3779_v63 = vld [vmem:[#allocation20 + $0x3e0] sm:$0xff] }
 0xb67   :  { %5425 = vmatprep.subr.bf16.mxu0 %v13801_v12  ;;  %v14026_v12 = vcombine.low %v3791_v47, %v3795_v56  ;;  %v3831_v5 = vld [vmem:[#allocation20 + $0x580] sm:$0xff] }
 0xb68   :  { %v3835_v39 = vld [vmem:[#allocation20 + $0x5a0] sm:$0xff] }
 0xb69   :  { %7129 = vmatpush1.bf16.msra.mxu1 %v13930_v54  ;;  %v3807_v54 = vld [vmem:[#allocation20 + $0x4c0] sm:$0xff] }
 0xb6a   :  { %5426 = vmatpush1.bf16.msra.mxu0 %v13800_v20  ;;  %7130 = vmatprep.subr.bf16.mxu1 %v13939_v16  ;;  %v3811_v20 = vld [vmem:[#allocation20 + $0x4e0] sm:$0xff]  ;;  %v13978_v16 = vcombine.low %v3743_v60, %v3747_v49 }
 0xb6b   :  { %5427 = vmatprep.subr.bf16.mxu0 %v13809_v14  ;;  %v13987_v14 = vcombine.high %v3751_v29, %v3755_v28  ;;  %v14043_v37 = vcombine.high %v3807_v54, %v3811_v20  ;;  %v3911_v42 = vld [vmem:[#allocation20 + $0x800] sm:$0xff] }
 0xb6c   :  { %v3915_v43 = vld [vmem:[#allocation20 + $0x820] sm:$0xff] }
 0xb6d   :  { %7131 = vmatpush1.bf16.msra.mxu1 %v13938_v27  ;;  %v13986_v27 = vcombine.low %v3751_v29, %v3755_v28  ;;  %v3839_v47 = vld [vmem:[#allocation20 + $0x5c0] sm:$0xff] }
 0xb6e   :  { %5428 = vmatpush1.bf16.msra.mxu0 %v13808_v17  ;;  %7132 = vmatprep.subr.bf16.mxu1 %v13947_v30  ;;  %v14042_v17 = vcombine.low %v3807_v54, %v3811_v20  ;;  %v13995_v30 = vcombine.high %v3759_v6, %v3763_v11  ;;  %v3843_v56 = vld [vmem:[#allocation20 + $0x5e0] sm:$0xff] }
 0xb6f   :  { %5429 = vmatprep.subr.bf16.mxu0 %v13817_v0  ;;  %v14051_v0 = vcombine.high %v3815_v52, %v3819_v48  ;;  %v3919_v60 = vld [vmem:[#allocation20 + $0x840] sm:$0xff] }
 0xb70   :  { %v3923_v49 = vld [vmem:[#allocation20 + $0x860] sm:$0xff] }
 0xb71   :  { %7133 = vmatpush1.bf16.msra.mxu1 %v13946_v41  ;;  %v13994_v41 = vcombine.low %v3759_v6, %v3763_v11  ;;  %v3927_v28 = vld [vmem:[#allocation20 + $0x880] sm:$0xff] }
 0xb72   :  { %5430 = vmatpush1.bf16.msra.mxu0 %v13816_v53  ;;  %7134 = vmatprep.subr.bf16.mxu1 %v13955_v50  ;;  %v14050_v53 = vcombine.low %v3815_v52, %v3819_v48  ;;  %v14003_v50 = vcombine.high %v3767_v32, %v3771_v33  ;;  %v3931_v54 = vld [vmem:[#allocation20 + $0x8a0] sm:$0xff] }
 0xb73   :  { %5431 = vmatprep.subr.bf16.mxu0 %v13825_v46  ;;  %v14059_v46 = vcombine.high %v3823_v34, %v3827_v51  ;;  %v3855_v20 = vld [vmem:[#allocation20 + $0x640] sm:$0xff] }
 0xb74   :  { %v3935_v6 = vld [vmem:[#allocation20 + $0x8c0] sm:$0xff] }
 0xb75   :  { %7135 = vmatpush1.bf16.msra.mxu1 %v13954_v15  ;;  %v14002_v15 = vcombine.low %v3767_v32, %v3771_v33  ;;  %v3939_v11 = vld [vmem:[#allocation20 + $0x8e0] sm:$0xff] }
 0xb76   :  { %5432 = vmatpush1.bf16.msra.mxu0 %v13824_v45  ;;  %7136 = vmatprep.subr.bf16.mxu1 %v13963_v36  ;;  %v14058_v45 = vcombine.low %v3823_v34, %v3827_v51  ;;  %v14011_v36 = vcombine.high %v3775_v35, %v3779_v63  ;;  %v3863_v52 = vld [vmem:[#allocation20 + $0x680] sm:$0xff] }
 0xb77   :  { %7159 = vmatprep.subr.bf16.mxu0 %v14019_v40  ;;  %v14067_v40 = vcombine.high %v3831_v5, %v3835_v39  ;;  %v3867_v48 = vld [vmem:[#allocation20 + $0x6a0] sm:$0xff] }
 0xb78   :  { %v3943_v32 = vld [vmem:[#allocation20 + $0x900] sm:$0xff] }
 0xb79   :  { %7137 = vmatpush1.bf16.msra.mxu1 %v13962_v38  ;;  %5434 = vmatmul.mubr.bf16.vlgmr.msra.gmra.mrb[96].mxu0 %v17943_v9  ;;  %v14034_v9 = vcombine.low %v3799_v19, %v3803_v31  ;;  %v14010_v38 = vcombine.low %v3775_v35, %v3779_v63  ;;  %v3847_v19 = vld [vmem:[#allocation20 + $0x600] sm:$0xff] }
 0xb7a   :  { %7138 = vmatprep.subr.bf16.mxu1 %v13971_v61  ;;  %7160 = vmatpush1.bf16.msra.mxu0 %v14018_v8  ;;  %v14066_v8 = vcombine.low %v3831_v5, %v3835_v39  ;;  %v14147_v61 = vcombine.high %v3911_v42, %v3915_v43  ;;  %v3851_v31 = vld [vmem:[#allocation20 + $0x620] sm:$0xff] }
 0xb7b   :  { %7191 = vmatprep.mubr.bf16.mxu0 %v17987_v22  ;;  %7161 = vmatprep.subr.bf16.mxu0 %v14027_v62  ;;  %v14075_v62 = vcombine.high %v3839_v47, %v3843_v56  ;;  %v14083_v29 = vcombine.high %v3847_v19, %v3851_v31  ;;  %v3947_v33 = vld [vmem:[#allocation20 + $0x920] sm:$0xff] }
 0xb7c   :  { %v3871_v34 = vld [vmem:[#allocation20 + $0x6c0] sm:$0xff] }
 0xb7d   :  { %7139 = vmatpush1.bf16.msra.mxu1 %v13970_v18  ;;  %v14146_v18 = vcombine.low %v3911_v42, %v3915_v43  ;;  %v3875_v51 = vld [vmem:[#allocation20 + $0x6e0] sm:$0xff] }
 0xb7e   :  { %7140 = vmatprep.subr.bf16.mxu1 %v13979_v23  ;;  %7162 = vmatpush1.bf16.msra.mxu0 %v14026_v12  ;;  %v17992_v12 = vpack.c.b16 %v17854_v58, %v17854_v58  ;;  %v14074_v23 = vcombine.low %v3839_v47, %v3843_v56  ;;  %v14082_v58 = vcombine.low %v3847_v19, %v3851_v31  ;;  %v3951_v35 = vld [vmem:[#allocation20 + $0x940] sm:$0xff] }
 0xb7f   :  { %7163 = vmatprep.subr.bf16.mxu0 %v14035_v55  ;;  %v14155_v55 = vcombine.high %v3919_v60, %v3923_v49  ;;  %v3955_v63 = vld [vmem:[#allocation20 + $0x960] sm:$0xff] }
 0xb80   :  { %v3879_v5 = vld [vmem:[#allocation20 + $0x700] sm:$0xff] }
 0xb81   :  { %7141 = vmatpush1.bf16.msra.mxu1 %v13978_v16  ;;  %v3859_v16 = vld [vmem:[#allocation20 + $0x660] sm:$0xff] }
 0xb82   :  { %7142 = vmatprep.subr.bf16.mxu1 %v13987_v14  ;;  %7164 = vmatpush1.bf16.msra.mxu0 %v14034_v9  ;;  %v14154_v9 = vcombine.low %v3919_v60, %v3923_v49  ;;  %v14163_v14 = vcombine.high %v3927_v28, %v3931_v54  ;;  %v3883_v39 = vld [vmem:[#allocation20 + $0x720] sm:$0xff] }
 0xb83   :  { %7165 = vmatprep.subr.bf16.mxu0 %v14043_v37  ;;  %v14091_v37 = vcombine.high %v3855_v20, %v3859_v16  ;;  %v3959_v42 = vld [vmem:[#allocation20 + $0x980] sm:$0xff] }
 0xb84   :  { %v3963_v43 = vld [vmem:[#allocation20 + $0x9a0] sm:$0xff] }
 0xb85   :  { %7143 = vmatpush1.bf16.msra.mxu1 %v13986_v27  ;;  %v14162_v27 = vcombine.low %v3927_v28, %v3931_v54  ;;  %v3887_v47 = vld [vmem:[#allocation20 + $0x740] sm:$0xff] }
 0xb86   :  { %7144 = vmatprep.subr.bf16.mxu1 %v13995_v30  ;;  %7166 = vmatpush1.bf16.msra.mxu0 %v14042_v17  ;;  %v14090_v17 = vcombine.low %v3855_v20, %v3859_v16  ;;  %v14171_v30 = vcombine.high %v3935_v6, %v3939_v11  ;;  %v3891_v56 = vld [vmem:[#allocation20 + $0x760] sm:$0xff] }
 0xb87   :  { %7167 = vmatprep.subr.bf16.mxu0 %v14051_v0  ;;  %v14099_v0 = vcombine.high %v3863_v52, %v3867_v48  ;;  %v14123_v60 = vcombine.high %v3887_v47, %v3891_v56  ;;  %v3967_v49 = vld [vmem:[#allocation20 + $0x9c0] sm:$0xff]  ;;  %v14122_v54 = vcombine.low %v3887_v47, %v3891_v56  ;;  %v3808_v56 = vld [vmem:[#allocation20 + $0x4c8] sm:$0xff] }
 0xb88   :  { %v3971_v19 = vld [vmem:[#allocation20 + $0x9e0] sm:$0xff] }
 0xb89   :  { %7145 = vmatpush1.bf16.msra.mxu1 %v13994_v41  ;;  %v14170_v41 = vcombine.low %v3935_v6, %v3939_v11  ;;  %v14203_v20 = vcombine.high %v3967_v49, %v3971_v19  ;;  %v3907_v6 = vld [vmem:[#allocation20 + $0x7e0] sm:$0xff] }
 0xb8a   :  { %7146 = vmatprep.subr.bf16.mxu1 %v14003_v50  ;;  %7168 = vmatpush1.bf16.msra.mxu0 %v14050_v53  ;;  %v14098_v53 = vcombine.low %v3863_v52, %v3867_v48  ;;  %v14179_v50 = vcombine.high %v3943_v32, %v3947_v33  ;;  %v14202_v48 = vcombine.low %v3967_v49, %v3971_v19  ;;  %v3816_v19 = vld [vmem:[#allocation20 + $0x508] sm:$0xff] }
 0xb8b   :  { %7169 = vmatprep.subr.bf16.mxu0 %v14059_v46  ;;  %v14107_v46 = vcombine.high %v3871_v34, %v3875_v51 }
 0xb8d   :  { %7147 = vmatpush1.bf16.msra.mxu1 %v14002_v15  ;;  %v14178_v15 = vcombine.low %v3943_v32, %v3947_v33 }
 0xb8e   :  { %7148 = vmatprep.subr.bf16.mxu1 %v14011_v36  ;;  %7170 = vmatpush1.bf16.msra.mxu0 %v14058_v45  ;;  %v14106_v45 = vcombine.low %v3871_v34, %v3875_v51  ;;  %v14187_v36 = vcombine.high %v3951_v35, %v3955_v63  ;;  %v3792_v34 = vld [vmem:[#allocation20 + $0x448] sm:$0xff] }
 0xb8f   :  { %7171 = vmatprep.subr.bf16.mxu0 %v14067_v40  ;;  %v14115_v40 = vcombine.high %v3879_v5, %v3883_v39  ;;  %v3796_v51 = vld [vmem:[#allocation20 + $0x468] sm:$0xff] }
 0xb91   :  { %7149 = vmatpush1.bf16.msra.mxu1 %v14010_v38  ;;  %v14186_v38 = vcombine.low %v3951_v35, %v3955_v63  ;;  %v14029_v63 = vcombine.high %v3792_v34, %v3796_v51 }
 0xb92   :  { %7172 = vmatpush1.bf16.msra.mxu0 %v14066_v8  ;;  %7200 = vmatprep.subr.bf16.mxu1 %v14147_v61  ;;  %v14114_v8 = vcombine.low %v3879_v5, %v3883_v39  ;;  %v14195_v61 = vcombine.high %v3959_v42, %v3963_v43  ;;  %v3800_v39 = vld [vmem:[#allocation20 + $0x488] sm:$0xff] }
 0xb93   :  { %7173 = vmatprep.subr.bf16.mxu0 %v14075_v62 }
 0xb94   :  { %7151 = vmatmul.mubr.bf16.vlgmr.msra.gmra.mrb[84].mxu1 %v17992_v12 }
 0xb95   :  { %7201 = vmatpush1.bf16.msra.mxu1 %v14146_v18  ;;  %7232 = vmatprep.mubr.bf16.mxu1 %v17204_v1  ;;  %v3895_v18 = vld [vmem:[#allocation20 + $0x780] sm:$0xff] }
 0xb96   :  { %7174 = vmatpush1.bf16.msra.mxu0 %v14074_v23  ;;  %7202 = vmatprep.subr.bf16.mxu1 %v14155_v55  ;;  %v3899_v23 = vld [vmem:[#allocation20 + $0x7a0] sm:$0xff] }
 0xb97   :  { %7175 = vmatprep.subr.bf16.mxu0 %v14083_v29  ;;  %v14194_v29 = vcombine.low %v3959_v42, %v3963_v43  ;;  %v14131_v16 = vcombine.high %v3895_v18, %v3899_v23 }
 0xb99   :  { %7203 = vmatpush1.bf16.msra.mxu1 %v14154_v9  ;;  %v3784_v9 = vld [vmem:[#allocation20 + $0x408] sm:$0xff] }
 0xb9a   :  { %7176 = vmatpush1.bf16.msra.mxu0 %v14082_v58  ;;  %7204 = vmatprep.subr.bf16.mxu1 %v14163_v14  ;;  %v3788_v58 = vld [vmem:[#allocation20 + $0x428] sm:$0xff] }
 0xb9b   :  { %7177 = vmatprep.subr.bf16.mxu0 %v14091_v37  ;;  %v3903_v37 = vld [vmem:[#allocation20 + $0x7c0] sm:$0xff] }
 0xb9c   :  { %v14139_v33 = vcombine.high %v3903_v37, %v3907_v6  ;;  %v14138_v35 = vcombine.low %v3903_v37, %v3907_v6 }
 0xb9d   :  { %7205 = vmatpush1.bf16.msra.mxu1 %v14162_v27 }
 0xb9e   :  { %7178 = vmatpush1.bf16.msra.mxu0 %v14090_v17  ;;  %7206 = vmatprep.subr.bf16.mxu1 %v14171_v30  ;;  %v14130_v30 = vcombine.low %v3895_v18, %v3899_v23  ;;  %v3680_v18 = vld [vmem:[#allocation20 + $0xc8] sm:$0xff] }
 0xb9f   :  { %7179 = vmatprep.subr.bf16.mxu0 %v14099_v0  ;;  %v14021_v0 = vcombine.high %v3784_v9, %v3788_v58  ;;  %v3684_v23 = vld [vmem:[#allocation20 + $0xe8] sm:$0xff] }
 0xba0   :  { %v13916_v37 = vcombine.low %v3680_v18, %v3684_v23 }
 0xba1   :  { %7207 = vmatpush1.bf16.msra.mxu1 %v14170_v41  ;;  %v3656_v41 = vld [vmem:[#allocation20 + $0x8] sm:$0xff] }
 0xba2   :  { %7180 = vmatpush1.bf16.msra.mxu0 %v14098_v53  ;;  %7208 = vmatprep.subr.bf16.mxu1 %v14179_v50  ;;  %v3660_v53 = vld [vmem:[#allocation20 + $0x28] sm:$0xff]  ;;  %v14020_v50 = vcombine.low %v3784_v9, %v3788_v58 }
 0xba3   :  { %7181 = vmatprep.subr.bf16.mxu0 %v14107_v46  ;;  %v18002_v46 = vpack.c.b16 %v17871_v59, %v17871_v59  ;;  %v13893_v5 = vcombine.high %v3656_v41, %v3660_v53  ;;  %v13892_v42 = vcombine.low %v3656_v41, %v3660_v53  ;;  %v18008_v59 = vpack.c.b16 %v17857_v13, %v17857_v13  ;;  %v3688_v9 = vld [vmem:[#allocation20 + $0x108] sm:$0xff] }
 0xba4   :  { %v3692_v58 = vld [vmem:[#allocation20 + $0x128] sm:$0xff] }
 0xba5   :  { %7209 = vmatpush1.bf16.msra.mxu1 %v14178_v15  ;;  %v3804_v15 = vld [vmem:[#allocation20 + $0x4a8] sm:$0xff] }
 0xba6   :  { %7182 = vmatpush1.bf16.msra.mxu0 %v14106_v45  ;;  %7210 = vmatprep.subr.bf16.mxu1 %v14187_v36  ;;  %v3664_v45 = vld [vmem:[#allocation20 + $0x48] sm:$0xff]  ;;  %v14037_v43 = vcombine.high %v3800_v39, %v3804_v15 }
 0xba7   :  { %v5189_v62 = vpop.f32.mrb[68].mxu1  ;;  %7183 = vmatprep.subr.bf16.mxu0 %v14115_v40  ;;  %v3668_v36 = vld [vmem:[#allocation20 + $0x68] sm:$0xff]  ;;  %v14028_v40 = vcombine.low %v3792_v34, %v3796_v51 }
 0xba8   :  { %v5191_v31 = vpop.f32.mrb[69].mxu1  ;;  %v13901_v47 = vcombine.high %v3664_v45, %v3668_v36  ;;  %v3840_v53 = vld [vmem:[#allocation20 + $0x5c8] sm:$0xff] }
 0xba9   :  { %7211 = vmatpush1.bf16.msra.mxu1 %v14186_v38  ;;  %v5193_v55 = vpop.f32.mrb[70].mxu1  ;;  %v3812_v38 = vld [vmem:[#allocation20 + $0x4e8] sm:$0xff] }
 0xbaa   :  { %v5194_v28 = vpop.f32.mrb[71].mxu1  ;;  %7184 = vmatpush1.bf16.msra.mxu0 %v14114_v8  ;;  %7212 = vmatprep.subr.bf16.mxu1 %v14195_v61  ;;  %v3672_v8 = vld [vmem:[#allocation20 + $0x88] sm:$0xff]  ;;  %v14045_v49 = vcombine.high %v3808_v56, %v3812_v38  ;;  %v14044_v55 = vcombine.low %v3808_v56, %v3812_v38 }
 0xbab   :  { %7185 = vmatprep.subr.bf16.mxu0 %v14123_v60  ;;  %v3676_v61 = vld [vmem:[#allocation20 + $0xa8] sm:$0xff]  ;;  %v13900_v60 = vcombine.low %v3664_v45, %v3668_v36 }
 0xbac   :  { %v5230_v14 = vpop.f32.mrb[84].mxu0  ;;  %v13909_v13 = vcombine.high %v3672_v8, %v3676_v61  ;;  %v3712_v56 = vld [vmem:[#allocation20 + $0x1c8] sm:$0xff] }
 0xbad   :  { %7213 = vmatpush1.bf16.msra.mxu1 %v14194_v29  ;;  %v17996_v11 = vadd.f32 %v5230_v14, %v5189_v62  ;;  %v5232_v52 = vpop.f32.mrb[85].mxu0  ;;  %v14036_v62 = vcombine.low %v3800_v39, %v3804_v15  ;;  %v13908_v29 = vcombine.low %v3672_v8, %v3676_v61  ;;  %v3716_v38 = vld [vmem:[#allocation20 + $0x1e8] sm:$0xff] }
 0xbae   :  { %v17998_v27 = vadd.f32 %v5232_v52, %v5191_v31  ;;  %7186 = vmatpush1.bf16.msra.mxu0 %v14122_v54  ;;  %7214 = vmatprep.subr.bf16.mxu1 %v14203_v20  ;;  %v5234_v17 = vpop.f32.mrb[86].mxu0  ;;  %v3820_v31 = vld [vmem:[#allocation20 + $0x528] sm:$0xff]  ;;  %v13917_v54 = vcombine.high %v3680_v18, %v3684_v23  ;;  %v13925_v52 = vcombine.high %v3688_v9, %v3692_v58 }
 0xbaf   :  { %v5235_v32 = vpop.f32.mrb[87].mxu0  ;;  %7187 = vmatprep.subr.bf16.mxu0 %v14131_v16  ;;  %v14053_v28 = vcombine.high %v3816_v19, %v3820_v31  ;;  %v3824_v20 = vld [vmem:[#allocation20 + $0x548] sm:$0xff]  ;;  %v14052_v14 = vcombine.low %v3816_v19, %v3820_v31  ;;  %v13948_v23 = vcombine.low %v3712_v56, %v3716_v38 }
 0xbb0   :  { %v3828_v16 = vld [vmem:[#allocation20 + $0x568] sm:$0xff] }
 0xbb1   :  { %7215 = vmatpush1.bf16.msra.mxu1 %v14202_v48  ;;  %v14061_v6 = vcombine.high %v3824_v20, %v3828_v16  ;;  %v3832_v48 = vld [vmem:[#allocation20 + $0x588] sm:$0xff]  ;;  %v14060_v32 = vcombine.low %v3824_v20, %v3828_v16 }
 0xbb2   :  { %7188 = vmatpush1.bf16.msra.mxu0 %v14130_v30  ;;  %7282 = vmatprep.subr.bf16.mxu1 %v14021_v0  ;;  %v3836_v17 = vld [vmem:[#allocation20 + $0x5a8] sm:$0xff] }
 0xbb3   :  { %7189 = vmatprep.subr.bf16.mxu0 %v14139_v33  ;;  %v3696_v30 = vld [vmem:[#allocation20 + $0x148] sm:$0xff]  ;;  %v13924_v33 = vcombine.low %v3688_v9, %v3692_v58  ;;  %v14069_v34 = vcombine.high %v3832_v48, %v3836_v17  ;;  %v14068_v15 = vcombine.low %v3832_v48, %v3836_v17 }
 0xbb4   :  { %7233 = vmatmul.mubr.bf16.vlgmr.msra.gmra.mrb[88].mxu1 %v18002_v46  ;;  %v3700_v0 = vld [vmem:[#allocation20 + $0x168] sm:$0xff] }
 0xbb5   :  { %7283 = vmatpush1.bf16.msra.mxu1 %v14020_v50  ;;  %7314 = vmatprep.mubr.bf16.mxu1 %v17987_v22  ;;  %v13933_v41 = vcombine.high %v3696_v30, %v3700_v0  ;;  %v3844_v50 = vld [vmem:[#allocation20 + $0x5e8] sm:$0xff]  ;;  %v13932_v36 = vcombine.low %v3696_v30, %v3700_v0 }
 0xbb6   :  { %7190 = vmatpush1.bf16.msra.mxu0 %v14138_v35  ;;  %7284 = vmatprep.subr.bf16.mxu1 %v14029_v63  ;;  %v3704_v63 = vld [vmem:[#allocation20 + $0x188] sm:$0xff]  ;;  %v14076_v8 = vcombine.low %v3840_v53, %v3844_v50 }
 0xbb7   :  { %7241 = vmatprep.subr.bf16.mxu0 %v13893_v5  ;;  %v3708_v5 = vld [vmem:[#allocation20 + $0x1a8] sm:$0xff] }
 0xbb8   :  { %v13940_v61 = vcombine.low %v3704_v63, %v3708_v5  ;;  %v3720_v19 = vld [vmem:[#allocation20 + $0x208] sm:$0xff] }
 0xbb9   :  { %7285 = vmatpush1.bf16.msra.mxu1 %v14028_v40  ;;  %7192 = vmatmul.mubr.bf16.vlgmr.msra.gmra.mrb[100].mxu0 %v18008_v59  ;;  %v14077_v40 = vcombine.high %v3840_v53, %v3844_v50  ;;  %v3724_v31 = vld [vmem:[#allocation20 + $0x228] sm:$0xff] }
 0xbba   :  { %7242 = vmatpush1.bf16.msra.mxu0 %v13892_v42  ;;  %7273 = vmatprep.mubr.bf16.mxu0 %v17980_v26  ;;  %v13941_v42 = vcombine.high %v3704_v63, %v3708_v5  ;;  %v3728_v20 = vld [vmem:[#allocation20 + $0x248] sm:$0xff]  ;;  %v13956_v58 = vcombine.low %v3720_v19, %v3724_v31 }
 0xbbb   :  { %7286 = vmatprep.subr.bf16.mxu1 %v14037_v43  ;;  %7243 = vmatprep.subr.bf16.mxu0 %v13901_v47  ;;  %v3848_v43 = vld [vmem:[#allocation20 + $0x608] sm:$0xff] }
 0xbbc   :  { %v3852_v47 = vld [vmem:[#allocation20 + $0x628] sm:$0xff] }
 0xbbd   :  { %7287 = vmatpush1.bf16.msra.mxu1 %v14036_v62  ;;  %v14085_v62 = vcombine.high %v3848_v43, %v3852_v47  ;;  %v14084_v18 = vcombine.low %v3848_v43, %v3852_v47  ;;  %v3732_v16 = vld [vmem:[#allocation20 + $0x268] sm:$0xff] }
 0xbbe   :  { %7244 = vmatpush1.bf16.msra.mxu0 %v13900_v60  ;;  %7288 = vmatprep.subr.bf16.mxu1 %v14045_v49  ;;  %v13949_v60 = vcombine.high %v3712_v56, %v3716_v38  ;;  %v3856_v49 = vld [vmem:[#allocation20 + $0x648] sm:$0xff]  ;;  %v13964_v0 = vcombine.low %v3728_v20, %v3732_v16 }
 0xbbf   :  { %7245 = vmatprep.subr.bf16.mxu0 %v13909_v13  ;;  %v3860_v13 = vld [vmem:[#allocation20 + $0x668] sm:$0xff] }
 0xbc0   :  { %v14092_v9 = vcombine.low %v3856_v49, %v3860_v13  ;;  %v3736_v48 = vld [vmem:[#allocation20 + $0x288] sm:$0xff] }
 0xbc1   :  { %7289 = vmatpush1.bf16.msra.mxu1 %v14044_v55  ;;  %v14093_v55 = vcombine.high %v3856_v49, %v3860_v13  ;;  %v3740_v17 = vld [vmem:[#allocation20 + $0x2a8] sm:$0xff] }
 0xbc2   :  { %7246 = vmatpush1.bf16.msra.mxu0 %v13908_v29  ;;  %7290 = vmatprep.subr.bf16.mxu1 %v14053_v28  ;;  %v13957_v29 = vcombine.high %v3720_v19, %v3724_v31  ;;  %v3864_v28 = vld [vmem:[#allocation20 + $0x688] sm:$0xff]  ;;  %v13972_v5 = vcombine.low %v3736_v48, %v3740_v17 }
 0xbc3   :  { %7247 = vmatprep.subr.bf16.mxu0 %v13917_v54  ;;  %v3868_v54 = vld [vmem:[#allocation20 + $0x6a8] sm:$0xff] }
 0xbc4   :  { %v14100_v30 = vcombine.low %v3864_v28, %v3868_v54  ;;  %v3744_v53 = vld [vmem:[#allocation20 + $0x2c8] sm:$0xff] }
 0xbc5   :  { %7291 = vmatpush1.bf16.msra.mxu1 %v14052_v14  ;;  %v14101_v14 = vcombine.high %v3864_v28, %v3868_v54  ;;  %v3748_v50 = vld [vmem:[#allocation20 + $0x2e8] sm:$0xff] }
 0xbc6   :  { %7248 = vmatpush1.bf16.msra.mxu0 %v13916_v37  ;;  %7292 = vmatprep.subr.bf16.mxu1 %v14061_v6  ;;  %v13965_v37 = vcombine.high %v3728_v20, %v3732_v16  ;;  %v3872_v6 = vld [vmem:[#allocation20 + $0x6c8] sm:$0xff]  ;;  %v13980_v47 = vcombine.low %v3744_v53, %v3748_v50 }
 0xbc7   :  { %v18012_v51 = vpop.f32.mrb[72].mxu1  ;;  %7249 = vmatprep.subr.bf16.mxu0 %v13925_v52  ;;  %v3876_v52 = vld [vmem:[#allocation20 + $0x6e8] sm:$0xff] }
 0xbc8   :  { %v18014_v35 = vpop.f32.mrb[73].mxu1  ;;  %v14108_v63 = vcombine.low %v3872_v6, %v3876_v52 }
 0xbc9   :  { %v5316_v39 = vpop.f32.mrb[74].mxu1  ;;  %7293 = vmatpush1.bf16.msra.mxu1 %v14060_v32  ;;  %v14109_v32 = vcombine.high %v3872_v6, %v3876_v52  ;;  %v3780_v6 = vld [vmem:[#allocation20 + $0x3e8] sm:$0xff] }
 0xbca   :  { %v5317_v45 = vpop.f32.mrb[75].mxu1  ;;  %7250 = vmatpush1.bf16.msra.mxu0 %v13924_v33  ;;  %7294 = vmatprep.subr.bf16.mxu1 %v14069_v34  ;;  %v13973_v33 = vcombine.high %v3736_v48, %v3740_v17  ;;  %v3880_v34 = vld [vmem:[#allocation20 + $0x708] sm:$0xff] }
 0xbcb   :  { %7251 = vmatprep.subr.bf16.mxu0 %v13933_v41  ;;  %v3884_v41 = vld [vmem:[#allocation20 + $0x728] sm:$0xff] }
 0xbcc   :  { %v14117_v39 = vcombine.high %v3880_v34, %v3884_v41  ;;  %v3888_v45 = vld [vmem:[#allocation20 + $0x748] sm:$0xff]  ;;  %v14116_v43 = vcombine.low %v3880_v34, %v3884_v41 }
 0xbcd   :  { %7295 = vmatpush1.bf16.msra.mxu1 %v14068_v15  ;;  %v13981_v15 = vcombine.high %v3744_v53, %v3748_v50  ;;  %v3665_v53 = vld [vmem:[#allocation20 + $0x50] sm:$0xff] }
 0xbce   :  { %7252 = vmatpush1.bf16.msra.mxu0 %v13932_v36  ;;  %7296 = vmatprep.subr.bf16.mxu1 %v14077_v40  ;;  %v3892_v36 = vld [vmem:[#allocation20 + $0x768] sm:$0xff]  ;;  %v3669_v50 = vld [vmem:[#allocation20 + $0x70] sm:$0xff] }
 0xbcf   :  { %7253 = vmatprep.subr.bf16.mxu0 %v13941_v42  ;;  %v3752_v40 = vld [vmem:[#allocation20 + $0x308] sm:$0xff]  ;;  %v14125_v56 = vcombine.high %v3888_v45, %v3892_v36  ;;  %v14124_v49 = vcombine.low %v3888_v45, %v3892_v36  ;;  %v3673_v45 = vld [vmem:[#allocation20 + $0x90] sm:$0xff] }
 0xbd0   :  { %v3756_v42 = vld [vmem:[#allocation20 + $0x328] sm:$0xff]  ;;  %v3677_v36 = vld [vmem:[#allocation20 + $0xb0] sm:$0xff] }
 0xbd1   :  { %7297 = vmatpush1.bf16.msra.mxu1 %v14076_v8  ;;  %v13989_v38 = vcombine.high %v3752_v40, %v3756_v42  ;;  %v3896_v8 = vld [vmem:[#allocation20 + $0x788] sm:$0xff]  ;;  %v13988_v13 = vcombine.low %v3752_v40, %v3756_v42 }
 0xbd2   :  { %7254 = vmatpush1.bf16.msra.mxu0 %v13940_v61  ;;  %7298 = vmatprep.subr.bf16.mxu1 %v14085_v62  ;;  %v3900_v61 = vld [vmem:[#allocation20 + $0x7a8] sm:$0xff] }
 0xbd3   :  { %7255 = vmatprep.subr.bf16.mxu0 %v13949_v60  ;;  %v3760_v62 = vld [vmem:[#allocation20 + $0x348] sm:$0xff]  ;;  %v14133_v19 = vcombine.high %v3896_v8, %v3900_v61  ;;  %v14132_v28 = vcombine.low %v3896_v8, %v3900_v61  ;;  %v3681_v8 = vld [vmem:[#allocation20 + $0xd0] sm:$0xff] }
 0xbd4   :  { %v3764_v60 = vld [vmem:[#allocation20 + $0x368] sm:$0xff]  ;;  %v3685_v61 = vld [vmem:[#allocation20 + $0xf0] sm:$0xff] }
 0xbd5   :  { %7299 = vmatpush1.bf16.msra.mxu1 %v14084_v18  ;;  %v13997_v31 = vcombine.high %v3760_v62, %v3764_v60  ;;  %v3904_v18 = vld [vmem:[#allocation20 + $0x7c8] sm:$0xff]  ;;  %v13996_v54 = vcombine.low %v3760_v62, %v3764_v60 }
 0xbd6   :  { %7256 = vmatpush1.bf16.msra.mxu0 %v13948_v23  ;;  %7300 = vmatprep.subr.bf16.mxu1 %v14093_v55  ;;  %v3908_v23 = vld [vmem:[#allocation20 + $0x7e8] sm:$0xff] }
 0xbd7   :  { %7257 = vmatprep.subr.bf16.mxu0 %v13957_v29  ;;  %v3768_v55 = vld [vmem:[#allocation20 + $0x388] sm:$0xff]  ;;  %v14141_v20 = vcombine.high %v3904_v18, %v3908_v23  ;;  %v14140_v17 = vcombine.low %v3904_v18, %v3908_v23  ;;  %v3689_v18 = vld [vmem:[#allocation20 + $0x110] sm:$0xff] }
 0xbd8   :  { %v3772_v29 = vld [vmem:[#allocation20 + $0x3a8] sm:$0xff]  ;;  %v3693_v23 = vld [vmem:[#allocation20 + $0x130] sm:$0xff] }
 0xbd9   :  { %7301 = vmatpush1.bf16.msra.mxu1 %v14092_v9  ;;  %v14005_v16 = vcombine.high %v3768_v55, %v3772_v29  ;;  %v3657_v9 = vld [vmem:[#allocation20 + $0x10] sm:$0xff]  ;;  %v3920_v40 = vld [vmem:[#allocation20 + $0x848] sm:$0xff] }
 0xbda   :  { %7258 = vmatpush1.bf16.msra.mxu0 %v13956_v58  ;;  %7302 = vmatprep.subr.bf16.mxu1 %v14101_v14  ;;  %v3661_v58 = vld [vmem:[#allocation20 + $0x30] sm:$0xff]  ;;  %v3924_v42 = vld [vmem:[#allocation20 + $0x868] sm:$0xff] }
 0xbdb   :  { %7259 = vmatprep.subr.bf16.mxu0 %v13965_v37  ;;  %v3776_v37 = vld [vmem:[#allocation20 + $0x3c8] sm:$0xff] }
 0xbdc   :  { %v14013_v41 = vcombine.high %v3776_v37, %v3780_v6  ;;  %v3928_v62 = vld [vmem:[#allocation20 + $0x888] sm:$0xff] }
 0xbdd   :  { %7303 = vmatpush1.bf16.msra.mxu1 %v14100_v30  ;;  %v3932_v60 = vld [vmem:[#allocation20 + $0x8a8] sm:$0xff] }
 0xbde   :  { %7260 = vmatpush1.bf16.msra.mxu0 %v13964_v0  ;;  %7304 = vmatprep.subr.bf16.mxu1 %v14109_v32  ;;  %v14004_v32 = vcombine.low %v3768_v55, %v3772_v29  ;;  %v3936_v55 = vld [vmem:[#allocation20 + $0x8c8] sm:$0xff] }
 0xbdf   :  { %7261 = vmatprep.subr.bf16.mxu0 %v13973_v33  ;;  %v13895_v33 = vcombine.high %v3657_v9, %v3661_v58  ;;  %v3940_v29 = vld [vmem:[#allocation20 + $0x8e8] sm:$0xff] }
 0xbe1   :  { %7305 = vmatpush1.bf16.msra.mxu1 %v14108_v63  ;;  %v3912_v63 = vld [vmem:[#allocation20 + $0x808] sm:$0xff] }
 0xbe2   :  { %7262 = vmatpush1.bf16.msra.mxu0 %v13972_v5  ;;  %7306 = vmatprep.subr.bf16.mxu1 %v14117_v39  ;;  %v3916_v5 = vld [vmem:[#allocation20 + $0x828] sm:$0xff]  ;;  %v14012_v39 = vcombine.low %v3776_v37, %v3780_v6  ;;  %v13926_v6 = vcombine.low %v3689_v18, %v3693_v23 }
 0xbe3   :  { %7263 = vmatprep.subr.bf16.mxu0 %v13981_v15  ;;  %v13903_v15 = vcombine.high %v3665_v53, %v3669_v50  ;;  %v3948_v37 = vld [vmem:[#allocation20 + $0x928] sm:$0xff] }
 0xbe5   :  { %7307 = vmatpush1.bf16.msra.mxu1 %v14116_v43  ;;  %v13902_v43 = vcombine.low %v3665_v53, %v3669_v50 }
 0xbe6   :  { %7264 = vmatpush1.bf16.msra.mxu0 %v13980_v47  ;;  %7308 = vmatprep.subr.bf16.mxu1 %v14125_v56  ;;  %v14148_v47 = vcombine.low %v3912_v63, %v3916_v5  ;;  %v13911_v56 = vcombine.high %v3673_v45, %v3677_v36 }
 0xbe7   :  { %7265 = vmatprep.subr.bf16.mxu0 %v13989_v38  ;;  %v14157_v38 = vcombine.high %v3920_v40, %v3924_v42 }
 0xbe9   :  { %7309 = vmatpush1.bf16.msra.mxu1 %v14124_v49  ;;  %v13910_v49 = vcombine.low %v3673_v45, %v3677_v36  ;;  %v3960_v45 = vld [vmem:[#allocation20 + $0x988] sm:$0xff] }
 0xbea   :  { %7266 = vmatpush1.bf16.msra.mxu0 %v13988_v13  ;;  %7310 = vmatprep.subr.bf16.mxu1 %v14133_v19  ;;  %v14156_v13 = vcombine.low %v3920_v40, %v3924_v42  ;;  %v13919_v19 = vcombine.high %v3681_v8, %v3685_v61  ;;  %v3964_v36 = vld [vmem:[#allocation20 + $0x9a8] sm:$0xff] }
 0xbeb   :  { %7267 = vmatprep.subr.bf16.mxu0 %v13997_v31  ;;  %v14165_v31 = vcombine.high %v3928_v62, %v3932_v60 }
 0xbec   :  { %v5271_v14 = vpop.f32.mrb[88].mxu0 }
 0xbed   :  { %7311 = vmatpush1.bf16.msra.mxu1 %v14132_v28  ;;  %v18017_v52 = vadd.f32 %v18012_v51, %v5271_v14  ;;  %v5273_v48 = vpop.f32.mrb[89].mxu0  ;;  %v13894_v51 = vcombine.low %v3657_v9, %v3661_v58  ;;  %v13918_v28 = vcombine.low %v3681_v8, %v3685_v61  ;;  %v3697_v9 = vld [vmem:[#allocation20 + $0x150] sm:$0xff]  ;;  %v3944_v14 = vld [vmem:[#allocation20 + $0x908] sm:$0xff] }
 0xbee   :  { %v18020_v30 = vadd.f32 %v18014_v35, %v5273_v48  ;;  %v5275_v0 = vpop.f32.mrb[90].mxu0  ;;  %7268 = vmatpush1.bf16.msra.mxu0 %v13996_v54  ;;  %7312 = vmatprep.subr.bf16.mxu1 %v14141_v20  ;;  %v14149_v35 = vcombine.high %v3912_v63, %v3916_v5  ;;  %v14164_v54 = vcombine.low %v3928_v62, %v3932_v60  ;;  %v3701_v58 = vld [vmem:[#allocation20 + $0x170] sm:$0xff]  ;;  %v3968_v60 = vld [vmem:[#allocation20 + $0x9c8] sm:$0xff] }
 0xbef   :  { %v5276_v34 = vpop.f32.mrb[91].mxu0  ;;  %7269 = vmatprep.subr.bf16.mxu0 %v14005_v16  ;;  %v13927_v20 = vcombine.high %v3689_v18, %v3693_v23  ;;  %v14173_v16 = vcombine.high %v3936_v55, %v3940_v29  ;;  %v14172_v48 = vcombine.low %v3936_v55, %v3940_v29  ;;  %v14181_v0 = vcombine.high %v3944_v14, %v3948_v37  ;;  %v3721_v8 = vld [vmem:[#allocation20 + $0x210] sm:$0xff] }
 0xbf0   :  { %v3952_v34 = vld [vmem:[#allocation20 + $0x948] sm:$0xff]  ;;  %v13934_v53 = vcombine.low %v3697_v9, %v3701_v58  ;;  %v14180_v50 = vcombine.low %v3944_v14, %v3948_v37  ;;  %v3725_v61 = vld [vmem:[#allocation20 + $0x230] sm:$0xff]  ;;  %v14196_v55 = vcombine.low %v3960_v45, %v3964_v36 }
 0xbf1   :  { %7313 = vmatpush1.bf16.msra.mxu1 %v14140_v17  ;;  %v13935_v17 = vcombine.high %v3697_v9, %v3701_v58  ;;  %v13959_v29 = vcombine.high %v3721_v8, %v3725_v61  ;;  %v3785_v9 = vld [vmem:[#allocation20 + $0x410] sm:$0xff]  ;;  %v13958_v14 = vcombine.low %v3721_v8, %v3725_v61 }
 0xbf2   :  { %7270 = vmatpush1.bf16.msra.mxu0 %v14004_v32  ;;  %7364 = vmatprep.subr.bf16.mxu1 %v13895_v33  ;;  %v3705_v32 = vld [vmem:[#allocation20 + $0x190] sm:$0xff] }
 0xbf3   :  { %7271 = vmatprep.subr.bf16.mxu0 %v14013_v41  ;;  %v3709_v33 = vld [vmem:[#allocation20 + $0x1b0] sm:$0xff]  ;;  %v3956_v41 = vld [vmem:[#allocation20 + $0x968] sm:$0xff] }
 0xbf4   :  { %7315 = vmatmul.mubr.bf16.vlgmr.msra.gmra.mrb[92].mxu1 %v18008_v59  ;;  %v13943_v63 = vcombine.high %v3705_v32, %v3709_v33  ;;  %v13942_v42 = vcombine.low %v3705_v32, %v3709_v33  ;;  %v3789_v58 = vld [vmem:[#allocation20 + $0x430] sm:$0xff] }
 0xbf5   :  { %7365 = vmatpush1.bf16.msra.mxu1 %v13894_v51  ;;  %7396 = vmatprep.mubr.bf16.mxu1 %v17980_v26  ;;  %v14189_v51 = vcombine.high %v3952_v34, %v3956_v41  ;;  %v3793_v32 = vld [vmem:[#allocation20 + $0x450] sm:$0xff] }
 0xbf6   :  { %7272 = vmatpush1.bf16.msra.mxu0 %v14012_v39  ;;  %7366 = vmatprep.subr.bf16.mxu1 %v13903_v15  ;;  %v3713_v39 = vld [vmem:[#allocation20 + $0x1d0] sm:$0xff] }
 0xbf7   :  { %7323 = vmatprep.subr.bf16.mxu0 %v14149_v35  ;;  %v3717_v15 = vld [vmem:[#allocation20 + $0x1f0] sm:$0xff] }
 0xbf8   :  { %v3797_v33 = vld [vmem:[#allocation20 + $0x470] sm:$0xff] }
 0xbf9   :  { %7367 = vmatpush1.bf16.msra.mxu1 %v13902_v43  ;;  %7274 = vmatmul.mubr.bf16.vlgmr.msra.gmra.mrb[104].mxu0 %v17992_v12 }
 0xbfa   :  { %7324 = vmatpush1.bf16.msra.mxu0 %v14148_v47  ;;  %7368 = vmatprep.subr.bf16.mxu1 %v13911_v56  ;;  %v14188_v47 = vcombine.low %v3952_v34, %v3956_v41  ;;  %v13951_v56 = vcombine.high %v3713_v39, %v3717_v15  ;;  %v14022_v41 = vcombine.low %v3785_v9, %v3789_v58 }
 0xbfb   :  { %7325 = vmatprep.subr.bf16.mxu0 %v14157_v38  ;;  %7355 = vmatprep.mubr.bf16.mxu0 %v17204_v1  ;;  %v14197_v38 = vcombine.high %v3960_v45, %v3964_v36 }
 0xbfd   :  { %7369 = vmatpush1.bf16.msra.mxu1 %v13910_v49  ;;  %v3972_v49 = vld [vmem:[#allocation20 + $0x9e8] sm:$0xff] }
 0xbfe   :  { %7326 = vmatpush1.bf16.msra.mxu0 %v14156_v13  ;;  %7370 = vmatprep.subr.bf16.mxu1 %v13919_v19  ;;  %v14204_v37 = vcombine.low %v3968_v60, %v3972_v49 }
 0xbff   :  { %7327 = vmatprep.subr.bf16.mxu0 %v14165_v31  ;;  %v13950_v31 = vcombine.low %v3713_v39, %v3717_v15  ;;  %v3805_v39 = vld [vmem:[#allocation20 + $0x4b0] sm:$0xff] }
 0xc01   :  { %7371 = vmatpush1.bf16.msra.mxu1 %v13918_v28 }
 0xc02   :  { %7328 = vmatpush1.bf16.msra.mxu0 %v14164_v54  ;;  %7372 = vmatprep.subr.bf16.mxu1 %v13927_v20  ;;  %v14205_v54 = vcombine.high %v3968_v60, %v3972_v49  ;;  %v3729_v20 = vld [vmem:[#allocation20 + $0x250] sm:$0xff] }
 0xc03   :  { %7329 = vmatprep.subr.bf16.mxu0 %v14173_v16  ;;  %v3733_v16 = vld [vmem:[#allocation20 + $0x270] sm:$0xff] }
 0xc04   :  { %v13966_v34 = vcombine.low %v3729_v20, %v3733_v16  ;;  %v3765_v60 = vld [vmem:[#allocation20 + $0x370] sm:$0xff] }
 0xc05   :  { %7373 = vmatpush1.bf16.msra.mxu1 %v13926_v6  ;;  %v13967_v6 = vcombine.high %v3729_v20, %v3733_v16  ;;  %v3817_v49 = vld [vmem:[#allocation20 + $0x510] sm:$0xff] }
 0xc06   :  { %7330 = vmatpush1.bf16.msra.mxu0 %v14172_v48  ;;  %7374 = vmatprep.subr.bf16.mxu1 %v13935_v17  ;;  %v14023_v48 = vcombine.high %v3785_v9, %v3789_v58  ;;  %v3737_v17 = vld [vmem:[#allocation20 + $0x290] sm:$0xff] }
 0xc07   :  { %v5353_v5 = vpop.f32.mrb[76].mxu1  ;;  %7331 = vmatprep.subr.bf16.mxu0 %v14181_v0  ;;  %v3741_v0 = vld [vmem:[#allocation20 + $0x2b0] sm:$0xff] }
 0xc08   :  { %v5355_v35 = vpop.f32.mrb[77].mxu1  ;;  %v13974_v15 = vcombine.low %v3737_v17, %v3741_v0  ;;  %v3825_v20 = vld [vmem:[#allocation20 + $0x550] sm:$0xff] }
 0xc09   :  { %v5357_v40 = vpop.f32.mrb[78].mxu1  ;;  %7375 = vmatpush1.bf16.msra.mxu1 %v13934_v53  ;;  %v13975_v53 = vcombine.high %v3737_v17, %v3741_v0  ;;  %v3829_v16 = vld [vmem:[#allocation20 + $0x570] sm:$0xff] }
 0xc0a   :  { %v5358_v43 = vpop.f32.mrb[79].mxu1  ;;  %7332 = vmatpush1.bf16.msra.mxu0 %v14180_v50  ;;  %7376 = vmatprep.subr.bf16.mxu1 %v13943_v63  ;;  %v14031_v50 = vcombine.high %v3793_v32, %v3797_v33  ;;  %v3745_v63 = vld [vmem:[#allocation20 + $0x2d0] sm:$0xff] }
 0xc0b   :  { %7333 = vmatprep.subr.bf16.mxu0 %v14189_v51  ;;  %v3801_v51 = vld [vmem:[#allocation20 + $0x490] sm:$0xff] }
 0xc0c   :  { %v5394_v62 = vpop.f32.mrb[92].mxu0  ;;  %v14039_v36 = vcombine.high %v3801_v51, %v3805_v39  ;;  %v3753_v40 = vld [vmem:[#allocation20 + $0x310] sm:$0xff] }
 0xc0d   :  { %7377 = vmatpush1.bf16.msra.mxu1 %v13942_v42  ;;  %v18026_v13 = vadd.f32 %v5394_v62, %v5353_v5  ;;  %v5396_v19 = vpop.f32.mrb[93].mxu0  ;;  %v3749_v5 = vld [vmem:[#allocation20 + $0x2f0] sm:$0xff] }
 0xc0e   :  { %v18028_v18 = vadd.f32 %v5396_v19, %v5355_v35  ;;  %v5398_v23 = vpop.f32.mrb[94].mxu0  ;;  %7334 = vmatpush1.bf16.msra.mxu0 %v14188_v47  ;;  %7378 = vmatprep.subr.bf16.mxu1 %v13951_v56  ;;  %v14030_v35 = vcombine.low %v3793_v32, %v3797_v33  ;;  %v13983_v45 = vcombine.high %v3745_v63, %v3749_v5  ;;  %v3757_v42 = vld [vmem:[#allocation20 + $0x330] sm:$0xff] }
 0xc0f   :  { %v5399_v28 = vpop.f32.mrb[95].mxu0  ;;  %7335 = vmatprep.subr.bf16.mxu0 %v14197_v38  ;;  %v3809_v43 = vld [vmem:[#allocation20 + $0x4d0] sm:$0xff]  ;;  %v13982_v56 = vcombine.low %v3745_v63, %v3749_v5  ;;  %v14038_v38 = vcombine.low %v3801_v51, %v3805_v39  ;;  %v13991_v8 = vcombine.high %v3753_v40, %v3757_v42 }
 0xc10   :  { %v3813_v47 = vld [vmem:[#allocation20 + $0x4f0] sm:$0xff] }
 0xc11   :  { %7379 = vmatpush1.bf16.msra.mxu1 %v13950_v31  ;;  %v14047_v61 = vcombine.high %v3809_v43, %v3813_v47  ;;  %v3761_v62 = vld [vmem:[#allocation20 + $0x350] sm:$0xff]  ;;  %v13990_v31 = vcombine.low %v3753_v40, %v3757_v42  ;;  %v14046_v23 = vcombine.low %v3809_v43, %v3813_v47 }
 0xc12   :  { %7336 = vmatpush1.bf16.msra.mxu0 %v14196_v55  ;;  %7380 = vmatprep.subr.bf16.mxu1 %v13959_v29  ;;  %v3821_v19 = vld [vmem:[#allocation20 + $0x530] sm:$0xff]  ;;  %v13999_v55 = vcombine.high %v3761_v62, %v3765_v60  ;;  %v13998_v9 = vcombine.low %v3761_v62, %v3765_v60 }
 0xc13   :  { %7337 = vmatprep.subr.bf16.mxu0 %v14205_v54  ;;  %v14055_v29 = vcombine.high %v3817_v49, %v3821_v19  ;;  %v3769_v28 = vld [vmem:[#allocation20 + $0x390] sm:$0xff]  ;;  %v14054_v58 = vcombine.low %v3817_v49, %v3821_v19 }
 0xc14   :  { %v3773_v54 = vld [vmem:[#allocation20 + $0x3b0] sm:$0xff] }
 0xc15   :  { %7381 = vmatpush1.bf16.msra.mxu1 %v13958_v14  ;;  %v14007_v14 = vcombine.high %v3769_v28, %v3773_v54  ;;  %v3781_v17 = vld [vmem:[#allocation20 + $0x3f0] sm:$0xff] }
 0xc16   :  { %7338 = vmatpush1.bf16.msra.mxu0 %v14204_v37  ;;  %7382 = vmatprep.subr.bf16.mxu1 %v13967_v6  ;;  %v14063_v6 = vcombine.high %v3825_v20, %v3829_v16  ;;  %v3833_v32 = vld [vmem:[#allocation20 + $0x590] sm:$0xff] }
 0xc17   :  { %7405 = vmatprep.subr.bf16.mxu0 %v14023_v48  ;;  %v3777_v48 = vld [vmem:[#allocation20 + $0x3d0] sm:$0xff] }
 0xc18   :  { %v3837_v33 = vld [vmem:[#allocation20 + $0x5b0] sm:$0xff]  ;;  %v14015_v63 = vcombine.high %v3777_v48, %v3781_v17 }
 0xc19   :  { %7383 = vmatpush1.bf16.msra.mxu1 %v13966_v34  ;;  %7356 = vmatmul.mubr.bf16.vlgmr.msra.gmra.mrb[108].mxu0 %v18002_v46  ;;  %v14071_v5 = vcombine.high %v3833_v32, %v3837_v33  ;;  %v3913_v51 = vld [vmem:[#allocation20 + $0x810] sm:$0xff] }
 0xc1a   :  { %7384 = vmatprep.subr.bf16.mxu1 %v13975_v53  ;;  %7406 = vmatpush1.bf16.msra.mxu0 %v14022_v41  ;;  %v14006_v41 = vcombine.low %v3769_v28, %v3773_v54  ;;  %v3917_v39 = vld [vmem:[#allocation20 + $0x830] sm:$0xff] }
 0xc1b   :  { %7437 = vmatprep.mubr.bf16.mxu0 %v17987_v22  ;;  %7407 = vmatprep.subr.bf16.mxu0 %v14031_v50  ;;  %v14062_v50 = vcombine.low %v3825_v20, %v3829_v16  ;;  %v14151_v40 = vcombine.high %v3913_v51, %v3917_v39  ;;  %v3921_v43 = vld [vmem:[#allocation20 + $0x850] sm:$0xff] }
 0xc1c   :  { %v3925_v47 = vld [vmem:[#allocation20 + $0x870] sm:$0xff] }
 0xc1d   :  { %7385 = vmatpush1.bf16.msra.mxu1 %v13974_v15  ;;  %v3841_v15 = vld [vmem:[#allocation20 + $0x5d0] sm:$0xff]  ;;  %v14159_v62 = vcombine.high %v3921_v43, %v3925_v47 }
 0xc1e   :  { %7386 = vmatprep.subr.bf16.mxu1 %v13983_v45  ;;  %7408 = vmatpush1.bf16.msra.mxu0 %v14030_v35  ;;  %v3845_v35 = vld [vmem:[#allocation20 + $0x5f0] sm:$0xff]  ;;  %v14014_v45 = vcombine.low %v3777_v48, %v3781_v17 }
 0xc1f   :  { %7409 = vmatprep.subr.bf16.mxu0 %v14039_v36  ;;  %v14070_v36 = vcombine.low %v3833_v32, %v3837_v33  ;;  %v14079_v42 = vcombine.high %v3841_v15, %v3845_v35  ;;  %v3929_v49 = vld [vmem:[#allocation20 + $0x890] sm:$0xff] }
 0xc20   :  { %v3933_v19 = vld [vmem:[#allocation20 + $0x8b0] sm:$0xff] }
 0xc21   :  { %7387 = vmatpush1.bf16.msra.mxu1 %v13982_v56  ;;  %v3849_v56 = vld [vmem:[#allocation20 + $0x610] sm:$0xff]  ;;  %v14167_v28 = vcombine.high %v3929_v49, %v3933_v19 }
 0xc22   :  { %7388 = vmatprep.subr.bf16.mxu1 %v13991_v8  ;;  %7410 = vmatpush1.bf16.msra.mxu0 %v14038_v38  ;;  %v3853_v38 = vld [vmem:[#allocation20 + $0x630] sm:$0xff]  ;;  %v14150_v8 = vcombine.low %v3913_v51, %v3917_v39 }
 0xc23   :  { %7411 = vmatprep.subr.bf16.mxu0 %v14047_v61  ;;  %v14078_v61 = vcombine.low %v3841_v15, %v3845_v35  ;;  %v14087_v60 = vcombine.high %v3849_v56, %v3853_v38  ;;  %v3937_v20 = vld [vmem:[#allocation20 + $0x8d0] sm:$0xff] }
 0xc24   :  { %v3941_v16 = vld [vmem:[#allocation20 + $0x8f0] sm:$0xff] }
 0xc25   :  { %7389 = vmatpush1.bf16.msra.mxu1 %v13990_v31  ;;  %v3857_v31 = vld [vmem:[#allocation20 + $0x650] sm:$0xff]  ;;  %v14175_v48 = vcombine.high %v3937_v20, %v3941_v16 }
 0xc26   :  { %7390 = vmatprep.subr.bf16.mxu1 %v13999_v55  ;;  %7412 = vmatpush1.bf16.msra.mxu0 %v14046_v23  ;;  %v3861_v23 = vld [vmem:[#allocation20 + $0x670] sm:$0xff]  ;;  %v14158_v55 = vcombine.low %v3921_v43, %v3925_v47 }
 0xc27   :  { %v18032_v37 = vpop.f32.mrb[80].mxu1  ;;  %7413 = vmatprep.subr.bf16.mxu0 %v14055_v29  ;;  %v14086_v29 = vcombine.low %v3849_v56, %v3853_v38  ;;  %v14095_v54 = vcombine.high %v3857_v31, %v3861_v23  ;;  %v3945_v32 = vld [vmem:[#allocation20 + $0x910] sm:$0xff] }
 0xc28   :  { %v18034_v0 = vpop.f32.mrb[81].mxu1  ;;  %v3949_v33 = vld [vmem:[#allocation20 + $0x930] sm:$0xff] }
 0xc29   :  { %v5480_v34 = vpop.f32.mrb[82].mxu1  ;;  %7391 = vmatpush1.bf16.msra.mxu1 %v13998_v9  ;;  %v3865_v9 = vld [vmem:[#allocation20 + $0x690] sm:$0xff] }
 0xc2a   :  { %v5481_v53 = vpop.f32.mrb[83].mxu1  ;;  %7392 = vmatprep.subr.bf16.mxu1 %v14007_v14  ;;  %7414 = vmatpush1.bf16.msra.mxu0 %v14054_v58  ;;  %v3869_v58 = vld [vmem:[#allocation20 + $0x6b0] sm:$0xff]  ;;  %v14166_v14 = vcombine.low %v3929_v49, %v3933_v19 }
 0xc2b   :  { %7415 = vmatprep.subr.bf16.mxu0 %v14063_v6  ;;  %v14094_v6 = vcombine.low %v3857_v31, %v3861_v23  ;;  %v14103_v17 = vcombine.high %v3865_v9, %v3869_v58  ;;  %v3873_v34 = vld [vmem:[#allocation20 + $0x6d0] sm:$0xff]  ;;  %v14174_v53 = vcombine.low %v3937_v20, %v3941_v16  ;;  %v3786_v20 = vld [vmem:[#allocation20 + $0x418] sm:$0xff] }
 0xc2c   :  { %v3953_v51 = vld [vmem:[#allocation20 + $0x950] sm:$0xff]  ;;  %v3790_v16 = vld [vmem:[#allocation20 + $0x438] sm:$0xff] }
 0xc2d   :  { %7393 = vmatpush1.bf16.msra.mxu1 %v14006_v41  ;;  %v3877_v41 = vld [vmem:[#allocation20 + $0x6f0] sm:$0xff] }
 0xc2e   :  { %7394 = vmatprep.subr.bf16.mxu1 %v14015_v63  ;;  %7416 = vmatpush1.bf16.msra.mxu0 %v14062_v50  ;;  %v14102_v50 = vcombine.low %v3865_v9, %v3869_v58  ;;  %v14183_v63 = vcombine.high %v3945_v32, %v3949_v33  ;;  %v3957_v39 = vld [vmem:[#allocation20 + $0x970] sm:$0xff] }
 0xc2f   :  { %7417 = vmatprep.subr.bf16.mxu0 %v14071_v5  ;;  %v14111_v5 = vcombine.high %v3873_v34, %v3877_v41  ;;  %v3881_v15 = vld [vmem:[#allocation20 + $0x710] sm:$0xff] }
 0xc30   :  { %v3885_v35 = vld [vmem:[#allocation20 + $0x730] sm:$0xff] }
 0xc31   :  { %7395 = vmatpush1.bf16.msra.mxu1 %v14014_v45  ;;  %v14182_v45 = vcombine.low %v3945_v32, %v3949_v33  ;;  %v3961_v43 = vld [vmem:[#allocation20 + $0x990] sm:$0xff] }
 0xc32   :  { %7418 = vmatpush1.bf16.msra.mxu0 %v14070_v36  ;;  %7446 = vmatprep.subr.bf16.mxu1 %v14151_v40  ;;  %v14110_v36 = vcombine.low %v3873_v34, %v3877_v41  ;;  %v14191_v40 = vcombine.high %v3953_v51, %v3957_v39  ;;  %v3965_v47 = vld [vmem:[#allocation20 + $0x9b0] sm:$0xff]  ;;  %v14025_v41 = vcombine.high %v3786_v20, %v3790_v16 }
 0xc33   :  { %7419 = vmatprep.subr.bf16.mxu0 %v14079_v42  ;;  %v14119_v42 = vcombine.high %v3881_v15, %v3885_v35  ;;  %v3889_v56 = vld [vmem:[#allocation20 + $0x750] sm:$0xff] }
 0xc34   :  { %7397 = vmatmul.mubr.bf16.vlgmr.msra.gmra.mrb[96].mxu1 %v17992_v12  ;;  %v3893_v38 = vld [vmem:[#allocation20 + $0x770] sm:$0xff] }
 0xc35   :  { %7447 = vmatpush1.bf16.msra.mxu1 %v14150_v8  ;;  %7478 = vmatprep.mubr.bf16.mxu1 %v17204_v1  ;;  %v14190_v8 = vcombine.low %v3953_v51, %v3957_v39  ;;  %v3969_v49 = vld [vmem:[#allocation20 + $0x9d0] sm:$0xff]  ;;  %v3658_v51 = vld [vmem:[#allocation20 + $0x18] sm:$0xff] }
 0xc36   :  { %7420 = vmatpush1.bf16.msra.mxu0 %v14078_v61  ;;  %7448 = vmatprep.subr.bf16.mxu1 %v14159_v62  ;;  %v14118_v61 = vcombine.low %v3881_v15, %v3885_v35  ;;  %v14199_v62 = vcombine.high %v3961_v43, %v3965_v47  ;;  %v3973_v19 = vld [vmem:[#allocation20 + $0x9f0] sm:$0xff]  ;;  %v3662_v39 = vld [vmem:[#allocation20 + $0x38] sm:$0xff] }
 0xc37   :  { %7421 = vmatprep.subr.bf16.mxu0 %v14087_v60  ;;  %v14127_v60 = vcombine.high %v3889_v56, %v3893_v38  ;;  %v3897_v31 = vld [vmem:[#allocation20 + $0x790] sm:$0xff] }
 0xc38   :  { %v3901_v23 = vld [vmem:[#allocation20 + $0x7b0] sm:$0xff] }
 0xc39   :  { %7449 = vmatpush1.bf16.msra.mxu1 %v14158_v55  ;;  %v14198_v55 = vcombine.low %v3961_v43, %v3965_v47  ;;  %v3905_v58 = vld [vmem:[#allocation20 + $0x7d0] sm:$0xff]  ;;  %v14134_v34 = vcombine.low %v3897_v31, %v3901_v23  ;;  %v13896_v47 = vcombine.low %v3658_v51, %v3662_v39 }
 0xc3a   :  { %7422 = vmatpush1.bf16.msra.mxu0 %v14086_v29  ;;  %7450 = vmatprep.subr.bf16.mxu1 %v14167_v28  ;;  %v14126_v29 = vcombine.low %v3889_v56, %v3893_v38  ;;  %v14207_v28 = vcombine.high %v3969_v49, %v3973_v19 }
 0xc3b   :  { %7423 = vmatprep.subr.bf16.mxu0 %v14095_v54  ;;  %v14135_v54 = vcombine.high %v3897_v31, %v3901_v23  ;;  %v3818_v23 = vld [vmem:[#allocation20 + $0x518] sm:$0xff] }
 0xc3d   :  { %7451 = vmatpush1.bf16.msra.mxu1 %v14166_v14  ;;  %v3909_v14 = vld [vmem:[#allocation20 + $0x7f0] sm:$0xff] }
 0xc3e   :  { %7424 = vmatpush1.bf16.msra.mxu0 %v14094_v6  ;;  %7452 = vmatprep.subr.bf16.mxu1 %v14175_v48  ;;  %v14142_v15 = vcombine.low %v3905_v58, %v3909_v14 }
 0xc3f   :  { %7425 = vmatprep.subr.bf16.mxu0 %v14103_v17  ;;  %v14206_v17 = vcombine.low %v3969_v49, %v3973_v19 }
 0xc41   :  { %7453 = vmatpush1.bf16.msra.mxu1 %v14174_v53 }
 0xc42   :  { %7426 = vmatpush1.bf16.msra.mxu0 %v14102_v50  ;;  %7454 = vmatprep.subr.bf16.mxu1 %v14183_v63  ;;  %v14143_v50 = vcombine.high %v3905_v58, %v3909_v14  ;;  %v3794_v63 = vld [vmem:[#allocation20 + $0x458] sm:$0xff] }
 0xc43   :  { %7427 = vmatprep.subr.bf16.mxu0 %v14111_v5  ;;  %v3798_v5 = vld [vmem:[#allocation20 + $0x478] sm:$0xff] }
 0xc44   :  { %v14033_v35 = vcombine.high %v3794_v63, %v3798_v5  ;;  %v14032_v43 = vcombine.low %v3794_v63, %v3798_v5  ;;  %v3826_v58 = vld [vmem:[#allocation20 + $0x558] sm:$0xff] }
 0xc45   :  { %7455 = vmatpush1.bf16.msra.mxu1 %v14182_v45  ;;  %v3802_v45 = vld [vmem:[#allocation20 + $0x498] sm:$0xff] }
 0xc46   :  { %7428 = vmatpush1.bf16.msra.mxu0 %v14110_v36  ;;  %7456 = vmatprep.subr.bf16.mxu1 %v14191_v40  ;;  %v3806_v36 = vld [vmem:[#allocation20 + $0x4b8] sm:$0xff] }
 0xc47   :  { %7429 = vmatprep.subr.bf16.mxu0 %v14119_v42  ;;  %v3666_v40 = vld [vmem:[#allocation20 + $0x58] sm:$0xff]  ;;  %v14041_v56 = vcombine.high %v3802_v45, %v3806_v36  ;;  %v14040_v49 = vcombine.low %v3802_v45, %v3806_v36 }
 0xc48   :  { %v3670_v42 = vld [vmem:[#allocation20 + $0x78] sm:$0xff] }
 0xc49   :  { %7457 = vmatpush1.bf16.msra.mxu1 %v14190_v8  ;;  %v13905_v38 = vcombine.high %v3666_v40, %v3670_v42  ;;  %v3810_v8 = vld [vmem:[#allocation20 + $0x4d8] sm:$0xff]  ;;  %v13904_v19 = vcombine.low %v3666_v40, %v3670_v42 }
 0xc4a   :  { %7430 = vmatpush1.bf16.msra.mxu0 %v14118_v61  ;;  %7458 = vmatprep.subr.bf16.mxu1 %v14199_v62  ;;  %v3814_v61 = vld [vmem:[#allocation20 + $0x4f8] sm:$0xff] }
 0xc4b   :  { %7431 = vmatprep.subr.bf16.mxu0 %v14127_v60  ;;  %v3674_v62 = vld [vmem:[#allocation20 + $0x98] sm:$0xff] }
 0xc4c   :  { %v5435_v9 = vpop.f32.mrb[96].mxu0  ;;  %v3678_v60 = vld [vmem:[#allocation20 + $0xb8] sm:$0xff] }
 0xc4d   :  { %7459 = vmatpush1.bf16.msra.mxu1 %v14198_v55  ;;  %v18039_v6 = vadd.f32 %v18032_v37, %v5435_v9  ;;  %v5437_v48 = vpop.f32.mrb[97].mxu0  ;;  %v14024_v37 = vcombine.low %v3786_v20, %v3790_v16  ;;  %v13913_v31 = vcombine.high %v3674_v62, %v3678_v60  ;;  %v3822_v55 = vld [vmem:[#allocation20 + $0x538] sm:$0xff]  ;;  %v13912_v20 = vcombine.low %v3674_v62, %v3678_v60 }
 0xc4e   :  { %v18042_v32 = vadd.f32 %v18034_v0, %v5437_v48  ;;  %v5439_v33 = vpop.f32.mrb[98].mxu0  ;;  %7432 = vmatpush1.bf16.msra.mxu0 %v14126_v29  ;;  %7460 = vmatprep.subr.bf16.mxu1 %v14207_v28  ;;  %v13897_v0 = vcombine.high %v3658_v51, %v3662_v39  ;;  %v3682_v29 = vld [vmem:[#allocation20 + $0xd8] sm:$0xff]  ;;  %v14057_v16 = vcombine.high %v3818_v23, %v3822_v55 }
 0xc4f   :  { %v5440_v53 = vpop.f32.mrb[99].mxu0  ;;  %7433 = vmatprep.subr.bf16.mxu0 %v14135_v54  ;;  %v3686_v28 = vld [vmem:[#allocation20 + $0xf8] sm:$0xff]  ;;  %v14048_v54 = vcombine.low %v3810_v8, %v3814_v61 }
 0xc50   :  { %v13921_v9 = vcombine.high %v3682_v29, %v3686_v28  ;;  %v3830_v14 = vld [vmem:[#allocation20 + $0x578] sm:$0xff]  ;;  %v13920_v33 = vcombine.low %v3682_v29, %v3686_v28 }
 0xc51   :  { %7461 = vmatpush1.bf16.msra.mxu1 %v14206_v17  ;;  %v3694_v48 = vld [vmem:[#allocation20 + $0x138] sm:$0xff]  ;;  %v14056_v17 = vcombine.low %v3818_v23, %v3822_v55  ;;  %v14064_v51 = vcombine.low %v3826_v58, %v3830_v14 }
 0xc52   :  { %7434 = vmatpush1.bf16.msra.mxu0 %v14134_v34  ;;  %7528 = vmatprep.subr.bf16.mxu1 %v14025_v41  ;;  %v14065_v34 = vcombine.high %v3826_v58, %v3830_v14  ;;  %v3834_v53 = vld [vmem:[#allocation20 + $0x598] sm:$0xff] }
 0xc53   :  { %7435 = vmatprep.subr.bf16.mxu0 %v14143_v50  ;;  %v3838_v50 = vld [vmem:[#allocation20 + $0x5b8] sm:$0xff] }
 0xc54   :  { %7479 = vmatmul.mubr.bf16.vlgmr.msra.gmra.mrb[100].mxu1 %v18002_v46  ;;  %v3698_v63 = vld [vmem:[#allocation20 + $0x158] sm:$0xff] }
 0xc55   :  { %7529 = vmatpush1.bf16.msra.mxu1 %v14024_v37  ;;  %7560 = vmatprep.mubr.bf16.mxu1 %v17987_v22  ;;  %v14049_v22 = vcombine.high %v3810_v8, %v3814_v61  ;;  %v3702_v5 = vld [vmem:[#allocation20 + $0x178] sm:$0xff]  ;;  %v14073_v37 = vcombine.high %v3834_v53, %v3838_v50 }
 0xc56   :  { %7436 = vmatpush1.bf16.msra.mxu0 %v14142_v15  ;;  %7530 = vmatprep.subr.bf16.mxu1 %v14033_v35  ;;  %v13937_v35 = vcombine.high %v3698_v63, %v3702_v5  ;;  %v3846_v45 = vld [vmem:[#allocation20 + $0x5f8] sm:$0xff]  ;;  %v13936_v61 = vcombine.low %v3698_v63, %v3702_v5 }
 0xc57   :  { %7487 = vmatprep.subr.bf16.mxu0 %v13897_v0  ;;  %v3842_v0 = vld [vmem:[#allocation20 + $0x5d8] sm:$0xff] }
 0xc58   :  { %v3706_v42 = vld [vmem:[#allocation20 + $0x198] sm:$0xff]  ;;  %v14081_v62 = vcombine.high %v3842_v0, %v3846_v45 }
 0xc59   :  { %7531 = vmatpush1.bf16.msra.mxu1 %v14032_v43  ;;  %7438 = vmatmul.mubr.bf16.vlgmr.msra.gmra.mrb[112].mxu0 %v18008_v59  ;;  %v3710_v43 = vld [vmem:[#allocation20 + $0x1b8] sm:$0xff] }
 0xc5a   :  { %7488 = vmatpush1.bf16.msra.mxu0 %v13896_v47  ;;  %7519 = vmatprep.mubr.bf16.mxu0 %v17980_v26  ;;  %v3690_v26 = vld [vmem:[#allocation20 + $0x118] sm:$0xff]  ;;  %v13945_v60 = vcombine.high %v3706_v42, %v3710_v43 }
 0xc5b   :  { %7532 = vmatprep.subr.bf16.mxu1 %v14041_v56  ;;  %7489 = vmatprep.subr.bf16.mxu0 %v13905_v38  ;;  %v13929_v41 = vcombine.high %v3690_v26, %v3694_v48  ;;  %v13928_v39 = vcombine.low %v3690_v26, %v3694_v48  ;;  %v14072_v38 = vcombine.low %v3834_v53, %v3838_v50  ;;  %v3858_v29 = vld [vmem:[#allocation20 + $0x658] sm:$0xff] }
 0xc5c   :  { %v3862_v28 = vld [vmem:[#allocation20 + $0x678] sm:$0xff] }
 0xc5d   :  { %7533 = vmatpush1.bf16.msra.mxu1 %v14040_v49  ;;  %v3850_v49 = vld [vmem:[#allocation20 + $0x618] sm:$0xff]  ;;  %v14097_v58 = vcombine.high %v3858_v29, %v3862_v28 }
 0xc5e   :  { %7490 = vmatpush1.bf16.msra.mxu0 %v13904_v19  ;;  %7534 = vmatprep.subr.bf16.mxu1 %v14049_v22  ;;  %v3854_v19 = vld [vmem:[#allocation20 + $0x638] sm:$0xff] }
 0xc5f   :  { %7491 = vmatprep.subr.bf16.mxu0 %v13913_v31  ;;  %v3718_v22 = vld [vmem:[#allocation20 + $0x1f8] sm:$0xff]  ;;  %v14080_v31 = vcombine.low %v3842_v0, %v3846_v45  ;;  %v14089_v23 = vcombine.high %v3850_v49, %v3854_v19 }
 0xc60   :  { %v3866_v26 = vld [vmem:[#allocation20 + $0x698] sm:$0xff] }
 0xc61   :  { %7535 = vmatpush1.bf16.msra.mxu1 %v14048_v54  ;;  %v3722_v54 = vld [vmem:[#allocation20 + $0x218] sm:$0xff] }
 0xc62   :  { %7492 = vmatpush1.bf16.msra.mxu0 %v13912_v20  ;;  %7536 = vmatprep.subr.bf16.mxu1 %v14057_v16  ;;  %v3726_v20 = vld [vmem:[#allocation20 + $0x238] sm:$0xff]  ;;  %v14088_v16 = vcombine.low %v3850_v49, %v3854_v19 }
 0xc63   :  { %7493 = vmatprep.subr.bf16.mxu0 %v13921_v9  ;;  %v13961_v14 = vcombine.high %v3722_v54, %v3726_v20  ;;  %v3870_v48 = vld [vmem:[#allocation20 + $0x6b8] sm:$0xff] }
 0xc64   :  { %v14105_v53 = vcombine.high %v3866_v26, %v3870_v48  ;;  %v3874_v63 = vld [vmem:[#allocation20 + $0x6d8] sm:$0xff] }
 0xc65   :  { %7537 = vmatpush1.bf16.msra.mxu1 %v14056_v17  ;;  %v3730_v17 = vld [vmem:[#allocation20 + $0x258] sm:$0xff] }
 0xc66   :  { %7494 = vmatpush1.bf16.msra.mxu0 %v13920_v33  ;;  %7538 = vmatprep.subr.bf16.mxu1 %v14065_v34  ;;  %v3734_v33 = vld [vmem:[#allocation20 + $0x278] sm:$0xff]  ;;  %v14096_v34 = vcombine.low %v3858_v29, %v3862_v28 }
 0xc67   :  { %v7152_v15 = vpop.f32.mrb[84].mxu1  ;;  %7495 = vmatprep.subr.bf16.mxu0 %v13929_v41  ;;  %v13960_v41 = vcombine.low %v3722_v54, %v3726_v20  ;;  %v13969_v50 = vcombine.high %v3730_v17, %v3734_v33  ;;  %v3878_v5 = vld [vmem:[#allocation20 + $0x6f8] sm:$0xff] }
 0xc68   :  { %v18049_v36 = vadd.f32 %v7152_v15, %v17996_v11  ;;  %v7154_v40 = vpop.f32.mrb[85].mxu1  ;;  %v3714_v11 = vld [vmem:[#allocation20 + $0x1d8] sm:$0xff]  ;;  %v13968_v15 = vcombine.low %v3730_v17, %v3734_v33 }
 0xc69   :  { %v18052_v47 = vadd.f32 %v7154_v40, %v17998_v27  ;;  %v7156_v56 = vpop.f32.mrb[86].mxu1  ;;  %7539 = vmatpush1.bf16.msra.mxu1 %v14064_v51  ;;  %v13944_v27 = vcombine.low %v3706_v42, %v3710_v43  ;;  %v13953_v55 = vcombine.high %v3714_v11, %v3718_v22  ;;  %v13952_v9 = vcombine.low %v3714_v11, %v3718_v22  ;;  %v3738_v51 = vld [vmem:[#allocation20 + $0x298] sm:$0xff] }
 0xc6a   :  { %v7157_v8 = vpop.f32.mrb[87].mxu1  ;;  %7496 = vmatpush1.bf16.msra.mxu0 %v13928_v39  ;;  %7540 = vmatprep.subr.bf16.mxu1 %v14073_v37  ;;  %v3742_v39 = vld [vmem:[#allocation20 + $0x2b8] sm:$0xff]  ;;  %v14104_v37 = vcombine.low %v3866_v26, %v3870_v48  ;;  %v14112_v56 = vcombine.low %v3874_v63, %v3878_v5 }
 0xc6b   :  { %7497 = vmatprep.subr.bf16.mxu0 %v13937_v35  ;;  %v14113_v35 = vcombine.high %v3874_v63, %v3878_v5  ;;  %v13977_v0 = vcombine.high %v3738_v51, %v3742_v39  ;;  %v3882_v45 = vld [vmem:[#allocation20 + $0x718] sm:$0xff] }
 0xc6c   :  { %v3886_v40 = vld [vmem:[#allocation20 + $0x738] sm:$0xff] }
 0xc6d   :  { %7541 = vmatpush1.bf16.msra.mxu1 %v14072_v38  ;;  %v3746_v42 = vld [vmem:[#allocation20 + $0x2d8] sm:$0xff]  ;;  %v13976_v38 = vcombine.low %v3738_v51, %v3742_v39  ;;  %v14121_v8 = vcombine.high %v3882_v45, %v3886_v40  ;;  %v14120_v11 = vcombine.low %v3882_v45, %v3886_v40  ;;  %v7614_v51 = vld [vmem:[#allocation23] sm:$0xff] }
 0xc6e   :  { %7498 = vmatpush1.bf16.msra.mxu0 %v13936_v61  ;;  %7542 = vmatprep.subr.bf16.mxu1 %v14081_v62  ;;  %v3750_v43 = vld [vmem:[#allocation20 + $0x2f8] sm:$0xff]  ;;  %v7618_v39 = vld [vmem:[#allocation23 + $0x20] sm:$0xff] }
 0xc6f   :  { %7499 = vmatprep.subr.bf16.mxu0 %v13945_v60  ;;  %v13985_v61 = vcombine.high %v3746_v42, %v3750_v43  ;;  %v3890_v62 = vld [vmem:[#allocation20 + $0x758] sm:$0xff]  ;;  %v13984_v22 = vcombine.low %v3746_v42, %v3750_v43 }
 0xc70   :  { %v3894_v60 = vld [vmem:[#allocation20 + $0x778] sm:$0xff] }
 0xc71   :  { %7543 = vmatpush1.bf16.msra.mxu1 %v14080_v31  ;;  %v3754_v49 = vld [vmem:[#allocation20 + $0x318] sm:$0xff]  ;;  %v14129_v31 = vcombine.high %v3890_v62, %v3894_v60  ;;  %v14128_v54 = vcombine.low %v3890_v62, %v3894_v60  ;;  %v7622_v62 = vld [vmem:[#allocation23 + $0x40] sm:$0xff] }
 0xc72   :  { %7500 = vmatpush1.bf16.msra.mxu0 %v13944_v27  ;;  %7544 = vmatprep.subr.bf16.mxu1 %v14089_v23  ;;  %v3758_v19 = vld [vmem:[#allocation20 + $0x338] sm:$0xff]  ;;  %v7626_v60 = vld [vmem:[#allocation23 + $0x60] sm:$0xff] }
 0xc73   :  { %7501 = vmatprep.subr.bf16.mxu0 %v13953_v55  ;;  %v13993_v27 = vcombine.high %v3754_v49, %v3758_v19  ;;  %v3898_v23 = vld [vmem:[#allocation20 + $0x798] sm:$0xff]  ;;  %v13992_v20 = vcombine.low %v3754_v49, %v3758_v19 }
 0xc74   :  { %v3902_v55 = vld [vmem:[#allocation20 + $0x7b8] sm:$0xff] }
 0xc75   :  { %7545 = vmatpush1.bf16.msra.mxu1 %v14088_v16  ;;  %v3762_v29 = vld [vmem:[#allocation20 + $0x358] sm:$0xff]  ;;  %v14137_v16 = vcombine.high %v3898_v23, %v3902_v55 }
 0xc76   :  { %7502 = vmatpush1.bf16.msra.mxu0 %v13952_v9  ;;  %7546 = vmatprep.subr.bf16.mxu1 %v14097_v58  ;;  %v3766_v28 = vld [vmem:[#allocation20 + $0x378] sm:$0xff] }
 0xc77   :  { %7503 = vmatprep.subr.bf16.mxu0 %v13961_v14  ;;  %v14001_v58 = vcombine.high %v3762_v29, %v3766_v28  ;;  %v3906_v14 = vld [vmem:[#allocation20 + $0x7d8] sm:$0xff] }
 0xc78   :  { %v3910_v26 = vld [vmem:[#allocation20 + $0x7f8] sm:$0xff] }
 0xc79   :  { %7547 = vmatpush1.bf16.msra.mxu1 %v14096_v34  ;;  %v3770_v17 = vld [vmem:[#allocation20 + $0x398] sm:$0xff]  ;;  %v14145_v63 = vcombine.high %v3906_v14, %v3910_v26  ;;  %v14144_v40 = vcombine.low %v3906_v14, %v3910_v26  ;;  %v7642_v14 = vld [vmem:[#allocation23 + $0xe0] sm:$0xff] }
 0xc7a   :  { %7504 = vmatpush1.bf16.msra.mxu0 %v13960_v41  ;;  %7548 = vmatprep.subr.bf16.mxu1 %v14105_v53  ;;  %v3774_v33 = vld [vmem:[#allocation20 + $0x3b8] sm:$0xff]  ;;  %v14136_v41 = vcombine.low %v3898_v23, %v3902_v55  ;;  %v7630_v55 = vld [vmem:[#allocation23 + $0x80] sm:$0xff] }
 0xc7b   :  { %7505 = vmatprep.subr.bf16.mxu0 %v13969_v50  ;;  %v14000_v50 = vcombine.low %v3762_v29, %v3766_v28  ;;  %v14009_v5 = vcombine.high %v3770_v17, %v3774_v33  ;;  %v3914_v19 = vld [vmem:[#allocation20 + $0x818] sm:$0xff]  ;;  %v7634_v29 = vld [vmem:[#allocation23 + $0xa0] sm:$0xff] }
 0xc7c   :  { %v3922_v28 = vld [vmem:[#allocation20 + $0x858] sm:$0xff] }
 0xc7d   :  { %7549 = vmatpush1.bf16.msra.mxu1 %v14104_v37  ;;  %v3930_v26 = vld [vmem:[#allocation20 + $0x898] sm:$0xff] }
 0xc7e   :  { %7506 = vmatpush1.bf16.msra.mxu0 %v13968_v15  ;;  %7550 = vmatprep.subr.bf16.mxu1 %v14113_v35  ;;  %v3778_v15 = vld [vmem:[#allocation20 + $0x3d8] sm:$0xff] }
 0xc7f   :  { %7507 = vmatprep.subr.bf16.mxu0 %v13977_v0  ;;  %v3782_v35 = vld [vmem:[#allocation20 + $0x3f8] sm:$0xff] }
 0xc81   :  { %7551 = vmatpush1.bf16.msra.mxu1 %v14112_v56  ;;  %v14008_v56 = vcombine.low %v3770_v17, %v3774_v33 }
 0xc82   :  { %7508 = vmatpush1.bf16.msra.mxu0 %v13976_v38  ;;  %7552 = vmatprep.subr.bf16.mxu1 %v14121_v8  ;;  %v14211_v38 = vcombine.high %v7614_v51, %v7618_v39 }
 0xc83   :  { %7509 = vmatprep.subr.bf16.mxu0 %v13985_v61  ;;  %v14017_v61 = vcombine.high %v3778_v15, %v3782_v35 }
 0xc85   :  { %7553 = vmatpush1.bf16.msra.mxu1 %v14120_v11  ;;  %v3918_v11 = vld [vmem:[#allocation20 + $0x838] sm:$0xff] }
 0xc86   :  { %7510 = vmatpush1.bf16.msra.mxu0 %v13984_v22  ;;  %7554 = vmatprep.subr.bf16.mxu1 %v14129_v31  ;;  %v14219_v31 = vcombine.high %v7622_v62, %v7626_v60  ;;  %v14153_v23 = vcombine.high %v3914_v19, %v3918_v11 }
 0xc87   :  { %v7234_v9 = vpop.f32.mrb[88].mxu1  ;;  %7511 = vmatprep.subr.bf16.mxu0 %v13993_v27  ;;  %v18062_v27 = vpack.c.b16 %v17968_v44, %v17968_v44  ;;  %v7638_v44 = vld [vmem:[#allocation23 + $0xc0] sm:$0xff] }
 0xc88   :  { %v7236_v48 = vpop.f32.mrb[89].mxu1  ;;  %v14235_v33 = vcombine.high %v7638_v44, %v7642_v14 }
 0xc89   :  { %v7238_v34 = vpop.f32.mrb[90].mxu1  ;;  %7555 = vmatpush1.bf16.msra.mxu1 %v14128_v54  ;;  %v3926_v54 = vld [vmem:[#allocation20 + $0x878] sm:$0xff] }
 0xc8a   :  { %v7239_v53 = vpop.f32.mrb[91].mxu1  ;;  %7512 = vmatpush1.bf16.msra.mxu0 %v13992_v20  ;;  %7556 = vmatprep.subr.bf16.mxu1 %v14137_v16  ;;  %v14218_v20 = vcombine.low %v7622_v62, %v7626_v60  ;;  %v14152_v16 = vcombine.low %v3914_v19, %v3918_v11  ;;  %v14160_v17 = vcombine.low %v3922_v28, %v3926_v54  ;;  %v7670_v11 = vld [vmem:[#allocation23 + $0x1c0] sm:$0xff] }
 0xc8b   :  { %7513 = vmatprep.subr.bf16.mxu0 %v14001_v58  ;;  %v14161_v58 = vcombine.high %v3922_v28, %v3926_v54  ;;  %v7650_v53 = vld [vmem:[#allocation23 + $0x120] sm:$0xff] }
 0xc8c   :  { %v7193_v37 = vpop.f32.mrb[100].mxu0  ;;  %v7678_v54 = vld [vmem:[#allocation23 + $0x200] sm:$0xff] }
 0xc8d   :  { %7557 = vmatpush1.bf16.msra.mxu1 %v14136_v41  ;;  %v7194_v0 = vadd.f32 %v7193_v37, %v18049_v36  ;;  %v7195_v45 = vpop.f32.mrb[101].mxu0  ;;  %v14210_v36 = vcombine.low %v7614_v51, %v7618_v39  ;;  %v7646_v41 = vld [vmem:[#allocation23 + $0x100] sm:$0xff] }
 0xc8e   :  { %v7196_v42 = vadd.f32 %v7195_v45, %v18052_v47  ;;  %v7197_v43 = vpop.f32.mrb[102].mxu0  ;;  %7514 = vmatpush1.bf16.msra.mxu0 %v14000_v50  ;;  %7558 = vmatprep.subr.bf16.mxu1 %v14145_v63  ;;  %v14016_v47 = vcombine.low %v3778_v15, %v3782_v35  ;;  %v3938_v50 = vld [vmem:[#allocation20 + $0x8d8] sm:$0xff]  ;;  %v14243_v39 = vcombine.high %v7646_v41, %v7650_v53  ;;  %v7654_v37 = vld [vmem:[#allocation23 + $0x140] sm:$0xff] }
 0xc8f   :  { %v7198_v8 = vpop.f32.mrb[103].mxu0  ;;  %7515 = vmatprep.subr.bf16.mxu0 %v14009_v5  ;;  %v18056_v49 = vadd.f32 %v7234_v9, %v7194_v0  ;;  %v14227_v9 = vcombine.high %v7630_v55, %v7634_v29  ;;  %v3942_v63 = vld [vmem:[#allocation20 + $0x8f8] sm:$0xff]  ;;  %v14234_v5 = vcombine.low %v7638_v44, %v7642_v14  ;;  %v7658_v15 = vld [vmem:[#allocation23 + $0x160] sm:$0xff]  ;;  %v14242_v45 = vcombine.low %v7646_v41, %v7650_v53 }
 0xc90   :  { %v18058_v22 = vadd.f32 %v7236_v48, %v7196_v42  ;;  %v3934_v48 = vld [vmem:[#allocation20 + $0x8b8] sm:$0xff]  ;;  %v7662_v43 = vld [vmem:[#allocation23 + $0x180] sm:$0xff] }
 0xc91   :  { %7559 = vmatpush1.bf16.msra.mxu1 %v14144_v40  ;;  %v14169_v34 = vcombine.high %v3930_v26, %v3934_v48  ;;  %v14168_v51 = vcombine.low %v3930_v26, %v3934_v48  ;;  %v3946_v35 = vld [vmem:[#allocation20 + $0x918] sm:$0xff]  ;;  %v14176_v40 = vcombine.low %v3938_v50, %v3942_v63  ;;  %v7686_v48 = vld [vmem:[#allocation23 + $0x240] sm:$0xff] }
 0xc92   :  { %7516 = vmatpush1.bf16.msra.mxu0 %v14008_v56  ;;  %8396 = vmatprep.subr.bf16.mxu1 %v14211_v38  ;;  %v3950_v0 = vld [vmem:[#allocation20 + $0x938] sm:$0xff]  ;;  %v7666_v56 = vld [vmem:[#allocation23 + $0x1a0] sm:$0xff] }
 0xc93   :  { %7517 = vmatprep.subr.bf16.mxu0 %v14017_v61  ;;  %v14185_v42 = vcombine.high %v3946_v35, %v3950_v0  ;;  %v3954_v38 = vld [vmem:[#allocation20 + $0x958] sm:$0xff]  ;;  %v14250_v61 = vcombine.low %v7654_v37, %v7658_v15  ;;  %v14184_v62 = vcombine.low %v3946_v35, %v3950_v0  ;;  %v14259_v60 = vcombine.high %v7662_v43, %v7666_v56  ;;  %v7702_v0 = vld [vmem:[#allocation23 + $0x2c0] sm:$0xff] }
 0xc94   :  { %7561 = vmatmul.mubr.bf16.vlgmr.msra.gmra.mrb[104].mxu1 %v18008_v59  ;;  %v14226_v59 = vcombine.low %v7630_v55, %v7634_v29  ;;  %v3958_v8 = vld [vmem:[#allocation20 + $0x978] sm:$0xff] }
 0xc95   :  { %8397 = vmatpush1.bf16.msra.mxu1 %v14210_v36  ;;  %8428 = vmatprep.mubr.bf16.mxu1 %v18062_v27  ;;  %v14193_v19 = vcombine.high %v3954_v38, %v3958_v8  ;;  %v7674_v36 = vld [vmem:[#allocation23 + $0x1e0] sm:$0xff]  ;;  %v14192_v55 = vcombine.low %v3954_v38, %v3958_v8 }
 0xc96   :  { %7518 = vmatpush1.bf16.msra.mxu0 %v14016_v47  ;;  %8398 = vmatprep.subr.bf16.mxu1 %v14219_v31  ;;  %v3962_v47 = vld [vmem:[#allocation20 + $0x998] sm:$0xff]  ;;  %v14267_v29 = vcombine.high %v7670_v11, %v7674_v36 }
 0xc97   :  { %7569 = vmatprep.subr.bf16.mxu0 %v14153_v23  ;;  %v3966_v31 = vld [vmem:[#allocation20 + $0x9b8] sm:$0xff]  ;;  %v14258_v23 = vcombine.low %v7662_v43, %v7666_v56 }
 0xc98   :  { %v14201_v28 = vcombine.high %v3962_v47, %v3966_v31  ;;  %v14200_v44 = vcombine.low %v3962_v47, %v3966_v31  ;;  %v9328_v43 = vld [vmem:[%s18464_s25 + $0x8] sm:$0xff] }
 0xc99   :  { %8399 = vmatpush1.bf16.msra.mxu1 %v14218_v20  ;;  %7520 = vmatmul.mubr.bf16.vlgmr.msra.gmra.mrb[116].mxu0 %v17992_v12  ;;  %v14177_v12 = vcombine.high %v3938_v50, %v3942_v63  ;;  %v7682_v20 = vld [vmem:[#allocation23 + $0x220] sm:$0xff] }
 0xc9a   :  { %7570 = vmatpush1.bf16.msra.mxu0 %v14152_v16  ;;  %8400 = vmatprep.subr.bf16.mxu1 %v14227_v9  ;;  %v3970_v16 = vld [vmem:[#allocation20 + $0x9d8] sm:$0xff]  ;;  %v14275_v14 = vcombine.high %v7678_v54, %v7682_v20  ;;  %v7694_v63 = vld [vmem:[#allocation23 + $0x280] sm:$0xff] }
 0xc9b   :  { %7571 = vmatprep.subr.bf16.mxu0 %v14161_v58  ;;  %7601 = vmatprep.mubr.bf16.mxu0 %v17204_v1  ;;  %v14251_v1 = vcombine.high %v7654_v37, %v7658_v15  ;;  %v3974_v9 = vld [vmem:[#allocation20 + $0x9f8] sm:$0xff]  ;;  %v14266_v58 = vcombine.low %v7670_v11, %v7674_v36 }
 0xc9c   :  { %v14209_v26 = vcombine.high %v3970_v16, %v3974_v9  ;;  %v14208_v41 = vcombine.low %v3970_v16, %v3974_v9  ;;  %9347 = vperm.xlu1 %15566, %v9328_v43   ;;  %v7675_v43 = vld [vmem:[#allocation23 + $0x1e8] sm:$0xff] }
 0xc9d   :  { %8401 = vmatpush1.bf16.msra.mxu1 %v14226_v59  ;;  %v7690_v59 = vld [vmem:[#allocation23 + $0x260] sm:$0xff] }
 0xc9e   :  { %7572 = vmatpush1.bf16.msra.mxu0 %v14160_v17  ;;  %8402 = vmatprep.subr.bf16.mxu1 %v14235_v33  ;;  %v7615_v17 = vld [vmem:[#allocation23 + $0x8] sm:$0xff]  ;;  %v14283_v53 = vcombine.high %v7686_v48, %v7690_v59 }
 0xc9f   :  { %7573 = vmatprep.subr.bf16.mxu0 %v14169_v34  ;;  %v7619_v33 = vld [vmem:[#allocation23 + $0x28] sm:$0xff]  ;;  %v14274_v34 = vcombine.low %v7678_v54, %v7682_v20 }
 0xca0   :  { %v14213_v50 = vcombine.high %v7615_v17, %v7619_v33  ;;  %v14212_v37 = vcombine.low %v7615_v17, %v7619_v33  ;;  %v9330_v20 = vld [vmem:[%s18464_s25 + $0x18] sm:$0xff] }
 0xca1   :  { %8403 = vmatpush1.bf16.msra.mxu1 %v14234_v5  ;;  %v7698_v5 = vld [vmem:[#allocation23 + $0x2a0] sm:$0xff] }
 0xca2   :  { %7574 = vmatpush1.bf16.msra.mxu0 %v14168_v51  ;;  %8404 = vmatprep.subr.bf16.mxu1 %v14243_v39  ;;  %v7623_v51 = vld [vmem:[#allocation23 + $0x48] sm:$0xff]  ;;  %v14291_v15 = vcombine.high %v7694_v63, %v7698_v5 }
 0xca3   :  { %7575 = vmatprep.subr.bf16.mxu0 %v14177_v12  ;;  %v7627_v39 = vld [vmem:[#allocation23 + $0x68] sm:$0xff]  ;;  %v14282_v12 = vcombine.low %v7686_v48, %v7690_v59 }
 0xca4   :  { %v14221_v35 = vcombine.high %v7623_v51, %v7627_v39  ;;  %v14220_v56 = vcombine.low %v7623_v51, %v7627_v39  ;;  %v7659_v48 = vld [vmem:[#allocation23 + $0x168] sm:$0xff] }
 0xca5   :  { %8405 = vmatpush1.bf16.msra.mxu1 %v14242_v45  ;;  %v7706_v45 = vld [vmem:[#allocation23 + $0x2e0] sm:$0xff]  ;;  %v7667_v51 = vld [vmem:[#allocation23 + $0x1a8] sm:$0xff] }
 0xca6   :  { %7576 = vmatpush1.bf16.msra.mxu0 %v14176_v40  ;;  %8406 = vmatprep.subr.bf16.mxu1 %v14251_v1  ;;  %v7631_v40 = vld [vmem:[#allocation23 + $0x88] sm:$0xff]  ;;  %v14299_v38 = vcombine.high %v7702_v0, %v7706_v45  ;;  %v14298_v11 = vcombine.low %v7702_v0, %v7706_v45  ;;  %v7616_v45 = vld [vmem:[#allocation23 + $0x10] sm:$0xff] }
 0xca7   :  { %7577 = vmatprep.subr.bf16.mxu0 %v14185_v42  ;;  %v7635_v1 = vld [vmem:[#allocation23 + $0xa8] sm:$0xff]  ;;  %v14290_v42 = vcombine.low %v7694_v63, %v7698_v5 }
 0xca8   :  { %v14229_v8 = vcombine.high %v7631_v40, %v7635_v1  ;;  %v14228_v36 = vcombine.low %v7631_v40, %v7635_v1  ;;  %v7663_v5 = vld [vmem:[#allocation23 + $0x188] sm:$0xff]  ;;  %v7620_v40 = vld [vmem:[#allocation23 + $0x30] sm:$0xff] }
 0xca9   :  { %8407 = vmatpush1.bf16.msra.mxu1 %v14250_v61  ;;  %v7710_v61 = vld [vmem:[#allocation23 + $0x300] sm:$0xff]  ;;  %v14261_v0 = vcombine.high %v7663_v5, %v7667_v51 }
 0xcaa   :  { %7578 = vmatpush1.bf16.msra.mxu0 %v14184_v62  ;;  %8408 = vmatprep.subr.bf16.mxu1 %v14259_v60  ;;  %v7714_v62 = vld [vmem:[#allocation23 + $0x320] sm:$0xff]  ;;  %v7639_v60 = vld [vmem:[#allocation23 + $0xc8] sm:$0xff] }
 0xcab   :  { %7579 = vmatprep.subr.bf16.mxu0 %v14193_v19  ;;  %v7643_v19 = vld [vmem:[#allocation23 + $0xe8] sm:$0xff]  ;;  %v14307_v47 = vcombine.high %v7710_v61, %v7714_v62  ;;  %v14306_v54 = vcombine.low %v7710_v61, %v7714_v62 }
 0xcac   :  { %v14237_v31 = vcombine.high %v7639_v60, %v7643_v19  ;;  %v14236_v16 = vcombine.low %v7639_v60, %v7643_v19  ;;  %v14260_v60 = vcombine.low %v7663_v5, %v7667_v51  ;;  %v14215_v19 = vcombine.high %v7616_v45, %v7620_v40  ;;  %v7648_v5 = vld [vmem:[#allocation23 + $0x110] sm:$0xff] }
 0xcad   :  { %8409 = vmatpush1.bf16.msra.mxu1 %v14258_v23  ;;  %v7718_v23 = vld [vmem:[#allocation23 + $0x340] sm:$0xff]  ;;  %v7652_v51 = vld [vmem:[#allocation23 + $0x130] sm:$0xff] }
 0xcae   :  { %7580 = vmatpush1.bf16.msra.mxu0 %v14192_v55  ;;  %8410 = vmatprep.subr.bf16.mxu1 %v14267_v29  ;;  %v7722_v55 = vld [vmem:[#allocation23 + $0x360] sm:$0xff]  ;;  %v7647_v29 = vld [vmem:[#allocation23 + $0x108] sm:$0xff] }
 0xcaf   :  { %7581 = vmatprep.subr.bf16.mxu0 %v14201_v28  ;;  %v7651_v28 = vld [vmem:[#allocation23 + $0x128] sm:$0xff]  ;;  %v14315_v9 = vcombine.high %v7718_v23, %v7722_v55  ;;  %v14314_v59 = vcombine.low %v7718_v23, %v7722_v55 }
 0xcb0   :  { %v14244_v17 = vcombine.low %v7647_v29, %v7651_v28  ;;  %v7679_v23 = vld [vmem:[#allocation23 + $0x208] sm:$0xff] }
 0xcb1   :  { %8411 = vmatpush1.bf16.msra.mxu1 %v14266_v58  ;;  %v14245_v58 = vcombine.high %v7647_v29, %v7651_v28  ;;  %v7683_v55 = vld [vmem:[#allocation23 + $0x228] sm:$0xff] }
 0xcb2   :  { %7582 = vmatpush1.bf16.msra.mxu0 %v14200_v44  ;;  %8412 = vmatprep.subr.bf16.mxu1 %v14275_v14  ;;  %v7726_v44 = vld [vmem:[#allocation23 + $0x380] sm:$0xff] }
 0xcb3   :  { %7583 = vmatprep.subr.bf16.mxu0 %v14209_v26  ;;  %v7730_v14 = vld [vmem:[#allocation23 + $0x3a0] sm:$0xff]  ;;  %v7655_v26 = vld [vmem:[#allocation23 + $0x148] sm:$0xff] }
 0xcb4   :  { %v14323_v33 = vcombine.high %v7726_v44, %v7730_v14 }
 0xcb5   :  { %8413 = vmatpush1.bf16.msra.mxu1 %v14274_v34 }
 0xcb6   :  { %7584 = vmatpush1.bf16.msra.mxu0 %v14208_v41  ;;  %8414 = vmatprep.subr.bf16.mxu1 %v14283_v53  ;;  %v14253_v41 = vcombine.high %v7655_v26, %v7659_v48  ;;  %v7734_v53 = vld [vmem:[#allocation23 + $0x3c0] sm:$0xff] }
 0xcb7   :  { %8437 = vmatprep.subr.bf16.mxu0 %v14213_v50  ;;  %v7738_v50 = vld [vmem:[#allocation23 + $0x3e0] sm:$0xff] }
 0xcb9   :  { %8415 = vmatpush1.bf16.msra.mxu1 %v14282_v12  ;;  %7602 = vmatmul.mubr.bf16.vlgmr.msra.gmra.mrb[120].mxu0 %v18002_v46  ;;  %v9329_v46 = vld [vmem:[%s18464_s25 + $0x10] sm:$0xff]  ;;  %v14322_v12 = vcombine.low %v7726_v44, %v7730_v14 }
 0xcba   :  { %8416 = vmatprep.subr.bf16.mxu1 %v14291_v15  ;;  %8438 = vmatpush1.bf16.msra.mxu0 %v14212_v37  ;;  %v14252_v15 = vcombine.low %v7655_v26, %v7659_v48  ;;  %v7691_v44 = vld [vmem:[#allocation23 + $0x268] sm:$0xff] }
 0xcbb   :  { %8469 = vmatprep.mubr.bf16.mxu0 %v18062_v27  ;;  %8439 = vmatprep.subr.bf16.mxu0 %v14221_v35  ;;  %v14331_v35 = vcombine.high %v7734_v53, %v7738_v50 }
 0xcbc   :  { %9350 = vperm.xlu1 %15566, %v9329_v46  }
 0xcbd   :  { %8417 = vmatpush1.bf16.msra.mxu1 %v14290_v42  ;;  %v7671_v42 = vld [vmem:[#allocation23 + $0x1c8] sm:$0xff] }
 0xcbe   :  { %8418 = vmatprep.subr.bf16.mxu1 %v14299_v38  ;;  %8440 = vmatpush1.bf16.msra.mxu0 %v14220_v56  ;;  %v14269_v46 = vcombine.high %v7671_v42, %v7675_v43  ;;  %v14268_v28 = vcombine.low %v7671_v42, %v7675_v43  ;;  %v7715_v42 = vld [vmem:[#allocation23 + $0x328] sm:$0xff]  ;;  %v14246_v43 = vcombine.low %v7648_v5, %v7652_v51 }
 0xcbf   :  { %8441 = vmatprep.subr.bf16.mxu0 %v14229_v8  ;;  %v14330_v8 = vcombine.low %v7734_v53, %v7738_v50 }
 0xcc0   :  { %9353 = vperm.xlu1 %15566, %v9330_v20   ;;  %v14277_v20 = vcombine.high %v7679_v23, %v7683_v55 }
 0xcc1   :  { %8419 = vmatpush1.bf16.msra.mxu1 %v14298_v11 }
 0xcc2   :  { %8420 = vmatprep.subr.bf16.mxu1 %v14307_v47  ;;  %8442 = vmatpush1.bf16.msra.mxu0 %v14228_v36  ;;  %v7624_v36 = vld [vmem:[#allocation23 + $0x50] sm:$0xff] }
 0xcc3   :  { %8443 = vmatprep.subr.bf16.mxu0 %v14237_v31  ;;  %v7628_v47 = vld [vmem:[#allocation23 + $0x70] sm:$0xff] }
 0xcc4   :  { %v14222_v14 = vcombine.low %v7624_v36, %v7628_v47 }
 0xcc5   :  { %8421 = vmatpush1.bf16.msra.mxu1 %v14306_v54  ;;  %v14223_v54 = vcombine.high %v7624_v36, %v7628_v47 }
 0xcc6   :  { %8422 = vmatprep.subr.bf16.mxu1 %v14315_v9  ;;  %8444 = vmatpush1.bf16.msra.mxu0 %v14236_v16  ;;  %v7632_v16 = vld [vmem:[#allocation23 + $0x90] sm:$0xff] }
 0xcc7   :  { %v7316_v34 = vpop.f32.mrb[92].mxu1  ;;  %8445 = vmatprep.subr.bf16.mxu0 %v14245_v58  ;;  %v7636_v9 = vld [vmem:[#allocation23 + $0xb0] sm:$0xff]  ;;  %v7687_v58 = vld [vmem:[#allocation23 + $0x248] sm:$0xff] }
 0xcc8   :  { %v7318_v63 = vpop.f32.mrb[93].mxu1  ;;  %v14231_v26 = vcombine.high %v7632_v16, %v7636_v9  ;;  %v14285_v48 = vcombine.high %v7687_v58, %v7691_v44  ;;  %v14284_v53 = vcombine.low %v7687_v58, %v7691_v44 }
 0xcc9   :  { %v7320_v39 = vpop.f32.mrb[94].mxu1  ;;  %8423 = vmatpush1.bf16.msra.mxu1 %v14314_v59  ;;  %v7640_v59 = vld [vmem:[#allocation23 + $0xd0] sm:$0xff] }
 0xcca   :  { %v7321_v37 = vpop.f32.mrb[95].mxu1  ;;  %8424 = vmatprep.subr.bf16.mxu1 %v14323_v33  ;;  %8446 = vmatpush1.bf16.msra.mxu0 %v14244_v17  ;;  %v7644_v17 = vld [vmem:[#allocation23 + $0xf0] sm:$0xff]  ;;  %v7695_v33 = vld [vmem:[#allocation23 + $0x288] sm:$0xff] }
 0xccb   :  { %8447 = vmatprep.subr.bf16.mxu0 %v14253_v41  ;;  %v14230_v41 = vcombine.low %v7632_v16, %v7636_v9  ;;  %v14239_v50 = vcombine.high %v7640_v59, %v7644_v17  ;;  %v7703_v39 = vld [vmem:[#allocation23 + $0x2c8] sm:$0xff]  ;;  %v14238_v37 = vcombine.low %v7640_v59, %v7644_v17  ;;  %v9332_v16 = vld [vmem:[%s18464_s25 + $0x28] sm:$0xff] }
 0xccc   :  { %v7275_v1 = vpop.f32.mrb[104].mxu0  ;;  %v7739_v59 = vld [vmem:[#allocation23 + $0x3e8] sm:$0xff] }
 0xccd   :  { %8425 = vmatpush1.bf16.msra.mxu1 %v14322_v12  ;;  %v7276_v56 = vadd.f32 %v7275_v1, %v18017_v52  ;;  %v7277_v38 = vpop.f32.mrb[105].mxu0  ;;  %v14214_v52 = vcombine.low %v7616_v45, %v7620_v40  ;;  %v7707_v12 = vld [vmem:[#allocation23 + $0x2e8] sm:$0xff]  ;;  %v7656_v45 = vld [vmem:[#allocation23 + $0x150] sm:$0xff] }
 0xcce   :  { %v7278_v61 = vadd.f32 %v7277_v38, %v18020_v30  ;;  %v7279_v62 = vpop.f32.mrb[106].mxu0  ;;  %8426 = vmatprep.subr.bf16.mxu1 %v14331_v35  ;;  %8448 = vmatpush1.bf16.msra.mxu0 %v14252_v15  ;;  %v18081_v30 = vpack.c.b16 %v17965_v7, %v17965_v7  ;;  %v14276_v7 = vcombine.low %v7679_v23, %v7683_v55  ;;  %v7660_v40 = vld [vmem:[#allocation23 + $0x170] sm:$0xff]  ;;  %v7711_v1 = vld [vmem:[#allocation23 + $0x308] sm:$0xff] }
 0xccf   :  { %v7280_v11 = vpop.f32.mrb[107].mxu0  ;;  %8449 = vmatprep.subr.bf16.mxu0 %v14261_v0  ;;  %v18075_v31 = vadd.f32 %v7316_v34, %v7276_v56  ;;  %v7699_v34 = vld [vmem:[#allocation23 + $0x2a8] sm:$0xff]  ;;  %v14247_v35 = vcombine.high %v7648_v5, %v7652_v51  ;;  %v14301_v0 = vcombine.high %v7703_v39, %v7707_v12  ;;  %v14300_v56 = vcombine.low %v7703_v39, %v7707_v12  ;;  %v7668_v62 = vld [vmem:[#allocation23 + $0x1b0] sm:$0xff] }
 0xcd0   :  { %v18077_v29 = vadd.f32 %v7318_v63, %v7278_v61  ;;  %v14293_v63 = vcombine.high %v7695_v33, %v7699_v34  ;;  %v14292_v15 = vcombine.low %v7695_v33, %v7699_v34  ;;  %v14255_v38 = vcombine.high %v7656_v45, %v7660_v40  ;;  %v7664_v61 = vld [vmem:[#allocation23 + $0x190] sm:$0xff] }
 0xcd1   :  { %8427 = vmatpush1.bf16.msra.mxu1 %v14330_v8  ;;  %v14309_v8 = vcombine.high %v7711_v1, %v7715_v42  ;;  %v14254_v11 = vcombine.low %v7656_v45, %v7660_v40  ;;  %v14308_v36 = vcombine.low %v7711_v1, %v7715_v42  ;;  %v14263_v47 = vcombine.high %v7664_v61, %v7668_v62  ;;  %v7672_v55 = vld [vmem:[#allocation23 + $0x1d0] sm:$0xff]  ;;  %v9336_v45 = vld [vmem:[%s18464_s25 + $0x48] sm:$0xff] }
 0xcd2   :  { %8450 = vmatpush1.bf16.msra.mxu0 %v14260_v60  ;;  %8478 = vmatprep.subr.bf16.mxu1 %v14215_v19  ;;  %v7719_v60 = vld [vmem:[#allocation23 + $0x348] sm:$0xff]  ;;  %v7688_v12 = vld [vmem:[#allocation23 + $0x250] sm:$0xff] }
 0xcd3   :  { %8451 = vmatprep.subr.bf16.mxu0 %v14269_v46  ;;  %v7723_v19 = vld [vmem:[#allocation23 + $0x368] sm:$0xff]  ;;  %v9331_v46 = vld [vmem:[%s18464_s25 + $0x20] sm:$0xff] }
 0xcd4   :  { %8429 = vmatmul.mubr.bf16.vlgmr.msra.gmra.mrb[108].mxu1 %v18081_v30  ;;  %v14317_v23 = vcombine.high %v7719_v60, %v7723_v19  ;;  %9356 = vperm.xlu1 %15566, %v9331_v46   ;;  %v14316_v9 = vcombine.low %v7719_v60, %v7723_v19  ;;  %v9338_v60 = vld [vmem:[%s18464_s25 + $0x58] sm:$0xff] }
 0xcd5   :  { %8479 = vmatpush1.bf16.msra.mxu1 %v14214_v52  ;;  %8510 = vmatprep.mubr.bf16.mxu1 %v18062_v27  ;;  %v7676_v52 = vld [vmem:[#allocation23 + $0x1f0] sm:$0xff] }
 0xcd6   :  { %8452 = vmatpush1.bf16.msra.mxu0 %v14268_v28  ;;  %8480 = vmatprep.subr.bf16.mxu1 %v14223_v54  ;;  %v7727_v28 = vld [vmem:[#allocation23 + $0x388] sm:$0xff]  ;;  %v14271_v58 = vcombine.high %v7672_v55, %v7676_v52  ;;  %v14270_v34 = vcombine.low %v7672_v55, %v7676_v52  ;;  %v7637_v55 = vld [vmem:[#allocation23 + $0xb8] sm:$0xff] }
 0xcd7   :  { %8453 = vmatprep.subr.bf16.mxu0 %v14277_v20  ;;  %v7731_v54 = vld [vmem:[#allocation23 + $0x3a8] sm:$0xff]  ;;  %v14262_v20 = vcombine.low %v7664_v61, %v7668_v62  ;;  %v9335_v61 = vld [vmem:[%s18464_s25 + $0x40] sm:$0xff] }
 0xcd8   :  { %v14325_v44 = vcombine.high %v7727_v28, %v7731_v54  ;;  %9359 = vperm.xlu1 %15566, %v9332_v16  }
 0xcd9   :  { %8481 = vmatpush1.bf16.msra.mxu1 %v14222_v14  ;;  %v7680_v14 = vld [vmem:[#allocation23 + $0x210] sm:$0xff] }
 0xcda   :  { %8454 = vmatpush1.bf16.msra.mxu0 %v14276_v7  ;;  %8482 = vmatprep.subr.bf16.mxu1 %v14231_v26  ;;  %v7684_v7 = vld [vmem:[#allocation23 + $0x230] sm:$0xff] }
 0xcdb   :  { %8455 = vmatprep.subr.bf16.mxu0 %v14285_v48  ;;  %v7735_v48 = vld [vmem:[#allocation23 + $0x3c8] sm:$0xff]  ;;  %v14279_v5 = vcombine.high %v7680_v14, %v7684_v7 }
 0xcdc   :  { %v14333_v39 = vcombine.high %v7735_v48, %v7739_v59  ;;  %v14332_v40 = vcombine.low %v7735_v48, %v7739_v59  ;;  %v9339_v48 = vld [vmem:[%s18464_s25 + $0x60] sm:$0xff]  ;;  %v9342_v59 = vld [vmem:[%s18464_s25 + $0x78] sm:$0xff] }
 0xcdd   :  { %8483 = vmatpush1.bf16.msra.mxu1 %v14230_v41  ;;  %v9333_v41 = vld [vmem:[%s18464_s25 + $0x30] sm:$0xff] }
 0xcde   :  { %8456 = vmatpush1.bf16.msra.mxu0 %v14284_v53  ;;  %8484 = vmatprep.subr.bf16.mxu1 %v14239_v50 }
 0xcdf   :  { %8457 = vmatprep.subr.bf16.mxu0 %v14293_v63  ;;  %v14324_v63 = vcombine.low %v7727_v28, %v7731_v54  ;;  %9362 = vperm.xlu1 %15566, %v9333_v41   ;;  %v9337_v28 = vld [vmem:[%s18464_s25 + $0x50] sm:$0xff]  ;;  %v9340_v54 = vld [vmem:[%s18464_s25 + $0x68] sm:$0xff] }
 0xce1   :  { %8485 = vmatpush1.bf16.msra.mxu1 %v14238_v37  ;;  %v9327_v37 = vld [vmem:[%s18464_s25] sm:$0xff] }
 0xce2   :  { %8458 = vmatpush1.bf16.msra.mxu0 %v14292_v15  ;;  %8486 = vmatprep.subr.bf16.mxu1 %v14247_v35  ;;  %v7617_v15 = vld [vmem:[#allocation23 + $0x18] sm:$0xff] }
 0xce3   :  { %8459 = vmatprep.subr.bf16.mxu0 %v14301_v0  ;;  %v7621_v35 = vld [vmem:[#allocation23 + $0x38] sm:$0xff]  ;;  %9344 = vperm.xlu0 %15565, %v9327_v37   ;;  %v9334_v0 = vld [vmem:[%s18464_s25 + $0x38] sm:$0xff] }
 0xce4   :  { %v14217_v42 = vcombine.high %v7617_v15, %v7621_v35  ;;  %9365 = vperm.xlu1 %15566, %v9334_v0   ;;  %v14216_v19 = vcombine.low %v7617_v15, %v7621_v35  ;;  %v7728_v15 = vld [vmem:[#allocation23 + $0x390] sm:$0xff]  ;;  %v7657_v0 = vld [vmem:[#allocation23 + $0x158] sm:$0xff] }
 0xce5   :  { %8487 = vmatpush1.bf16.msra.mxu1 %v14246_v43  ;;  %v7696_v43 = vld [vmem:[#allocation23 + $0x290] sm:$0xff] }
 0xce6   :  { %8460 = vmatpush1.bf16.msra.mxu0 %v14300_v56  ;;  %8488 = vmatprep.subr.bf16.mxu1 %v14255_v38  ;;  %v7700_v56 = vld [vmem:[#allocation23 + $0x2b0] sm:$0xff]  ;;  %v7625_v38 = vld [vmem:[#allocation23 + $0x58] sm:$0xff] }
 0xce7   :  { %8461 = vmatprep.subr.bf16.mxu0 %v14309_v8  ;;  %v7629_v8 = vld [vmem:[#allocation23 + $0x78] sm:$0xff]  ;;  %9371 = vperm.xlu0 %15565, %v9336_v45   ;;  %v14294_v52 = vcombine.low %v7696_v43, %v7700_v56  ;;  %v7732_v35 = vld [vmem:[#allocation23 + $0x3b0] sm:$0xff] }
 0xce8   :  { %v14225_v46 = vcombine.high %v7625_v38, %v7629_v8  ;;  %9368 = vperm.xlu1 %15566, %v9335_v61  }
 0xce9   :  { %8489 = vmatpush1.bf16.msra.mxu1 %v14254_v11  ;;  %v14295_v11 = vcombine.high %v7696_v43, %v7700_v56  ;;  %v7736_v56 = vld [vmem:[#allocation23 + $0x3d0] sm:$0xff] }
 0xcea   :  { %8462 = vmatpush1.bf16.msra.mxu0 %v14308_v36  ;;  %8490 = vmatprep.subr.bf16.mxu1 %v14263_v47  ;;  %v7704_v36 = vld [vmem:[#allocation23 + $0x2d0] sm:$0xff] }
 0xceb   :  { %8463 = vmatprep.subr.bf16.mxu0 %v14317_v23  ;;  %v7708_v47 = vld [vmem:[#allocation23 + $0x2f0] sm:$0xff]  ;;  %v7633_v23 = vld [vmem:[#allocation23 + $0x98] sm:$0xff]  ;;  %9377 = vperm.xlu0 %15565, %v9338_v60  }
 0xcec   :  { %v7357_v26 = vpop.f32.mrb[108].mxu0  ;;  %v14303_v16 = vcombine.high %v7704_v36, %v7708_v47  ;;  %9374 = vperm.xlu1 %15566, %v9337_v28   ;;  %v7669_v60 = vld [vmem:[#allocation23 + $0x1b8] sm:$0xff] }
 0xced   :  { %8491 = vmatpush1.bf16.msra.mxu1 %v14262_v20  ;;  %v18088_v17 = vadd.f32 %v7357_v26, %v18075_v31  ;;  %v7359_v33 = vpop.f32.mrb[109].mxu0  ;;  %v7692_v31 = vld [vmem:[#allocation23 + $0x270] sm:$0xff]  ;;  %v14224_v20 = vcombine.low %v7625_v38, %v7629_v8  ;;  %v14302_v26 = vcombine.low %v7704_v36, %v7708_v47  ;;  %v7677_v28 = vld [vmem:[#allocation23 + $0x1f8] sm:$0xff] }
 0xcee   :  { %v18092_v53 = vadd.f32 %v7359_v33, %v18077_v29  ;;  %v7361_v50 = vpop.f32.mrb[110].mxu0  ;;  %8464 = vmatpush1.bf16.msra.mxu0 %v14316_v9  ;;  %8492 = vmatprep.subr.bf16.mxu1 %v14271_v58  ;;  %v14278_v29 = vcombine.low %v7680_v14, %v7684_v7  ;;  %v14287_v1 = vcombine.high %v7688_v12, %v7692_v31  ;;  %v7712_v58 = vld [vmem:[#allocation23 + $0x310] sm:$0xff]  ;;  %v7641_v14 = vld [vmem:[#allocation23 + $0xd8] sm:$0xff] }
 0xcef   :  { %v7362_v51 = vpop.f32.mrb[111].mxu0  ;;  %8465 = vmatprep.subr.bf16.mxu0 %v14325_v44  ;;  %v14286_v62 = vcombine.low %v7688_v12, %v7692_v31  ;;  %v14233_v9 = vcombine.high %v7633_v23, %v7637_v55  ;;  %v7716_v44 = vld [vmem:[#allocation23 + $0x330] sm:$0xff]  ;;  %v7645_v7 = vld [vmem:[#allocation23 + $0xf8] sm:$0xff]  ;;  %9383 = vperm.xlu0 %15565, %v9340_v54   ;;  %v14232_v33 = vcombine.low %v7633_v23, %v7637_v55 }
 0xcf0   :  { %v14241_v41 = vcombine.high %v7641_v14, %v7645_v7  ;;  %v7724_v50 = vld [vmem:[#allocation23 + $0x370] sm:$0xff]  ;;  %9380 = vperm.xlu1 %15566, %v9339_v48   ;;  %v14310_v51 = vcombine.low %v7712_v58, %v7716_v44  ;;  %v14240_v12 = vcombine.low %v7641_v14, %v7645_v7  ;;  %v7693_v48 = vld [vmem:[#allocation23 + $0x278] sm:$0xff] }
 0xcf1   :  { %8493 = vmatpush1.bf16.msra.mxu1 %v14270_v34  ;;  %v14311_v34 = vcombine.high %v7712_v58, %v7716_v44  ;;  %v7740_v38 = vld [vmem:[#allocation23 + $0x3f0] sm:$0xff]  ;;  %v15872_v58 = vld [vmem:[#allocation26] sm:$0xff]  }
 0xcf2   :  { %8466 = vmatpush1.bf16.msra.mxu0 %v14324_v63  ;;  %8494 = vmatprep.subr.bf16.mxu1 %v14279_v5  ;;  %v7649_v63 = vld [vmem:[#allocation23 + $0x118] sm:$0xff]  ;;  %v14335_v23 = vcombine.high %v7736_v56, %v7740_v38  ;;  %v15873_v14 = vld [vmem:[#allocation26 + $0x48] sm:$0xff]  }
 0xcf3   :  { %8467 = vmatprep.subr.bf16.mxu0 %v14333_v39  ;;  %v7653_v5 = vld [vmem:[#allocation23 + $0x138] sm:$0xff]  ;;  %9389 = vperm.xlu0 %15565, %v9342_v59   ;;  %v9341_v39 = vld [vmem:[%s18464_s25 + $0x70] sm:$0xff]  ;;  %v15874_v59 = vld [vmem:[#allocation26 + $0x8] sm:$0xff]  }
 0xcf4   :  { %v14249_v37 = vcombine.high %v7649_v63, %v7653_v5  ;;  %9386 = vperm.xlu1 %15566, %v9341_v39  }
 0xcf5   :  { %8495 = vmatpush1.bf16.msra.mxu1 %v14278_v29  ;;  %v7661_v29 = vld [vmem:[#allocation23 + $0x178] sm:$0xff] }
 0xcf6   :  { %8468 = vmatpush1.bf16.msra.mxu0 %v14332_v40  ;;  %8496 = vmatprep.subr.bf16.mxu1 %v14287_v1  ;;  %v14248_v40 = vcombine.low %v7649_v63, %v7653_v5  ;;  %v14327_v1 = vcombine.high %v7728_v15, %v7732_v35  ;;  %v14257_v43 = vcombine.high %v7657_v0, %v7661_v29  ;;  %v15876_v63 = vld [vmem:[#allocation26 + $0x10] sm:$0xff]  }
 0xcf7   :  { %8519 = vmatprep.subr.bf16.mxu0 %v14217_v42  ;;  %v14256_v47 = vcombine.low %v7657_v0, %v7661_v29  ;;  %v7713_v29 = vld [vmem:[#allocation23 + $0x318] sm:$0xff] }
 0xcf9   :  { %8497 = vmatpush1.bf16.msra.mxu1 %v14286_v62  ;;  %8470 = vmatmul.mubr.bf16.vlgmr.msra.gmra.mrb[124].mxu0 %v18081_v30  ;;  %v7665_v62 = vld [vmem:[#allocation23 + $0x198] sm:$0xff] }
 0xcfa   :  { %8498 = vmatprep.subr.bf16.mxu1 %v14295_v11  ;;  %8520 = vmatpush1.bf16.msra.mxu0 %v14216_v19  ;;  %v14265_v55 = vcombine.high %v7665_v62, %v7669_v60  ;;  %v14264_v54 = vcombine.low %v7665_v62, %v7669_v60  ;;  %v15882_v62 = vld [vmem:[#allocation26 + $0x28] sm:$0xff]  }
 0xcfb   :  { %8551 = vmatprep.mubr.bf16.mxu0 %v18062_v27  ;;  %8521 = vmatprep.subr.bf16.mxu0 %v14225_v46  ;;  %v7720_v27 = vld [vmem:[#allocation23 + $0x350] sm:$0xff]  ;;  %v14326_v46 = vcombine.low %v7728_v15, %v7732_v35  ;;  %v15879_v35 = vld [vmem:[#allocation26 + $0x60] sm:$0xff]  }
 0xcfc   :  { %v14319_v31 = vcombine.high %v7720_v27, %v7724_v50  ;;  %v14318_v45 = vcombine.low %v7720_v27, %v7724_v50  ;;  %v7697_v27 = vld [vmem:[#allocation23 + $0x298] sm:$0xff] }
 0xcfd   :  { %8499 = vmatpush1.bf16.msra.mxu1 %v14294_v52  ;;  %v7673_v52 = vld [vmem:[#allocation23 + $0x1d8] sm:$0xff] }
 0xcfe   :  { %8500 = vmatprep.subr.bf16.mxu1 %v14303_v16  ;;  %8522 = vmatpush1.bf16.msra.mxu0 %v14224_v20  ;;  %v15871_v20 = vld [vmem:[#allocation26 + $0x40] sm:$0xff]   ;;  %v7681_v16 = vld [vmem:[#allocation23 + $0x218] sm:$0xff]  ;;  %v14272_v44 = vcombine.low %v7673_v52, %v7677_v28 }
 0xcff   :  { %8523 = vmatprep.subr.bf16.mxu0 %v14233_v9  ;;  %v7685_v9 = vld [vmem:[#allocation23 + $0x238] sm:$0xff] }
 0xd00   :  { %v14281_v7 = vcombine.high %v7681_v16, %v7685_v9  ;;  %v7701_v50 = vld [vmem:[#allocation23 + $0x2b8] sm:$0xff] }
 0xd01   :  { %8501 = vmatpush1.bf16.msra.mxu1 %v14302_v26  ;;  %v7689_v26 = vld [vmem:[#allocation23 + $0x258] sm:$0xff]  ;;  %v14297_v39 = vcombine.high %v7697_v27, %v7701_v50  ;;  %v14296_v15 = vcombine.low %v7697_v27, %v7701_v50  ;;  %v15887_v27 = vld [vmem:[#allocation26 + $0xc0] sm:$0xff]  }
 0xd02   :  { %8502 = vmatprep.subr.bf16.mxu1 %v14311_v34  ;;  %8524 = vmatpush1.bf16.msra.mxu0 %v14232_v33  ;;  %v14280_v33 = vcombine.low %v7681_v16, %v7685_v9  ;;  %v15875_v34 = vld [vmem:[#allocation26 + $0x50] sm:$0xff]   ;;  %v14288_v5 = vcombine.low %v7689_v26, %v7693_v48  ;;  %v15888_v50 = vld [vmem:[#allocation26 + $0x80] sm:$0xff]  }
 0xd03   :  { %8525 = vmatprep.subr.bf16.mxu0 %v14241_v41  ;;  %v14289_v41 = vcombine.high %v7689_v26, %v7693_v48  ;;  %v7741_v16 = vld [vmem:[#allocation23 + $0x3f8] sm:$0xff]  ;;  %v15886_v48 = vld [vmem:[#allocation26 + $0x38] sm:$0xff]  }
 0xd05   :  { %8503 = vmatpush1.bf16.msra.mxu1 %v14310_v51  ;;  %v15877_v51 = vld [vmem:[#allocation26 + $0x58] sm:$0xff]  }
 0xd06   :  { %8504 = vmatprep.subr.bf16.mxu1 %v14319_v31  ;;  %8526 = vmatpush1.bf16.msra.mxu0 %v14240_v12  ;;  %v7705_v12 = vld [vmem:[#allocation23 + $0x2d8] sm:$0xff] }
 0xd07   :  { %v7398_v42 = vpop.f32.mrb[96].mxu1  ;;  %8527 = vmatprep.subr.bf16.mxu0 %v14249_v37  ;;  %v7709_v31 = vld [vmem:[#allocation23 + $0x2f8] sm:$0xff]  ;;  %v15878_v37 = vld [vmem:[#allocation26 + $0x18] sm:$0xff]  }
 0xd08   :  { %v18107_v8 = vadd.f32 %v7398_v42, %v18026_v13  ;;  %v7400_v61 = vpop.f32.mrb[97].mxu1  ;;  %v14334_v13 = vcombine.low %v7736_v56, %v7740_v38  ;;  %v14305_v0 = vcombine.high %v7705_v12, %v7709_v31  ;;  %v15881_v42 = vld [vmem:[#allocation26 + $0x68] sm:$0xff]   ;;  %v7721_v56 = vld [vmem:[#allocation23 + $0x358] sm:$0xff] }
 0xd09   :  { %v18110_v19 = vadd.f32 %v7400_v61, %v18028_v18  ;;  %v7402_v11 = vpop.f32.mrb[98].mxu1  ;;  %8505 = vmatpush1.bf16.msra.mxu1 %v14318_v45  ;;  %v14273_v18 = vcombine.high %v7673_v52, %v7677_v28  ;;  %v7717_v45 = vld [vmem:[#allocation23 + $0x338] sm:$0xff] }
 0xd0a   :  { %v7403_v36 = vpop.f32.mrb[99].mxu1  ;;  %8506 = vmatprep.subr.bf16.mxu1 %v14327_v1  ;;  %8528 = vmatpush1.bf16.msra.mxu0 %v14248_v40  ;;  %v15880_v40 = vld [vmem:[#allocation26 + $0x20] sm:$0xff]   ;;  %v14304_v1 = vcombine.low %v7705_v12, %v7709_v31  ;;  %v7725_v38 = vld [vmem:[#allocation23 + $0x378] sm:$0xff]  ;;  %v14312_v61 = vcombine.low %v7713_v29, %v7717_v45  ;;  %v15894_v12 = vld [vmem:[#allocation26 + $0x98] sm:$0xff]  }
 0xd0b   :  { %8529 = vmatprep.subr.bf16.mxu0 %v14257_v43  ;;  %v14313_v43 = vcombine.high %v7713_v29, %v7717_v45  ;;  %v14321_v11 = vcombine.high %v7721_v56, %v7725_v38  ;;  %v7729_v36 = vld [vmem:[#allocation23 + $0x398] sm:$0xff]  ;;  %v14320_v28 = vcombine.low %v7721_v56, %v7725_v38  ;;  %v15895_v31 = vld [vmem:[#allocation26 + $0xe0] sm:$0xff]   ;;  %v15903_v45 = vld [vmem:[#allocation26 + $0xf8] sm:$0xff]  }
 0xd0c   :  { %v15901_v29 = vld [vmem:[#allocation26 + $0xb0] sm:$0xff]  }
 0xd0d   :  { %8507 = vmatpush1.bf16.msra.mxu1 %v14326_v46 }
 0xd0e   :  { %8508 = vmatprep.subr.bf16.mxu1 %v14335_v23  ;;  %8530 = vmatpush1.bf16.msra.mxu0 %v14256_v47  ;;  %v7733_v47 = vld [vmem:[#allocation23 + $0x3b8] sm:$0xff] }
 0xd0f   :  { %8531 = vmatprep.subr.bf16.mxu0 %v14265_v55  ;;  %v15883_v55 = vld [vmem:[#allocation26 + $0x70] sm:$0xff]   ;;  %v14328_v26 = vcombine.low %v7729_v36, %v7733_v47 }
 0xd11   :  { %8509 = vmatpush1.bf16.msra.mxu1 %v14334_v13  ;;  %v15884_v13 = vld [vmem:[#allocation26 + $0x30] sm:$0xff]  }
 0xd12   :  { %8532 = vmatpush1.bf16.msra.mxu0 %v14264_v54  ;;  %14976 = vmatprep.subr.bf16.mxu1 %v15871_v20  ;;  %v14329_v54 = vcombine.high %v7729_v36, %v7733_v47  ;;  %v7737_v20 = vld [vmem:[#allocation23 + $0x3d8] sm:$0xff] }
 0xd13   :  { %8533 = vmatprep.subr.bf16.mxu0 %v14273_v18 }
 0xd14   :  { %8511 = vmatmul.mubr.bf16.vlgmr.msra.gmra.mrb[112].mxu1 %v18081_v30 }
 0xd15   :  { %14977 = vmatpush3.bf16.msra.mxu1 %v15872_v58 }
 0xd16   :  { %8534 = vmatpush1.bf16.msra.mxu0 %v14272_v44  ;;  %14978 = vmatprep.subr.bf16.mxu1 %v15873_v14  ;;  %v15885_v44 = vld [vmem:[#allocation26 + $0x78] sm:$0xff]  }
 0xd17   :  { %8535 = vmatprep.subr.bf16.mxu0 %v14281_v7 }
 0xd19   :  { %14979 = vmatpush3.bf16.msra.mxu1 %v15874_v59 }
 0xd1a   :  { %8536 = vmatpush1.bf16.msra.mxu0 %v14280_v33  ;;  %14980 = vmatprep.subr.bf16.mxu1 %v15875_v34  ;;  %v14337_v33 = vcombine.high %v7737_v20, %v7741_v16 }
 0xd1b   :  { %8537 = vmatprep.subr.bf16.mxu0 %v14289_v41 }
 0xd1d   :  { %14981 = vmatpush3.bf16.msra.mxu1 %v15876_v63  ;;  %v15890_v63 = vld [vmem:[#allocation26 + $0x88] sm:$0xff]  }
 0xd1e   :  { %8538 = vmatpush1.bf16.msra.mxu0 %v14288_v5  ;;  %14982 = vmatprep.subr.bf16.mxu1 %v15877_v51  ;;  %v15891_v5 = vld [vmem:[#allocation26 + $0xd0] sm:$0xff]  }
 0xd1f   :  { %8539 = vmatprep.subr.bf16.mxu0 %v14297_v39  ;;  %v15892_v51 = vld [vmem:[#allocation26 + $0x90] sm:$0xff]   ;;  %v15893_v39 = vld [vmem:[#allocation26 + $0xd8] sm:$0xff]  }
 0xd21   :  { %14983 = vmatpush3.bf16.msra.mxu1 %v15878_v37  ;;  %v15896_v37 = vld [vmem:[#allocation26 + $0xa0] sm:$0xff]  }
 0xd22   :  { %8540 = vmatpush1.bf16.msra.mxu0 %v14296_v15  ;;  %14984 = vmatprep.subr.bf16.mxu1 %v15879_v35  ;;  %v15897_v15 = vld [vmem:[#allocation26 + $0xe8] sm:$0xff]  }
 0xd23   :  { %8541 = vmatprep.subr.bf16.mxu0 %v14305_v0  ;;  %v15898_v35 = vld [vmem:[#allocation26 + $0xa8] sm:$0xff]   ;;  %v15900_v0 = vld [vmem:[#allocation26 + $0x140] sm:$0xff]  }
 0xd25   :  { %14985 = vmatpush3.bf16.msra.mxu1 %v15880_v40  ;;  %v15905_v40 = vld [vmem:[#allocation26 + $0xb8] sm:$0xff]  }
 0xd26   :  { %8542 = vmatpush1.bf16.msra.mxu0 %v14304_v1  ;;  %14986 = vmatprep.subr.bf16.mxu1 %v15881_v42 }
 0xd27   :  { %v7480_v60 = vpop.f32.mrb[100].mxu1  ;;  %8543 = vmatprep.subr.bf16.mxu0 %v14313_v43 }
 0xd28   :  { %v7482_v46 = vpop.f32.mrb[101].mxu1 }
 0xd29   :  { %v7484_v23 = vpop.f32.mrb[102].mxu1  ;;  %14987 = vmatpush3.bf16.msra.mxu1 %v15882_v62 }
 0xd2a   :  { %v7485_v52 = vpop.f32.mrb[103].mxu1  ;;  %8544 = vmatpush1.bf16.msra.mxu0 %v14312_v61  ;;  %14988 = vmatprep.subr.bf16.mxu1 %v15883_v55  ;;  %v15921_v23 = vld [vmem:[#allocation26 + $0x1c0] sm:$0xff]  }
 0xd2b   :  { %8545 = vmatprep.subr.bf16.mxu0 %v14321_v11 }
 0xd2c   :  { %v7439_v18 = vpop.f32.mrb[112].mxu0 }
 0xd2d   :  { %v7440_v9 = vadd.f32 %v7439_v18, %v18107_v8  ;;  %v7441_v58 = vpop.f32.mrb[113].mxu0  ;;  %14989 = vmatpush3.bf16.msra.mxu1 %v15884_v13  ;;  %v14336_v8 = vcombine.low %v7737_v20, %v7741_v16  ;;  %v18126_v20 = vld [vmem:[#allocation25] sm:$0xff] }
 0xd2e   :  { %v7442_v14 = vadd.f32 %v7441_v58, %v18110_v19  ;;  %v7443_v7 = vpop.f32.mrb[114].mxu0  ;;  %8546 = vmatpush1.bf16.msra.mxu0 %v14320_v28  ;;  %14990 = vmatprep.subr.bf16.mxu1 %v15885_v44  ;;  %v15889_v19 = vld [vmem:[#allocation26 + $0xc8] sm:$0xff]   ;;  %v8577_v16 = vrot.slane %v18126_v20, %v17650_v25 }
 0xd2f   :  { %v7444_v59 = vpop.f32.mrb[115].mxu0  ;;  %8547 = vmatprep.subr.bf16.mxu0 %v14329_v54  ;;  %v18115_v34 = vadd.f32 %v7480_v60, %v7440_v9 }
 0xd30   :  { %v18117_v41 = vadd.f32 %v7482_v46, %v7442_v14 }
 0xd31   :  { %14991 = vmatpush3.bf16.msra.mxu1 %v15886_v48 }
 0xd32   :  { %8548 = vmatpush1.bf16.msra.mxu0 %v14328_v26  ;;  %15020 = vmatprep.subr.bf16.mxu1 %v15900_v0  ;;  %v8581_v0 = vrot.slane %v18126_v20, %v17732_v21 }
 0xd33   :  { %8549 = vmatprep.subr.bf16.mxu0 %v14337_v33 }
 0xd36   :  { %8550 = vmatpush1.bf16.msra.mxu0 %v14336_v8 }
 0xd37   :  { %14998 = vmatprep.subr.bf16.mxu0 %v15887_v27  ;;  %v15902_v27 = vld [vmem:[#allocation26 + $0x100] sm:$0xff]  }
 0xd39   :  { %8552 = vmatmul.mubr.bf16.vlgmr.msra.gmra.mrb[128].mxu0 %v18081_v30  ;;  %v15899_v30 = vld [vmem:[#allocation26 + $0xf0] sm:$0xff]  }
 0xd3a   :  { %14999 = vmatpush3.bf16.msra.mxu0 %v15888_v50 }
 0xd3b   :  { %15000 = vmatprep.subr.bf16.mxu0 %v15889_v19  ;;  %v15904_v19 = vld [vmem:[#allocation26 + $0x148] sm:$0xff]  }
 0xd3e   :  { %15001 = vmatpush3.bf16.msra.mxu0 %v15890_v63  ;;  %v15906_v63 = vld [vmem:[#allocation26 + $0x108] sm:$0xff]  }
 0xd3f   :  { %15002 = vmatprep.subr.bf16.mxu0 %v15891_v5  ;;  %v15907_v5 = vld [vmem:[#allocation26 + $0x150] sm:$0xff]  }
 0xd42   :  { %15003 = vmatpush3.bf16.msra.mxu0 %v15892_v51  ;;  %v15910_v51 = vld [vmem:[#allocation26 + $0x118] sm:$0xff]  }
 0xd43   :  { %15004 = vmatprep.subr.bf16.mxu0 %v15893_v39  ;;  %v15911_v39 = vld [vmem:[#allocation26 + $0x160] sm:$0xff]  }
 0xd46   :  { %15005 = vmatpush3.bf16.msra.mxu0 %v15894_v12  ;;  %v15912_v12 = vld [vmem:[#allocation26 + $0x120] sm:$0xff]  }
 0xd47   :  { %15006 = vmatprep.subr.bf16.mxu0 %v15895_v31  ;;  %v15913_v31 = vld [vmem:[#allocation26 + $0x168] sm:$0xff]  }
 0xd4a   :  { %15007 = vmatpush3.bf16.msra.mxu0 %v15896_v37  ;;  %v15914_v37 = vld [vmem:[#allocation26 + $0x128] sm:$0xff]  }
 0xd4b   :  { %15008 = vmatprep.subr.bf16.mxu0 %v15897_v15  ;;  %v15915_v15 = vld [vmem:[#allocation26 + $0x170] sm:$0xff]  }
 0xd4e   :  { %15009 = vmatpush3.bf16.msra.mxu0 %v15898_v35  ;;  %v15916_v35 = vld [vmem:[#allocation26 + $0x130] sm:$0xff]  }
 0xd4f   :  { %15010 = vmatprep.subr.bf16.mxu0 %v15899_v30  ;;  %v15917_v30 = vld [vmem:[#allocation26 + $0x178] sm:$0xff]  }
 0xd52   :  { %15011 = vmatpush3.bf16.msra.mxu0 %v15901_v29  ;;  %v15918_v29 = vld [vmem:[#allocation26 + $0x138] sm:$0xff]  }
 0xd53   :  { %15012 = vmatprep.subr.bf16.mxu0 %v15903_v45 }
 0xd56   :  { %15013 = vmatpush3.bf16.msra.mxu0 %v15905_v40  ;;  %v8585_v40 = vrot.slane %v18126_v20, %v17828_v10 }
 0xd57   :  { %15042 = vmatprep.subr.bf16.mxu0 %v15921_v23 }
 0xd67   :  { %v7562_v1 = vpop.f32.mrb[104].mxu1 }
 0xd68   :  { %v7564_v42 = vpop.f32.mrb[105].mxu1 }
 0xd69   :  { %v7566_v43 = vpop.f32.mrb[106].mxu1 }
 0xd6a   :  { %v7567_v56 = vpop.f32.mrb[107].mxu1 }
 0xd6c   :  { %v7521_v38 = vpop.f32.mrb[116].mxu0 }
 0xd6d   :  { %v7522_v61 = vadd.f32 %v7521_v38, %v18039_v6  ;;  %v7523_v62 = vpop.f32.mrb[117].mxu0  ;;  %v8573_v6 = vrot.slane %v18126_v20, %v17647_v24 }
 0xd6e   :  { %v7524_v60 = vadd.f32 %v7523_v62, %v18042_v32  ;;  %v7525_v11 = vpop.f32.mrb[118].mxu0 }
 0xd6f   :  { %v7526_v46 = vpop.f32.mrb[119].mxu0  ;;  %v7563_v36 = vadd.f32 %v7562_v1, %v7522_v61  ;;  %v18138_v1 = vld [vmem:[#allocation29] sm:$0xff]  }
 0xd70   :  { %v7565_v47 = vadd.f32 %v7564_v42, %v7524_v60 }
 0xd8c   :  { %v7603_v55 = vpop.f32.mrb[120].mxu0 }
 0xd8d   :  { %v18122_v52 = vadd.f32 %v7603_v55, %v7563_v36  ;;  %v7605_v28 = vpop.f32.mrb[121].mxu0  ;;  %v15924_v55 = vld [vmem:[#allocation26 + $0x1c8] sm:$0xff]  }
 0xd8e   :  { %v18124_v13 = vadd.f32 %v7605_v28, %v7565_v47  ;;  %v7607_v54 = vpop.f32.mrb[122].mxu0  ;;  %v15923_v47 = vld [vmem:[#allocation26 + $0x180] sm:$0xff]   ;;  %v15927_v28 = vld [vmem:[#allocation26 + $0x1d0] sm:$0xff]  }
 0xd8f   :  { %v7608_v18 = vpop.f32.mrb[123].mxu0  ;;  %v15930_v54 = vld [vmem:[#allocation26 + $0x1d8] sm:$0xff]  }
 0xd90   :  { %v15932_v18 = vld [vmem:[#allocation26 + $0x198] sm:$0xff]  }
 0xda7   :  { %v8430_v32 = vpop.f32.mrb[108].mxu1 }
 0xda8   :  { %v8560_v9 = vadd.f32 %v8430_v32, %v18056_v49  ;;  %v8432_v58 = vpop.f32.mrb[109].mxu1  ;;  %v15908_v49 = vld [vmem:[#allocation26 + $0x110] sm:$0xff]   ;;  %v8592_v32 = vsub.s32 5, %v17551_v2 }
 0xda9   :  { %v8561_v44 = vadd.f32 %v8432_v58, %v18058_v22  ;;  %v8434_v14 = vpop.f32.mrb[110].mxu1  ;;  %v15909_v22 = vld [vmem:[#allocation26 + $0x158] sm:$0xff]   ;;  %v8589_v58 = vrot.slane %v18126_v20, %v17839_v57 }
 0xdaa   :  { %v8610_v7 = vadd.f32 %v8573_v6, %v8560_v9  ;;  %v8435_v26 = vpop.f32.mrb[111].mxu1  ;;  %v15933_v6 = vld [vmem:[#allocation26 + $0x1e0] sm:$0xff]   ;;  %v15936_v9 = vld [vmem:[#allocation26 + $0x1e8] sm:$0xff]  }
 0xdab   :  { %v8611_v48 = vadd.f32 %v8577_v16, %v8561_v44  ;;  %v15935_v16 = vld [vmem:[#allocation26 + $0x1a0] sm:$0xff]   ;;  %v9348_v44 = vpop.permute.xlu1 %9347 }
 0xdac   :  { %v8618_v59 = vmax.f32 %v8610_v7, 0.0  ;;  %v8593_v7 = vrot.slane %v18126_v20, %v8592_v32  ;;  %vm9392_vm14 = vcmp.eq.s32.totalorder %v17553_v3, %v9348_v44 }
 0xdad   :  { %v8619_v33 = vmax.f32 %v8611_v48, 0.0 }
 0xdae   :  { %v8626_v50 = vpack.c.bf16 %v8618_v59, %v8618_v59  ;;  %v15938_v59 = vld [vmem:[#allocation26 + $0x1a8] sm:$0xff]  }
 0xdaf   :  { %v8627_v8 = vpack.c.bf16 %v8619_v33, %v8619_v33 }
 0xdb1   :  { %9185 = vmatprep.mubr.bf16.mxu1 %v8627_v8 }
 0xdb2   :  { %9186 = vmatmul.mubr.bf16.vlgmr.msra.gmra.mrb[116].mxu1 %v8626_v50 }
 0xdb3   :  { %15021 = vmatpush3.bf16.msra.mxu1 %v15902_v27  ;;  %v15939_v27 = vld [vmem:[#allocation26 + $0x1f0] sm:$0xff]  }
 0xdb4   :  { %15022 = vmatprep.subr.bf16.mxu1 %v15904_v19 }
 0xdb7   :  { %15023 = vmatpush3.bf16.msra.mxu1 %v15906_v63 }
 0xdb8   :  { %15024 = vmatprep.subr.bf16.mxu1 %v15907_v5 }
 0xdbb   :  { %15025 = vmatpush3.bf16.msra.mxu1 %v15908_v49  ;;  %v9345_v49 = vpop.permute.xlu0 %9344 }
 0xdbc   :  { %15026 = vmatprep.subr.bf16.mxu1 %v15909_v22  ;;  %v15940_v22 = vld [vmem:[#allocation26 + $0x1b0] sm:$0xff]   ;;  %vm9391_vm15 = vcmp.eq.s32.totalorder %v17553_v3, %v9345_v49  ;;  %v15952_v49 = vld [vmem:[#allocation31 + $0x18] sm:$0xff]  }
 0xdbd   :  { %vm14427_vm0 = vmpackc.low %vm9392_vm14, %vm9391_vm15 }
 0xdbf   :  { %15027 = vmatpush3.bf16.msra.mxu1 %v15910_v51  ;;  %v9351_v51 = vpop.permute.xlu1 %9350 }
 0xdc0   :  { %15028 = vmatprep.subr.bf16.mxu1 %v15911_v39  ;;  %vm9393_vm1 = vcmp.eq.s32.totalorder %v17553_v3, %v9351_v51  ;;  %v15959_v51 = vld [vmem:[#allocation31 + $0xa0] sm:$0xff]  }
 0xdc3   :  { %15029 = vmatpush3.bf16.msra.mxu1 %v15912_v12 }
 0xdc4   :  { %15030 = vmatprep.subr.bf16.mxu1 %v15913_v31  ;;  %v15920_v31 = vld [vmem:[#allocation29 + $0x8] sm:$0xff]  }
 0xdc7   :  { %15031 = vmatpush3.bf16.msra.mxu1 %v15914_v37  ;;  %v15942_v37 = vld [vmem:[#allocation26 + $0x1b8] sm:$0xff]  }
 0xdc8   :  { %15032 = vmatprep.subr.bf16.mxu1 %v15915_v15  ;;  %v9354_v15 = vpop.permute.xlu1 %9353 }
 0xdc9   :  { %vm9394_vm2 = vcmp.eq.s32.totalorder %v17553_v3, %v9354_v15  ;;  %v15963_v15 = vld [vmem:[#allocation31 + $0x78] sm:$0xff]  }
 0xdca   :  { %vm14429_vm5 = vmpackc.low %vm9394_vm2, %vm9393_vm1 }
 0xdcb   :  { %15033 = vmatpush3.bf16.msra.mxu1 %v15916_v35  ;;  %v17206_v35 = vmov 1.0|1.0  }
 0xdcc   :  { %v8471_v45 = vpop.f32.mrb[124].mxu0  ;;  %15034 = vmatprep.subr.bf16.mxu1 %v15917_v30  ;;  %v15922_v30 = vld [vmem:[#allocation29 + $0x10] sm:$0xff]  }
 0xdcd   :  { %v8562_v42 = vadd.f32 %v8471_v45, %v18088_v17  ;;  %v8473_v43 = vpop.f32.mrb[125].mxu0  ;;  %v15926_v17 = vld [vmem:[#allocation26 + $0x188] sm:$0xff]  }
 0xdce   :  { %v8563_v56 = vadd.f32 %v8473_v43, %v18092_v53  ;;  %v8475_v38 = vpop.f32.mrb[126].mxu0  ;;  %v15929_v53 = vld [vmem:[#allocation26 + $0x190] sm:$0xff]   ;;  %v15928_v45 = vld [vmem:[#allocation29 + $0x20] sm:$0xff]  }
 0xdcf   :  { %v8612_v61 = vadd.f32 %v8581_v0, %v8562_v42  ;;  %v8476_v62 = vpop.f32.mrb[127].mxu0  ;;  %15035 = vmatpush3.bf16.msra.mxu1 %v15918_v29  ;;  %v15925_v0 = vld [vmem:[#allocation29 + $0x18] sm:$0xff]   ;;  %v9357_v29 = vpop.permute.xlu1 %9356  ;;  %v15931_v42 = vld [vmem:[#allocation29 + $0x28] sm:$0xff]  }
 0xdd0   :  { %v8613_v60 = vadd.f32 %v8585_v40, %v8563_v56  ;;  %15299 = vmatprep.subr.bf16.mxu1 %v18138_v1  ;;  %v8596_v56 = vsub.s32 6, %v17551_v2  ;;  %v15937_v38 = vld [vmem:[#allocation29 + $0x38] sm:$0xff]   ;;  %vm9395_vm3 = vcmp.eq.s32.totalorder %v17553_v3, %v9357_v29 }
 0xdd1   :  { %v8620_v11 = vmax.f32 %v8612_v61, 0.0  ;;  %v8600_v61 = vsub.s32 7, %v17551_v2 }
 0xdd2   :  { %v8621_v46 = vmax.f32 %v8613_v60, 0.0  ;;  %v8597_v60 = vrot.slane %v18126_v20, %v8596_v56 }
 0xdd3   :  { %v8628_v23 = vpack.c.bf16 %v8620_v11, %v8620_v11  ;;  %v9360_v40 = vpop.permute.xlu1 %9359 }
 0xdd4   :  { %v8629_v36 = vpack.c.bf16 %v8621_v46, %v8621_v46  ;;  %v8601_v46 = vrot.slane %v18126_v20, %v8600_v61  ;;  %vm9396_vm4 = vcmp.eq.s32.totalorder %v17553_v3, %v9360_v40  ;;  %v9372_v20 = vpop.permute.xlu0 %9371 }
 0xdd5   :  { %vm14431_vm6 = vmpackc.low %vm9396_vm4, %vm9395_vm3  ;;  %vm9400_vm9 = vcmp.eq.s32.totalorder %v17553_v3, %v9372_v20 }
 0xdd6   :  { %9225 = vmatprep.mubr.bf16.mxu0 %v8629_v36 }
 0xdd7   :  { %9226 = vmatmul.mubr.bf16.vlgmr.msra.gmra.mrb[132].mxu0 %v8628_v23  ;;  %v9363_v43 = vpop.permute.xlu1 %9362 }
 0xdd8   :  { %15043 = vmatpush3.bf16.msra.mxu0 %v15923_v47  ;;  %vm9397_vm7 = vcmp.eq.s32.totalorder %v17553_v3, %v9363_v43  ;;  %v14338_v43 = vld [vmem:[#allocation28] ss:$0 sm:$0xff] }
 0xdd9   :  { %15044 = vmatprep.subr.bf16.mxu0 %v15924_v55 }
 0xddb   :  { %v9366_v62 = vpop.permute.xlu1 %9365 }
 0xddc   :  { %15045 = vmatpush3.bf16.msra.mxu0 %v15926_v17  ;;  %vm9398_vm8 = vcmp.eq.s32.totalorder %v17553_v3, %v9366_v62 }
 0xddd   :  { %15046 = vmatprep.subr.bf16.mxu0 %v15927_v28  ;;  %vm14433_vm11 = vmpackc.low %vm9398_vm8, %vm9397_vm7  ;;  %vm9657_vm7 = vcmp.lt.s32.totalorder %v17551_v2, 6  ;;  %vm9624_vm8 = vcmp.lt.s32.totalorder %v17551_v2, 7 }
 0xde0   :  { %15047 = vmatpush3.bf16.msra.mxu0 %v15929_v53 }
 0xde1   :  { %15048 = vmatprep.subr.bf16.mxu0 %v15930_v54  ;;  %v9369_v54 = vpop.permute.xlu1 %9368 }
 0xde2   :  { %vm9399_vm10 = vcmp.eq.s32.totalorder %v17553_v3, %v9369_v54 }
 0xde3   :  { %vm14435_vm12 = vmpackc.low %vm9400_vm9, %vm9399_vm10  ;;  %vm9314_vm9 = vcmask 1041408   ;;  %vm17207_vm10 = vmmov 0  }
 0xde4   :  { %15049 = vmatpush3.bf16.msra.mxu0 %v15932_v18 }
 0xde5   :  { %15050 = vmatprep.subr.bf16.mxu0 %v15933_v6 }
 0xde7   :  { %v8512_v14 = vpop.f32.mrb[112].mxu1 }
 0xde8   :  { %v8564_v26 = vadd.f32 %v8512_v14, %v18115_v34  ;;  %v8514_v48 = vpop.f32.mrb[113].mxu1  ;;  %15051 = vmatpush3.bf16.msra.mxu0 %v15935_v16  ;;  %v15941_v34 = vld [vmem:[#allocation26 + $0x1f8] sm:$0xff]   ;;  %v9378_v16 = vpop.permute.xlu0 %9377 }
 0xde9   :  { %v8565_v33 = vadd.f32 %v8514_v48, %v18117_v41  ;;  %v8516_v8 = vpop.f32.mrb[114].mxu1  ;;  %15052 = vmatprep.subr.bf16.mxu0 %v15936_v9  ;;  %v9375_v9 = vpop.permute.xlu1 %9374  ;;  %vm9402_vm14 = vcmp.eq.s32.totalorder %v17553_v3, %v9378_v16  ;;  %v15944_v48 = vld [vmem:[#allocation31] sm:$0xff]  }
 0xdea   :  { %v8614_v50 = vadd.f32 %v8589_v58, %v8564_v26  ;;  %v8517_v19 = vpop.f32.mrb[115].mxu1  ;;  %vm9401_vm15 = vcmp.eq.s32.totalorder %v17553_v3, %v9375_v9  ;;  %v15943_v26 = vld [vmem:[#allocation31 + $0x40] sm:$0xff]   ;;  %v15950_v8 = vld [vmem:[#allocation31 + $0x88] sm:$0xff]  }
 0xdeb   :  { %v8615_v63 = vadd.f32 %v8593_v7, %v8565_v33  ;;  %vm14437_vm2 = vmpackc.low %vm9402_vm14, %vm9401_vm15  ;;  %v15947_v33 = vld [vmem:[#allocation31 + $0x80] sm:$0xff]   ;;  %v15953_v19 = vld [vmem:[#allocation31 + $0x90] sm:$0xff]  }
 0xdec   :  { %v8622_v5 = vmax.f32 %v8614_v50, 0.0  ;;  %15053 = vmatpush3.bf16.msra.mxu0 %v15938_v59  ;;  %v9384_v58 = vpop.permute.xlu0 %9383  ;;  %v15945_v59 = vld [vmem:[#allocation31 + $0x48] sm:$0xff]   ;;  %v15948_v50 = vld [vmem:[#allocation31 + $0x50] sm:$0xff]  }
 0xded   :  { %v8623_v39 = vmax.f32 %v8615_v63, 0.0  ;;  %15054 = vmatprep.subr.bf16.mxu0 %v15939_v27  ;;  %v9381_v44 = vpop.permute.xlu1 %9380  ;;  %v15946_v27 = vld [vmem:[#allocation31 + $0x8] sm:$0xff]   ;;  %v15949_v63 = vld [vmem:[#allocation31 + $0x10] sm:$0xff]  }
 0xdee   :  { %v8630_v41 = vpack.c.bf16 %v8622_v5, %v8622_v5  ;;  %vm9403_vm1 = vcmp.eq.s32.totalorder %v17553_v3, %v9381_v44  ;;  %v15956_v5 = vld [vmem:[#allocation31 + $0x98] sm:$0xff]  }
 0xdef   :  { %v8631_v12 = vpack.c.bf16 %v8623_v39, %v8623_v39  ;;  %v15955_v39 = vld [vmem:[#allocation31 + $0x20] sm:$0xff]  }
 0xdf0   :  { %15055 = vmatpush3.bf16.msra.mxu0 %v15940_v22  ;;  %v9390_v14 = vpop.permute.xlu0 %9389  ;;  %v15954_v22 = vld [vmem:[#allocation31 + $0x60] sm:$0xff]  }
 0xdf1   :  { %9265 = vmatprep.mubr.bf16.mxu1 %v8631_v12  ;;  %15056 = vmatprep.subr.bf16.mxu0 %v15941_v34  ;;  %v9387_v7 = vpop.permute.xlu1 %9386  ;;  %vm9406_vm4 = vcmp.eq.s32.totalorder %v17553_v3, %v9390_v14  ;;  %v15957_v34 = vld [vmem:[#allocation31 + $0x68] sm:$0xff]  }
 0xdf2   :  { %9266 = vmatmul.mubr.bf16.vlgmr.msra.gmra.mrb[120].mxu1 %v8630_v41  ;;  %v15958_v12 = vld [vmem:[#allocation31 + $0x28] sm:$0xff]   ;;  %v15960_v41 = vld [vmem:[#allocation31 + $0x70] sm:$0xff]  }
 0xdf3   :  { %15300 = vmatpush3.bf16.msra.mxu1 %v18138_v1  ;;  %15315 = vmatprep.mubr.msk.bf16.mxu1 %vm14427_vm0, %v17206_v35  ;;  %v15934_v1 = vld [vmem:[#allocation29 + $0x30] sm:$0xff]   ;;  %vm9404_vm0 = vcmp.eq.s32.totalorder %v17553_v3, %v9384_v58 }
 0xdf4   :  { %15301 = vmatprep.subr.bf16.mxu1 %v15920_v31  ;;  %15057 = vmatpush3.bf16.msra.mxu0 %v15942_v37  ;;  %vm14439_vm3 = vmpackc.low %vm9404_vm0, %vm9403_vm1  ;;  %v15962_v37 = vld [vmem:[#allocation31 + $0xa8] sm:$0xff]  }
 0xdf5   :  { %15080 = vmatprep.subr.bf16.mxu0 %v15943_v26 }
 0xdf7   :  { %15302 = vmatpush3.bf16.msra.mxu1 %v15920_v31  ;;  %v15961_v31 = vld [vmem:[#allocation31 + $0x30] sm:$0xff]  }
 0xdf8   :  { %15303 = vmatprep.subr.bf16.mxu1 %v15922_v30 }
 0xdfb   :  { %15304 = vmatpush3.bf16.msra.mxu1 %v15922_v30  ;;  %v15965_v30 = vld [vmem:[#allocation31 + $0xb0] sm:$0xff]  }
 0xdfc   :  { %15305 = vmatprep.subr.bf16.mxu1 %v15925_v0 }
 0xdff   :  { %15306 = vmatpush3.bf16.msra.mxu1 %v15925_v0  ;;  %v15966_v0 = vld [vmem:[#allocation31 + $0xb8] sm:$0xff]  }
 0xe00   :  { %15307 = vmatprep.subr.bf16.mxu1 %v15928_v45 }
 0xe03   :  { %15308 = vmatpush3.bf16.msra.mxu1 %v15928_v45 }
 0xe04   :  { %15309 = vmatprep.subr.bf16.mxu1 %v15931_v42 }
 0xe07   :  { %15310 = vmatpush3.bf16.msra.mxu1 %v15931_v42 }
 0xe08   :  { %15311 = vmatprep.subr.bf16.mxu1 %v15934_v1 }
 0xe0b   :  { %15312 = vmatpush3.bf16.msra.mxu1 %v15934_v1 }
 0xe0c   :  { %15313 = vmatprep.subr.bf16.mxu1 %v15937_v38  ;;  %v8553_v11 = vpop.f32.mrb[128].mxu0 }
 0xe0d   :  { %v8566_v36 = vadd.f32 %v8553_v11, %v18122_v52  ;;  %v8555_v47 = vpop.f32.mrb[129].mxu0 }
 0xe0e   :  { %v8567_v23 = vadd.f32 %v8555_v47, %v18124_v13  ;;  %v8557_v55 = vpop.f32.mrb[130].mxu0 }
 0xe0f   :  { %v8616_v17 = vadd.f32 %v8597_v60, %v8566_v36  ;;  %15314 = vmatpush3.bf16.msra.mxu1 %v15937_v38  ;;  %v8558_v28 = vpop.f32.mrb[131].mxu0 }
 0xe10   :  { %v8617_v53 = vadd.f32 %v8601_v46, %v8567_v23  ;;  %15331 = vmatprep.subr.bf16.mxu1 %v15947_v33 }
 0xe11   :  { %v8624_v52 = vmax.f32 %v8616_v17, 0.0 }
 0xe12   :  { %v8625_v18 = vmax.f32 %v8617_v53, 0.0  ;;  %15316 = vmatmul.mubr.msk.bf16.vlgmr.msra.gmra.mrb[124].mxu1 %vm14429_vm5, %v17206_v35  ;;  %vm9405_vm5 = vcmp.eq.s32.totalorder %v17553_v3, %v9387_v7  ;;  %v15951_v3 = vld [vmem:[#allocation31 + $0x58] sm:$0xff]  }
 0xe13   :  { %15319 = vmatprep.mubr.msk.bf16.mxu1 %vm14431_vm6, %v17206_v35  ;;  %v8632_v6 = vpack.c.bf16 %v8624_v52, %v8624_v52  ;;  %vm14441_vm6 = vmpackc.low %vm9406_vm4, %vm9405_vm5  ;;  %15332 = vmatpush3.bf16.msra.mxu1 %v15947_v33 }
 0xe14   :  { %v8633_v13 = vpack.c.bf16 %v8625_v18, %v8625_v18  ;;  %15333 = vmatprep.subr.bf16.mxu1 %v15950_v8 }
 0xe16   :  { %9305 = vmatprep.mubr.bf16.mxu0 %v8633_v13 }
 0xe17   :  { %9306 = vmatmul.mubr.bf16.vlgmr.msra.gmra.mrb[136].mxu0 %v8632_v6  ;;  %15334 = vmatpush3.bf16.msra.mxu1 %v15950_v8 }
 0xe18   :  { %15081 = vmatpush3.bf16.msra.mxu0 %v15944_v48  ;;  %15335 = vmatprep.subr.bf16.mxu1 %v15953_v19 }
 0xe19   :  { %15082 = vmatprep.subr.bf16.mxu0 %v15945_v59 }
 0xe1a   :  { %15320 = vmatmul.mubr.msk.bf16.gmra.mrb[128].mxu1 %vm14433_vm11, %v17206_v35 }
 0xe1b   :  { %15323 = vmatprep.mubr.msk.bf16.mxu1 %vm14435_vm12, %v17206_v35  ;;  %15336 = vmatpush3.bf16.msra.mxu1 %v15953_v19 }
 0xe1c   :  { %15083 = vmatpush3.bf16.msra.mxu0 %v15946_v27  ;;  %15337 = vmatprep.subr.bf16.mxu1 %v15956_v5 }
 0xe1d   :  { %15084 = vmatprep.subr.bf16.mxu0 %v15948_v50 }
 0xe1f   :  { %15338 = vmatpush3.bf16.msra.mxu1 %v15956_v5 }
 0xe20   :  { %15085 = vmatpush3.bf16.msra.mxu0 %v15949_v63  ;;  %15339 = vmatprep.subr.bf16.mxu1 %v15959_v51 }
 0xe21   :  { %15086 = vmatprep.subr.bf16.mxu0 %v15951_v3 }
 0xe22   :  { %15324 = vmatmul.mubr.msk.bf16.gmra.mrb[132].mxu1 %vm14437_vm2, %v17206_v35 }
 0xe23   :  { %15327 = vmatprep.mubr.msk.bf16.mxu1 %vm14439_vm3, %v17206_v35  ;;  %15340 = vmatpush3.bf16.msra.mxu1 %v15959_v51 }
 0xe24   :  { %15087 = vmatpush3.bf16.msra.mxu0 %v15952_v49  ;;  %15341 = vmatprep.subr.bf16.mxu1 %v15962_v37 }
 0xe25   :  { %15088 = vmatprep.subr.bf16.mxu0 %v15954_v22 }
 0xe27   :  { %15342 = vmatpush3.bf16.msra.mxu1 %v15962_v37 }
 0xe28   :  { %15089 = vmatpush3.bf16.msra.mxu0 %v15955_v39  ;;  %15343 = vmatprep.subr.bf16.mxu1 %v15965_v30 }
 0xe29   :  { %15090 = vmatprep.subr.bf16.mxu0 %v15957_v34 }
 0xe2a   :  { %15328 = vmatmul.mubr.msk.bf16.gmra.mrb[136].mxu1 %vm14441_vm6, %v17206_v35  ;;  %v15964_v35 = vld [vmem:[#allocation31 + $0x38] sm:$0xff]  }
 0xe2b   :  { %15344 = vmatpush3.bf16.msra.mxu1 %v15965_v30 }
 0xe2c   :  { %15091 = vmatpush3.bf16.msra.mxu0 %v15958_v12  ;;  %15345 = vmatprep.subr.bf16.mxu1 %v15966_v0 }
 0xe2d   :  { %15092 = vmatprep.subr.bf16.mxu0 %v15960_v41 }
 0xe2f   :  { %15346 = vmatpush3.bf16.msra.mxu1 %v15966_v0 }
 0xe30   :  { %15093 = vmatpush3.bf16.msra.mxu0 %v15961_v31  ;;  %15363 = vmatprep.subr.bf16.mxu1 %v17205_v4 }
 0xe31   :  { %15094 = vmatprep.subr.bf16.mxu0 %v15963_v15 }
 0xe34   :  { %15095 = vmatpush3.bf16.msra.mxu0 %v15964_v35 }
 0xe85   :  { %v14992_v29 = vpop.f32.mrb[116].mxu1 }
 0xe86   :  { %v14993_v45 = vpop.f32.mrb[117].mxu1 }
 0xe87   :  { %v14994_v40 = vadd.f32 %v14993_v45, %v14992_v29  ;;  %v14995_v42 = vpop.f32.mrb[118].mxu1 }
 0xe88   :  { %v14996_v1 = vpop.f32.mrb[119].mxu1 }
 0xe89   :  { %v9188_v60 = vadd.f32 %v14994_v40, %v14338_v43 }
 0xeaa   :  { %v15014_v38 = vpop.f32.mrb[132].mxu0 }
 0xeab   :  { %v15015_v62 = vpop.f32.mrb[133].mxu0 }
 0xeac   :  { %v15016_v11 = vadd.f32 %v15015_v62, %v15014_v38  ;;  %v15017_v46 = vpop.f32.mrb[134].mxu0 }
 0xead   :  { %v15018_v36 = vpop.f32.mrb[135].mxu0 }
 0xeae   :  { %v9228_v47 = vadd.f32 %v15016_v11, %v9188_v60 }
 0xec5   :  { %v15036_v23 = vpop.f32.mrb[120].mxu1 }
 0xec6   :  { %v15037_v55 = vpop.f32.mrb[121].mxu1 }
 0xec7   :  { %v15038_v17 = vadd.f32 %v15037_v55, %v15036_v23  ;;  %v15039_v28 = vpop.f32.mrb[122].mxu1 }
 0xec8   :  { %v15040_v53 = vpop.f32.mrb[123].mxu1 }
 0xec9   :  { %v9268_v20 = vadd.f32 %v15038_v17, %v9228_v47 }
 0xee5   :  { %v18187_v54 = vpop.f32.mrb[124].mxu1 }
 0xee6   :  { %v18189_v52 = vpop.f32.mrb[125].mxu1  ;;  %v9610_v18 = vrot.slane %v18187_v54, 1  ;;  %v9643_v13 = vrot.slane %v18187_v54, 2 }
 0xee7   :  { %v18193_v6 = vpop.f32.mrb[126].mxu1  ;;  %v9608_v16 = vrot.slane %v18189_v52, 1  ;;  %v9641_v7 = vrot.slane %v18189_v52, 2 }
 0xee8   :  { %v9611_v9 = vrot.slane %v18193_v6, 1  ;;  %v9644_v58 = vrot.slane %v18193_v6, 2  ;;  %v9677_v44 = vpack.c.bf16 %v18193_v6, %v18187_v54  ;;  %v9548_v14 = vpop.f32.mrb[127].mxu1 }
 0xee9   :  { %v9609_v26 = vrot.slane %v9548_v14, 1  ;;  %v9642_v48 = vrot.slane %v9548_v14, 2  ;;  %v9674_v59 = vpack.c.bf16 %v9548_v14, %v18189_v52  ;;  %v15968_v52 = vld [vmem:[#allocation34 + $0x8] sm:$0xff]  }
 0xeea   :  { %v9670_v33 = vsel %vm9657_vm7, %v9643_v13, %v9644_v58  ;;  %v15058_v8 = vpop.f32.mrb[136].mxu0  ;;  %v9637_v27 = vsel %vm9624_vm8, %v9610_v18, %v9611_v9 }
 0xeeb   :  { %v15059_v50 = vpop.f32.mrb[137].mxu0  ;;  %v9638_v19 = vsel %vm9624_vm8, %v9609_v26, %v9610_v18  ;;  %v9639_v63 = vsel %vm9624_vm8, %v9608_v16, %v9609_v26  ;;  %v9671_v3 = vsel %vm9657_vm7, %v9642_v48, %v9643_v13  ;;  %v9672_v5 = vsel %vm9657_vm7, %v9641_v7, %v9642_v48 }
 0xeec   :  { %v15060_v49 = vadd.f32 %v15059_v50, %v15058_v8  ;;  %v9675_v22 = vpack.c.bf16 %v9638_v19, %v9639_v63  ;;  %v9676_v51 = vpack.c.bf16 %v9671_v3, %v9672_v5  ;;  %v15061_v39 = vpop.f32.mrb[138].mxu0 }
 0xeed   :  { %v18220_v34 = vpop.f32.mrb[128].mxu1  ;;  %v15062_v12 = vpop.f32.mrb[139].mxu0 }
 0xeee   :  { %v18222_v41 = vadd.f32 %v15060_v49, %v9268_v20  ;;  %v18224_v31 = vpop.f32.mrb[129].mxu1  ;;  %9929 = vmatprep.mubr.bf16.mxu0 %v9675_v22  ;;  %15347 = vmatprep.mubr.bf16.mxu1 %v9676_v51  ;;  %v9614_v37 = vrot.slane %v18220_v34, 1  ;;  %v9647_v15 = vrot.slane %v18220_v34, 2 }
 0xeef   :  { %v9612_v35 = vrot.slane %v18224_v31, 1  ;;  %v9645_v30 = vrot.slane %v18224_v31, 2  ;;  %v18230_v0 = vpop.f32.mrb[130].mxu1  ;;  %9930 = vmatmul.mubr.bf16.vlgmr.msra.gmra.mrb[140].mxu0 %v9674_v59 }
 0xef0   :  { %16405 = vtanh.f32 %v18222_v41  ;;  %v9615_v29 = vrot.slane %v18230_v0, 1  ;;  %v9648_v45 = vrot.slane %v18230_v0, 2  ;;  %v9683_v40 = vpack.c.bf16 %v18230_v0, %v18220_v34  ;;  %v9564_v42 = vpop.f32.mrb[131].mxu1  ;;  %v15970_v34 = vld [vmem:[#allocation34 + $0x18] sm:$0xff]   ;;  %v15971_v0 = vld [vmem:[#allocation34 + $0x20] sm:$0xff]  }
 0xef1   :  { %v9669_v1 = vsel %vm9657_vm7, %v9644_v58, %v9645_v30  ;;  %v9613_v43 = vrot.slane %v9564_v42, 1  ;;  %v9646_v38 = vrot.slane %v9564_v42, 2  ;;  %v9680_v62 = vpack.c.bf16 %v9564_v42, %v18224_v31 }
 0xef2   :  { %v9679_v60 = vpack.c.bf16 %v9669_v1, %v9670_v33  ;;  %v9636_v11 = vsel %vm9624_vm8, %v9611_v9, %v9612_v35  ;;  %v9666_v46 = vsel %vm9657_vm7, %v9647_v15, %v9648_v45  ;;  %v9633_v36 = vsel %vm9624_vm8, %v9614_v37, %v9615_v29 }
 0xef3   :  { %v9678_v47 = vpack.c.bf16 %v9636_v11, %v9637_v27  ;;  %v9667_v23 = vsel %vm9657_vm7, %v9646_v38, %v9647_v15  ;;  %v9668_v55 = vsel %vm9657_vm7, %v9645_v30, %v9646_v38  ;;  %v9634_v17 = vsel %vm9624_vm8, %v9613_v43, %v9614_v37 }
 0xef4   :  { %15348 = vmatmul.mubr.bf16.vlgmr.msra.gmra.mrb[140].mxu1 %v9679_v60  ;;  %v9682_v28 = vpack.c.bf16 %v9667_v23, %v9668_v55  ;;  %v9635_v53 = vsel %vm9624_vm8, %v9612_v35, %v9613_v43 }
 0xef5   :  { %9937 = vmatprep.mubr.bf16.mxu0 %v9678_v47  ;;  %v18254_v20 = vpop.f32.mrb[132].mxu1  ;;  %v9681_v54 = vpack.c.bf16 %v9634_v17, %v9635_v53 }
 0xef6   :  { %v18256_v18 = vpop.f32.mrb[133].mxu1  ;;  %15351 = vmatprep.mubr.bf16.mxu1 %v9682_v28  ;;  %v9618_v13 = vrot.slane %v18254_v20, 1  ;;  %v9651_v14 = vrot.slane %v18254_v20, 2 }
 0xef7   :  { %v9616_v6 = vrot.slane %v18256_v18, 1  ;;  %v9649_v9 = vrot.slane %v18256_v18, 2  ;;  %v18261_v58 = vpop.f32.mrb[134].mxu1  ;;  %9938 = vmatmul.mubr.bf16.gmra.mrb[144].mxu0 %v9677_v44 }
 0xef8   :  { %v9619_v26 = vrot.slane %v18261_v58, 1  ;;  %v9652_v48 = vrot.slane %v18261_v58, 2  ;;  %v9689_v59 = vpack.c.bf16 %v18261_v58, %v18254_v20  ;;  %v9580_v33 = vpop.f32.mrb[135].mxu1  ;;  %9945 = vmatprep.mubr.bf16.mxu0 %v9681_v54 }
 0xef9   :  { %v9617_v8 = vrot.slane %v9580_v33, 1  ;;  %v9650_v27 = vrot.slane %v9580_v33, 2  ;;  %v9686_v50 = vpack.c.bf16 %v9580_v33, %v18256_v18  ;;  %v9665_v19 = vsel %vm9657_vm7, %v9648_v45, %v9649_v9 }
 0xefa   :  { %v18271_v44 = vpop.eup %16405  ;;  %v9685_v63 = vpack.c.bf16 %v9665_v19, %v9666_v46  ;;  %v9632_v3 = vsel %vm9624_vm8, %v9615_v29, %v9616_v6  ;;  %v9662_v5 = vsel %vm9657_vm7, %v9651_v14, %v9652_v48  ;;  %v9629_v49 = vsel %vm9624_vm8, %v9618_v13, %v9619_v26 }
 0xefb   :  { %v9663_v22 = vsel %vm9657_vm7, %v9650_v27, %v9651_v14  ;;  %v9664_v51 = vsel %vm9657_vm7, %v9649_v9, %v9650_v27  ;;  %v9315_v39 = vsel %vm9314_vm9, %v18271_v44, -inf  ;;  %v9684_v12 = vpack.c.bf16 %v9632_v3, %v9633_v36  ;;  %v15974_v27 = vld [vmem:[#allocation34 + $0x38] sm:$0xff]  }
 0xefc   :  { %15352 = vmatmul.mubr.bf16.gmra.mrb[144].mxu1 %v9685_v63  ;;  %v9688_v31 = vpack.c.bf16 %v9663_v22, %v9664_v51  ;;  %9316 = vmax.xlane.f32.xlu0 %v9315_v39  ;;  %v9630_v37 = vsel %vm9624_vm8, %v9617_v8, %v9618_v13  ;;  %v9631_v15 = vsel %vm9624_vm8, %v9616_v6, %v9617_v8  ;;  %v15967_v8 = vld [vmem:[#allocation34] sm:$0xff]   ;;  %v18324_v63 = vld [vmem:[#allocation32] ss:$0 sm:$0xff] }
 0xefd   :  { %v15329_v35 = vpop.f32.mrb[136].mxu1  ;;  %v9687_v30 = vpack.c.bf16 %v9630_v37, %v9631_v15  ;;  %15364 = vmatpush3.bf16.msra.mxu1 %v15967_v8 }
 0xefe   :  { %v9593_v29 = vpop.f32.mrb[137].mxu1  ;;  %15355 = vmatprep.mubr.bf16.mxu1 %v9688_v31  ;;  %v9622_v45 = vrot.slane %v15329_v35, 1  ;;  %v9655_v38 = vrot.slane %v15329_v35, 2  ;;  %15365 = vmatprep.subr.bf16.mxu1 %v17205_v4 }
 0xeff   :  { %v9620_v42 = vrot.slane %v9593_v29, 1  ;;  %v9653_v1 = vrot.slane %v9593_v29, 2  ;;  %v15330_v43 = vpop.f32.mrb[138].mxu1  ;;  %9946 = vmatmul.mubr.bf16.gmra.mrb[148].mxu0 %v9680_v62 }
 0xf00   :  { %v9623_v60 = vrot.slane %v15330_v43, 1  ;;  %v9656_v11 = vrot.slane %v15330_v43, 2  ;;  %v9695_v46 = vpack.c.bf16 %v15330_v43, %v15329_v35  ;;  %v9596_v36 = vpop.f32.mrb[139].mxu1  ;;  %9953 = vmatprep.mubr.bf16.mxu0 %v9684_v12 }
 0xf01   :  { %v9621_v47 = vrot.slane %v9596_v36, 1  ;;  %v9654_v23 = vrot.slane %v9596_v36, 2  ;;  %v9692_v55 = vpack.c.bf16 %v9596_v36, %v9593_v29  ;;  %v9661_v17 = vsel %vm9657_vm7, %v9652_v48, %v9653_v1  ;;  %15366 = vmatpush3.bf16.msra.mxu1 %v15968_v52 }
 0xf02   :  { %v9691_v28 = vpack.c.bf16 %v9661_v17, %v9662_v5  ;;  %v9658_v53 = vsel %vm9657_vm7, %v9655_v38, %v9656_v11  ;;  %v9673_v62 = vsel %vm9657_vm7, %v9656_v11, %v9641_v7  ;;  %v9628_v20 = vsel %vm9624_vm8, %v9619_v26, %v9620_v42  ;;  %15367 = vmatprep.subr.bf16.mxu1 %v17205_v4 }
 0xf03   :  { %v9659_v54 = vsel %vm9657_vm7, %v9654_v23, %v9655_v38  ;;  %v9660_v18 = vsel %vm9657_vm7, %v9653_v1, %v9654_v23  ;;  %v9697_v13 = vpack.c.bf16 %v9673_v62, %v9658_v53  ;;  %v9690_v6 = vpack.c.bf16 %v9628_v20, %v9629_v49 }
 0xf04   :  { %15356 = vmatmul.mubr.bf16.gmra.mrb[148].mxu1 %v9691_v28  ;;  %v9694_v9 = vpack.c.bf16 %v9659_v54, %v9660_v18  ;;  %v9626_v58 = vsel %vm9624_vm8, %v9621_v47, %v9622_v45  ;;  %v9627_v14 = vsel %vm9624_vm8, %v9620_v42, %v9621_v47  ;;  %v9625_v7 = vsel %vm9624_vm8, %v9622_v45, %v9623_v60 }
 0xf05   :  { %v9693_v26 = vpack.c.bf16 %v9626_v58, %v9627_v14  ;;  %v9640_v48 = vsel %vm9624_vm8, %v9623_v60, %v9608_v16  ;;  %v15969_v16 = vld [vmem:[#allocation34 + $0x10] sm:$0xff]  }
 0xf06   :  { %15359 = vmatprep.mubr.bf16.mxu1 %v9694_v9  ;;  %v9696_v33 = vpack.c.bf16 %v9640_v48, %v9625_v7  ;;  %15368 = vmatpush3.bf16.msra.mxu1 %v15969_v16 }
 0xf07   :  { %9954 = vmatmul.mubr.bf16.gmra.mrb[152].mxu0 %v9683_v40  ;;  %15369 = vmatprep.subr.bf16.mxu1 %v17205_v4  ;;  %v15972_v40 = vld [vmem:[#allocation34 + $0x28] sm:$0xff]  }
 0xf08   :  { %9961 = vmatprep.mubr.bf16.mxu0 %v9687_v30 }
 0xf0a   :  { %15370 = vmatpush3.bf16.msra.mxu1 %v15970_v34 }
 0xf0b   :  { %15371 = vmatprep.subr.bf16.mxu1 %v17205_v4 }
 0xf0c   :  { %15360 = vmatmul.mubr.bf16.gmra.mrb[152].mxu1 %v9697_v13 }
 0xf0d   :  { %15379 = vmatprep.mubr.msk.bf16.mxu1 %vm17207_vm10, %v17205_v4 }
 0xf0e   :  { %15372 = vmatpush3.bf16.msra.mxu1 %v15971_v0 }
 0xf0f   :  { %9962 = vmatmul.mubr.bf16.gmra.mrb[156].mxu0 %v9686_v50  ;;  %15373 = vmatprep.subr.bf16.mxu1 %v17205_v4 }
 0xf10   :  { %9969 = vmatprep.mubr.bf16.mxu0 %v9690_v6 }
 0xf12   :  { %15374 = vmatpush3.bf16.msra.mxu1 %v15972_v40 }
 0xf13   :  { %15375 = vmatprep.subr.bf16.mxu1 %v17205_v4 }
 0xf17   :  { %9970 = vmatmul.mubr.bf16.gmra.mrb[160].mxu0 %v9689_v59  ;;  %v15973_v59 = vld [vmem:[#allocation34 + $0x30] sm:$0xff]  }
 0xf18   :  { %9977 = vmatprep.mubr.bf16.mxu0 %v9693_v26  ;;  %15376 = vmatpush3.bf16.msra.mxu1 %v15973_v59 }
 0xf19   :  { %15377 = vmatprep.subr.bf16.mxu1 %v17205_v4 }
 0xf1c   :  { %15378 = vmatpush3.bf16.msra.mxu1 %v15974_v27 }
 0xf1f   :  { %9978 = vmatmul.mubr.bf16.gmra.mrb[164].mxu0 %v9692_v55 }
 0xf20   :  { %9985 = vmatprep.mubr.bf16.mxu0 %v9696_v33 }
 0xf27   :  { %9986 = vmatmul.mubr.bf16.gmra.mrb[168].mxu0 %v9695_v46 }
 0xfc2   :  { %v15096_v50 = vpop.f32.mrb[140].mxu0 }
 0xfc3   :  { %v15097_v19 = vpop.f32.mrb[141].mxu0 }
 0xfc4   :  { %v15098_v3 = vadd.f32 %v15097_v19, %v15096_v50  ;;  %v15099_v5 = vpop.f32.mrb[142].mxu0 }
 0xfc5   :  { %v15100_v49 = vpop.f32.mrb[143].mxu0 }
 0xfc6   :  { %v15101_v22 = vadd.f32 %v15100_v49, %v15099_v5  ;;  %v9932_v51 = vadd.f32 %v15098_v3, %v18324_v63 }
 0xfc7   :  { %v15349_v39 = vpop.f32.mrb[140].mxu1 }
 0xfc8   :  { %v10028_v12 = vpop.f32.mrb[141].mxu1  ;;  %v9935_v31 = vadd.f32 %v15101_v22, %v18324_v63 }
 0xfc9   :  { %v10029_v37 = vadd.f32 %v10028_v12, %v9932_v51  ;;  %v15350_v15 = vpop.f32.mrb[142].mxu1 }
 0xfca   :  { %v15102_v35 = vpop.f32.mrb[144].mxu0  ;;  %v10031_v30 = vpop.f32.mrb[143].mxu1 }
 0xfcb   :  { %v10032_v4 = vadd.f32 %v10031_v30, %v9935_v31  ;;  %v15103_v29 = vpop.f32.mrb[145].mxu0  ;;  %v10091_v23 = vmax.f32 %v10029_v37, 0.0 }
 0xfcc   :  { %v15104_v45 = vadd.f32 %v15103_v29, %v15102_v35  ;;  %v15105_v42 = vpop.f32.mrb[146].mxu0 }
 0xfcd   :  { %v15106_v1 = vpop.f32.mrb[147].mxu0  ;;  %v10092_v20 = vmax.f32 %v10032_v4, 0.0 }
 0xfce   :  { %v9940_v43 = vadd.f32 %v15104_v45, %v18324_v63  ;;  %v15107_v38 = vadd.f32 %v15106_v1, %v15105_v42 }
 0xfcf   :  { %v15353_v60 = vpop.f32.mrb[144].mxu1 }
 0xfd0   :  { %v10037_v11 = vadd.f32 %v15349_v39, %v9940_v43  ;;  %v9943_v46 = vadd.f32 %v15107_v38, %v18324_v63  ;;  %v10044_v36 = vpop.f32.mrb[145].mxu1  ;;  %v18334_v39 = vadd.s32 56, %v17551_v2  ;;  %v13193_v2 = vld [vmem:[#allocation43 + $0x88] sm:$0xff] }
 0xfd1   :  { %v15354_v47 = vpop.f32.mrb[146].mxu1 }
 0xfd2   :  { %v10093_v55 = vmax.f32 %v10037_v11, 0.0  ;;  %v10040_v17 = vadd.f32 %v15350_v15, %v9943_v46  ;;  %v15108_v28 = vpop.f32.mrb[148].mxu0  ;;  %v10047_v53 = vpop.f32.mrb[147].mxu1  ;;  %vm10118_vm11 = vcmp.lt.s32.totalorder %v18334_v39, 62 }
 0xfd3   :  { %v15109_v62 = vpop.f32.mrb[149].mxu0  ;;  %v9317_v39 = vpop.xlane.xlu0 %9316 }
 0xfd4   :  { %v10135_v54 = vmax.f32 %v10091_v23, %v10093_v55  ;;  %v10094_v18 = vmax.f32 %v10040_v17, 0.0  ;;  %v15110_v13 = vadd.f32 %v15109_v62, %v15108_v28  ;;  %v15111_v6 = vpop.f32.mrb[150].mxu0 }
 0xfd5   :  { %v15112_v9 = vpop.f32.mrb[151].mxu0 }
 0xfd6   :  { %v10136_v58 = vmax.f32 %v10092_v20, %v10094_v18  ;;  %v9948_v14 = vadd.f32 %v15110_v13, %v18324_v63  ;;  %v15113_v7 = vadd.f32 %v15112_v9, %v15111_v6 }
 0xfd7   :  { %v15357_v26 = vpop.f32.mrb[148].mxu1 }
 0xfd8   :  { %v10045_v48 = vadd.f32 %v10044_v36, %v9948_v14  ;;  %v9951_v33 = vadd.f32 %v15113_v7, %v18324_v63  ;;  %v10060_v8 = vpop.f32.mrb[149].mxu1 }
 0xfd9   :  { %v15358_v52 = vpop.f32.mrb[150].mxu1 }
 0xfda   :  { %v10095_v16 = vmax.f32 %v10045_v48, 0.0  ;;  %v10048_v34 = vadd.f32 %v10047_v53, %v9951_v33  ;;  %v15114_v0 = vpop.f32.mrb[152].mxu0  ;;  %v10063_v40 = vpop.f32.mrb[151].mxu1 }
 0xfdb   :  { %v15115_v59 = vpop.f32.mrb[153].mxu0 }
 0xfdc   :  { %v10137_v27 = vmax.f32 %v10135_v54, %v10095_v16  ;;  %v10096_v50 = vmax.f32 %v10048_v34, 0.0  ;;  %v15116_v19 = vadd.f32 %v15115_v59, %v15114_v0  ;;  %v15117_v3 = vpop.f32.mrb[154].mxu0 }
 0xfdd   :  { %v15118_v5 = vpop.f32.mrb[155].mxu0 }
 0xfde   :  { %v10138_v49 = vmax.f32 %v10136_v58, %v10096_v50  ;;  %v9956_v22 = vadd.f32 %v15116_v19, %v18324_v63  ;;  %v15119_v51 = vadd.f32 %v15118_v5, %v15117_v3 }
 0xfdf   :  { %v15361_v12 = vpop.f32.mrb[152].mxu1 }
 0xfe0   :  { %v10053_v31 = vadd.f32 %v15353_v60, %v9956_v22  ;;  %v9959_v37 = vadd.f32 %v15119_v51, %v18324_v63  ;;  %v10076_v15 = vpop.f32.mrb[153].mxu1 }
 0xfe1   :  { %v15362_v35 = vpop.f32.mrb[154].mxu1 }
 0xfe2   :  { %v10097_v30 = vmax.f32 %v10053_v31, 0.0  ;;  %v10056_v4 = vadd.f32 %v15354_v47, %v9959_v37  ;;  %v15120_v29 = vpop.f32.mrb[156].mxu0  ;;  %v10079_v45 = vpop.f32.mrb[155].mxu1 }
 0xfe3   :  { %v15121_v42 = vpop.f32.mrb[157].mxu0 }
 0xfe4   :  { %v10139_v1 = vmax.f32 %v10137_v27, %v10097_v30  ;;  %v10098_v43 = vmax.f32 %v10056_v4, 0.0  ;;  %v15122_v38 = vadd.f32 %v15121_v42, %v15120_v29  ;;  %v15123_v11 = vpop.f32.mrb[158].mxu0 }
 0xfe5   :  { %v15124_v46 = vpop.f32.mrb[159].mxu0 }
 0xfe6   :  { %v10126_v36 = vsel %vm10118_vm11, %v10098_v43, -3.4028235e+38  ;;  %v9964_v60 = vadd.f32 %v15122_v38, %v18324_v63  ;;  %v15125_v23 = vadd.f32 %v15124_v46, %v15123_v11 }
 0xfe7   :  { %v10140_v55 = vmax.f32 %v10138_v49, %v10126_v36 }
 0xfe8   :  { %v10061_v17 = vadd.f32 %v10060_v8, %v9964_v60  ;;  %v9967_v47 = vadd.f32 %v15125_v23, %v18324_v63 }
 0xfe9   :  { %v10141_v28 = vmax.f32 %v10139_v1, %v10140_v55 }
 0xfea   :  { %v10064_v53 = vadd.f32 %v10063_v40, %v9967_v47  ;;  %v15126_v62 = vpop.f32.mrb[160].mxu0  ;;  %v10099_v7 = vmax.f32 %v10061_v17, 0.0 }
 0xfeb   :  { %v15127_v20 = vpop.f32.mrb[161].mxu0  ;;  %v10142_v42 = vrot.slane %v10141_v28, 4 }
 0xfec   :  { %v15128_v54 = vadd.f32 %v15127_v20, %v15126_v62  ;;  %v15129_v18 = vpop.f32.mrb[162].mxu0  ;;  %v10100_v34 = vmax.f32 %v10064_v53, 0.0 }
 0xfed   :  { %v15130_v13 = vpop.f32.mrb[163].mxu0 }
 0xfee   :  { %v9972_v6 = vadd.f32 %v15128_v54, %v18324_v63  ;;  %v15131_v9 = vadd.f32 %v15130_v13, %v15129_v18 }
 0xff0   :  { %v10069_v58 = vadd.f32 %v15357_v26, %v9972_v6  ;;  %v9975_v14 = vadd.f32 %v15131_v9, %v18324_v63 }
 0xff2   :  { %v10101_v48 = vmax.f32 %v10069_v58, 0.0  ;;  %v10072_v33 = vadd.f32 %v15358_v52, %v9975_v14  ;;  %v15132_v16 = vpop.f32.mrb[164].mxu0 }
 0xff3   :  { %v15133_v8 = vpop.f32.mrb[165].mxu0 }
 0xff4   :  { %v10148_v0 = vmax.f32 %v10099_v7, %v10101_v48  ;;  %v10102_v59 = vmax.f32 %v10072_v33, 0.0  ;;  %v15134_v40 = vadd.f32 %v15133_v8, %v15132_v16  ;;  %v15135_v27 = vpop.f32.mrb[166].mxu0  ;;  %v9318_v16 = vsub.f32 %v18271_v44, %v9317_v39  ;;  %v14468_v8 = vld [vmem:[#allocation35] ss:$0 sm:$0xff]  ;;  %v10341_v39 = vld [vmem:[#allocation37 + $0x168] sm:$0xff] }
 0xff5   :  { %v15136_v50 = vpop.f32.mrb[167].mxu0 }
 0xff6   :  { %v10149_v19 = vmax.f32 %v10100_v34, %v10102_v59  ;;  %v9980_v3 = vadd.f32 %v15134_v40, %v18324_v63  ;;  %v15137_v5 = vadd.f32 %v15136_v50, %v15135_v27 }
 0xff8   :  { %v10077_v49 = vadd.f32 %v10076_v15, %v9980_v3  ;;  %v9983_v26 = vadd.f32 %v15137_v5, %v18324_v63  ;;  %v10143_v15 = vmax.f32 %v10141_v28, %v10142_v42 }
 0xffa   :  { %v10103_v22 = vmax.f32 %v10077_v49, 0.0  ;;  %v10080_v51 = vadd.f32 %v10079_v45, %v9983_v26  ;;  %v15138_v31 = vpop.f32.mrb[168].mxu0  ;;  %v10144_v17 = vrot.slane %v10143_v15, 2  ;;  %v10296_v49 = vld [vmem:[#allocation37] sm:$0xff] }
 0xffb   :  { %v15139_v37 = vpop.f32.mrb[169].mxu0  ;;  %v10300_v26 = vld [vmem:[#allocation37 + $0x20] sm:$0xff] }
 0xffc   :  { %v10150_v52 = vmax.f32 %v10148_v0, %v10103_v22  ;;  %v10104_v30 = vmax.f32 %v10080_v51, 0.0  ;;  %v15140_v4 = vadd.f32 %v15139_v37, %v15138_v31  ;;  %v15141_v29 = vpop.f32.mrb[170].mxu0  ;;  %v10145_v62 = vmax.f32 %v10143_v15, %v10144_v17  ;;  %v10297_v22 = vld [vmem:[#allocation37 + $0x8] sm:$0xff]  ;;  %v10320_v17 = vld [vmem:[#allocation37 + $0xc0] sm:$0xff] }
 0xffd   :  { %v15142_v1 = vpop.f32.mrb[171].mxu0  ;;  %v9319_v0 = vmul.f32 1.442695, %v9318_v16  ;;  %v14477_v51 = vcombine.low %v10296_v49, %v10300_v26  ;;  %v14478_v31 = vcombine.high %v10296_v49, %v10300_v26  ;;  %v10301_v37 = vld [vmem:[#allocation37 + $0x28] sm:$0xff] }
 0xffe   :  { %v10151_v43 = vmax.f32 %v10149_v19, %v10104_v30  ;;  %v9988_v38 = vadd.f32 %v15140_v4, %v18324_v63  ;;  %v15143_v11 = vadd.f32 %v15142_v1, %v15141_v29  ;;  %v10146_v18 = vrot.slane %v10145_v62, 1  ;;  %v10308_v30 = vld [vmem:[#allocation37 + $0x60] sm:$0xff]  ;;  %v10305_v1 = vld [vmem:[#allocation37 + $0x48] sm:$0xff] }
 0xfff   :  { %v14479_v4 = vcombine.low %v10297_v22, %v10301_v37  ;;  %v14480_v29 = vcombine.high %v10297_v22, %v10301_v37  ;;  %11106 = vmatprep.subr.bf16.mxu0 %v14478_v31  ;;  %v10317_v15 = vld [vmem:[#allocation37 + $0xa8] sm:$0xff]  ;;  %v10356_v31 = vld [vmem:[#allocation37 + $0x1e0] sm:$0xff] }
0x1000   :  { %v10085_v46 = vadd.f32 %v15361_v12, %v9988_v38  ;;  %v9991_v36 = vadd.f32 %v15143_v11, %v18324_v63  ;;  %v10147_v9 = vmax.f32 %v10145_v62, %v10146_v18  ;;  %v10312_v38 = vld [vmem:[#allocation37 + $0x80] sm:$0xff]  ;;  %11107 = vmatpush1.bf16.msra.mxu0 %v14477_v51  ;;  %v10325_v62 = vld [vmem:[#allocation37 + $0xe8] sm:$0xff] }
0x1001   :  { %11147 = vmatprep.subr.bf16.mxu1 %v14480_v29  ;;  %v10352_v51 = vld [vmem:[#allocation37 + $0x1c0] sm:$0xff]  ;;  %v10353_v37 = vld [vmem:[#allocation37 + $0x1c8] sm:$0xff] }
0x1002   :  { %v10105_v60 = vmax.f32 %v10085_v46, 0.0  ;;  %v10088_v23 = vadd.f32 %v15362_v35, %v9991_v36  ;;  %v10161_v63 = vpack.c.bf16 %v10147_v9, %v10147_v9  ;;  %v10316_v46 = vld [vmem:[#allocation37 + $0xa0] sm:$0xff]  ;;  %v10313_v36 = vld [vmem:[#allocation37 + $0x88] sm:$0xff]  ;;  %v14534_v29 = vcombine.high %v10352_v51, %v10356_v31 }
0x1003   :  { %v10332_v9 = vld [vmem:[#allocation37 + $0x120] sm:$0xff] }
0x1004   :  { %v10152_v55 = vmax.f32 %v10150_v52, %v10105_v60  ;;  %v10106_v45 = vmax.f32 %v10088_v23, 0.0  ;;  %v10188_v35 = vunpack.c.l.b16 %v10161_v63  ;;  %v10304_v52 = vld [vmem:[#allocation37 + $0x40] sm:$0xff] }
0x1005   :  { %v14486_v42 = vcombine.high %v10304_v52, %v10308_v30  ;;  %v14485_v60 = vcombine.low %v10304_v52, %v10308_v30  ;;  %v10357_v52 = vld [vmem:[#allocation37 + $0x1e8] sm:$0xff] }
0x1006   :  { %v10134_v47 = vsel %vm10118_vm11, %v10106_v45, -3.4028235e+38  ;;  %v14496_v45 = vcombine.high %v10313_v36, %v10317_v15 }
0x1007   :  { %v10153_v53 = vmax.f32 %v10151_v43, %v10134_v47  ;;  %v10309_v43 = vld [vmem:[#allocation37 + $0x68] sm:$0xff]  ;;  %11108 = vmatprep.subr.bf16.mxu0 %v14486_v42  ;;  %v10324_v47 = vld [vmem:[#allocation37 + $0xe0] sm:$0xff]  ;;  %v14536_v42 = vcombine.high %v10353_v37, %v10357_v52 }
0x1008   :  { %v14488_v11 = vcombine.high %v10305_v1, %v10309_v43  ;;  %v14487_v23 = vcombine.low %v10305_v1, %v10309_v43  ;;  %11109 = vmatpush1.bf16.msra.mxu0 %v14485_v60  ;;  %v14502_v18 = vcombine.high %v10320_v17, %v10324_v47  ;;  %v14501_v63 = vcombine.low %v10320_v17, %v10324_v47  ;;  %v10360_v1 = vld [vmem:[#allocation37 + $0x200] sm:$0xff]  ;;  %v10373_v17 = vld [vmem:[#allocation37 + $0x268] sm:$0xff] }
0x1009   :  { %v10154_v20 = vmax.f32 %v10152_v55, %v10153_v53  ;;  %v14494_v55 = vcombine.high %v10312_v38, %v10316_v46  ;;  %v10321_v53 = vld [vmem:[#allocation37 + $0xc8] sm:$0xff]  ;;  %v10364_v43 = vld [vmem:[#allocation37 + $0x220] sm:$0xff] }
0x100a   :  { %v14541_v47 = vcombine.low %v10360_v1, %v10364_v43 }
0x100b   :  { %v10155_v54 = vrot.slane %v10154_v20, 4  ;;  %11110 = vmatprep.subr.bf16.mxu0 %v14494_v55  ;;  %v10372_v55 = vld [vmem:[#allocation37 + $0x260] sm:$0xff] }
0x100d   :  { %v10156_v13 = vmax.f32 %v10154_v20, %v10155_v54  ;;  %v14493_v20 = vcombine.low %v10312_v38, %v10316_v46  ;;  %v14495_v54 = vcombine.low %v10313_v36, %v10317_v15  ;;  %v10361_v38 = vld [vmem:[#allocation37 + $0x208] sm:$0xff]  ;;  %v14533_v46 = vcombine.low %v10352_v51, %v10356_v31 }
0x100e   :  { %v14535_v36 = vcombine.low %v10353_v37, %v10357_v52  ;;  %v14542_v15 = vcombine.high %v10360_v1, %v10364_v43  ;;  %v10397_v31 = vld [vmem:[#allocation37 + $0x328] sm:$0xff]  ;;  %v10400_v37 = vld [vmem:[#allocation37 + $0x340] sm:$0xff] }
0x100f   :  { %v10157_v6 = vrot.slane %v10156_v13, 2  ;;  %11111 = vmatpush1.bf16.msra.mxu0 %v14493_v20  ;;  %v10404_v52 = vld [vmem:[#allocation37 + $0x360] sm:$0xff] }
0x1010   :  { %11112 = vmatprep.subr.bf16.mxu0 %v14502_v18  ;;  %v10380_v18 = vld [vmem:[#allocation37 + $0x2a0] sm:$0xff] }
0x1011   :  { %v10158_v12 = vmax.f32 %v10156_v13, %v10157_v6  ;;  %v14504_v13 = vcombine.high %v10321_v53, %v10325_v62  ;;  %v10328_v6 = vld [vmem:[#allocation37 + $0x100] sm:$0xff] }
0x1012   :  { %v14509_v16 = vcombine.low %v10328_v6, %v10332_v9  ;;  %v10408_v1 = vld [vmem:[#allocation37 + $0x380] sm:$0xff] }
0x1013   :  { %v10159_v58 = vrot.slane %v10158_v12, 1  ;;  %11113 = vmatpush1.bf16.msra.mxu0 %v14501_v63 }
0x1015   :  { %v10160_v28 = vmax.f32 %v10158_v12, %v10159_v58  ;;  %v10329_v12 = vld [vmem:[#allocation37 + $0x108] sm:$0xff] }
0x1016   :  { %v10333_v58 = vld [vmem:[#allocation37 + $0x128] sm:$0xff] }
0x1017   :  { %v10162_v14 = vpack.c.bf16 %v10160_v28, %v10160_v28  ;;  %v14503_v28 = vcombine.low %v10321_v53, %v10325_v62 }
0x1019   :  { %v10189_v7 = vunpack.c.l.b16 %v10162_v14  ;;  %v14510_v14 = vcombine.high %v10328_v6, %v10332_v9  ;;  %v10381_v6 = vld [vmem:[#allocation37 + $0x2a8] sm:$0xff] }
0x101b   :  { %v10190_v48 = vsel %vm4185_vm13, %v10189_v7, %v10188_v35  ;;  %v14512_v35 = vcombine.high %v10329_v12, %v10333_v58  ;;  %v10336_v7 = vld [vmem:[#allocation37 + $0x140] sm:$0xff]  ;;  %11114 = vmatprep.subr.bf16.mxu0 %v14510_v14 }
0x101c   :  { %v10191_v33 = vpack.c.b16 %v10190_v48, %v10190_v48  ;;  %v10340_v48 = vld [vmem:[#allocation37 + $0x160] sm:$0xff]  ;;  %11115 = vmatpush1.bf16.msra.mxu0 %v14509_v16 }
0x101d   :  { %v10388_v14 = vld [vmem:[#allocation37 + $0x2e0] sm:$0xff] }
0x101e   :  { %15380 = vmatmul.mubr.bf16.vlgmr.msra.gmra.mrb[156].mxu1 %v10191_v33  ;;  %v10337_v33 = vld [vmem:[#allocation37 + $0x148] sm:$0xff] }
0x101f   :  { %11148 = vmatpush1.bf16.msra.mxu1 %v14479_v4  ;;  %v14519_v49 = vcombine.low %v10337_v33, %v10341_v39 }
0x1020   :  { %11149 = vmatprep.subr.bf16.mxu1 %v14488_v11  ;;  %v10365_v11 = vld [vmem:[#allocation37 + $0x228] sm:$0xff] }
0x1021   :  { %v14544_v60 = vcombine.high %v10361_v38, %v10365_v11  ;;  %v14543_v53 = vcombine.low %v10361_v38, %v10365_v11  ;;  %v10412_v38 = vld [vmem:[#allocation37 + $0x3a0] sm:$0xff]  ;;  %v10409_v11 = vld [vmem:[#allocation37 + $0x388] sm:$0xff] }
0x1023   :  { %11150 = vmatpush1.bf16.msra.mxu1 %v14487_v23  ;;  %v10368_v23 = vld [vmem:[#allocation37 + $0x240] sm:$0xff] }
0x1024   :  { %11151 = vmatprep.subr.bf16.mxu1 %v14496_v45  ;;  %v10369_v45 = vld [vmem:[#allocation37 + $0x248] sm:$0xff]  ;;  %v14550_v62 = vcombine.high %v10368_v23, %v10372_v55  ;;  %v14549_v9 = vcombine.low %v10368_v23, %v10372_v55  ;;  %v10416_v55 = vld [vmem:[#allocation37 + $0x3c0] sm:$0xff] }
0x1025   :  { %v14552_v20 = vcombine.high %v10369_v45, %v10373_v17 }
0x1027   :  { %11152 = vmatpush1.bf16.msra.mxu1 %v14495_v54  ;;  %v10376_v54 = vld [vmem:[#allocation37 + $0x280] sm:$0xff] }
0x1028   :  { %11153 = vmatprep.subr.bf16.mxu1 %v14504_v13  ;;  %v10377_v13 = vld [vmem:[#allocation37 + $0x288] sm:$0xff] }
0x1029   :  { %v14560_v63 = vcombine.high %v10377_v13, %v10381_v6 }
0x102b   :  { %11154 = vmatpush1.bf16.msra.mxu1 %v14503_v28  ;;  %v10384_v28 = vld [vmem:[#allocation37 + $0x2c0] sm:$0xff] }
0x102c   :  { %11155 = vmatprep.subr.bf16.mxu1 %v14512_v35  ;;  %v10385_v35 = vld [vmem:[#allocation37 + $0x2c8] sm:$0xff] }
0x10f1   :  { %v10275_v34 = vpop.f32.mrb[156].mxu1 }
0x10f2   :  { %v18352_v59 = vadd.f32 %v14468_v8, %v10275_v34  ;;  %v15381_v40 = vpop.f32.mrb[157].mxu1  ;;  %v14511_v8 = vcombine.low %v10329_v12, %v10333_v58  ;;  %v14518_v34 = vcombine.high %v10336_v7, %v10340_v48  ;;  %v14551_v12 = vcombine.low %v10369_v45, %v10373_v17  ;;  %v10420_v45 = vld [vmem:[#allocation37 + $0x3e0] sm:$0xff]  ;;  %v10417_v17 = vld [vmem:[#allocation37 + $0x3c8] sm:$0xff] }
0x10f3   :  { %v10278_v27 = vpop.f32.mrb[158].mxu1  ;;  %v10344_v40 = vld [vmem:[#allocation37 + $0x180] sm:$0xff]  ;;  %v14558_v58 = vcombine.high %v10376_v54, %v10380_v18 }
0x10f4   :  { %16407 = vtanh.f32 %v18352_v59  ;;  %v15382_v50 = vpop.f32.mrb[159].mxu1  ;;  %v10348_v27 = vld [vmem:[#allocation37 + $0x1a0] sm:$0xff]  ;;  %11156 = vmatpush1.bf16.msra.mxu1 %v14511_v8  ;;  %11116 = vmatprep.subr.bf16.mxu0 %v14518_v34  ;;  %v14565_v8 = vcombine.low %v10384_v28, %v10388_v14 }
0x10f5   :  { %16409 = vpow2.f32 %v9319_v0  ;;  %v14520_v0 = vcombine.high %v10337_v33, %v10341_v39  ;;  %v10345_v50 = vld [vmem:[#allocation37 + $0x188] sm:$0xff]  ;;  %v14526_v26 = vcombine.high %v10344_v40, %v10348_v27  ;;  %v14525_v30 = vcombine.low %v10344_v40, %v10348_v27 }
0x10f6   :  { %v14559_v33 = vcombine.low %v10377_v13, %v10381_v6  ;;  %v14566_v39 = vcombine.high %v10384_v28, %v10388_v14  ;;  %v10298_v6 = vld [vmem:[#allocation37 + $0x10] sm:$0xff]  ;;  %v10303_v28 = vld [vmem:[#allocation37 + $0x38] sm:$0xff] }
0x10f7   :  { %11157 = vmatprep.subr.bf16.mxu1 %v14520_v0 }
0x10f8   :  { %11158 = vmatpush1.bf16.msra.mxu1 %v14519_v49  ;;  %v10396_v49 = vld [vmem:[#allocation37 + $0x320] sm:$0xff] }
0x10fe   :  { %v18355_v19 = vpop.eup %16407 }
0x10ff   :  { %v10282_v3 = vsel %vm9314_vm9, %v18355_v19, -inf  ;;  %v18359_v5 = vpop.eup %16409 }
0x1100   :  { %10283 = vmax.xlane.f32.xlu1 %v10282_v3  ;;  %v9321_v44 = vsel %vm9314_vm9, %v18359_v5, 0.0  ;;  %v10349_v3 = vld [vmem:[#allocation37 + $0x1a8] sm:$0xff] }
0x1101   :  { %v14528_v22 = vcombine.high %v10345_v50, %v10349_v3  ;;  %v14527_v4 = vcombine.low %v10345_v50, %v10349_v3 }
0x1103   :  { %11159 = vmatprep.subr.bf16.mxu1 %v14528_v22 }
0x1104   :  { %9322 = vadd.xlane.f32.xlu1 %v9321_v44  ;;  %v14517_v44 = vcombine.low %v10336_v7, %v10340_v48  ;;  %11160 = vmatpush1.bf16.msra.mxu1 %v14527_v4  ;;  %v10389_v7 = vld [vmem:[#allocation37 + $0x2e8] sm:$0xff]  ;;  %v14557_v48 = vcombine.low %v10376_v54, %v10380_v18  ;;  %v14597_v18 = vcombine.low %v10416_v55, %v10420_v45 }
0x1105   :  { %11161 = vmatprep.subr.bf16.mxu1 %v14536_v42  ;;  %v14568_v16 = vcombine.high %v10385_v35, %v10389_v7  ;;  %v14567_v34 = vcombine.low %v10385_v35, %v10389_v7  ;;  %v10405_v42 = vld [vmem:[#allocation37 + $0x368] sm:$0xff] }
0x1106   :  { %11117 = vmatpush1.bf16.msra.mxu0 %v14517_v44  ;;  %v10392_v44 = vld [vmem:[#allocation37 + $0x300] sm:$0xff] }
0x1107   :  { %11118 = vmatprep.subr.bf16.mxu0 %v14526_v26  ;;  %v10393_v26 = vld [vmem:[#allocation37 + $0x308] sm:$0xff]  ;;  %v14573_v22 = vcombine.low %v10392_v44, %v10396_v49  ;;  %v14574_v51 = vcombine.high %v10392_v44, %v10396_v49  ;;  %v10311_v44 = vld [vmem:[#allocation37 + $0x78] sm:$0xff] }
0x1108   :  { %11162 = vmatpush1.bf16.msra.mxu1 %v14535_v36  ;;  %v14576_v4 = vcombine.high %v10393_v26, %v10397_v31  ;;  %v14581_v36 = vcombine.low %v10400_v37, %v10404_v52 }
0x1109   :  { %11163 = vmatprep.subr.bf16.mxu1 %v14544_v60  ;;  %v14590_v60 = vcombine.high %v10408_v1, %v10412_v38 }
0x110a   :  { %11119 = vmatpush1.bf16.msra.mxu0 %v14525_v30  ;;  %v14575_v30 = vcombine.low %v10393_v26, %v10397_v31 }
0x110b   :  { %11120 = vmatprep.subr.bf16.mxu0 %v14534_v29  ;;  %v14582_v29 = vcombine.high %v10400_v37, %v10404_v52  ;;  %v10315_v37 = vld [vmem:[#allocation37 + $0x98] sm:$0xff] }
0x110c   :  { %11164 = vmatpush1.bf16.msra.mxu1 %v14543_v53  ;;  %v14589_v53 = vcombine.low %v10408_v1, %v10412_v38  ;;  %v10319_v52 = vld [vmem:[#allocation37 + $0xb8] sm:$0xff] }
0x110d   :  { %11165 = vmatprep.subr.bf16.mxu1 %v14552_v20  ;;  %v14598_v20 = vcombine.high %v10416_v55, %v10420_v45 }
0x110e   :  { %11121 = vmatpush1.bf16.msra.mxu0 %v14533_v46  ;;  %v10413_v46 = vld [vmem:[#allocation37 + $0x3a8] sm:$0xff] }
0x110f   :  { %11122 = vmatprep.subr.bf16.mxu0 %v14542_v15  ;;  %v14592_v23 = vcombine.high %v10409_v11, %v10413_v46 }
0x1110   :  { %11166 = vmatpush1.bf16.msra.mxu1 %v14551_v12  ;;  %v10299_v12 = vld [vmem:[#allocation37 + $0x18] sm:$0xff] }
0x1111   :  { %11167 = vmatprep.subr.bf16.mxu1 %v14560_v63  ;;  %v14483_v14 = vcombine.low %v10299_v12, %v10303_v28  ;;  %v14484_v35 = vcombine.high %v10299_v12, %v10303_v28  ;;  %v10350_v12 = vld [vmem:[#allocation37 + $0x1b0] sm:$0xff] }
0x1112   :  { %11123 = vmatpush1.bf16.msra.mxu0 %v14541_v47  ;;  %v10421_v47 = vld [vmem:[#allocation37 + $0x3e8] sm:$0xff] }
0x1113   :  { %11124 = vmatprep.subr.bf16.mxu0 %v14550_v62  ;;  %v14591_v62 = vcombine.low %v10409_v11, %v10413_v46  ;;  %v14600_v54 = vcombine.high %v10417_v17, %v10421_v47  ;;  %v14599_v13 = vcombine.low %v10417_v17, %v10421_v47  ;;  %v10330_v46 = vld [vmem:[#allocation37 + $0x110] sm:$0xff] }
0x1114   :  { %11168 = vmatpush1.bf16.msra.mxu1 %v14559_v33  ;;  %v10338_v47 = vld [vmem:[#allocation37 + $0x150] sm:$0xff] }
0x1115   :  { %11169 = vmatprep.subr.bf16.mxu1 %v14568_v16 }
0x1116   :  { %11125 = vmatpush1.bf16.msra.mxu0 %v14549_v9  ;;  %v10302_v9 = vld [vmem:[#allocation37 + $0x30] sm:$0xff] }
0x1117   :  { %11126 = vmatprep.subr.bf16.mxu0 %v14558_v58  ;;  %v14481_v58 = vcombine.low %v10298_v6, %v10302_v9  ;;  %v14482_v63 = vcombine.high %v10298_v6, %v10302_v9  ;;  %v10346_v9 = vld [vmem:[#allocation37 + $0x190] sm:$0xff] }
0x1118   :  { %11170 = vmatpush1.bf16.msra.mxu1 %v14567_v34 }
0x1119   :  { %11171 = vmatprep.subr.bf16.mxu1 %v14576_v4  ;;  %v10322_v4 = vld [vmem:[#allocation37 + $0xd0] sm:$0xff] }
0x111a   :  { %11127 = vmatpush1.bf16.msra.mxu0 %v14557_v48 }
0x111b   :  { %11128 = vmatprep.subr.bf16.mxu0 %v14566_v39 }
0x111c   :  { %11172 = vmatpush1.bf16.msra.mxu1 %v14575_v30  ;;  %v14500_v30 = vcombine.high %v10315_v37, %v10319_v52 }
0x111e   :  { %11129 = vmatpush1.bf16.msra.mxu0 %v14565_v8 }
0x111f   :  { %11130 = vmatprep.subr.bf16.mxu0 %v14574_v51 }
0x1122   :  { %11131 = vmatpush1.bf16.msra.mxu0 %v14573_v22  ;;  %v10314_v22 = vld [vmem:[#allocation37 + $0x90] sm:$0xff] }
0x1123   :  { %11132 = vmatprep.subr.bf16.mxu0 %v14582_v29  ;;  %v10326_v29 = vld [vmem:[#allocation37 + $0xf0] sm:$0xff] }
0x1124   :  { %v14506_v38 = vcombine.high %v10322_v4, %v10326_v29 }
0x1126   :  { %11133 = vmatpush1.bf16.msra.mxu0 %v14581_v36  ;;  %v10334_v36 = vld [vmem:[#allocation37 + $0x130] sm:$0xff] }
0x1127   :  { %11134 = vmatprep.subr.bf16.mxu0 %v14590_v60  ;;  %v10335_v60 = vld [vmem:[#allocation37 + $0x138] sm:$0xff]  ;;  %v14514_v45 = vcombine.high %v10330_v46, %v10334_v36 }
0x112a   :  { %11135 = vmatpush1.bf16.msra.mxu0 %v14589_v53  ;;  %v10342_v53 = vld [vmem:[#allocation37 + $0x170] sm:$0xff] }
0x112b   :  { %11136 = vmatprep.subr.bf16.mxu0 %v14598_v20  ;;  %v10343_v20 = vld [vmem:[#allocation37 + $0x178] sm:$0xff]  ;;  %v14521_v28 = vcombine.low %v10338_v47, %v10342_v53 }
0x112e   :  { %11137 = vmatpush1.bf16.msra.mxu0 %v14597_v18 }
0x112f   :  { %11188 = vmatprep.subr.bf16.mxu0 %v14482_v63  ;;  %v10351_v63 = vld [vmem:[#allocation37 + $0x1b8] sm:$0xff] }
0x118d   :  { %v10284_v0 = vpop.xlane.xlu1 %10283 }
0x118e   :  { %v10285_v40 = vsub.f32 %v18355_v19, %v10284_v0  ;;  %v10401_v19 = vld [vmem:[#allocation37 + $0x348] sm:$0xff] }
0x118f   :  { %v14584_v43 = vcombine.high %v10401_v19, %v10405_v42  ;;  %v14583_v15 = vcombine.low %v10401_v19, %v10405_v42  ;;  %v10323_v19 = vld [vmem:[#allocation37 + $0xd8] sm:$0xff] }
0x1190   :  { %v10286_v27 = vmul.f32 1.442695, %v10285_v40  ;;  %v10306_v40 = vld [vmem:[#allocation37 + $0x50] sm:$0xff]  ;;  %v10327_v42 = vld [vmem:[#allocation37 + $0xf8] sm:$0xff] }
0x1191   :  { %11173 = vmatprep.subr.bf16.mxu1 %v14584_v43  ;;  %v9323_v7 = vpop.xlane.xlu1 %9322  ;;  %v14499_v43 = vcombine.low %v10315_v37, %v10319_v52  ;;  %v14508_v11 = vcombine.high %v10323_v19, %v10327_v42  ;;  %v14507_v55 = vcombine.low %v10323_v19, %v10327_v42  ;;  %v10370_v37 = vld [vmem:[#allocation37 + $0x250] sm:$0xff] }
0x1192   :  { %16411 = vpow2.f32 %v10286_v27  ;;  %11174 = vmatpush1.bf16.msra.mxu1 %v14583_v15  ;;  %v10310_v27 = vld [vmem:[#allocation37 + $0x70] sm:$0xff]  ;;  %v10331_v15 = vld [vmem:[#allocation37 + $0x118] sm:$0xff] }
0x1193   :  { %11175 = vmatprep.subr.bf16.mxu1 %v14592_v23  ;;  %16413 = vrcp.f32 %v9323_v7  ;;  %v14490_v51 = vcombine.high %v10306_v40, %v10310_v27  ;;  %v14505_v23 = vcombine.low %v10322_v4, %v10326_v29  ;;  %v14516_v17 = vcombine.high %v10331_v15, %v10335_v60  ;;  %v10374_v52 = vld [vmem:[#allocation37 + $0x270] sm:$0xff] }
0x1194   :  { %v14515_v18 = vcombine.low %v10331_v15, %v10335_v60  ;;  %v14554_v4 = vcombine.high %v10370_v37, %v10374_v52  ;;  %v10378_v19 = vld [vmem:[#allocation37 + $0x290] sm:$0xff] }
0x1195   :  { %v10382_v42 = vld [vmem:[#allocation37 + $0x2b0] sm:$0xff] }
0x1196   :  { %11176 = vmatpush1.bf16.msra.mxu1 %v14591_v62  ;;  %v10339_v62 = vld [vmem:[#allocation37 + $0x158] sm:$0xff]  ;;  %v10386_v15 = vld [vmem:[#allocation37 + $0x2d0] sm:$0xff] }
0x1197   :  { %11177 = vmatprep.subr.bf16.mxu1 %v14600_v54  ;;  %v14513_v54 = vcombine.low %v10330_v46, %v10334_v36  ;;  %v14524_v6 = vcombine.high %v10339_v62, %v10343_v20  ;;  %v14562_v46 = vcombine.high %v10378_v19, %v10382_v42  ;;  %v10390_v60 = vld [vmem:[#allocation37 + $0x2f0] sm:$0xff] }
0x119a   :  { %11178 = vmatpush1.bf16.msra.mxu1 %v14599_v13  ;;  %v14522_v13 = vcombine.high %v10338_v47, %v10342_v53  ;;  %v14570_v47 = vcombine.high %v10386_v15, %v10390_v60 }
0x119b   :  { %11229 = vmatprep.subr.bf16.mxu1 %v14484_v35  ;;  %v14530_v35 = vcombine.high %v10346_v9, %v10350_v12 }
0x119c   :  { %v18364_v50 = vpop.eup %16411 }
0x119d   :  { %v10288_v3 = vsel %vm9314_vm9, %v18364_v50, 0.0  ;;  %v16414_v33 = vpop.eup %16413 }
0x119e   :  { %10289 = vadd.xlane.f32.xlu0 %v10288_v3  ;;  %v9325_v39 = vmul.f32 %v16414_v33, %v18359_v5  ;;  %v10307_v3 = vld [vmem:[#allocation37 + $0x58] sm:$0xff]  ;;  %v10318_v5 = vld [vmem:[#allocation37 + $0xb0] sm:$0xff] }
0x119f   :  { %v14492_v31 = vcombine.high %v10307_v3, %v10311_v44  ;;  %v14497_v1 = vcombine.low %v10314_v22, %v10318_v5  ;;  %v10358_v33 = vld [vmem:[#allocation37 + $0x1f0] sm:$0xff] }
0x11a0   :  { %v9326_v34 = vmul.f32 %v9325_v39, %v18222_v41  ;;  %v14489_v41 = vcombine.low %v10306_v40, %v10310_v27  ;;  %v10355_v39 = vld [vmem:[#allocation37 + $0x1d8] sm:$0xff]  ;;  %v10362_v27 = vld [vmem:[#allocation37 + $0x210] sm:$0xff] }
0x11a2   :  { %v18372_v26 = vpack.c.bf16 %v9326_v34, %v9326_v34 }
0x122b   :  { %v10290_v48 = vpop.xlane.xlu0 %10289 }
0x122c   :  { %16415 = vrcp.f32 %v10290_v48  ;;  %v10354_v48 = vld [vmem:[#allocation37 + $0x1d0] sm:$0xff] }
0x1236   :  { %v16416_v16 = vpop.eup %16415 }
0x1237   :  { %v10292_v8 = vmul.f32 %v16416_v16, %v18364_v50  ;;  %v14498_v50 = vcombine.high %v10314_v22, %v10318_v5  ;;  %v10359_v16 = vld [vmem:[#allocation37 + $0x1f8] sm:$0xff]  ;;  %v14537_v22 = vcombine.low %v10354_v48, %v10358_v33 }
0x1238   :  { %v14540_v40 = vcombine.high %v10355_v39, %v10359_v16 }
0x1239   :  { %v10293_v0 = vmul.f32 %v10292_v8, %v18352_v59  ;;  %v14491_v59 = vcombine.low %v10307_v3, %v10311_v44  ;;  %v14529_v8 = vcombine.low %v10346_v9, %v10350_v12  ;;  %v10366_v3 = vld [vmem:[#allocation37 + $0x230] sm:$0xff]  ;;  %v10363_v44 = vld [vmem:[#allocation37 + $0x218] sm:$0xff] }
0x123b   :  { %v10295_v49 = vpack.c.bf16 %v10293_v0, %v10293_v0  ;;  %v14538_v0 = vcombine.high %v10354_v48, %v10358_v33 }
0x123d   :  { %11138 = vmatprep.mubr.bf16.mxu0 %v10295_v49  ;;  %11179 = vmatprep.mubr.bf16.mxu1 %v10295_v49 }
0x123e   :  { %11139 = vmatmul.mubr.bf16.vlgmr.msra.gmra.mrb[172].mxu0 %v18372_v26  ;;  %11180 = vmatmul.mubr.bf16.vlgmr.msra.gmra.mrb[160].mxu1 %v18372_v26 }
0x123f   :  { %11189 = vmatpush1.bf16.msra.mxu0 %v14481_v58  ;;  %11230 = vmatpush1.bf16.msra.mxu1 %v14483_v14  ;;  %v10347_v58 = vld [vmem:[#allocation37 + $0x198] sm:$0xff]  ;;  %v14523_v14 = vcombine.low %v10339_v62, %v10343_v20  ;;  %v10394_v62 = vld [vmem:[#allocation37 + $0x310] sm:$0xff] }
0x1240   :  { %11220 = vmatprep.mubr.bf16.mxu0 %v10295_v49  ;;  %11261 = vmatprep.mubr.bf16.mxu1 %v10295_v49  ;;  %v14532_v7 = vcombine.high %v10347_v58, %v10351_v63  ;;  %v14531_v34 = vcombine.low %v10347_v58, %v10351_v63  ;;  %v10367_v49 = vld [vmem:[#allocation37 + $0x238] sm:$0xff]  ;;  %v10398_v20 = vld [vmem:[#allocation37 + $0x330] sm:$0xff] }
0x1241   :  { %11190 = vmatprep.subr.bf16.mxu0 %v14490_v51  ;;  %11231 = vmatprep.subr.bf16.mxu1 %v14492_v31  ;;  %v14539_v51 = vcombine.low %v10355_v39, %v10359_v16  ;;  %v14546_v31 = vcombine.high %v10362_v27, %v10366_v3  ;;  %v14548_v5 = vcombine.high %v10363_v44, %v10367_v49  ;;  %v10402_v58 = vld [vmem:[#allocation37 + $0x350] sm:$0xff] }
0x1242   :  { %v14578_v9 = vcombine.high %v10394_v62, %v10398_v20  ;;  %v10406_v63 = vld [vmem:[#allocation37 + $0x370] sm:$0xff] }
0x1243   :  { %11191 = vmatpush1.bf16.msra.mxu0 %v14489_v41  ;;  %11232 = vmatpush1.bf16.msra.mxu1 %v14491_v59  ;;  %v10371_v41 = vld [vmem:[#allocation37 + $0x258] sm:$0xff]  ;;  %v14586_v48 = vcombine.high %v10402_v58, %v10406_v63  ;;  %v10410_v39 = vld [vmem:[#allocation37 + $0x390] sm:$0xff] }
0x1244   :  { %11192 = vmatprep.subr.bf16.mxu0 %v14498_v50  ;;  %11233 = vmatprep.subr.bf16.mxu1 %v14500_v30  ;;  %v10375_v59 = vld [vmem:[#allocation37 + $0x278] sm:$0xff]  ;;  %v14545_v50 = vcombine.low %v10362_v27, %v10366_v3  ;;  %v14547_v30 = vcombine.low %v10363_v44, %v10367_v49  ;;  %v10414_v16 = vld [vmem:[#allocation37 + $0x3b0] sm:$0xff] }
0x1245   :  { %v14556_v29 = vcombine.high %v10371_v41, %v10375_v59  ;;  %v14594_v27 = vcombine.high %v10410_v39, %v10414_v16  ;;  %v10418_v44 = vld [vmem:[#allocation37 + $0x3d0] sm:$0xff] }
0x1246   :  { %v10422_v49 = vld [vmem:[#allocation37 + $0x3f0] sm:$0xff] }
0x1247   :  { %11193 = vmatpush1.bf16.msra.mxu0 %v14497_v1  ;;  %11234 = vmatpush1.bf16.msra.mxu1 %v14499_v43  ;;  %v10379_v1 = vld [vmem:[#allocation37 + $0x298] sm:$0xff] }
0x1248   :  { %11194 = vmatprep.subr.bf16.mxu0 %v14506_v38  ;;  %11235 = vmatprep.subr.bf16.mxu1 %v14508_v11  ;;  %v10383_v43 = vld [vmem:[#allocation37 + $0x2b8] sm:$0xff]  ;;  %v14553_v38 = vcombine.low %v10370_v37, %v10374_v52  ;;  %v14555_v11 = vcombine.low %v10371_v41, %v10375_v59  ;;  %v14602_v37 = vcombine.high %v10418_v44, %v10422_v49 }
0x1249   :  { %v14564_v36 = vcombine.high %v10379_v1, %v10383_v43  ;;  %v14601_v41 = vcombine.low %v10418_v44, %v10422_v49  ;;  %v16046_v44 = vld [vmem:[#allocation40 + $0x16c] ss:$16 sps:$4 sm:$0xff]   ;;  %v16041_v49 = vld [vmem:[#allocation40 + $0x160] ss:$16 sps:$4 sm:$0xff]  }
0x124b   :  { %11195 = vmatpush1.bf16.msra.mxu0 %v14505_v23  ;;  %11236 = vmatpush1.bf16.msra.mxu1 %v14507_v55  ;;  %v10387_v23 = vld [vmem:[#allocation37 + $0x2d8] sm:$0xff] }
0x124c   :  { %11196 = vmatprep.subr.bf16.mxu0 %v14514_v45  ;;  %11237 = vmatprep.subr.bf16.mxu1 %v14516_v17  ;;  %v10391_v55 = vld [vmem:[#allocation37 + $0x2f8] sm:$0xff]  ;;  %v14561_v45 = vcombine.low %v10378_v19, %v10382_v42  ;;  %v14563_v17 = vcombine.low %v10379_v1, %v10383_v43  ;;  %v15986_v42 = vld [vmem:[#allocation40 + $0x2c] ss:$16 sps:$4 sm:$0xff]   ;;  %v15984_v43 = vld [vmem:[#allocation40 + $0x28] ss:$16 sps:$4 sm:$0xff]  }
0x124d   :  { %v14572_v53 = vcombine.high %v10387_v23, %v10391_v55  ;;  %v15983_v19 = vld [vmem:[#allocation40 + $0x24] ss:$16 sps:$4 sm:$0xff]   ;;  %v15981_v1 = vld [vmem:[#allocation40 + $0x20] ss:$16 sps:$4 sm:$0xff]  }
0x124f   :  { %11197 = vmatpush1.bf16.msra.mxu0 %v14513_v54  ;;  %11238 = vmatpush1.bf16.msra.mxu1 %v14515_v18  ;;  %v10395_v54 = vld [vmem:[#allocation37 + $0x318] sm:$0xff] }
0x1250   :  { %11198 = vmatprep.subr.bf16.mxu0 %v14522_v13  ;;  %11239 = vmatprep.subr.bf16.mxu1 %v14524_v6  ;;  %v10399_v18 = vld [vmem:[#allocation37 + $0x338] sm:$0xff]  ;;  %v14569_v13 = vcombine.low %v10386_v15, %v10390_v60  ;;  %v14571_v6 = vcombine.low %v10387_v23, %v10391_v55  ;;  %v15998_v60 = vld [vmem:[#allocation40 + $0x6c] ss:$16 sps:$4 sm:$0xff]  }
0x1251   :  { %v14580_v12 = vcombine.high %v10395_v54, %v10399_v18  ;;  %v15995_v15 = vld [vmem:[#allocation40 + $0x64] ss:$16 sps:$4 sm:$0xff]   ;;  %v15993_v23 = vld [vmem:[#allocation40 + $0x60] ss:$16 sps:$4 sm:$0xff]  }
0x1252   :  { %v16001_v55 = vld [vmem:[#allocation40 + $0x84] ss:$16 sps:$4 sm:$0xff]  }
0x1253   :  { %11199 = vmatpush1.bf16.msra.mxu0 %v14521_v28  ;;  %11240 = vmatpush1.bf16.msra.mxu1 %v14523_v14  ;;  %v10403_v28 = vld [vmem:[#allocation37 + $0x358] sm:$0xff] }
0x1254   :  { %11200 = vmatprep.subr.bf16.mxu0 %v14530_v35  ;;  %11241 = vmatprep.subr.bf16.mxu1 %v14532_v7  ;;  %v10407_v14 = vld [vmem:[#allocation37 + $0x378] sm:$0xff]  ;;  %v14577_v35 = vcombine.low %v10394_v62, %v10398_v20  ;;  %v14579_v7 = vcombine.low %v10395_v54, %v10399_v18  ;;  %v16010_v62 = vld [vmem:[#allocation40 + $0xac] ss:$16 sps:$4 sm:$0xff]   ;;  %v16008_v54 = vld [vmem:[#allocation40 + $0xa8] ss:$16 sps:$4 sm:$0xff]  }
0x1255   :  { %v14588_v33 = vcombine.high %v10403_v28, %v10407_v14  ;;  %v16005_v20 = vld [vmem:[#allocation40 + $0xa0] ss:$16 sps:$4 sm:$0xff]   ;;  %v16013_v18 = vld [vmem:[#allocation40 + $0xc4] ss:$16 sps:$4 sm:$0xff]  }
0x1257   :  { %11201 = vmatpush1.bf16.msra.mxu0 %v14529_v8  ;;  %11242 = vmatpush1.bf16.msra.mxu1 %v14531_v34  ;;  %v10411_v8 = vld [vmem:[#allocation37 + $0x398] sm:$0xff] }
0x1258   :  { %11202 = vmatprep.subr.bf16.mxu0 %v14538_v0  ;;  %11243 = vmatprep.subr.bf16.mxu1 %v14540_v40  ;;  %v10415_v34 = vld [vmem:[#allocation37 + $0x3b8] sm:$0xff]  ;;  %v14585_v0 = vcombine.low %v10402_v58, %v10406_v63  ;;  %v14587_v40 = vcombine.low %v10403_v28, %v10407_v14  ;;  %v16022_v58 = vld [vmem:[#allocation40 + $0xec] ss:$16 sps:$4 sm:$0xff]   ;;  %v16020_v28 = vld [vmem:[#allocation40 + $0xe8] ss:$16 sps:$4 sm:$0xff]  }
0x1259   :  { %v14596_v3 = vcombine.high %v10411_v8, %v10415_v34  ;;  %v16017_v63 = vld [vmem:[#allocation40 + $0xe0] ss:$16 sps:$4 sm:$0xff]   ;;  %v16025_v14 = vld [vmem:[#allocation40 + $0x104] ss:$16 sps:$4 sm:$0xff]  }
0x125b   :  { %11203 = vmatpush1.bf16.msra.mxu0 %v14537_v22  ;;  %11244 = vmatpush1.bf16.msra.mxu1 %v14539_v51  ;;  %v10419_v22 = vld [vmem:[#allocation37 + $0x3d8] sm:$0xff] }
0x125c   :  { %11204 = vmatprep.subr.bf16.mxu0 %v14546_v31  ;;  %11245 = vmatprep.subr.bf16.mxu1 %v14548_v5  ;;  %v10423_v51 = vld [vmem:[#allocation37 + $0x3f8] sm:$0xff]  ;;  %v14593_v31 = vcombine.low %v10410_v39, %v10414_v16  ;;  %v14595_v5 = vcombine.low %v10411_v8, %v10415_v34  ;;  %v16034_v39 = vld [vmem:[#allocation40 + $0x12c] ss:$16 sps:$4 sm:$0xff]   ;;  %v16032_v8 = vld [vmem:[#allocation40 + $0x128] ss:$16 sps:$4 sm:$0xff]  }
0x125d   :  { %v14604_v52 = vcombine.high %v10419_v22, %v10423_v51  ;;  %v14603_v59 = vcombine.low %v10419_v22, %v10423_v51  ;;  %v16029_v16 = vld [vmem:[#allocation40 + $0x120] ss:$16 sps:$4 sm:$0xff]   ;;  %v16037_v34 = vld [vmem:[#allocation40 + $0x144] ss:$16 sps:$4 sm:$0xff]   ;;  %v16044_v22 = vld [vmem:[#allocation40 + $0x168] ss:$16 sps:$4 sm:$0xff]  }
0x125e   :  { %v16049_v51 = vld [vmem:[#allocation40 + $0x184] ss:$16 sps:$4 sm:$0xff]  }
0x125f   :  { %11205 = vmatpush1.bf16.msra.mxu0 %v14545_v50  ;;  %11246 = vmatpush1.bf16.msra.mxu1 %v14547_v30  ;;  %v15977_v50 = vld [vmem:[#allocation40 + $0x4] ss:$16 sps:$4 sm:$0xff]   ;;  %v15980_v30 = vld [vmem:[#allocation40 + $0xc] ss:$16 sps:$4 sm:$0xff]  }
0x1260   :  { %11206 = vmatprep.subr.bf16.mxu0 %v14554_v4  ;;  %11247 = vmatprep.subr.bf16.mxu1 %v14556_v29  ;;  %v15975_v4 = vld [vmem:[#allocation40] ss:$16 sps:$4 sm:$0xff]   ;;  %v15978_v29 = vld [vmem:[#allocation40 + $0x8] ss:$16 sps:$4 sm:$0xff]  }
0x1263   :  { %11207 = vmatpush1.bf16.msra.mxu0 %v14553_v38  ;;  %11248 = vmatpush1.bf16.msra.mxu1 %v14555_v11  ;;  %v15989_v38 = vld [vmem:[#allocation40 + $0x44] ss:$16 sps:$4 sm:$0xff]   ;;  %v15992_v11 = vld [vmem:[#allocation40 + $0x4c] ss:$16 sps:$4 sm:$0xff]  }
0x1264   :  { %11208 = vmatprep.subr.bf16.mxu0 %v14562_v46  ;;  %11249 = vmatprep.subr.bf16.mxu1 %v14564_v36  ;;  %v15987_v46 = vld [vmem:[#allocation40 + $0x40] ss:$16 sps:$4 sm:$0xff]   ;;  %v15990_v36 = vld [vmem:[#allocation40 + $0x48] ss:$16 sps:$4 sm:$0xff]  }
0x1267   :  { %11209 = vmatpush1.bf16.msra.mxu0 %v14561_v45  ;;  %11250 = vmatpush1.bf16.msra.mxu1 %v14563_v17  ;;  %v16004_v45 = vld [vmem:[#allocation40 + $0x8c] ss:$16 sps:$4 sm:$0xff]   ;;  %v15999_v17 = vld [vmem:[#allocation40 + $0x80] ss:$16 sps:$4 sm:$0xff]  }
0x1268   :  { %11210 = vmatprep.subr.bf16.mxu0 %v14570_v47  ;;  %11251 = vmatprep.subr.bf16.mxu1 %v14572_v53  ;;  %v16002_v47 = vld [vmem:[#allocation40 + $0x88] ss:$16 sps:$4 sm:$0xff]   ;;  %v16007_v53 = vld [vmem:[#allocation40 + $0xa4] ss:$16 sps:$4 sm:$0xff]  }
0x126b   :  { %11211 = vmatpush1.bf16.msra.mxu0 %v14569_v13  ;;  %11252 = vmatpush1.bf16.msra.mxu1 %v14571_v6  ;;  %v16016_v13 = vld [vmem:[#allocation40 + $0xcc] ss:$16 sps:$4 sm:$0xff]   ;;  %v16011_v6 = vld [vmem:[#allocation40 + $0xc0] ss:$16 sps:$4 sm:$0xff]  }
0x126c   :  { %11212 = vmatprep.subr.bf16.mxu0 %v14578_v9  ;;  %11253 = vmatprep.subr.bf16.mxu1 %v14580_v12  ;;  %v16014_v9 = vld [vmem:[#allocation40 + $0xc8] ss:$16 sps:$4 sm:$0xff]   ;;  %v16019_v12 = vld [vmem:[#allocation40 + $0xe4] ss:$16 sps:$4 sm:$0xff]  }
0x126f   :  { %11213 = vmatpush1.bf16.msra.mxu0 %v14577_v35  ;;  %11254 = vmatpush1.bf16.msra.mxu1 %v14579_v7  ;;  %v16028_v35 = vld [vmem:[#allocation40 + $0x10c] ss:$16 sps:$4 sm:$0xff]   ;;  %v16023_v7 = vld [vmem:[#allocation40 + $0x100] ss:$16 sps:$4 sm:$0xff]  }
0x1270   :  { %11214 = vmatprep.subr.bf16.mxu0 %v14586_v48  ;;  %11255 = vmatprep.subr.bf16.mxu1 %v14588_v33  ;;  %v16026_v48 = vld [vmem:[#allocation40 + $0x108] ss:$16 sps:$4 sm:$0xff]   ;;  %v16031_v33 = vld [vmem:[#allocation40 + $0x124] ss:$16 sps:$4 sm:$0xff]  }
0x1273   :  { %11215 = vmatpush1.bf16.msra.mxu0 %v14585_v0  ;;  %11256 = vmatpush1.bf16.msra.mxu1 %v14587_v40  ;;  %v16040_v0 = vld [vmem:[#allocation40 + $0x14c] ss:$16 sps:$4 sm:$0xff]   ;;  %v16035_v40 = vld [vmem:[#allocation40 + $0x140] ss:$16 sps:$4 sm:$0xff]  }
0x1274   :  { %11216 = vmatprep.subr.bf16.mxu0 %v14594_v27  ;;  %11257 = vmatprep.subr.bf16.mxu1 %v14596_v3  ;;  %v16038_v27 = vld [vmem:[#allocation40 + $0x148] ss:$16 sps:$4 sm:$0xff]   ;;  %v16043_v3 = vld [vmem:[#allocation40 + $0x164] ss:$16 sps:$4 sm:$0xff]  }
0x1277   :  { %11217 = vmatpush1.bf16.msra.mxu0 %v14593_v31  ;;  %11258 = vmatpush1.bf16.msra.mxu1 %v14595_v5  ;;  %v16052_v31 = vld [vmem:[#allocation40 + $0x18c] ss:$16 sps:$4 sm:$0xff]   ;;  %v16047_v5 = vld [vmem:[#allocation40 + $0x180] ss:$16 sps:$4 sm:$0xff]  }
0x1278   :  { %11218 = vmatprep.subr.bf16.mxu0 %v14602_v37  ;;  %11259 = vmatprep.subr.bf16.mxu1 %v14604_v52  ;;  %v16050_v37 = vld [vmem:[#allocation40 + $0x188] ss:$16 sps:$4 sm:$0xff]   ;;  %v16055_v52 = vld [vmem:[#allocation40 + $0x1a4] ss:$16 sps:$4 sm:$0xff]  }
0x127b   :  { %11219 = vmatpush1.bf16.msra.mxu0 %v14601_v41  ;;  %11260 = vmatpush1.bf16.msra.mxu1 %v14603_v59  ;;  %v16058_v41 = vld [vmem:[#allocation40 + $0x1ac] ss:$16 sps:$4 sm:$0xff]   ;;  %v16053_v59 = vld [vmem:[#allocation40 + $0x1a0] ss:$16 sps:$4 sm:$0xff]  }
0x127c   :  { %12844 = vmatprep.subr.bf16.mxu0 %v15977_v50  ;;  %13008 = vmatprep.subr.bf16.mxu1 %v15980_v30  ;;  %v16056_v50 = vld [vmem:[#allocation40 + $0x1a8] ss:$16 sps:$4 sm:$0xff]   ;;  %v16061_v30 = vld [vmem:[#allocation40 + $0x1c4] ss:$16 sps:$4 sm:$0xff]  }
0x127e   :  { %11221 = vmatmul.mubr.bf16.vlgmr.msra.gmra.mrb[176].mxu0 %v18372_v26  ;;  %11262 = vmatmul.mubr.bf16.vlgmr.msra.gmra.mrb[164].mxu1 %v18372_v26  ;;  %v15996_v26 = vld [vmem:[#allocation40 + $0x68] ss:$16 sps:$4 sm:$0xff]  }
0x127f   :  { %12845 = vmatpush1.bf16.msra.mxu0 %v15975_v4  ;;  %13009 = vmatpush1.bf16.msra.mxu1 %v15978_v29  ;;  %v16064_v4 = vld [vmem:[#allocation40 + $0x1cc] ss:$16 sps:$4 sm:$0xff]   ;;  %v16059_v29 = vld [vmem:[#allocation40 + $0x1c0] ss:$16 sps:$4 sm:$0xff]  }
0x1280   :  { %12846 = vmatprep.subr.bf16.mxu0 %v15983_v19  ;;  %13010 = vmatprep.subr.bf16.mxu1 %v15986_v42  ;;  %v16062_v19 = vld [vmem:[#allocation40 + $0x1c8] ss:$16 sps:$4 sm:$0xff]   ;;  %v16067_v42 = vld [vmem:[#allocation40 + $0x1e4] ss:$16 sps:$4 sm:$0xff]  }
0x1283   :  { %12847 = vmatpush1.bf16.msra.mxu0 %v15981_v1  ;;  %13011 = vmatpush1.bf16.msra.mxu1 %v15984_v43  ;;  %v16070_v1 = vld [vmem:[#allocation40 + $0x1ec] ss:$16 sps:$4 sm:$0xff]   ;;  %v16065_v43 = vld [vmem:[#allocation40 + $0x1e0] ss:$16 sps:$4 sm:$0xff]  }
0x1284   :  { %12848 = vmatprep.subr.bf16.mxu0 %v15989_v38  ;;  %13012 = vmatprep.subr.bf16.mxu1 %v15992_v11  ;;  %v16068_v38 = vld [vmem:[#allocation40 + $0x1e8] ss:$16 sps:$4 sm:$0xff]   ;;  %v16073_v11 = vld [vmem:[#allocation40 + $0x204] ss:$16 sps:$4 sm:$0xff]  }
0x1287   :  { %12849 = vmatpush1.bf16.msra.mxu0 %v15987_v46  ;;  %13013 = vmatpush1.bf16.msra.mxu1 %v15990_v36  ;;  %v16076_v46 = vld [vmem:[#allocation40 + $0x20c] ss:$16 sps:$4 sm:$0xff]  }
0x1288   :  { %12850 = vmatprep.subr.bf16.mxu0 %v15995_v15  ;;  %13014 = vmatprep.subr.bf16.mxu1 %v15998_v60  ;;  %v18378_v36 = vld [vmem:[#allocation38] sm:$0xff] }
0x1289   :  { %v10429_v15 = vrot.slane %v18378_v36, %v17647_v24  ;;  %v10433_v60 = vrot.slane %v18378_v36, %v17650_v25 }
0x128b   :  { %12851 = vmatpush1.bf16.msra.mxu0 %v15993_v23  ;;  %13015 = vmatpush1.bf16.msra.mxu1 %v15996_v26  ;;  %v10441_v23 = vrot.slane %v18378_v36, %v17828_v10 }
0x128c   :  { %12852 = vmatprep.subr.bf16.mxu0 %v16001_v55  ;;  %13016 = vmatprep.subr.bf16.mxu1 %v16004_v45 }
0x128f   :  { %12853 = vmatpush1.bf16.msra.mxu0 %v15999_v17  ;;  %13017 = vmatpush1.bf16.msra.mxu1 %v16002_v47 }
0x1290   :  { %12854 = vmatprep.subr.bf16.mxu0 %v16007_v53  ;;  %13018 = vmatprep.subr.bf16.mxu1 %v16010_v62 }
0x1293   :  { %12855 = vmatpush1.bf16.msra.mxu0 %v16005_v20  ;;  %13019 = vmatpush1.bf16.msra.mxu1 %v16008_v54 }
0x1294   :  { %12856 = vmatprep.subr.bf16.mxu0 %v16013_v18  ;;  %13020 = vmatprep.subr.bf16.mxu1 %v16016_v13 }
0x1297   :  { %12857 = vmatpush1.bf16.msra.mxu0 %v16011_v6  ;;  %13021 = vmatpush1.bf16.msra.mxu1 %v16014_v9 }
0x1298   :  { %12858 = vmatprep.subr.bf16.mxu0 %v16019_v12  ;;  %13022 = vmatprep.subr.bf16.mxu1 %v16022_v58 }
0x129b   :  { %12859 = vmatpush1.bf16.msra.mxu0 %v16017_v63  ;;  %13023 = vmatpush1.bf16.msra.mxu1 %v16020_v28  ;;  %v16071_v63 = vld [vmem:[#allocation40 + $0x200] ss:$16 sps:$4 sm:$0xff]   ;;  %v16074_v28 = vld [vmem:[#allocation40 + $0x208] ss:$16 sps:$4 sm:$0xff]  }
0x129c   :  { %12860 = vmatprep.subr.bf16.mxu0 %v16025_v14  ;;  %13024 = vmatprep.subr.bf16.mxu1 %v16028_v35  ;;  %v16079_v35 = vld [vmem:[#allocation40 + $0x224] ss:$16 sps:$4 sm:$0xff]  }
0x129f   :  { %12861 = vmatpush1.bf16.msra.mxu0 %v16023_v7  ;;  %13025 = vmatpush1.bf16.msra.mxu1 %v16026_v48  ;;  %v16082_v7 = vld [vmem:[#allocation40 + $0x22c] ss:$16 sps:$4 sm:$0xff]  }
0x12a0   :  { %12862 = vmatprep.subr.bf16.mxu0 %v16031_v33  ;;  %13026 = vmatprep.subr.bf16.mxu1 %v16034_v39  ;;  %v16077_v33 = vld [vmem:[#allocation40 + $0x220] ss:$16 sps:$4 sm:$0xff]   ;;  %v16080_v39 = vld [vmem:[#allocation40 + $0x228] ss:$16 sps:$4 sm:$0xff]  }
0x12a3   :  { %12863 = vmatpush1.bf16.msra.mxu0 %v16029_v16  ;;  %13027 = vmatpush1.bf16.msra.mxu1 %v16032_v8  ;;  %v16085_v16 = vld [vmem:[#allocation40 + $0x244] ss:$16 sps:$4 sm:$0xff]   ;;  %v16088_v8 = vld [vmem:[#allocation40 + $0x24c] ss:$16 sps:$4 sm:$0xff]  }
0x12a4   :  { %12864 = vmatprep.subr.bf16.mxu0 %v16037_v34  ;;  %13028 = vmatprep.subr.bf16.mxu1 %v16040_v0  ;;  %v16083_v34 = vld [vmem:[#allocation40 + $0x240] ss:$16 sps:$4 sm:$0xff]   ;;  %v16086_v0 = vld [vmem:[#allocation40 + $0x248] ss:$16 sps:$4 sm:$0xff]  }
0x12a7   :  { %12865 = vmatpush1.bf16.msra.mxu0 %v16035_v40  ;;  %13029 = vmatpush1.bf16.msra.mxu1 %v16038_v27  ;;  %v16091_v40 = vld [vmem:[#allocation40 + $0x264] ss:$16 sps:$4 sm:$0xff]   ;;  %v16094_v27 = vld [vmem:[#allocation40 + $0x26c] ss:$16 sps:$4 sm:$0xff]  }
0x12a8   :  { %12866 = vmatprep.subr.bf16.mxu0 %v16043_v3  ;;  %13030 = vmatprep.subr.bf16.mxu1 %v16046_v44  ;;  %v16089_v3 = vld [vmem:[#allocation40 + $0x260] ss:$16 sps:$4 sm:$0xff]   ;;  %v16092_v44 = vld [vmem:[#allocation40 + $0x268] ss:$16 sps:$4 sm:$0xff]  }
0x12ab   :  { %12867 = vmatpush1.bf16.msra.mxu0 %v16041_v49  ;;  %13031 = vmatpush1.bf16.msra.mxu1 %v16044_v22  ;;  %v16097_v49 = vld [vmem:[#allocation40 + $0x284] ss:$16 sps:$4 sm:$0xff]   ;;  %v16100_v22 = vld [vmem:[#allocation40 + $0x28c] ss:$16 sps:$4 sm:$0xff]  }
0x12ac   :  { %12868 = vmatprep.subr.bf16.mxu0 %v16049_v51  ;;  %13032 = vmatprep.subr.bf16.mxu1 %v16052_v31  ;;  %v16095_v51 = vld [vmem:[#allocation40 + $0x280] ss:$16 sps:$4 sm:$0xff]   ;;  %v16098_v31 = vld [vmem:[#allocation40 + $0x288] ss:$16 sps:$4 sm:$0xff]  }
0x12af   :  { %12869 = vmatpush1.bf16.msra.mxu0 %v16047_v5  ;;  %13033 = vmatpush1.bf16.msra.mxu1 %v16050_v37  ;;  %v16103_v5 = vld [vmem:[#allocation40 + $0x2a4] ss:$16 sps:$4 sm:$0xff]   ;;  %v16106_v37 = vld [vmem:[#allocation40 + $0x2ac] ss:$16 sps:$4 sm:$0xff]  }
0x12b0   :  { %12870 = vmatprep.subr.bf16.mxu0 %v16055_v52  ;;  %13034 = vmatprep.subr.bf16.mxu1 %v16058_v41  ;;  %v16101_v52 = vld [vmem:[#allocation40 + $0x2a0] ss:$16 sps:$4 sm:$0xff]   ;;  %v16104_v41 = vld [vmem:[#allocation40 + $0x2a8] ss:$16 sps:$4 sm:$0xff]  }
0x12b3   :  { %12871 = vmatpush1.bf16.msra.mxu0 %v16053_v59  ;;  %13035 = vmatpush1.bf16.msra.mxu1 %v16056_v50  ;;  %v16109_v59 = vld [vmem:[#allocation40 + $0x2c4] ss:$16 sps:$4 sm:$0xff]   ;;  %v16112_v50 = vld [vmem:[#allocation40 + $0x2cc] ss:$16 sps:$4 sm:$0xff]  }
0x12b4   :  { %12872 = vmatprep.subr.bf16.mxu0 %v16061_v30  ;;  %13036 = vmatprep.subr.bf16.mxu1 %v16064_v4  ;;  %v16107_v30 = vld [vmem:[#allocation40 + $0x2c0] ss:$16 sps:$4 sm:$0xff]   ;;  %v16110_v4 = vld [vmem:[#allocation40 + $0x2c8] ss:$16 sps:$4 sm:$0xff]  }
0x12b7   :  { %12873 = vmatpush1.bf16.msra.mxu0 %v16059_v29  ;;  %13037 = vmatpush1.bf16.msra.mxu1 %v16062_v19  ;;  %v16115_v29 = vld [vmem:[#allocation40 + $0x2e4] ss:$16 sps:$4 sm:$0xff]   ;;  %v16118_v19 = vld [vmem:[#allocation40 + $0x2ec] ss:$16 sps:$4 sm:$0xff]  }
0x12b8   :  { %12874 = vmatprep.subr.bf16.mxu0 %v16067_v42  ;;  %13038 = vmatprep.subr.bf16.mxu1 %v16070_v1  ;;  %v16113_v42 = vld [vmem:[#allocation40 + $0x2e0] ss:$16 sps:$4 sm:$0xff]   ;;  %v16116_v1 = vld [vmem:[#allocation40 + $0x2e8] ss:$16 sps:$4 sm:$0xff]  }
0x12bb   :  { %12875 = vmatpush1.bf16.msra.mxu0 %v16065_v43  ;;  %13039 = vmatpush1.bf16.msra.mxu1 %v16068_v38  ;;  %v16121_v43 = vld [vmem:[#allocation40 + $0x304] ss:$16 sps:$4 sm:$0xff]   ;;  %v16124_v38 = vld [vmem:[#allocation40 + $0x30c] ss:$16 sps:$4 sm:$0xff]  }
0x12bc   :  { %12885 = vmatprep.subr.bf16.mxu0 %v16073_v11  ;;  %13049 = vmatprep.subr.bf16.mxu1 %v16076_v46  ;;  %v16119_v11 = vld [vmem:[#allocation40 + $0x300] ss:$16 sps:$4 sm:$0xff]   ;;  %v16122_v46 = vld [vmem:[#allocation40 + $0x308] ss:$16 sps:$4 sm:$0xff]  }
0x1311   :  { %v11140_v26 = vpop.f32.mrb[172].mxu0  ;;  %v18386_v55 = vpop.f32.mrb[160].mxu1 }
0x1312   :  { %v11141_v45 = vadd.f32 %v11140_v26, %v10429_v15  ;;  %v11142_v17 = vpop.f32.mrb[173].mxu0  ;;  %v11183_v47 = vpop.f32.mrb[161].mxu1  ;;  %v16127_v15 = vld [vmem:[#allocation40 + $0x324] ss:$16 sps:$4 sm:$0xff]   ;;  %v16128_v26 = vld [vmem:[#allocation40 + $0x328] ss:$16 sps:$4 sm:$0xff]  }
0x1313   :  { %v11143_v53 = vadd.f32 %v11142_v17, %v10433_v60  ;;  %v11184_v62 = vadd.f32 %v11183_v47, %v10441_v23  ;;  %v11144_v20 = vpop.f32.mrb[174].mxu0  ;;  %v11185_v54 = vpop.f32.mrb[162].mxu1  ;;  %v16130_v60 = vld [vmem:[#allocation40 + $0x32c] ss:$16 sps:$4 sm:$0xff]   ;;  %v16125_v23 = vld [vmem:[#allocation40 + $0x320] ss:$16 sps:$4 sm:$0xff]  }
0x1314   :  { %v11270_v18 = vmax.f32 %v11141_v45, 0.0  ;;  %v11145_v13 = vpop.f32.mrb[175].mxu0  ;;  %v11186_v6 = vpop.f32.mrb[163].mxu1  ;;  %v16133_v45 = vld [vmem:[#allocation40 + $0x344] ss:$16 sps:$4 sm:$0xff]  }
0x1315   :  { %v11271_v9 = vmax.f32 %v11143_v53, 0.0  ;;  %v11273_v12 = vmax.f32 %v11184_v62, 0.0  ;;  %v16136_v17 = vld [vmem:[#allocation40 + $0x34c] ss:$16 sps:$4 sm:$0xff]   ;;  %v16131_v47 = vld [vmem:[#allocation40 + $0x340] ss:$16 sps:$4 sm:$0xff]  }
0x1316   :  { %v11278_v14 = vpack.c.bf16 %v11270_v18, %v11270_v18  ;;  %v16134_v53 = vld [vmem:[#allocation40 + $0x348] ss:$16 sps:$4 sm:$0xff]   ;;  %v16139_v62 = vld [vmem:[#allocation40 + $0x364] ss:$16 sps:$4 sm:$0xff]   ;;  %v16142_v20 = vld [vmem:[#allocation40 + $0x36c] ss:$16 sps:$4 sm:$0xff]  }
0x1317   :  { %v11279_v58 = vpack.c.bf16 %v11271_v9, %v11271_v9  ;;  %v11281_v48 = vpack.c.bf16 %v11273_v12, %v11273_v12  ;;  %v16137_v54 = vld [vmem:[#allocation40 + $0x360] ss:$16 sps:$4 sm:$0xff]   ;;  %v16140_v18 = vld [vmem:[#allocation40 + $0x368] ss:$16 sps:$4 sm:$0xff]   ;;  %v16145_v13 = vld [vmem:[#allocation40 + $0x384] ss:$16 sps:$4 sm:$0xff]  }
0x1318   :  { %v16148_v6 = vld [vmem:[#allocation40 + $0x38c] ss:$16 sps:$4 sm:$0xff]   ;;  %v16143_v9 = vld [vmem:[#allocation40 + $0x380] ss:$16 sps:$4 sm:$0xff]   ;;  %v16146_v12 = vld [vmem:[#allocation40 + $0x388] ss:$16 sps:$4 sm:$0xff]  }
0x1319   :  { %12876 = vmatprep.mubr.bf16.mxu0 %v11279_v58  ;;  %13040 = vmatprep.mubr.bf16.mxu1 %v11279_v58  ;;  %v16151_v58 = vld [vmem:[#allocation40 + $0x3a4] ss:$16 sps:$4 sm:$0xff]  }
0x131a   :  { %12877 = vmatmul.mubr.bf16.vlgmr.msra.gmra.mrb[180].mxu0 %v11278_v14  ;;  %13041 = vmatmul.mubr.bf16.vlgmr.msra.gmra.mrb[168].mxu1 %v11278_v14  ;;  %v16152_v14 = vld [vmem:[#allocation40 + $0x3a8] ss:$16 sps:$4 sm:$0xff]  }
0x131b   :  { %12886 = vmatpush1.bf16.msra.mxu0 %v16071_v63  ;;  %13050 = vmatpush1.bf16.msra.mxu1 %v16074_v28  ;;  %v16154_v63 = vld [vmem:[#allocation40 + $0x3ac] ss:$16 sps:$4 sm:$0xff]   ;;  %v16149_v28 = vld [vmem:[#allocation40 + $0x3a0] ss:$16 sps:$4 sm:$0xff]  }
0x131c   :  { %12917 = vmatprep.mubr.bf16.mxu0 %v11281_v48  ;;  %13081 = vmatprep.mubr.bf16.mxu1 %v11281_v48  ;;  %v16160_v48 = vld [vmem:[#allocation40 + $0x3cc] ss:$16 sps:$4 sm:$0xff]  }
0x131d   :  { %12887 = vmatprep.subr.bf16.mxu0 %v16079_v35  ;;  %13051 = vmatprep.subr.bf16.mxu1 %v16082_v7  ;;  %v10437_v35 = vrot.slane %v18378_v36, %v17732_v21  ;;  %v16157_v7 = vld [vmem:[#allocation40 + $0x3c4] ss:$16 sps:$4 sm:$0xff]  }
0x131f   :  { %12888 = vmatpush1.bf16.msra.mxu0 %v16077_v33  ;;  %13052 = vmatpush1.bf16.msra.mxu1 %v16080_v39  ;;  %v10449_v33 = vrot.slane %v18378_v36, %v8592_v32  ;;  %v16155_v39 = vld [vmem:[#allocation40 + $0x3c0] ss:$16 sps:$4 sm:$0xff]   ;;  %v16164_v32 = vld [vmem:[#allocation40 + $0x3e8] ss:$16 sps:$4 sm:$0xff]  }
0x1320   :  { %12889 = vmatprep.subr.bf16.mxu0 %v16085_v16  ;;  %13053 = vmatprep.subr.bf16.mxu1 %v16088_v8  ;;  %v16158_v16 = vld [vmem:[#allocation40 + $0x3c8] ss:$16 sps:$4 sm:$0xff]   ;;  %v11182_v8 = vadd.f32 %v18386_v55, %v10437_v35 }
0x1321   :  { %v16212_v35 = vld [vmem:[#allocation40 + $0x4e8] ss:$16 sps:$4 sm:$0xff]  }
0x1322   :  { %v11272_v55 = vmax.f32 %v11182_v8, 0.0  ;;  %v16226_v8 = vld [vmem:[#allocation40 + $0x52c] ss:$16 sps:$4 sm:$0xff]  }
0x1323   :  { %12890 = vmatpush1.bf16.msra.mxu0 %v16083_v34  ;;  %13054 = vmatpush1.bf16.msra.mxu1 %v16086_v0  ;;  %v16163_v34 = vld [vmem:[#allocation40 + $0x3e4] ss:$16 sps:$4 sm:$0xff]   ;;  %v16166_v0 = vld [vmem:[#allocation40 + $0x3ec] ss:$16 sps:$4 sm:$0xff]  }
0x1324   :  { %12891 = vmatprep.subr.bf16.mxu0 %v16091_v40  ;;  %13055 = vmatprep.subr.bf16.mxu1 %v16094_v27 }
0x1327   :  { %12892 = vmatpush1.bf16.msra.mxu0 %v16089_v3  ;;  %13056 = vmatpush1.bf16.msra.mxu1 %v16092_v44 }
0x1328   :  { %12893 = vmatprep.subr.bf16.mxu0 %v16097_v49  ;;  %13057 = vmatprep.subr.bf16.mxu1 %v16100_v22  ;;  %v16161_v49 = vld [vmem:[#allocation40 + $0x3e0] ss:$16 sps:$4 sm:$0xff]  }
0x132b   :  { %12894 = vmatpush1.bf16.msra.mxu0 %v16095_v51  ;;  %13058 = vmatpush1.bf16.msra.mxu1 %v16098_v31 }
0x132c   :  { %12895 = vmatprep.subr.bf16.mxu0 %v16103_v5  ;;  %13059 = vmatprep.subr.bf16.mxu1 %v16106_v37  ;;  %v16169_v5 = vld [vmem:[#allocation40 + $0x404] ss:$16 sps:$4 sm:$0xff]  }
0x132f   :  { %12896 = vmatpush1.bf16.msra.mxu0 %v16101_v52  ;;  %13060 = vmatpush1.bf16.msra.mxu1 %v16104_v41  ;;  %v16172_v41 = vld [vmem:[#allocation40 + $0x40c] ss:$16 sps:$4 sm:$0xff]  }
0x1330   :  { %12897 = vmatprep.subr.bf16.mxu0 %v16109_v59  ;;  %13061 = vmatprep.subr.bf16.mxu1 %v16112_v50  ;;  %v16167_v50 = vld [vmem:[#allocation40 + $0x400] ss:$16 sps:$4 sm:$0xff]  }
0x1333   :  { %12898 = vmatpush1.bf16.msra.mxu0 %v16107_v30  ;;  %13062 = vmatpush1.bf16.msra.mxu1 %v16110_v4  ;;  %v11280_v30 = vpack.c.bf16 %v11272_v55, %v11272_v55  ;;  %v16170_v4 = vld [vmem:[#allocation40 + $0x408] ss:$16 sps:$4 sm:$0xff]  }
0x1334   :  { %12899 = vmatprep.subr.bf16.mxu0 %v16115_v29  ;;  %13063 = vmatprep.subr.bf16.mxu1 %v16118_v19  ;;  %v16175_v19 = vld [vmem:[#allocation40 + $0x424] ss:$16 sps:$4 sm:$0xff]   ;;  %v16236_v55 = vld [vmem:[#allocation40 + $0x568] ss:$16 sps:$4 sm:$0xff]  }
0x1337   :  { %12900 = vmatpush1.bf16.msra.mxu0 %v16113_v42  ;;  %13064 = vmatpush1.bf16.msra.mxu1 %v16116_v1  ;;  %v16178_v42 = vld [vmem:[#allocation40 + $0x42c] ss:$16 sps:$4 sm:$0xff]   ;;  %v16173_v1 = vld [vmem:[#allocation40 + $0x420] ss:$16 sps:$4 sm:$0xff]  }
0x1338   :  { %12901 = vmatprep.subr.bf16.mxu0 %v16121_v43  ;;  %13065 = vmatprep.subr.bf16.mxu1 %v16124_v38  ;;  %v16176_v43 = vld [vmem:[#allocation40 + $0x428] ss:$16 sps:$4 sm:$0xff]   ;;  %v16181_v38 = vld [vmem:[#allocation40 + $0x444] ss:$16 sps:$4 sm:$0xff]  }
0x133b   :  { %12902 = vmatpush1.bf16.msra.mxu0 %v16119_v11  ;;  %13066 = vmatpush1.bf16.msra.mxu1 %v16122_v46  ;;  %v16184_v11 = vld [vmem:[#allocation40 + $0x44c] ss:$16 sps:$4 sm:$0xff]   ;;  %v16179_v46 = vld [vmem:[#allocation40 + $0x440] ss:$16 sps:$4 sm:$0xff]  }
0x133c   :  { %12903 = vmatprep.subr.bf16.mxu0 %v16127_v15  ;;  %13067 = vmatprep.subr.bf16.mxu1 %v16130_v60  ;;  %v16182_v15 = vld [vmem:[#allocation40 + $0x448] ss:$16 sps:$4 sm:$0xff]   ;;  %v16187_v60 = vld [vmem:[#allocation40 + $0x464] ss:$16 sps:$4 sm:$0xff]  }
0x133f   :  { %12904 = vmatpush1.bf16.msra.mxu0 %v16125_v23  ;;  %13068 = vmatpush1.bf16.msra.mxu1 %v16128_v26  ;;  %v16190_v23 = vld [vmem:[#allocation40 + $0x46c] ss:$16 sps:$4 sm:$0xff]   ;;  %v16185_v26 = vld [vmem:[#allocation40 + $0x460] ss:$16 sps:$4 sm:$0xff]  }
0x1340   :  { %12905 = vmatprep.subr.bf16.mxu0 %v16133_v45  ;;  %13069 = vmatprep.subr.bf16.mxu1 %v16136_v17  ;;  %v16188_v45 = vld [vmem:[#allocation40 + $0x468] ss:$16 sps:$4 sm:$0xff]   ;;  %v16193_v17 = vld [vmem:[#allocation40 + $0x484] ss:$16 sps:$4 sm:$0xff]  }
0x1343   :  { %12906 = vmatpush1.bf16.msra.mxu0 %v16131_v47  ;;  %13070 = vmatpush1.bf16.msra.mxu1 %v16134_v53  ;;  %v16196_v47 = vld [vmem:[#allocation40 + $0x48c] ss:$16 sps:$4 sm:$0xff]   ;;  %v16191_v53 = vld [vmem:[#allocation40 + $0x480] ss:$16 sps:$4 sm:$0xff]  }
0x1344   :  { %12907 = vmatprep.subr.bf16.mxu0 %v16139_v62  ;;  %13071 = vmatprep.subr.bf16.mxu1 %v16142_v20  ;;  %v16194_v62 = vld [vmem:[#allocation40 + $0x488] ss:$16 sps:$4 sm:$0xff]   ;;  %v16199_v20 = vld [vmem:[#allocation40 + $0x4a4] ss:$16 sps:$4 sm:$0xff]  }
0x1347   :  { %12908 = vmatpush1.bf16.msra.mxu0 %v16137_v54  ;;  %13072 = vmatpush1.bf16.msra.mxu1 %v16140_v18  ;;  %v16202_v54 = vld [vmem:[#allocation40 + $0x4ac] ss:$16 sps:$4 sm:$0xff]   ;;  %v16197_v18 = vld [vmem:[#allocation40 + $0x4a0] ss:$16 sps:$4 sm:$0xff]  }
0x1348   :  { %12909 = vmatprep.subr.bf16.mxu0 %v16145_v13  ;;  %13073 = vmatprep.subr.bf16.mxu1 %v16148_v6  ;;  %v16200_v13 = vld [vmem:[#allocation40 + $0x4a8] ss:$16 sps:$4 sm:$0xff]   ;;  %v16205_v6 = vld [vmem:[#allocation40 + $0x4c4] ss:$16 sps:$4 sm:$0xff]  }
0x134b   :  { %12910 = vmatpush1.bf16.msra.mxu0 %v16143_v9  ;;  %13074 = vmatpush1.bf16.msra.mxu1 %v16146_v12  ;;  %v16208_v9 = vld [vmem:[#allocation40 + $0x4cc] ss:$16 sps:$4 sm:$0xff]   ;;  %v16203_v12 = vld [vmem:[#allocation40 + $0x4c0] ss:$16 sps:$4 sm:$0xff]  }
0x134c   :  { %12911 = vmatprep.subr.bf16.mxu0 %v16151_v58  ;;  %13075 = vmatprep.subr.bf16.mxu1 %v16154_v63  ;;  %v16206_v58 = vld [vmem:[#allocation40 + $0x4c8] ss:$16 sps:$4 sm:$0xff]   ;;  %v16211_v63 = vld [vmem:[#allocation40 + $0x4e4] ss:$16 sps:$4 sm:$0xff]  }
0x134f   :  { %12912 = vmatpush1.bf16.msra.mxu0 %v16149_v28  ;;  %13076 = vmatpush1.bf16.msra.mxu1 %v16152_v14  ;;  %v16214_v28 = vld [vmem:[#allocation40 + $0x4ec] ss:$16 sps:$4 sm:$0xff]   ;;  %v16209_v14 = vld [vmem:[#allocation40 + $0x4e0] ss:$16 sps:$4 sm:$0xff]  }
0x1350   :  { %12913 = vmatprep.subr.bf16.mxu0 %v16157_v7  ;;  %13077 = vmatprep.subr.bf16.mxu1 %v16160_v48  ;;  %v16217_v7 = vld [vmem:[#allocation40 + $0x504] ss:$16 sps:$4 sm:$0xff]   ;;  %v16220_v48 = vld [vmem:[#allocation40 + $0x50c] ss:$16 sps:$4 sm:$0xff]  }
0x1351   :  { %v18394_v40 = vpop.f32.mrb[176].mxu0  ;;  %v18396_v27 = vpop.f32.mrb[164].mxu1 }
0x1352   :  { %v11224_v3 = vpop.f32.mrb[177].mxu0  ;;  %v18398_v44 = vpop.f32.mrb[165].mxu1 }
0x1353   :  { %v11225_v22 = vadd.f32 %v11224_v3, %v10449_v33  ;;  %v11226_v51 = vpop.f32.mrb[178].mxu0  ;;  %v11267_v31 = vpop.f32.mrb[166].mxu1  ;;  %12914 = vmatpush1.bf16.msra.mxu0 %v16155_v39  ;;  %13078 = vmatpush1.bf16.msra.mxu1 %v16158_v16  ;;  %v16215_v33 = vld [vmem:[#allocation40 + $0x500] ss:$16 sps:$4 sm:$0xff]   ;;  %v16218_v39 = vld [vmem:[#allocation40 + $0x508] ss:$16 sps:$4 sm:$0xff]  }
0x1354   :  { %v11227_v37 = vpop.f32.mrb[179].mxu0  ;;  %v11268_v52 = vpop.f32.mrb[167].mxu1  ;;  %12915 = vmatprep.subr.bf16.mxu0 %v16163_v34  ;;  %13079 = vmatprep.subr.bf16.mxu1 %v16166_v0  ;;  %v16223_v16 = vld [vmem:[#allocation40 + $0x524] ss:$16 sps:$4 sm:$0xff]   ;;  %v16221_v34 = vld [vmem:[#allocation40 + $0x520] ss:$16 sps:$4 sm:$0xff]  }
0x1355   :  { %v11275_v59 = vmax.f32 %v11225_v22, 0.0  ;;  %v16224_v0 = vld [vmem:[#allocation40 + $0x528] ss:$16 sps:$4 sm:$0xff]   ;;  %v16229_v3 = vld [vmem:[#allocation40 + $0x544] ss:$16 sps:$4 sm:$0xff]  }
0x1356   :  { %v16227_v22 = vld [vmem:[#allocation40 + $0x540] ss:$16 sps:$4 sm:$0xff]   ;;  %v16230_v51 = vld [vmem:[#allocation40 + $0x548] ss:$16 sps:$4 sm:$0xff]   ;;  %v16235_v31 = vld [vmem:[#allocation40 + $0x564] ss:$16 sps:$4 sm:$0xff]  }
0x1357   :  { %12916 = vmatpush1.bf16.msra.mxu0 %v16161_v49  ;;  %13080 = vmatpush1.bf16.msra.mxu1 %v16164_v32  ;;  %v11283_v29 = vpack.c.bf16 %v11275_v59, %v11275_v59  ;;  %v16232_v49 = vld [vmem:[#allocation40 + $0x54c] ss:$16 sps:$4 sm:$0xff]   ;;  %v16241_v37 = vld [vmem:[#allocation40 + $0x584] ss:$16 sps:$4 sm:$0xff]   ;;  %v16242_v59 = vld [vmem:[#allocation40 + $0x588] ss:$16 sps:$4 sm:$0xff]  }
0x1358   :  { %12926 = vmatprep.subr.bf16.mxu0 %v16169_v5  ;;  %13090 = vmatprep.subr.bf16.mxu1 %v16172_v41  ;;  %v16238_v32 = vld [vmem:[#allocation40 + $0x56c] ss:$16 sps:$4 sm:$0xff]   ;;  %v16233_v5 = vld [vmem:[#allocation40 + $0x560] ss:$16 sps:$4 sm:$0xff]  }
0x1359   :  { %v16244_v52 = vld [vmem:[#allocation40 + $0x58c] ss:$16 sps:$4 sm:$0xff]   ;;  %v16239_v41 = vld [vmem:[#allocation40 + $0x580] ss:$16 sps:$4 sm:$0xff]  }
0x135a   :  { %12918 = vmatmul.mubr.bf16.vlgmr.msra.gmra.mrb[180].mxu0 %v11280_v30  ;;  %13082 = vmatmul.mubr.bf16.vlgmr.msra.gmra.mrb[168].mxu1 %v11280_v30  ;;  %v16250_v30 = vld [vmem:[#allocation40 + $0x5ac] ss:$16 sps:$4 sm:$0xff]  }
0x135b   :  { %12927 = vmatpush1.bf16.msra.mxu0 %v16167_v50  ;;  %12958 = vmatprep.mubr.bf16.mxu0 %v11283_v29  ;;  %v16247_v50 = vld [vmem:[#allocation40 + $0x5a4] ss:$16 sps:$4 sm:$0xff]  }
0x135c   :  { %13091 = vmatpush1.bf16.msra.mxu1 %v16170_v4  ;;  %13122 = vmatprep.mubr.bf16.mxu1 %v11283_v29  ;;  %v16245_v4 = vld [vmem:[#allocation40 + $0x5a0] ss:$16 sps:$4 sm:$0xff]   ;;  %v10445_v29 = vrot.slane %v18378_v36, %v17839_v57  ;;  %v16262_v57 = vld [vmem:[#allocation40 + $0x5ec] ss:$16 sps:$4 sm:$0xff]  }
0x135d   :  { %12928 = vmatprep.subr.bf16.mxu0 %v16175_v19  ;;  %13092 = vmatprep.subr.bf16.mxu1 %v16178_v42  ;;  %v16248_v19 = vld [vmem:[#allocation40 + $0x5a8] ss:$16 sps:$4 sm:$0xff]   ;;  %v16253_v42 = vld [vmem:[#allocation40 + $0x5c4] ss:$16 sps:$4 sm:$0xff]  }
0x135f   :  { %12929 = vmatpush1.bf16.msra.mxu0 %v16173_v1  ;;  %v16256_v1 = vld [vmem:[#allocation40 + $0x5cc] ss:$16 sps:$4 sm:$0xff]  }
0x1360   :  { %13093 = vmatpush1.bf16.msra.mxu1 %v16176_v43  ;;  %12930 = vmatprep.subr.bf16.mxu0 %v16181_v38  ;;  %v10457_v43 = vrot.slane %v18378_v36, %v8600_v61  ;;  %v16251_v38 = vld [vmem:[#allocation40 + $0x5c0] ss:$16 sps:$4 sm:$0xff]   ;;  %v16268_v61 = vld [vmem:[#allocation40 + $0x60c] ss:$16 sps:$4 sm:$0xff]  }
0x1361   :  { %13094 = vmatprep.subr.bf16.mxu1 %v16184_v11  ;;  %v11223_v11 = vadd.f32 %v18394_v40, %v10445_v29  ;;  %v16263_v40 = vld [vmem:[#allocation40 + $0x600] ss:$16 sps:$4 sm:$0xff]   ;;  %v16320_v29 = vld [vmem:[#allocation40 + $0x728] ss:$16 sps:$4 sm:$0xff]  }
0x1363   :  { %12931 = vmatpush1.bf16.msra.mxu0 %v16179_v46  ;;  %v16254_v46 = vld [vmem:[#allocation40 + $0x5c8] ss:$16 sps:$4 sm:$0xff]  }
0x1364   :  { %13095 = vmatpush1.bf16.msra.mxu1 %v16182_v15  ;;  %12932 = vmatprep.subr.bf16.mxu0 %v16187_v60  ;;  %v16259_v15 = vld [vmem:[#allocation40 + $0x5e4] ss:$16 sps:$4 sm:$0xff]   ;;  %v11266_v60 = vadd.f32 %v18398_v44, %v10457_v43  ;;  %v16274_v44 = vld [vmem:[#allocation40 + $0x62c] ss:$16 sps:$4 sm:$0xff]   ;;  %v16326_v43 = vld [vmem:[#allocation40 + $0x748] ss:$16 sps:$4 sm:$0xff]  }
0x1365   :  { %13096 = vmatprep.subr.bf16.mxu1 %v16190_v23  ;;  %v16257_v23 = vld [vmem:[#allocation40 + $0x5e0] ss:$16 sps:$4 sm:$0xff]  }
0x1367   :  { %12933 = vmatpush1.bf16.msra.mxu0 %v16185_v26  ;;  %v11274_v26 = vmax.f32 %v11223_v11, 0.0  ;;  %v16334_v11 = vld [vmem:[#allocation40 + $0x76c] ss:$16 sps:$4 sm:$0xff]  }
0x1368   :  { %13097 = vmatpush1.bf16.msra.mxu1 %v16188_v45  ;;  %12934 = vmatprep.subr.bf16.mxu0 %v16193_v17  ;;  %v16260_v45 = vld [vmem:[#allocation40 + $0x5e8] ss:$16 sps:$4 sm:$0xff]   ;;  %v16265_v17 = vld [vmem:[#allocation40 + $0x604] ss:$16 sps:$4 sm:$0xff]  }
0x1369   :  { %13098 = vmatprep.subr.bf16.mxu1 %v16196_v47  ;;  %v11277_v47 = vmax.f32 %v11266_v60, 0.0  ;;  %v16340_v60 = vld [vmem:[#allocation40 + $0x78c] ss:$16 sps:$4 sm:$0xff]  }
0x136b   :  { %12935 = vmatpush1.bf16.msra.mxu0 %v16191_v53  ;;  %v11282_v53 = vpack.c.bf16 %v11274_v26, %v11274_v26  ;;  %v16338_v26 = vld [vmem:[#allocation40 + $0x788] ss:$16 sps:$4 sm:$0xff]  }
0x136c   :  { %13099 = vmatpush1.bf16.msra.mxu1 %v16194_v62  ;;  %12936 = vmatprep.subr.bf16.mxu0 %v16199_v20  ;;  %v16266_v62 = vld [vmem:[#allocation40 + $0x608] ss:$16 sps:$4 sm:$0xff]   ;;  %v16271_v20 = vld [vmem:[#allocation40 + $0x624] ss:$16 sps:$4 sm:$0xff]  }
0x136d   :  { %13100 = vmatprep.subr.bf16.mxu1 %v16202_v54  ;;  %v11285_v54 = vpack.c.bf16 %v11277_v47, %v11277_v47  ;;  %v10453_v47 = vrot.slane %v18378_v36, %v8596_v56  ;;  %v16353_v56 = vld [vmem:[#allocation40 + $0x7e0] ss:$16 sps:$4 sm:$0xff]  }
0x136f   :  { %12937 = vmatpush1.bf16.msra.mxu0 %v16197_v18  ;;  %v16269_v18 = vld [vmem:[#allocation40 + $0x620] ss:$16 sps:$4 sm:$0xff]  }
0x1370   :  { %13101 = vmatpush1.bf16.msra.mxu1 %v16200_v13  ;;  %12938 = vmatprep.subr.bf16.mxu0 %v16205_v6  ;;  %v16272_v13 = vld [vmem:[#allocation40 + $0x628] ss:$16 sps:$4 sm:$0xff]   ;;  %v16277_v6 = vld [vmem:[#allocation40 + $0x644] ss:$16 sps:$4 sm:$0xff]  }
0x1371   :  { %13102 = vmatprep.subr.bf16.mxu1 %v16208_v9  ;;  %v16280_v9 = vld [vmem:[#allocation40 + $0x64c] ss:$16 sps:$4 sm:$0xff]  }
0x1373   :  { %12939 = vmatpush1.bf16.msra.mxu0 %v16203_v12  ;;  %v16275_v12 = vld [vmem:[#allocation40 + $0x640] ss:$16 sps:$4 sm:$0xff]  }
0x1374   :  { %13103 = vmatpush1.bf16.msra.mxu1 %v16206_v58  ;;  %12940 = vmatprep.subr.bf16.mxu0 %v16211_v63  ;;  %v16278_v58 = vld [vmem:[#allocation40 + $0x648] ss:$16 sps:$4 sm:$0xff]   ;;  %v16283_v63 = vld [vmem:[#allocation40 + $0x664] ss:$16 sps:$4 sm:$0xff]  }
0x1375   :  { %13104 = vmatprep.subr.bf16.mxu1 %v16214_v28  ;;  %v16286_v28 = vld [vmem:[#allocation40 + $0x66c] ss:$16 sps:$4 sm:$0xff]  }
0x1377   :  { %12941 = vmatpush1.bf16.msra.mxu0 %v16209_v14  ;;  %v16281_v14 = vld [vmem:[#allocation40 + $0x660] ss:$16 sps:$4 sm:$0xff]  }
0x1378   :  { %13105 = vmatpush1.bf16.msra.mxu1 %v16212_v35  ;;  %12942 = vmatprep.subr.bf16.mxu0 %v16217_v7  ;;  %v16284_v35 = vld [vmem:[#allocation40 + $0x668] ss:$16 sps:$4 sm:$0xff]   ;;  %v16289_v7 = vld [vmem:[#allocation40 + $0x684] ss:$16 sps:$4 sm:$0xff]  }
0x1379   :  { %13106 = vmatprep.subr.bf16.mxu1 %v16220_v48  ;;  %v16292_v48 = vld [vmem:[#allocation40 + $0x68c] ss:$16 sps:$4 sm:$0xff]  }
0x137b   :  { %12943 = vmatpush1.bf16.msra.mxu0 %v16215_v33  ;;  %v16287_v33 = vld [vmem:[#allocation40 + $0x680] ss:$16 sps:$4 sm:$0xff]  }
0x137c   :  { %13107 = vmatpush1.bf16.msra.mxu1 %v16218_v39  ;;  %12944 = vmatprep.subr.bf16.mxu0 %v16223_v16  ;;  %v16290_v39 = vld [vmem:[#allocation40 + $0x688] ss:$16 sps:$4 sm:$0xff]   ;;  %v16295_v16 = vld [vmem:[#allocation40 + $0x6a4] ss:$16 sps:$4 sm:$0xff]  }
0x137d   :  { %13108 = vmatprep.subr.bf16.mxu1 %v16226_v8  ;;  %v16298_v8 = vld [vmem:[#allocation40 + $0x6ac] ss:$16 sps:$4 sm:$0xff]  }
0x137f   :  { %12945 = vmatpush1.bf16.msra.mxu0 %v16221_v34  ;;  %v16293_v34 = vld [vmem:[#allocation40 + $0x6a0] ss:$16 sps:$4 sm:$0xff]  }
0x1380   :  { %13109 = vmatpush1.bf16.msra.mxu1 %v16224_v0  ;;  %12946 = vmatprep.subr.bf16.mxu0 %v16229_v3  ;;  %v16296_v0 = vld [vmem:[#allocation40 + $0x6a8] ss:$16 sps:$4 sm:$0xff]   ;;  %v16301_v3 = vld [vmem:[#allocation40 + $0x6c4] ss:$16 sps:$4 sm:$0xff]  }
0x1381   :  { %13110 = vmatprep.subr.bf16.mxu1 %v16232_v49  ;;  %v16304_v49 = vld [vmem:[#allocation40 + $0x6cc] ss:$16 sps:$4 sm:$0xff]  }
0x1383   :  { %12947 = vmatpush1.bf16.msra.mxu0 %v16227_v22  ;;  %v16299_v22 = vld [vmem:[#allocation40 + $0x6c0] ss:$16 sps:$4 sm:$0xff]  }
0x1384   :  { %13111 = vmatpush1.bf16.msra.mxu1 %v16230_v51  ;;  %12948 = vmatprep.subr.bf16.mxu0 %v16235_v31  ;;  %v16302_v51 = vld [vmem:[#allocation40 + $0x6c8] ss:$16 sps:$4 sm:$0xff]   ;;  %v16307_v31 = vld [vmem:[#allocation40 + $0x6e4] ss:$16 sps:$4 sm:$0xff]  }
0x1385   :  { %13112 = vmatprep.subr.bf16.mxu1 %v16238_v32  ;;  %v16310_v32 = vld [vmem:[#allocation40 + $0x6ec] ss:$16 sps:$4 sm:$0xff]  }
0x1387   :  { %12949 = vmatpush1.bf16.msra.mxu0 %v16233_v5  ;;  %v16305_v5 = vld [vmem:[#allocation40 + $0x6e0] ss:$16 sps:$4 sm:$0xff]  }
0x1388   :  { %13113 = vmatpush1.bf16.msra.mxu1 %v16236_v55  ;;  %12950 = vmatprep.subr.bf16.mxu0 %v16241_v37  ;;  %v16308_v55 = vld [vmem:[#allocation40 + $0x6e8] ss:$16 sps:$4 sm:$0xff]   ;;  %v16313_v37 = vld [vmem:[#allocation40 + $0x704] ss:$16 sps:$4 sm:$0xff]  }
0x1389   :  { %13114 = vmatprep.subr.bf16.mxu1 %v16244_v52  ;;  %v16316_v52 = vld [vmem:[#allocation40 + $0x70c] ss:$16 sps:$4 sm:$0xff]  }
0x138b   :  { %12951 = vmatpush1.bf16.msra.mxu0 %v16239_v41  ;;  %v16311_v41 = vld [vmem:[#allocation40 + $0x700] ss:$16 sps:$4 sm:$0xff]  }
0x138c   :  { %13115 = vmatpush1.bf16.msra.mxu1 %v16242_v59  ;;  %12952 = vmatprep.subr.bf16.mxu0 %v16247_v50  ;;  %v16314_v59 = vld [vmem:[#allocation40 + $0x708] ss:$16 sps:$4 sm:$0xff]   ;;  %v16319_v50 = vld [vmem:[#allocation40 + $0x724] ss:$16 sps:$4 sm:$0xff]  }
0x138d   :  { %13116 = vmatprep.subr.bf16.mxu1 %v16250_v30  ;;  %v16322_v30 = vld [vmem:[#allocation40 + $0x72c] ss:$16 sps:$4 sm:$0xff]  }
0x138f   :  { %12953 = vmatpush1.bf16.msra.mxu0 %v16245_v4  ;;  %v16317_v4 = vld [vmem:[#allocation40 + $0x720] ss:$16 sps:$4 sm:$0xff]  }
0x1390   :  { %13117 = vmatpush1.bf16.msra.mxu1 %v16248_v19  ;;  %12954 = vmatprep.subr.bf16.mxu0 %v16253_v42  ;;  %v16325_v19 = vld [vmem:[#allocation40 + $0x744] ss:$16 sps:$4 sm:$0xff]   ;;  %v16328_v42 = vld [vmem:[#allocation40 + $0x74c] ss:$16 sps:$4 sm:$0xff]  }
0x1391   :  { %13118 = vmatprep.subr.bf16.mxu1 %v16256_v1  ;;  %v16323_v1 = vld [vmem:[#allocation40 + $0x740] ss:$16 sps:$4 sm:$0xff]  }
0x1393   :  { %12955 = vmatpush1.bf16.msra.mxu0 %v16251_v38  ;;  %v16331_v38 = vld [vmem:[#allocation40 + $0x764] ss:$16 sps:$4 sm:$0xff]  }
0x1394   :  { %13119 = vmatpush1.bf16.msra.mxu1 %v16254_v46  ;;  %12956 = vmatprep.subr.bf16.mxu0 %v16259_v15  ;;  %v16329_v46 = vld [vmem:[#allocation40 + $0x760] ss:$16 sps:$4 sm:$0xff]   ;;  %v16332_v15 = vld [vmem:[#allocation40 + $0x768] ss:$16 sps:$4 sm:$0xff]  }
0x1395   :  { %13120 = vmatprep.subr.bf16.mxu1 %v16262_v57  ;;  %v16337_v57 = vld [vmem:[#allocation40 + $0x784] ss:$16 sps:$4 sm:$0xff]  }
0x1397   :  { %12957 = vmatpush1.bf16.msra.mxu0 %v16257_v23  ;;  %v16335_v23 = vld [vmem:[#allocation40 + $0x780] ss:$16 sps:$4 sm:$0xff]  }
0x1398   :  { %13121 = vmatpush1.bf16.msra.mxu1 %v16260_v45  ;;  %12967 = vmatprep.subr.bf16.mxu0 %v16265_v17  ;;  %v16343_v45 = vld [vmem:[#allocation40 + $0x7a4] ss:$16 sps:$4 sm:$0xff]   ;;  %v16346_v17 = vld [vmem:[#allocation40 + $0x7ac] ss:$16 sps:$4 sm:$0xff]  }
0x1399   :  { %13131 = vmatprep.subr.bf16.mxu1 %v16268_v61  ;;  %v16341_v61 = vld [vmem:[#allocation40 + $0x7a0] ss:$16 sps:$4 sm:$0xff]  }
0x139a   :  { %12959 = vmatmul.mubr.bf16.vlgmr.msra.gmra.mrb[180].mxu0 %v11282_v53 }
0x139b   :  { %13123 = vmatmul.mubr.bf16.vlgmr.msra.gmra.mrb[168].mxu1 %v11282_v53  ;;  %12968 = vmatpush1.bf16.msra.mxu0 %v16263_v40  ;;  %v16344_v40 = vld [vmem:[#allocation40 + $0x7a8] ss:$16 sps:$4 sm:$0xff]   ;;  %v16349_v53 = vld [vmem:[#allocation40 + $0x7c4] ss:$16 sps:$4 sm:$0xff]  }
0x139c   :  { %12999 = vmatprep.mubr.bf16.mxu0 %v11285_v54  ;;  %13132 = vmatpush1.bf16.msra.mxu1 %v16266_v62  ;;  %v16352_v62 = vld [vmem:[#allocation40 + $0x7cc] ss:$16 sps:$4 sm:$0xff]  }
0x139d   :  { %13163 = vmatprep.mubr.bf16.mxu1 %v11285_v54  ;;  %12969 = vmatprep.subr.bf16.mxu0 %v16271_v20  ;;  %v16347_v20 = vld [vmem:[#allocation40 + $0x7c0] ss:$16 sps:$4 sm:$0xff]   ;;  %v11264_v54 = vadd.f32 %v18396_v27, %v10453_v47 }
0x139e   :  { %13133 = vmatprep.subr.bf16.mxu1 %v16274_v44  ;;  %v16350_v44 = vld [vmem:[#allocation40 + $0x7c8] ss:$16 sps:$4 sm:$0xff]   ;;  %v13195_v27 = vld [vmem:[#allocation43 + $0x98] sm:$0xff] }
0x139f   :  { %12970 = vmatpush1.bf16.msra.mxu0 %v16269_v18  ;;  %v16355_v18 = vld [vmem:[#allocation40 + $0x7e4] ss:$16 sps:$4 sm:$0xff]   ;;  %v11276_v36 = vmax.f32 %v11264_v54, 0.0 }
0x13a0   :  { %13134 = vmatpush1.bf16.msra.mxu1 %v16272_v13  ;;  %12971 = vmatprep.subr.bf16.mxu0 %v16277_v6  ;;  %v16358_v13 = vld [vmem:[#allocation40 + $0x7ec] ss:$16 sps:$4 sm:$0xff]   ;;  %v13192_v6 = vld [vmem:[#allocation43 + $0x80] sm:$0xff] }
0x13a1   :  { %13135 = vmatprep.subr.bf16.mxu1 %v16280_v9  ;;  %v16356_v9 = vld [vmem:[#allocation40 + $0x7e8] ss:$16 sps:$4 sm:$0xff]  }
0x13a3   :  { %12972 = vmatpush1.bf16.msra.mxu0 %v16275_v12  ;;  %v15383_v12 = vpack.c.bf16 %v13193_v2, %v13192_v6 }
0x13a4   :  { %13136 = vmatpush1.bf16.msra.mxu1 %v16278_v58  ;;  %12973 = vmatprep.subr.bf16.mxu0 %v16283_v63  ;;  %v13176_v58 = vld [vmem:[#allocation43] sm:$0xff]  ;;  %v13177_v63 = vld [vmem:[#allocation43 + $0x8] sm:$0xff] }
0x13a5   :  { %13137 = vmatprep.subr.bf16.mxu1 %v16286_v28  ;;  %v13194_v28 = vld [vmem:[#allocation43 + $0x90] sm:$0xff] }
0x13a7   :  { %12974 = vmatpush1.bf16.msra.mxu0 %v16281_v14  ;;  %v15385_v14 = vpack.c.bf16 %v13177_v63, %v13176_v58 }
0x13a8   :  { %13138 = vmatpush1.bf16.msra.mxu1 %v16284_v35  ;;  %12975 = vmatprep.subr.bf16.mxu0 %v16289_v7  ;;  %v11284_v35 = vpack.c.bf16 %v11276_v36, %v11276_v36  ;;  %v15387_v7 = vpack.c.bf16 %v13195_v27, %v13194_v28  ;;  %v13208_v36 = vld [vmem:[#allocation43 + $0x100] sm:$0xff]  ;;  %v13226_v28 = vld [vmem:[#allocation43 + $0x190] sm:$0xff]  ;;  %v13227_v27 = vld [vmem:[#allocation43 + $0x198] sm:$0xff] }
0x13a9   :  { %13139 = vmatprep.subr.bf16.mxu1 %v16292_v48  ;;  %v13178_v48 = vld [vmem:[#allocation43 + $0x10] sm:$0xff] }
0x13ab   :  { %12976 = vmatpush1.bf16.msra.mxu0 %v16287_v33  ;;  %v13179_v33 = vld [vmem:[#allocation43 + $0x18] sm:$0xff] }
0x13ac   :  { %13140 = vmatpush1.bf16.msra.mxu1 %v16290_v39  ;;  %12977 = vmatprep.subr.bf16.mxu0 %v16295_v16  ;;  %v13196_v39 = vld [vmem:[#allocation43 + $0xa0] sm:$0xff]  ;;  %v13197_v16 = vld [vmem:[#allocation43 + $0xa8] sm:$0xff] }
0x13ad   :  { %13141 = vmatprep.subr.bf16.mxu1 %v16298_v8  ;;  %v15389_v8 = vpack.c.bf16 %v13179_v33, %v13178_v48 }
0x13af   :  { %12978 = vmatpush1.bf16.msra.mxu0 %v16293_v34  ;;  %v15391_v34 = vpack.c.bf16 %v13197_v16, %v13196_v39  ;;  %v13210_v39 = vld [vmem:[#allocation43 + $0x110] sm:$0xff]  ;;  %v13211_v16 = vld [vmem:[#allocation43 + $0x118] sm:$0xff] }
0x13b0   :  { %13142 = vmatpush1.bf16.msra.mxu1 %v16296_v0  ;;  %12979 = vmatprep.subr.bf16.mxu0 %v16301_v3  ;;  %v13180_v0 = vld [vmem:[#allocation43 + $0x20] sm:$0xff]  ;;  %v13181_v3 = vld [vmem:[#allocation43 + $0x28] sm:$0xff] }
0x13b1   :  { %13143 = vmatprep.subr.bf16.mxu1 %v16304_v49  ;;  %v13198_v49 = vld [vmem:[#allocation43 + $0xb0] sm:$0xff] }
0x13b3   :  { %12980 = vmatpush1.bf16.msra.mxu0 %v16299_v22  ;;  %v13199_v22 = vld [vmem:[#allocation43 + $0xb8] sm:$0xff] }
0x13b4   :  { %13144 = vmatpush1.bf16.msra.mxu1 %v16302_v51  ;;  %12981 = vmatprep.subr.bf16.mxu0 %v16307_v31  ;;  %v15393_v51 = vpack.c.bf16 %v13181_v3, %v13180_v0  ;;  %v15395_v31 = vpack.c.bf16 %v13199_v22, %v13198_v49  ;;  %v13229_v0 = vld [vmem:[#allocation43 + $0x1a8] sm:$0xff]  ;;  %v15421_v3 = vpack.c.bf16 %v13211_v16, %v13210_v39  ;;  %v13212_v22 = vld [vmem:[#allocation43 + $0x120] sm:$0xff] }
0x13b5   :  { %13145 = vmatprep.subr.bf16.mxu1 %v16310_v32  ;;  %v13182_v32 = vld [vmem:[#allocation43 + $0x30] sm:$0xff] }
0x13b7   :  { %12982 = vmatpush1.bf16.msra.mxu0 %v16305_v5  ;;  %v13183_v5 = vld [vmem:[#allocation43 + $0x38] sm:$0xff] }
0x13b8   :  { %13146 = vmatpush1.bf16.msra.mxu1 %v16308_v55  ;;  %12983 = vmatprep.subr.bf16.mxu0 %v16313_v37  ;;  %v13200_v55 = vld [vmem:[#allocation43 + $0xc0] sm:$0xff]  ;;  %v13201_v37 = vld [vmem:[#allocation43 + $0xc8] sm:$0xff] }
0x13b9   :  { %13147 = vmatprep.subr.bf16.mxu1 %v16316_v52  ;;  %v15397_v52 = vpack.c.bf16 %v13183_v5, %v13182_v32  ;;  %v13231_v32 = vld [vmem:[#allocation43 + $0x1b8] sm:$0xff] }
0x13bb   :  { %12984 = vmatpush1.bf16.msra.mxu0 %v16311_v41  ;;  %v15399_v41 = vpack.c.bf16 %v13201_v37, %v13200_v55  ;;  %v13214_v37 = vld [vmem:[#allocation43 + $0x130] sm:$0xff] }
0x13bc   :  { %13148 = vmatpush1.bf16.msra.mxu1 %v16314_v59  ;;  %12985 = vmatprep.subr.bf16.mxu0 %v16319_v50  ;;  %v13184_v59 = vld [vmem:[#allocation43 + $0x40] sm:$0xff]  ;;  %v13185_v50 = vld [vmem:[#allocation43 + $0x48] sm:$0xff] }
0x13bd   :  { %13149 = vmatprep.subr.bf16.mxu1 %v16322_v30  ;;  %v13202_v30 = vld [vmem:[#allocation43 + $0xd0] sm:$0xff] }
0x13bf   :  { %12986 = vmatpush1.bf16.msra.mxu0 %v16317_v4  ;;  %v13203_v4 = vld [vmem:[#allocation43 + $0xd8] sm:$0xff] }
0x13c0   :  { %13150 = vmatpush1.bf16.msra.mxu1 %v16320_v29  ;;  %12987 = vmatprep.subr.bf16.mxu0 %v16325_v19  ;;  %v15401_v29 = vpack.c.bf16 %v13185_v50, %v13184_v59  ;;  %v15403_v19 = vpack.c.bf16 %v13203_v4, %v13202_v30  ;;  %v13233_v59 = vld [vmem:[#allocation43 + $0x1c8] sm:$0xff]  ;;  %v13216_v4 = vld [vmem:[#allocation43 + $0x140] sm:$0xff] }
0x13c1   :  { %13151 = vmatprep.subr.bf16.mxu1 %v16328_v42  ;;  %v13186_v42 = vld [vmem:[#allocation43 + $0x50] sm:$0xff] }
0x13c3   :  { %12988 = vmatpush1.bf16.msra.mxu0 %v16323_v1  ;;  %v13187_v1 = vld [vmem:[#allocation43 + $0x58] sm:$0xff] }
0x13c4   :  { %13152 = vmatpush1.bf16.msra.mxu1 %v16326_v43  ;;  %12989 = vmatprep.subr.bf16.mxu0 %v16331_v38  ;;  %v13204_v43 = vld [vmem:[#allocation43 + $0xe0] sm:$0xff]  ;;  %v13205_v38 = vld [vmem:[#allocation43 + $0xe8] sm:$0xff] }
0x13c5   :  { %13153 = vmatprep.subr.bf16.mxu1 %v16334_v11  ;;  %v15405_v11 = vpack.c.bf16 %v13187_v1, %v13186_v42  ;;  %v13235_v42 = vld [vmem:[#allocation43 + $0x1d8] sm:$0xff] }
0x13c7   :  { %12990 = vmatpush1.bf16.msra.mxu0 %v16329_v46  ;;  %v15407_v46 = vpack.c.bf16 %v13205_v38, %v13204_v43  ;;  %v13218_v38 = vld [vmem:[#allocation43 + $0x150] sm:$0xff] }
0x13c8   :  { %13154 = vmatpush1.bf16.msra.mxu1 %v16332_v15  ;;  %12991 = vmatprep.subr.bf16.mxu0 %v16337_v57  ;;  %v13188_v15 = vld [vmem:[#allocation43 + $0x60] sm:$0xff]  ;;  %v13189_v57 = vld [vmem:[#allocation43 + $0x68] sm:$0xff] }
0x13c9   :  { %13155 = vmatprep.subr.bf16.mxu1 %v16340_v60  ;;  %v15409_v60 = vpack.c.bf16 %v13189_v57, %v13188_v15  ;;  %v13237_v15 = vld [vmem:[#allocation43 + $0x1e8] sm:$0xff] }
0x13cb   :  { %12992 = vmatpush1.bf16.msra.mxu0 %v16335_v23  ;;  %v13206_v23 = vld [vmem:[#allocation43 + $0xf0] sm:$0xff] }
0x13cc   :  { %13156 = vmatpush1.bf16.msra.mxu1 %v16338_v26  ;;  %12993 = vmatprep.subr.bf16.mxu0 %v16343_v45  ;;  %v13207_v26 = vld [vmem:[#allocation43 + $0xf8] sm:$0xff] }
0x13cd   :  { %13157 = vmatprep.subr.bf16.mxu1 %v16346_v17  ;;  %v15411_v45 = vpack.c.bf16 %v13207_v26, %v13206_v23  ;;  %v13190_v17 = vld [vmem:[#allocation43 + $0x70] sm:$0xff]  ;;  %v13220_v23 = vld [vmem:[#allocation43 + $0x160] sm:$0xff]  ;;  %v13221_v26 = vld [vmem:[#allocation43 + $0x168] sm:$0xff] }
0x13cf   :  { %12994 = vmatpush1.bf16.msra.mxu0 %v16341_v61  ;;  %v13191_v61 = vld [vmem:[#allocation43 + $0x78] sm:$0xff] }
0x13d0   :  { %13158 = vmatpush1.bf16.msra.mxu1 %v16344_v40  ;;  %12995 = vmatprep.subr.bf16.mxu0 %v16349_v53  ;;  %v15413_v47 = vpack.c.bf16 %v13191_v61, %v13190_v17  ;;  %v13224_v40 = vld [vmem:[#allocation43 + $0x180] sm:$0xff]  ;;  %v13225_v53 = vld [vmem:[#allocation43 + $0x188] sm:$0xff]  ;;  %v13239_v17 = vld [vmem:[#allocation43 + $0x1f8] sm:$0xff]  ;;  %v15441_v61 = vpack.c.bf16 %v13221_v26, %v13220_v23 }
0x13d1   :  { %13159 = vmatprep.subr.bf16.mxu1 %v16352_v62  ;;  %v15415_v62 = vpack.c.bf16 %v13225_v53, %v13224_v40  ;;  %v13222_v53 = vld [vmem:[#allocation43 + $0x170] sm:$0xff] }
0x13d3   :  { %12996 = vmatpush1.bf16.msra.mxu0 %v16347_v20  ;;  %v18411_v20 = vld [vmem:[#allocation41] sm:$0xf] }
0x13d4   :  { %13160 = vmatpush1.bf16.msra.mxu1 %v16350_v44  ;;  %12997 = vmatprep.subr.bf16.mxu0 %v16355_v18  ;;  %v11547_v54 = vrot.slane %v18411_v20, %v17647_v24  ;;  %v11551_v44 = vrot.slane %v18411_v20, %v17650_v25  ;;  %v11559_v18 = vrot.slane %v18411_v20, %v17828_v10 }
0x13d5   :  { %13161 = vmatprep.subr.bf16.mxu1 %v16358_v13  ;;  %v15419_v10 = vpack.c.bf16 %v13227_v27, %v13226_v28 }
0x13d7   :  { %12998 = vmatpush1.bf16.msra.mxu0 %v16353_v56 }
0x13d8   :  { %13162 = vmatpush1.bf16.msra.mxu1 %v16356_v9  ;;  %15384 = vmatprep.subr.bf16.mxu0 %v15383_v12  ;;  %v13209_v9 = vld [vmem:[#allocation43 + $0x108] sm:$0xff] }
0x13d9   :  { %v15417_v48 = vpack.c.bf16 %v13209_v9, %v13208_v36  ;;  %v14861_v36 = vld [vmem:[#allocation44] ss:$0 sm:$0xff] }
0x13da   :  { %13000 = vmatmul.mubr.bf16.vlgmr.msra.gmra.mrb[180].mxu0 %v11284_v35 }
0x13db   :  { %13164 = vmatmul.mubr.bf16.vlgmr.msra.gmra.mrb[168].mxu1 %v11284_v35  ;;  %15386 = vmatpush3.bf16.msra.mxu0 %v15385_v14 }
0x13dc   :  { %15388 = vmatprep.subr.bf16.mxu0 %v15387_v7 }
0x13df   :  { %15390 = vmatpush3.bf16.msra.mxu0 %v15389_v8 }
0x13e0   :  { %15392 = vmatprep.subr.bf16.mxu0 %v15391_v34  ;;  %v13228_v34 = vld [vmem:[#allocation43 + $0x1a0] sm:$0xff] }
0x13e1   :  { %v15423_v49 = vpack.c.bf16 %v13229_v0, %v13228_v34 }
0x13e3   :  { %15394 = vmatpush3.bf16.msra.mxu0 %v15393_v51  ;;  %v13213_v51 = vld [vmem:[#allocation43 + $0x128] sm:$0xff] }
0x13e4   :  { %15396 = vmatprep.subr.bf16.mxu0 %v15395_v31  ;;  %v13230_v31 = vld [vmem:[#allocation43 + $0x1b0] sm:$0xff]  ;;  %v15425_v5 = vpack.c.bf16 %v13213_v51, %v13212_v22 }
0x13e5   :  { %v15427_v55 = vpack.c.bf16 %v13231_v32, %v13230_v31 }
0x13e7   :  { %15398 = vmatpush3.bf16.msra.mxu0 %v15397_v52  ;;  %v13215_v52 = vld [vmem:[#allocation43 + $0x138] sm:$0xff] }
0x13e8   :  { %15400 = vmatprep.subr.bf16.mxu0 %v15399_v41  ;;  %v13232_v41 = vld [vmem:[#allocation43 + $0x1c0] sm:$0xff]  ;;  %v15429_v50 = vpack.c.bf16 %v13215_v52, %v13214_v37 }
0x13e9   :  { %v15431_v30 = vpack.c.bf16 %v13233_v59, %v13232_v41 }
0x13eb   :  { %15402 = vmatpush3.bf16.msra.mxu0 %v15401_v29  ;;  %v13217_v29 = vld [vmem:[#allocation43 + $0x148] sm:$0xff] }
0x13ec   :  { %15404 = vmatprep.subr.bf16.mxu0 %v15403_v19  ;;  %v13234_v19 = vld [vmem:[#allocation43 + $0x1d0] sm:$0xff]  ;;  %v15433_v1 = vpack.c.bf16 %v13217_v29, %v13216_v4 }
0x13ed   :  { %v15435_v43 = vpack.c.bf16 %v13235_v42, %v13234_v19 }
0x13ef   :  { %15406 = vmatpush3.bf16.msra.mxu0 %v15405_v11  ;;  %v13219_v11 = vld [vmem:[#allocation43 + $0x158] sm:$0xff] }
0x13f0   :  { %15408 = vmatprep.subr.bf16.mxu0 %v15407_v46  ;;  %v13236_v46 = vld [vmem:[#allocation43 + $0x1e0] sm:$0xff]  ;;  %v15437_v57 = vpack.c.bf16 %v13219_v11, %v13218_v38 }
0x13f3   :  { %15410 = vmatpush3.bf16.msra.mxu0 %v15409_v60  ;;  %v15439_v60 = vpack.c.bf16 %v13237_v15, %v13236_v46 }
0x13f4   :  { %15412 = vmatprep.subr.bf16.mxu0 %v15411_v45  ;;  %v13238_v45 = vld [vmem:[#allocation43 + $0x1f0] sm:$0xff] }
0x13f5   :  { %v15443_v40 = vpack.c.bf16 %v13239_v17, %v13238_v45 }
0x13f7   :  { %15414 = vmatpush3.bf16.msra.mxu0 %v15413_v47  ;;  %v11555_v47 = vrot.slane %v18411_v20, %v17732_v21 }
0x13f8   :  { %15416 = vmatprep.subr.bf16.mxu0 %v15415_v62  ;;  %v13223_v62 = vld [vmem:[#allocation43 + $0x178] sm:$0xff] }
0x14ad   :  { %v13001_v13 = vpop.f32.mrb[180].mxu0 }
0x14ae   :  { %v15447_v6 = vadd.f32 %v13001_v13, %v11547_v54  ;;  %v18419_v2 = vpop.f32.mrb[168].mxu1  ;;  %v13003_v56 = vpop.f32.mrb[181].mxu0  ;;  %v15445_v54 = vpack.c.bf16 %v13223_v62, %v13222_v53 }
0x14af   :  { %v15448_v12 = vadd.f32 %v13003_v56, %v11551_v44  ;;  %v13167_v58 = vpop.f32.mrb[169].mxu1  ;;  %v13005_v63 = vpop.f32.mrb[182].mxu0  ;;  %v15449_v44 = vadd.f32 %v18419_v2, %v11555_v47 }
0x14b0   :  { %v15450_v14 = vadd.f32 %v13167_v58, %v11559_v18  ;;  %v13169_v24 = vpop.f32.mrb[170].mxu1  ;;  %v13006_v35 = vpop.f32.mrb[183].mxu0  ;;  %v13172_v33 = vmax.f32 %v15447_v6, 0.0 }
0x14b1   :  { %v13173_v7 = vmax.f32 %v15448_v12, 0.0  ;;  %v13170_v25 = vpop.f32.mrb[171].mxu1  ;;  %v13174_v18 = vmax.f32 %v15449_v44, 0.0 }
0x14b2   :  { %v13175_v8 = vmax.f32 %v15450_v14, 0.0 }
0x14b3   :  { %13311 = vmatprep.mubr.f32.mxu0 %v13173_v7 }
0x14b4   :  { %13312 = vmatmul.mubr.f32.vlgmr.msra.gmra.mrb[184].mxu0 %v13172_v33 }
0x14b5   :  { %15418 = vmatpush3.bf16.msra.mxu0 %v15417_v48  ;;  %13381 = vmatprep.mubr.f32.mxu0 %v13175_v8 }
0x14b6   :  { %15420 = vmatprep.subr.bf16.mxu0 %v15419_v10 }
0x14b9   :  { %15422 = vmatpush3.bf16.msra.mxu0 %v15421_v3 }
0x14ba   :  { %15424 = vmatprep.subr.bf16.mxu0 %v15423_v49 }
0x14bd   :  { %15426 = vmatpush3.bf16.msra.mxu0 %v15425_v5 }
0x14be   :  { %15428 = vmatprep.subr.bf16.mxu0 %v15427_v55 }
0x14c1   :  { %15430 = vmatpush3.bf16.msra.mxu0 %v15429_v50 }
0x14c2   :  { %15432 = vmatprep.subr.bf16.mxu0 %v15431_v30 }
0x14c5   :  { %15434 = vmatpush3.bf16.msra.mxu0 %v15433_v1 }
0x14c6   :  { %15436 = vmatprep.subr.bf16.mxu0 %v15435_v43 }
0x14c9   :  { %15438 = vmatpush3.bf16.msra.mxu0 %v15437_v57 }
0x14ca   :  { %15440 = vmatprep.subr.bf16.mxu0 %v15439_v60 }
0x14cd   :  { %15442 = vmatpush3.bf16.msra.mxu0 %v15441_v61 }
0x14ce   :  { %15444 = vmatprep.subr.bf16.mxu0 %v15443_v40 }
0x14d1   :  { %15446 = vmatpush3.bf16.msra.mxu0 %v15445_v54 }
0x14d4   :  { %13382 = vmatmul.mubr.f32.vlgmr.msra.gmra.mrb[186].mxu0 %v13174_v18 }
0x1587   :  { %v15201_v13 = vpop.f32.mrb[184].mxu0 }
0x1588   :  { %v15202_v6 = vpop.f32.mrb[185].mxu0 }
0x1589   :  { %v15203_v56 = vadd.f32 %v15202_v6, %v15201_v13 }
0x158b   :  { %v13314_v21 = vadd.f32 %v15203_v56, %v14861_v36 }
0x15a7   :  { %v15236_v9 = vpop.f32.mrb[186].mxu0 }
0x15a8   :  { %v15237_v12 = vpop.f32.mrb[187].mxu0 }
0x15a9   :  { %v15238_v20 = vadd.f32 %v15237_v12, %v15236_v9 }
0x15ab   :  { %v13384_v58 = vadd.f32 %v15238_v20, %v13314_v21 }
0x15ad   :  { %13387 = vst [vmem:[#allocation46] sm:$0x3] %v13384_v58 }
0x15ae   :  { %17092 = shalt.err (!%p17089_p4)
}
0x15af   :  { %s17093_s15 = scalar_lea.hbm %s17362_s4, 32 }
0x15b0   :  { %p17094_p5 = scmp.ne.s32.totalorder %s17362_s4, %s17093_s15  ;;  %p17097_p6 = scmp.lt.u32.totalorder %s17093_s15, %s17362_s4 }
0x15b2   :  { %p17099_p7 = pnand %p17097_p6, %p17094_p5 }
0x15b4   :  { %17102 = shalt.err (!%p17099_p7)
}
0x15b5   :  { %13397 = dma.vmem_to_hbm [thread:$0]  %s13395_s18, 32, %s17362_s4, [#allocation4]  }
0x15b6   :  { %17133 = dma.done.wait [#allocation4], 32  }
0x15b7   :  { %17134 = vsyncadd [#allocation4], 4294967264 }
0x15b8   :  { %13401 = vsyncpa [#allocation3], 1 }
0x15b9   :  { %13402 = vsyncpa [#allocation6], 1 }
0x15ba   :  { %13403 = vsyncpa [#allocation9], 1 }
0x15bb   :  { %13404 = vsyncpa [#allocation12], 1 }
0x15bc   :  { %13405 = vsyncpa [#allocation15], 1 }
0x15bd   :  { %13406 = vsyncpa [#allocation18], 1 }
0x15be   :  { %13407 = vsyncpa [#allocation21], 1 }
0x15bf   :  { %13408 = vsyncpa [#allocation24], 1 }
0x15c0   :  { %13409 = vsyncpa [#allocation27], 1 }
0x15c1   :  { %13410 = vsyncpa [#allocation30], 1 }
0x15c2   :  { %13411 = vsyncpa [#allocation33], 1 }
0x15c3   :  { %13412 = vsyncpa [#allocation36], 1 }
0x15c4   :  { %13413 = vsyncpa [#allocation39], 1 }
0x15c5   :  { %13414 = vsyncpa [#allocation42], 1 }
0x15c6   :  { %13415 = vsyncpa [#allocation45], 1 }
0x15c7   :  { %13416 = vsyncpa [#allocation4], 1 }

</bundles_post_ra>
